<compile_context>
chip_gen: v7x
topology: tpu7x:2x2x1
jax: 0.10.0
libtpu: 0.0.40
codegen_flags: <defaults>
</compile_context>

<pallas_src>
import math

import jax
import jax.numpy as jnp
from jax.experimental import pallas as pl
from jax.experimental.pallas import tpu as pltpu

# ----------------------------- model dims -----------------------------------
B = 2          # batch
S_SRC = 8      # source sequence length
S_TGT = 8      # target sequence length
D_MODEL = 32   # model width
N_HEADS = 4    # attention heads
D_HEAD = D_MODEL // N_HEADS
D_FF = 64      # feed-forward hidden
N_LAYERS = 2   # encoder / decoder depth
VOCAB_SRC = 16
VOCAB_TGT = 16
LN_EPS = 1e-6


# --------------------- in-kernel building blocks (traced) ---------------------
def _layer_norm(x, ln):
    # Annotated-transformer LayerNorm: a * (x - mean) / (std + eps) + b,
    # std uses the unbiased estimator (torch.Tensor.std default).
    a = ln["a"][...]
    b = ln["b"][...]
    d = x.shape[-1]
    mean = jnp.mean(x, axis=-1, keepdims=True)
    var = jnp.sum((x - mean) ** 2, axis=-1, keepdims=True) * (1.0 / (d - 1))
    inv = pl.reciprocal(jnp.sqrt(var) + LN_EPS, approx=True)
    return a * (x - mean) * inv + b


def _attention(xq, xkv, bias, w, sq, sk):
    # Multi-head scaled-dot-product attention on batch-folded activations
    # (dropout disabled / eval).
    #   xq:   (B*sq, D) query source
    #   xkv:  (B*sk, D) key/value source
    #   bias: (B, sq, sk) additive mask bias ((mask-1)*1e9)
    # Heads are statically unrolled, but each head's score / context matmul is
    # batched over the batch axis, and the output projection is folded per head
    # through wo viewed as (H, dk, D) -- no concatenate needed.
    scale = 1.0 / math.sqrt(D_HEAD)
    xq16 = xq.astype(jnp.bfloat16)
    xkv16 = xkv.astype(jnp.bfloat16)
    q = jnp.dot(xq16, w["wq"][...], preferred_element_type=jnp.float32) + w["bq"][...]
    k = jnp.dot(xkv16, w["wk"][...], preferred_element_type=jnp.float32) + w["bk"][...]
    v = jnp.dot(xkv16, w["wv"][...], preferred_element_type=jnp.float32) + w["bv"][...]

    out = jnp.zeros((B * sq, D_MODEL), jnp.float32)
    for h in range(N_HEADS):
        lo = h * D_HEAD
        qh = q[:, lo:lo + D_HEAD].reshape(B, sq, D_HEAD)
        kh = k[:, lo:lo + D_HEAD].reshape(B, sk, D_HEAD)
        vh = v[:, lo:lo + D_HEAD].reshape(B, sk, D_HEAD)
        s = jnp.einsum("bqd,bkd->bqk", qh, kh,
                       preferred_element_type=jnp.float32) * scale + bias
        s = s - jnp.max(s, axis=-1, keepdims=True)      # stable softmax
        e = jnp.exp(s)
        p = e * pl.reciprocal(jnp.sum(e, axis=-1, keepdims=True), approx=True)
        ctx = jnp.einsum("bqk,bkd->bqd", p, vh,
                         preferred_element_type=jnp.float32)      # (B, sq, dk)
        # fold the output projection per head: wo viewed as (H, dk, D)
        out = out + jnp.dot(ctx.reshape(B * sq, D_HEAD), w["wo"][h],
                            preferred_element_type=jnp.float32)
    return out + w["bo"][...]


def _ffn(x, w):
    # PositionwiseFeedForward: W2(relu(W1 x + b1)) + b2  (dropout disabled).
    h = jnp.dot(x.astype(jnp.bfloat16), w["w1"][...],
                preferred_element_type=jnp.float32) + w["b1"][...]
    h = jnp.maximum(h, 0.0)
    return jnp.dot(h.astype(jnp.bfloat16), w["w2"][...],
                   preferred_element_type=jnp.float32) + w["b2"][...]


def _make_fused_kernel(treedef):
    # Whole encoder-decoder forward (encoder stack, decoder stack, generator)
    # in one kernel; all operands live in VMEM for the entire call.
    def fused_forward_kernel(*refs):
        out_ref = refs[-1]
        t = jax.tree_util.tree_unflatten(treedef, refs[:-1])
        p = t["params"]

        # ------------------------------ encoder ------------------------------
        x = t["src_x"][...]                       # (B*S_src, D) f32
        enc_bias = t["enc_bias"][...]             # (B, S_src, S_src)
        for lyr in p["enc_layers"]:
            xn = _layer_norm(x, lyr["ln1"])
            x = x + _attention(xn, xn, enc_bias, lyr["attn"], S_SRC, S_SRC)
            xn = _layer_norm(x, lyr["ln2"])
            x = x + _ffn(xn, lyr["ff"])
        memory = _layer_norm(x, p["enc_norm"])    # (B*S_src, D)

        # ------------------------------ decoder ------------------------------
        y = t["tgt_x"][...]                       # (B*S_tgt, D) f32
        self_bias = t["self_bias"][...]           # (B, S_tgt, S_tgt)
        cross_bias = t["cross_bias"][...]         # (B, S_tgt, S_src)
        for lyr in p["dec_layers"]:
            yn = _layer_norm(y, lyr["ln1"])
            y = y + _attention(yn, yn, self_bias, lyr["self_attn"], S_TGT, S_TGT)
            yn = _layer_norm(y, lyr["ln2"])
            y = y + _attention(yn, memory, cross_bias, lyr["src_attn"], S_TGT, S_SRC)
            yn = _layer_norm(y, lyr["ln3"])
            y = y + _ffn(yn, lyr["ff"])
        y = _layer_norm(y, p["dec_norm"])

        # ------------------- generator: Linear + log_softmax ------------------
        logits = jnp.dot(y.astype(jnp.bfloat16), p["gen"]["w"][...],
                         preferred_element_type=jnp.float32) + p["gen"]["b"][...]
        z = logits - jnp.max(logits, axis=-1, keepdims=True)
        lse = jnp.log(jnp.sum(jnp.exp(z), axis=-1, keepdims=True))
        out_ref[...] = (z - lse).reshape(B, S_TGT, VOCAB_TGT)

    return fused_forward_kernel


# ----------------------------- parameter setup --------------------------------
def _linear(key, din, dout):
    kw, kb = jax.random.split(key)
    w = jax.random.normal(kw, (din, dout), jnp.float32) / math.sqrt(din)
    b = jax.random.normal(kb, (1, dout), jnp.float32) * 0.01
    return w, b


def _attn_params(key):
    ks = jax.random.split(key, 4)
    wq, bq = _linear(ks[0], D_MODEL, D_MODEL)
    wk, bk = _linear(ks[1], D_MODEL, D_MODEL)
    wv, bv = _linear(ks[2], D_MODEL, D_MODEL)
    wo, bo = _linear(ks[3], D_MODEL, D_MODEL)
    return dict(wq=wq, bq=bq, wk=wk, bk=bk, wv=wv, bv=bv, wo=wo, bo=bo)


def _ffn_params(key):
    k1, k2 = jax.random.split(key)
    w1, b1 = _linear(k1, D_MODEL, D_FF)
    w2, b2 = _linear(k2, D_FF, D_MODEL)
    return dict(w1=w1, b1=b1, w2=w2, b2=b2)


def _ln_params():
    return jnp.ones((1, D_MODEL), jnp.float32), jnp.zeros((1, D_MODEL), jnp.float32)


def init_params(key):
    keys = jax.random.split(key, 16)
    params = {}
    params["src_lut"] = jax.random.normal(keys[0], (VOCAB_SRC, D_MODEL), jnp.float32)
    params["tgt_lut"] = jax.random.normal(keys[1], (VOCAB_TGT, D_MODEL), jnp.float32)

    enc_layers = []
    for i in range(N_LAYERS):
        k = jax.random.fold_in(keys[2], i)
        ka, kf = jax.random.split(k)
        a1, b1 = _ln_params()
        a2, b2 = _ln_params()
        enc_layers.append(dict(attn=_attn_params(ka), ff=_ffn_params(kf),
                               ln1_a=a1, ln1_b=b1, ln2_a=a2, ln2_b=b2))
    params["enc_layers"] = enc_layers
    params["enc_norm_a"], params["enc_norm_b"] = _ln_params()

    dec_layers = []
    for i in range(N_LAYERS):
        k = jax.random.fold_in(keys[3], i)
        ks, kx, kf = jax.random.split(k, 3)
        a1, b1 = _ln_params()
        a2, b2 = _ln_params()
        a3, b3 = _ln_params()
        dec_layers.append(dict(self_attn=_attn_params(ks), src_attn=_attn_params(kx),
                               ff=_ffn_params(kf),
                               ln1_a=a1, ln1_b=b1, ln2_a=a2, ln2_b=b2,
                               ln3_a=a3, ln3_b=b3))
    params["dec_layers"] = dec_layers
    params["dec_norm_a"], params["dec_norm_b"] = _ln_params()

    gw, gb = _linear(keys[4], D_MODEL, VOCAB_TGT)
    params["gen"] = dict(w=gw, b=gb)
    return params


# --------------------- kernel-facing parameter packing ------------------------
def _prep_attn(a):
    # bf16 for the wide Q/K/V projections (MXU-friendly); wo is re-viewed as
    # (H, dk, D) so the kernel folds the output projection per head (no concat).
    return dict(
        wq=a["wq"].astype(jnp.bfloat16), bq=a["bq"],
        wk=a["wk"].astype(jnp.bfloat16), bk=a["bk"],
        wv=a["wv"].astype(jnp.bfloat16), bv=a["bv"],
        wo=a["wo"].reshape(N_HEADS, D_HEAD, D_MODEL),
        bo=a["bo"])


def _prep_ffn(f):
    return dict(w1=f["w1"].astype(jnp.bfloat16), b1=f["b1"],
                w2=f["w2"].astype(jnp.bfloat16), b2=f["b2"])


def prepare_kernel_params(params):
    enc_layers = [dict(ln1=dict(a=l["ln1_a"], b=l["ln1_b"]),
                       attn=_prep_attn(l["attn"]),
                       ln2=dict(a=l["ln2_a"], b=l["ln2_b"]),
                       ff=_prep_ffn(l["ff"])) for l in params["enc_layers"]]
    dec_layers = [dict(ln1=dict(a=l["ln1_a"], b=l["ln1_b"]),
                       self_attn=_prep_attn(l["self_attn"]),
                       ln2=dict(a=l["ln2_a"], b=l["ln2_b"]),
                       src_attn=_prep_attn(l["src_attn"]),
                       ln3=dict(a=l["ln3_a"], b=l["ln3_b"]),
                       ff=_prep_ffn(l["ff"])) for l in params["dec_layers"]]
    return dict(
        enc_layers=enc_layers,
        enc_norm=dict(a=params["enc_norm_a"], b=params["enc_norm_b"]),
        dec_layers=dec_layers,
        dec_norm=dict(a=params["dec_norm_a"], b=params["dec_norm_b"]),
        gen=dict(w=params["gen"]["w"].astype(jnp.bfloat16), b=params["gen"]["b"]))


# ----------------------------- JAX glue ----------------------------------------
def positional_encoding(seq_len, d_model):
    pos = jnp.arange(seq_len, dtype=jnp.float32)[:, None]
    div = jnp.exp(jnp.arange(0, d_model, 2, dtype=jnp.float32) *
                  (-math.log(10000.0) / d_model))
    pe = jnp.zeros((seq_len, d_model), jnp.float32)
    pe = pe.at[:, 0::2].set(jnp.sin(pos * div))
    pe = pe.at[:, 1::2].set(jnp.cos(pos * div))
    return pe


def embed(tokens, lut, pe):
    # Embeddings(d_model) * sqrt(d_model) + PositionalEncoding (dropout off).
    # TODO(synk): embedding gather + PE add stay in plain JAX (glue, not hot path).
    x = lut[tokens] * math.sqrt(D_MODEL)
    return x + pe[None, : tokens.shape[1], :]


def _mask_bias(mask, shape):
    # masked_fill(mask == 0, -1e9) expressed as an additive bias for the scores.
    return (jnp.broadcast_to(mask, shape).astype(jnp.float32) - 1.0) * 1e9


# ----------------------------- forward pass ------------------------------------
@jax.jit
def encoder_decoder_forward(params, src, tgt, src_mask, tgt_mask):
    # forward(src, tgt, src_mask, tgt_mask) = decode(encode(src, src_mask), ...)
    src_x = embed(src, params["src_lut"], positional_encoding(S_SRC, D_MODEL))
    tgt_x = embed(tgt, params["tgt_lut"], positional_encoding(S_TGT, D_MODEL))

    inputs = dict(
        src_x=src_x.reshape(B * S_SRC, D_MODEL),     # batch folded into rows
        tgt_x=tgt_x.reshape(B * S_TGT, D_MODEL),
        enc_bias=_mask_bias(src_mask, (B, S_SRC, S_SRC)),
        self_bias=_mask_bias(tgt_mask, (B, S_TGT, S_TGT)),
        cross_bias=_mask_bias(src_mask, (B, S_TGT, S_SRC)),
        params=prepare_kernel_params(params),
    )
    leaves, treedef = jax.tree_util.tree_flatten(inputs)

    vmem = pl.BlockSpec(memory_space=pltpu.MemorySpace.VMEM)
    return pl.pallas_call(
        _make_fused_kernel(treedef),
        out_shape=jax.ShapeDtypeStruct((B, S_TGT, VOCAB_TGT), jnp.float32),
        in_specs=[vmem] * len(leaves),
        out_specs=vmem,
    )(*leaves)


# ----------------------------- main --------------------------------------------
if __name__ == "__main__":
    key = jax.random.PRNGKey(0)
    kp, ks, kt = jax.random.split(key, 3)

    params = init_params(kp)

    src = jax.random.randint(ks, (B, S_SRC), 0, VOCAB_SRC, dtype=jnp.int32)
    tgt = jax.random.randint(kt, (B, S_TGT), 0, VOCAB_TGT, dtype=jnp.int32)

    # src_mask: (B, 1, S_src) all-ones padding mask; tgt_mask: causal (B, S, S).
    src_mask = jnp.ones((B, 1, S_SRC), jnp.float32)
    subsequent = jnp.tril(jnp.ones((S_TGT, S_TGT), jnp.float32))
    tgt_mask = jnp.broadcast_to(subsequent[None], (B, S_TGT, S_TGT))

    out = encoder_decoder_forward(params, src, tgt, src_mask, tgt_mask)
    out = jax.block_until_ready(out)

    assert out.shape == (B, S_TGT, VOCAB_TGT)
    # log_softmax rows must sum to ~1 in prob space
    assert bool(jnp.allclose(jnp.sum(jnp.exp(out), axis=-1), 1.0, atol=1e-4))
    print("KERNEL_OK")
</pallas_src>

<mosaic_0001>
module attributes {stable_mosaic.version = 11 : i64} {
  func.func @fused_forward_kernel(%arg0: memref<2x8x8xf32, #tpu.memory_space<vmem>>, %arg1: memref<2x8x8xf32, #tpu.memory_space<vmem>>, %arg2: memref<1x64xf32, #tpu.memory_space<vmem>>, %arg3: memref<1x32xf32, #tpu.memory_space<vmem>>, %arg4: memref<32x64xbf16, #tpu.memory_space<vmem>>, %arg5: memref<64x32xbf16, #tpu.memory_space<vmem>>, %arg6: memref<1x32xf32, #tpu.memory_space<vmem>>, %arg7: memref<1x32xf32, #tpu.memory_space<vmem>>, %arg8: memref<1x32xf32, #tpu.memory_space<vmem>>, %arg9: memref<1x32xf32, #tpu.memory_space<vmem>>, %arg10: memref<1x32xf32, #tpu.memory_space<vmem>>, %arg11: memref<1x32xf32, #tpu.memory_space<vmem>>, %arg12: memref<1x32xf32, #tpu.memory_space<vmem>>, %arg13: memref<1x32xf32, #tpu.memory_space<vmem>>, %arg14: memref<1x32xf32, #tpu.memory_space<vmem>>, %arg15: memref<1x32xf32, #tpu.memory_space<vmem>>, %arg16: memref<32x32xbf16, #tpu.memory_space<vmem>>, %arg17: memref<4x8x32xf32, #tpu.memory_space<vmem>>, %arg18: memref<32x32xbf16, #tpu.memory_space<vmem>>, %arg19: memref<32x32xbf16, #tpu.memory_space<vmem>>, %arg20: memref<1x32xf32, #tpu.memory_space<vmem>>, %arg21: memref<1x32xf32, #tpu.memory_space<vmem>>, %arg22: memref<1x32xf32, #tpu.memory_space<vmem>>, %arg23: memref<1x32xf32, #tpu.memory_space<vmem>>, %arg24: memref<32x32xbf16, #tpu.memory_space<vmem>>, %arg25: memref<4x8x32xf32, #tpu.memory_space<vmem>>, %arg26: memref<32x32xbf16, #tpu.memory_space<vmem>>, %arg27: memref<32x32xbf16, #tpu.memory_space<vmem>>, %arg28: memref<1x64xf32, #tpu.memory_space<vmem>>, %arg29: memref<1x32xf32, #tpu.memory_space<vmem>>, %arg30: memref<32x64xbf16, #tpu.memory_space<vmem>>, %arg31: memref<64x32xbf16, #tpu.memory_space<vmem>>, %arg32: memref<1x32xf32, #tpu.memory_space<vmem>>, %arg33: memref<1x32xf32, #tpu.memory_space<vmem>>, %arg34: memref<1x32xf32, #tpu.memory_space<vmem>>, %arg35: memref<1x32xf32, #tpu.memory_space<vmem>>, %arg36: memref<1x32xf32, #tpu.memory_space<vmem>>, %arg37: memref<1x32xf32, #tpu.memory_space<vmem>>, %arg38: memref<1x32xf32, #tpu.memory_space<vmem>>, %arg39: memref<1x32xf32, #tpu.memory_space<vmem>>, %arg40: memref<1x32xf32, #tpu.memory_space<vmem>>, %arg41: memref<1x32xf32, #tpu.memory_space<vmem>>, %arg42: memref<32x32xbf16, #tpu.memory_space<vmem>>, %arg43: memref<4x8x32xf32, #tpu.memory_space<vmem>>, %arg44: memref<32x32xbf16, #tpu.memory_space<vmem>>, %arg45: memref<32x32xbf16, #tpu.memory_space<vmem>>, %arg46: memref<1x32xf32, #tpu.memory_space<vmem>>, %arg47: memref<1x32xf32, #tpu.memory_space<vmem>>, %arg48: memref<1x32xf32, #tpu.memory_space<vmem>>, %arg49: memref<1x32xf32, #tpu.memory_space<vmem>>, %arg50: memref<32x32xbf16, #tpu.memory_space<vmem>>, %arg51: memref<4x8x32xf32, #tpu.memory_space<vmem>>, %arg52: memref<32x32xbf16, #tpu.memory_space<vmem>>, %arg53: memref<32x32xbf16, #tpu.memory_space<vmem>>, %arg54: memref<1x32xf32, #tpu.memory_space<vmem>>, %arg55: memref<1x32xf32, #tpu.memory_space<vmem>>, %arg56: memref<1x32xf32, #tpu.memory_space<vmem>>, %arg57: memref<1x32xf32, #tpu.memory_space<vmem>>, %arg58: memref<1x32xf32, #tpu.memory_space<vmem>>, %arg59: memref<1x32xf32, #tpu.memory_space<vmem>>, %arg60: memref<32x32xbf16, #tpu.memory_space<vmem>>, %arg61: memref<4x8x32xf32, #tpu.memory_space<vmem>>, %arg62: memref<32x32xbf16, #tpu.memory_space<vmem>>, %arg63: memref<32x32xbf16, #tpu.memory_space<vmem>>, %arg64: memref<1x64xf32, #tpu.memory_space<vmem>>, %arg65: memref<1x32xf32, #tpu.memory_space<vmem>>, %arg66: memref<32x64xbf16, #tpu.memory_space<vmem>>, %arg67: memref<64x32xbf16, #tpu.memory_space<vmem>>, %arg68: memref<1x32xf32, #tpu.memory_space<vmem>>, %arg69: memref<1x32xf32, #tpu.memory_space<vmem>>, %arg70: memref<1x32xf32, #tpu.memory_space<vmem>>, %arg71: memref<1x32xf32, #tpu.memory_space<vmem>>, %arg72: memref<1x32xf32, #tpu.memory_space<vmem>>, %arg73: memref<1x32xf32, #tpu.memory_space<vmem>>, %arg74: memref<1x32xf32, #tpu.memory_space<vmem>>, %arg75: memref<1x32xf32, #tpu.memory_space<vmem>>, %arg76: memref<32x32xbf16, #tpu.memory_space<vmem>>, %arg77: memref<4x8x32xf32, #tpu.memory_space<vmem>>, %arg78: memref<32x32xbf16, #tpu.memory_space<vmem>>, %arg79: memref<32x32xbf16, #tpu.memory_space<vmem>>, %arg80: memref<1x64xf32, #tpu.memory_space<vmem>>, %arg81: memref<1x32xf32, #tpu.memory_space<vmem>>, %arg82: memref<32x64xbf16, #tpu.memory_space<vmem>>, %arg83: memref<64x32xbf16, #tpu.memory_space<vmem>>, %arg84: memref<1x32xf32, #tpu.memory_space<vmem>>, %arg85: memref<1x32xf32, #tpu.memory_space<vmem>>, %arg86: memref<1x32xf32, #tpu.memory_space<vmem>>, %arg87: memref<1x32xf32, #tpu.memory_space<vmem>>, %arg88: memref<1x32xf32, #tpu.memory_space<vmem>>, %arg89: memref<1x32xf32, #tpu.memory_space<vmem>>, %arg90: memref<1x16xf32, #tpu.memory_space<vmem>>, %arg91: memref<32x16xbf16, #tpu.memory_space<vmem>>, %arg92: memref<2x8x8xf32, #tpu.memory_space<vmem>>, %arg93: memref<16x32xf32, #tpu.memory_space<vmem>>, %arg94: memref<16x32xf32, #tpu.memory_space<vmem>>, %arg95: memref<2x8x16xf32, #tpu.memory_space<vmem>>) attributes {dimension_semantics = [], scalar_prefetch = 0 : i64, scratch_operands = 0 : i64, tpu.core_type = #tpu.core_type<tc>} {
    %c0 = arith.constant 0 : index
    %c0_0 = arith.constant 0 : index
    %0 = vector.load %arg93[%c0, %c0_0] : memref<16x32xf32, #tpu.memory_space<vmem>>, vector<16x32xf32>
    %c0_1 = arith.constant 0 : index
    %c0_2 = arith.constant 0 : index
    %c0_3 = arith.constant 0 : index
    %1 = vector.load %arg1[%c0_1, %c0_2, %c0_3] : memref<2x8x8xf32, #tpu.memory_space<vmem>>, vector<2x8x8xf32>
    %c0_4 = arith.constant 0 : index
    %c0_5 = arith.constant 0 : index
    %2 = vector.load %arg68[%c0_4, %c0_5] : memref<1x32xf32, #tpu.memory_space<vmem>>, vector<1x32xf32>
    %c0_6 = arith.constant 0 : index
    %c0_7 = arith.constant 0 : index
    %3 = vector.load %arg69[%c0_6, %c0_7] : memref<1x32xf32, #tpu.memory_space<vmem>>, vector<1x32xf32>
    %cst = arith.constant dense<0.000000e+00> : vector<16xf32>
    %4 = vector.multi_reduction <add>, %0, %cst [1] : vector<16x32xf32> to vector<16xf32>
    %5 = vector.shape_cast %4 : vector<16xf32> to vector<16x1xf32>
    %cst_8 = arith.constant 3.200000e+01 : f32
    %6 = vector.broadcast %cst_8 : f32 to vector<16x1xf32>
    %7 = arith.divf %5, %6 : vector<16x1xf32>
    %8 = vector.broadcast %7 : vector<16x1xf32> to vector<16x32xf32>
    %9 = arith.subf %0, %8 : vector<16x32xf32>
    %10 = arith.mulf %9, %9 : vector<16x32xf32>
    %cst_9 = arith.constant dense<0.000000e+00> : vector<16xf32>
    %11 = vector.multi_reduction <add>, %10, %cst_9 [1] : vector<16x32xf32> to vector<16xf32>
    %12 = vector.shape_cast %11 : vector<16xf32> to vector<16x1xf32>
    %cst_10 = arith.constant 0.0322580636 : f32
    %13 = vector.broadcast %cst_10 : f32 to vector<16x1xf32>
    %14 = arith.mulf %12, %13 : vector<16x1xf32>
    %15 = math.sqrt %14 : vector<16x1xf32>
    %cst_11 = arith.constant 9.99999997E-7 : f32
    %16 = vector.broadcast %cst_11 : f32 to vector<16x1xf32>
    %17 = arith.addf %15, %16 : vector<16x1xf32>
    %18 = tpu.reciprocal %17 {approx = true} : vector<16x1xf32> -> vector<16x1xf32>
    %19 = vector.broadcast %7 : vector<16x1xf32> to vector<16x32xf32>
    %20 = arith.subf %0, %19 : vector<16x32xf32>
    %21 = vector.broadcast %2 : vector<1x32xf32> to vector<16x32xf32>
    %22 = arith.mulf %21, %20 : vector<16x32xf32>
    %23 = vector.broadcast %18 : vector<16x1xf32> to vector<16x32xf32>
    %24 = arith.mulf %22, %23 : vector<16x32xf32>
    %25 = vector.broadcast %3 : vector<1x32xf32> to vector<16x32xf32>
    %26 = arith.addf %24, %25 : vector<16x32xf32>
    %27 = arith.truncf %26 : vector<16x32xf32> to vector<16x32xbf16>
    %28 = arith.truncf %26 : vector<16x32xf32> to vector<16x32xbf16>
    %c0_12 = arith.constant 0 : index
    %c0_13 = arith.constant 0 : index
    %29 = vector.load %arg62[%c0_12, %c0_13] : memref<32x32xbf16, #tpu.memory_space<vmem>>, vector<32x32xbf16>
    %cst_14 = arith.constant dense<0.000000e+00> : vector<16x32xf32>
    %30 = tpu.matmul %27, %29, %cst_14 {dimension_numbers = #tpu.dot_dimension_numbers<[1], [0], [0], [1], [0, 0, 1, 1], [], []>} : vector<16x32xbf16>, vector<32x32xbf16>, vector<16x32xf32> -> vector<16x32xf32>
    %c0_15 = arith.constant 0 : index
    %c0_16 = arith.constant 0 : index
    %31 = vector.load %arg58[%c0_15, %c0_16] : memref<1x32xf32, #tpu.memory_space<vmem>>, vector<1x32xf32>
    %32 = vector.broadcast %31 : vector<1x32xf32> to vector<16x32xf32>
    %33 = arith.addf %30, %32 : vector<16x32xf32>
    %c0_17 = arith.constant 0 : index
    %c0_18 = arith.constant 0 : index
    %34 = vector.load %arg60[%c0_17, %c0_18] : memref<32x32xbf16, #tpu.memory_space<vmem>>, vector<32x32xbf16>
    %cst_19 = arith.constant dense<0.000000e+00> : vector<16x32xf32>
    %35 = tpu.matmul %28, %34, %cst_19 {dimension_numbers = #tpu.dot_dimension_numbers<[1], [0], [0], [1], [0, 0, 1, 1], [], []>} : vector<16x32xbf16>, vector<32x32xbf16>, vector<16x32xf32> -> vector<16x32xf32>
    %c0_20 = arith.constant 0 : index
    %c0_21 = arith.constant 0 : index
    %36 = vector.load %arg56[%c0_20, %c0_21] : memref<1x32xf32, #tpu.memory_space<vmem>>, vector<1x32xf32>
    %37 = vector.broadcast %36 : vector<1x32xf32> to vector<16x32xf32>
    %38 = arith.addf %35, %37 : vector<16x32xf32>
    %c0_22 = arith.constant 0 : index
    %c0_23 = arith.constant 0 : index
    %39 = vector.load %arg63[%c0_22, %c0_23] : memref<32x32xbf16, #tpu.memory_space<vmem>>, vector<32x32xbf16>
    %cst_24 = arith.constant dense<0.000000e+00> : vector<16x32xf32>
    %40 = tpu.matmul %28, %39, %cst_24 {dimension_numbers = #tpu.dot_dimension_numbers<[1], [0], [0], [1], [0, 0, 1, 1], [], []>} : vector<16x32xbf16>, vector<32x32xbf16>, vector<16x32xf32> -> vector<16x32xf32>
    %c0_25 = arith.constant 0 : index
    %c0_26 = arith.constant 0 : index
    %41 = vector.load %arg59[%c0_25, %c0_26] : memref<1x32xf32, #tpu.memory_space<vmem>>, vector<1x32xf32>
    %42 = vector.broadcast %41 : vector<1x32xf32> to vector<16x32xf32>
    %43 = arith.addf %40, %42 : vector<16x32xf32>
    %cst_27 = arith.constant 0.000000e+00 : f32
    %44 = vector.broadcast %cst_27 : f32 to vector<16x32xf32>
    %45 = vector.extract_strided_slice %33 {offsets = [0, 0], sizes = [16, 8], strides = [1, 1]} : vector<16x32xf32> to vector<16x8xf32>
    %46 = vector.shape_cast %45 : vector<16x8xf32> to vector<2x8x8xf32>
    %47 = vector.extract_strided_slice %38 {offsets = [0, 0], sizes = [16, 8], strides = [1, 1]} : vector<16x32xf32> to vector<16x8xf32>
    %48 = vector.shape_cast %47 : vector<16x8xf32> to vector<2x8x8xf32>
    %49 = vector.extract_strided_slice %43 {offsets = [0, 0], sizes = [16, 8], strides = [1, 1]} : vector<16x32xf32> to vector<16x8xf32>
    %50 = vector.shape_cast %49 : vector<16x8xf32> to vector<2x8x8xf32>
    "tpu.trace_start"() <{level = 10 : i32, message = "bqd,bkd->bqk"}> : () -> ()
    %cst_28 = arith.constant dense<0.000000e+00> : vector<2x8x8xf32>
    %51 = tpu.matmul %46, %48, %cst_28 {dimension_numbers = #tpu.dot_dimension_numbers<[2], [2], [1], [1], [0, 0, 0, 1, 1, 1], [0], [0]>} : vector<2x8x8xf32>, vector<2x8x8xf32>, vector<2x8x8xf32> -> vector<2x8x8xf32>
    "tpu.trace_stop"() : () -> ()
    %cst_29 = arith.constant 0.353553385 : f32
    %52 = vector.broadcast %cst_29 : f32 to vector<2x8x8xf32>
    %53 = arith.mulf %51, %52 : vector<2x8x8xf32>
    %54 = arith.addf %53, %1 : vector<2x8x8xf32>
    %cst_30 = arith.constant dense<0xFF800000> : vector<2x8xf32>
    %55 = vector.multi_reduction <maximumf>, %54, %cst_30 [2] : vector<2x8x8xf32> to vector<2x8xf32>
    %56 = vector.shape_cast %55 : vector<2x8xf32> to vector<2x8x1xf32>
    %57 = vector.broadcast %56 : vector<2x8x1xf32> to vector<2x8x8xf32>
    %58 = arith.subf %54, %57 : vector<2x8x8xf32>
    %59 = math.exp %58 : vector<2x8x8xf32>
    %cst_31 = arith.constant dense<0.000000e+00> : vector<2x8xf32>
    %60 = vector.multi_reduction <add>, %59, %cst_31 [2] : vector<2x8x8xf32> to vector<2x8xf32>
    %61 = vector.shape_cast %60 : vector<2x8xf32> to vector<2x8x1xf32>
    %62 = tpu.reciprocal %61 {approx = true} : vector<2x8x1xf32> -> vector<2x8x1xf32>
    %63 = vector.broadcast %62 : vector<2x8x1xf32> to vector<2x8x8xf32>
    %64 = arith.mulf %59, %63 : vector<2x8x8xf32>
    "tpu.trace_start"() <{level = 10 : i32, message = "bqk,bkd->bqd"}> : () -> ()
    %cst_32 = arith.constant dense<0.000000e+00> : vector<2x8x8xf32>
    %65 = tpu.matmul %64, %50, %cst_32 {dimension_numbers = #tpu.dot_dimension_numbers<[2], [1], [1], [2], [0, 0, 0, 1, 1, 2], [0], [0]>} : vector<2x8x8xf32>, vector<2x8x8xf32>, vector<2x8x8xf32> -> vector<2x8x8xf32>
    "tpu.trace_stop"() : () -> ()
    %66 = vector.shape_cast %65 : vector<2x8x8xf32> to vector<16x8xf32>
    %c0_33 = arith.constant 0 : index
    %c0_34 = arith.constant 0 : index
    %c0_35 = arith.constant 0 : index
    %67 = vector.load %arg61[%c0_33, %c0_34, %c0_35] : memref<4x8x32xf32, #tpu.memory_space<vmem>>, vector<1x8x32xf32>
    %68 = vector.shape_cast %67 : vector<1x8x32xf32> to vector<8x32xf32>
    %cst_36 = arith.constant dense<0.000000e+00> : vector<16x32xf32>
    %69 = tpu.matmul %66, %68, %cst_36 {dimension_numbers = #tpu.dot_dimension_numbers<[1], [0], [0], [1], [0, 0, 1, 1], [], []>} : vector<16x8xf32>, vector<8x32xf32>, vector<16x32xf32> -> vector<16x32xf32>
    %70 = arith.addf %44, %69 : vector<16x32xf32>
    %71 = vector.extract_strided_slice %33 {offsets = [0, 8], sizes = [16, 8], strides = [1, 1]} : vector<16x32xf32> to vector<16x8xf32>
    %72 = vector.shape_cast %71 : vector<16x8xf32> to vector<2x8x8xf32>
    %73 = vector.extract_strided_slice %38 {offsets = [0, 8], sizes = [16, 8], strides = [1, 1]} : vector<16x32xf32> to vector<16x8xf32>
    %74 = vector.shape_cast %73 : vector<16x8xf32> to vector<2x8x8xf32>
    %75 = vector.extract_strided_slice %43 {offsets = [0, 8], sizes = [16, 8], strides = [1, 1]} : vector<16x32xf32> to vector<16x8xf32>
    %76 = vector.shape_cast %75 : vector<16x8xf32> to vector<2x8x8xf32>
    "tpu.trace_start"() <{level = 10 : i32, message = "bqd,bkd->bqk"}> : () -> ()
    %cst_37 = arith.constant dense<0.000000e+00> : vector<2x8x8xf32>
    %77 = tpu.matmul %72, %74, %cst_37 {dimension_numbers = #tpu.dot_dimension_numbers<[2], [2], [1], [1], [0, 0, 0, 1, 1, 1], [0], [0]>} : vector<2x8x8xf32>, vector<2x8x8xf32>, vector<2x8x8xf32> -> vector<2x8x8xf32>
    "tpu.trace_stop"() : () -> ()
    %cst_38 = arith.constant 0.353553385 : f32
    %78 = vector.broadcast %cst_38 : f32 to vector<2x8x8xf32>
    %79 = arith.mulf %77, %78 : vector<2x8x8xf32>
    %80 = arith.addf %79, %1 : vector<2x8x8xf32>
    %cst_39 = arith.constant dense<0xFF800000> : vector<2x8xf32>
    %81 = vector.multi_reduction <maximumf>, %80, %cst_39 [2] : vector<2x8x8xf32> to vector<2x8xf32>
    %82 = vector.shape_cast %81 : vector<2x8xf32> to vector<2x8x1xf32>
    %83 = vector.broadcast %82 : vector<2x8x1xf32> to vector<2x8x8xf32>
    %84 = arith.subf %80, %83 : vector<2x8x8xf32>
    %85 = math.exp %84 : vector<2x8x8xf32>
    %cst_40 = arith.constant dense<0.000000e+00> : vector<2x8xf32>
    %86 = vector.multi_reduction <add>, %85, %cst_40 [2] : vector<2x8x8xf32> to vector<2x8xf32>
    %87 = vector.shape_cast %86 : vector<2x8xf32> to vector<2x8x1xf32>
    %88 = tpu.reciprocal %87 {approx = true} : vector<2x8x1xf32> -> vector<2x8x1xf32>
    %89 = vector.broadcast %88 : vector<2x8x1xf32> to vector<2x8x8xf32>
    %90 = arith.mulf %85, %89 : vector<2x8x8xf32>
    "tpu.trace_start"() <{level = 10 : i32, message = "bqk,bkd->bqd"}> : () -> ()
    %cst_41 = arith.constant dense<0.000000e+00> : vector<2x8x8xf32>
    %91 = tpu.matmul %90, %76, %cst_41 {dimension_numbers = #tpu.dot_dimension_numbers<[2], [1], [1], [2], [0, 0, 0, 1, 1, 2], [0], [0]>} : vector<2x8x8xf32>, vector<2x8x8xf32>, vector<2x8x8xf32> -> vector<2x8x8xf32>
    "tpu.trace_stop"() : () -> ()
    %92 = vector.shape_cast %91 : vector<2x8x8xf32> to vector<16x8xf32>
    %c1 = arith.constant 1 : index
    %c0_42 = arith.constant 0 : index
    %c0_43 = arith.constant 0 : index
    %93 = vector.load %arg61[%c1, %c0_42, %c0_43] : memref<4x8x32xf32, #tpu.memory_space<vmem>>, vector<1x8x32xf32>
    %94 = vector.shape_cast %93 : vector<1x8x32xf32> to vector<8x32xf32>
    %cst_44 = arith.constant dense<0.000000e+00> : vector<16x32xf32>
    %95 = tpu.matmul %92, %94, %cst_44 {dimension_numbers = #tpu.dot_dimension_numbers<[1], [0], [0], [1], [0, 0, 1, 1], [], []>} : vector<16x8xf32>, vector<8x32xf32>, vector<16x32xf32> -> vector<16x32xf32>
    %96 = arith.addf %70, %95 : vector<16x32xf32>
    %97 = vector.extract_strided_slice %33 {offsets = [0, 16], sizes = [16, 8], strides = [1, 1]} : vector<16x32xf32> to vector<16x8xf32>
    %98 = vector.shape_cast %97 : vector<16x8xf32> to vector<2x8x8xf32>
    %99 = vector.extract_strided_slice %38 {offsets = [0, 16], sizes = [16, 8], strides = [1, 1]} : vector<16x32xf32> to vector<16x8xf32>
    %100 = vector.shape_cast %99 : vector<16x8xf32> to vector<2x8x8xf32>
    %101 = vector.extract_strided_slice %43 {offsets = [0, 16], sizes = [16, 8], strides = [1, 1]} : vector<16x32xf32> to vector<16x8xf32>
    %102 = vector.shape_cast %101 : vector<16x8xf32> to vector<2x8x8xf32>
    "tpu.trace_start"() <{level = 10 : i32, message = "bqd,bkd->bqk"}> : () -> ()
    %cst_45 = arith.constant dense<0.000000e+00> : vector<2x8x8xf32>
    %103 = tpu.matmul %98, %100, %cst_45 {dimension_numbers = #tpu.dot_dimension_numbers<[2], [2], [1], [1], [0, 0, 0, 1, 1, 1], [0], [0]>} : vector<2x8x8xf32>, vector<2x8x8xf32>, vector<2x8x8xf32> -> vector<2x8x8xf32>
    "tpu.trace_stop"() : () -> ()
    %cst_46 = arith.constant 0.353553385 : f32
    %104 = vector.broadcast %cst_46 : f32 to vector<2x8x8xf32>
    %105 = arith.mulf %103, %104 : vector<2x8x8xf32>
    %106 = arith.addf %105, %1 : vector<2x8x8xf32>
    %cst_47 = arith.constant dense<0xFF800000> : vector<2x8xf32>
    %107 = vector.multi_reduction <maximumf>, %106, %cst_47 [2] : vector<2x8x8xf32> to vector<2x8xf32>
    %108 = vector.shape_cast %107 : vector<2x8xf32> to vector<2x8x1xf32>
    %109 = vector.broadcast %108 : vector<2x8x1xf32> to vector<2x8x8xf32>
    %110 = arith.subf %106, %109 : vector<2x8x8xf32>
    %111 = math.exp %110 : vector<2x8x8xf32>
    %cst_48 = arith.constant dense<0.000000e+00> : vector<2x8xf32>
    %112 = vector.multi_reduction <add>, %111, %cst_48 [2] : vector<2x8x8xf32> to vector<2x8xf32>
    %113 = vector.shape_cast %112 : vector<2x8xf32> to vector<2x8x1xf32>
    %114 = tpu.reciprocal %113 {approx = true} : vector<2x8x1xf32> -> vector<2x8x1xf32>
    %115 = vector.broadcast %114 : vector<2x8x1xf32> to vector<2x8x8xf32>
    %116 = arith.mulf %111, %115 : vector<2x8x8xf32>
    "tpu.trace_start"() <{level = 10 : i32, message = "bqk,bkd->bqd"}> : () -> ()
    %cst_49 = arith.constant dense<0.000000e+00> : vector<2x8x8xf32>
    %117 = tpu.matmul %116, %102, %cst_49 {dimension_numbers = #tpu.dot_dimension_numbers<[2], [1], [1], [2], [0, 0, 0, 1, 1, 2], [0], [0]>} : vector<2x8x8xf32>, vector<2x8x8xf32>, vector<2x8x8xf32> -> vector<2x8x8xf32>
    "tpu.trace_stop"() : () -> ()
    %118 = vector.shape_cast %117 : vector<2x8x8xf32> to vector<16x8xf32>
    %c2 = arith.constant 2 : index
    %c0_50 = arith.constant 0 : index
    %c0_51 = arith.constant 0 : index
    %119 = vector.load %arg61[%c2, %c0_50, %c0_51] : memref<4x8x32xf32, #tpu.memory_space<vmem>>, vector<1x8x32xf32>
    %120 = vector.shape_cast %119 : vector<1x8x32xf32> to vector<8x32xf32>
    %cst_52 = arith.constant dense<0.000000e+00> : vector<16x32xf32>
    %121 = tpu.matmul %118, %120, %cst_52 {dimension_numbers = #tpu.dot_dimension_numbers<[1], [0], [0], [1], [0, 0, 1, 1], [], []>} : vector<16x8xf32>, vector<8x32xf32>, vector<16x32xf32> -> vector<16x32xf32>
    %122 = arith.addf %96, %121 : vector<16x32xf32>
    %123 = vector.extract_strided_slice %33 {offsets = [0, 24], sizes = [16, 8], strides = [1, 1]} : vector<16x32xf32> to vector<16x8xf32>
    %124 = vector.shape_cast %123 : vector<16x8xf32> to vector<2x8x8xf32>
    %125 = vector.extract_strided_slice %38 {offsets = [0, 24], sizes = [16, 8], strides = [1, 1]} : vector<16x32xf32> to vector<16x8xf32>
    %126 = vector.shape_cast %125 : vector<16x8xf32> to vector<2x8x8xf32>
    %127 = vector.extract_strided_slice %43 {offsets = [0, 24], sizes = [16, 8], strides = [1, 1]} : vector<16x32xf32> to vector<16x8xf32>
    %128 = vector.shape_cast %127 : vector<16x8xf32> to vector<2x8x8xf32>
    "tpu.trace_start"() <{level = 10 : i32, message = "bqd,bkd->bqk"}> : () -> ()
    %cst_53 = arith.constant dense<0.000000e+00> : vector<2x8x8xf32>
    %129 = tpu.matmul %124, %126, %cst_53 {dimension_numbers = #tpu.dot_dimension_numbers<[2], [2], [1], [1], [0, 0, 0, 1, 1, 1], [0], [0]>} : vector<2x8x8xf32>, vector<2x8x8xf32>, vector<2x8x8xf32> -> vector<2x8x8xf32>
    "tpu.trace_stop"() : () -> ()
    %cst_54 = arith.constant 0.353553385 : f32
    %130 = vector.broadcast %cst_54 : f32 to vector<2x8x8xf32>
    %131 = arith.mulf %129, %130 : vector<2x8x8xf32>
    %132 = arith.addf %131, %1 : vector<2x8x8xf32>
    %cst_55 = arith.constant dense<0xFF800000> : vector<2x8xf32>
    %133 = vector.multi_reduction <maximumf>, %132, %cst_55 [2] : vector<2x8x8xf32> to vector<2x8xf32>
    %134 = vector.shape_cast %133 : vector<2x8xf32> to vector<2x8x1xf32>
    %135 = vector.broadcast %134 : vector<2x8x1xf32> to vector<2x8x8xf32>
    %136 = arith.subf %132, %135 : vector<2x8x8xf32>
    %137 = math.exp %136 : vector<2x8x8xf32>
    %cst_56 = arith.constant dense<0.000000e+00> : vector<2x8xf32>
    %138 = vector.multi_reduction <add>, %137, %cst_56 [2] : vector<2x8x8xf32> to vector<2x8xf32>
    %139 = vector.shape_cast %138 : vector<2x8xf32> to vector<2x8x1xf32>
    %140 = tpu.reciprocal %139 {approx = true} : vector<2x8x1xf32> -> vector<2x8x1xf32>
    %141 = vector.broadcast %140 : vector<2x8x1xf32> to vector<2x8x8xf32>
    %142 = arith.mulf %137, %141 : vector<2x8x8xf32>
    "tpu.trace_start"() <{level = 10 : i32, message = "bqk,bkd->bqd"}> : () -> ()
    %cst_57 = arith.constant dense<0.000000e+00> : vector<2x8x8xf32>
    %143 = tpu.matmul %142, %128, %cst_57 {dimension_numbers = #tpu.dot_dimension_numbers<[2], [1], [1], [2], [0, 0, 0, 1, 1, 2], [0], [0]>} : vector<2x8x8xf32>, vector<2x8x8xf32>, vector<2x8x8xf32> -> vector<2x8x8xf32>
    "tpu.trace_stop"() : () -> ()
    %144 = vector.shape_cast %143 : vector<2x8x8xf32> to vector<16x8xf32>
    %c3 = arith.constant 3 : index
    %c0_58 = arith.constant 0 : index
    %c0_59 = arith.constant 0 : index
    %145 = vector.load %arg61[%c3, %c0_58, %c0_59] : memref<4x8x32xf32, #tpu.memory_space<vmem>>, vector<1x8x32xf32>
    %146 = vector.shape_cast %145 : vector<1x8x32xf32> to vector<8x32xf32>
    %cst_60 = arith.constant dense<0.000000e+00> : vector<16x32xf32>
    %147 = tpu.matmul %144, %146, %cst_60 {dimension_numbers = #tpu.dot_dimension_numbers<[1], [0], [0], [1], [0, 0, 1, 1], [], []>} : vector<16x8xf32>, vector<8x32xf32>, vector<16x32xf32> -> vector<16x32xf32>
    %148 = arith.addf %122, %147 : vector<16x32xf32>
    %c0_61 = arith.constant 0 : index
    %c0_62 = arith.constant 0 : index
    %149 = vector.load %arg57[%c0_61, %c0_62] : memref<1x32xf32, #tpu.memory_space<vmem>>, vector<1x32xf32>
    %150 = vector.broadcast %149 : vector<1x32xf32> to vector<16x32xf32>
    %151 = arith.addf %148, %150 : vector<16x32xf32>
    %152 = arith.addf %0, %151 : vector<16x32xf32>
    %c0_63 = arith.constant 0 : index
    %c0_64 = arith.constant 0 : index
    %153 = vector.load %arg70[%c0_63, %c0_64] : memref<1x32xf32, #tpu.memory_space<vmem>>, vector<1x32xf32>
    %c0_65 = arith.constant 0 : index
    %c0_66 = arith.constant 0 : index
    %154 = vector.load %arg71[%c0_65, %c0_66] : memref<1x32xf32, #tpu.memory_space<vmem>>, vector<1x32xf32>
    %cst_67 = arith.constant dense<0.000000e+00> : vector<16xf32>
    %155 = vector.multi_reduction <add>, %152, %cst_67 [1] : vector<16x32xf32> to vector<16xf32>
    %156 = vector.shape_cast %155 : vector<16xf32> to vector<16x1xf32>
    %cst_68 = arith.constant 3.200000e+01 : f32
    %157 = vector.broadcast %cst_68 : f32 to vector<16x1xf32>
    %158 = arith.divf %156, %157 : vector<16x1xf32>
    %159 = vector.broadcast %158 : vector<16x1xf32> to vector<16x32xf32>
    %160 = arith.subf %152, %159 : vector<16x32xf32>
    %161 = arith.mulf %160, %160 : vector<16x32xf32>
    %cst_69 = arith.constant dense<0.000000e+00> : vector<16xf32>
    %162 = vector.multi_reduction <add>, %161, %cst_69 [1] : vector<16x32xf32> to vector<16xf32>
    %163 = vector.shape_cast %162 : vector<16xf32> to vector<16x1xf32>
    %cst_70 = arith.constant 0.0322580636 : f32
    %164 = vector.broadcast %cst_70 : f32 to vector<16x1xf32>
    %165 = arith.mulf %163, %164 : vector<16x1xf32>
    %166 = math.sqrt %165 : vector<16x1xf32>
    %cst_71 = arith.constant 9.99999997E-7 : f32
    %167 = vector.broadcast %cst_71 : f32 to vector<16x1xf32>
    %168 = arith.addf %166, %167 : vector<16x1xf32>
    %169 = tpu.reciprocal %168 {approx = true} : vector<16x1xf32> -> vector<16x1xf32>
    %170 = vector.broadcast %158 : vector<16x1xf32> to vector<16x32xf32>
    %171 = arith.subf %152, %170 : vector<16x32xf32>
    %172 = vector.broadcast %153 : vector<1x32xf32> to vector<16x32xf32>
    %173 = arith.mulf %172, %171 : vector<16x32xf32>
    %174 = vector.broadcast %169 : vector<16x1xf32> to vector<16x32xf32>
    %175 = arith.mulf %173, %174 : vector<16x32xf32>
    %176 = vector.broadcast %154 : vector<1x32xf32> to vector<16x32xf32>
    %177 = arith.addf %175, %176 : vector<16x32xf32>
    %178 = arith.truncf %177 : vector<16x32xf32> to vector<16x32xbf16>
    %c0_72 = arith.constant 0 : index
    %c0_73 = arith.constant 0 : index
    %179 = vector.load %arg66[%c0_72, %c0_73] : memref<32x64xbf16, #tpu.memory_space<vmem>>, vector<32x64xbf16>
    %cst_74 = arith.constant dense<0.000000e+00> : vector<16x64xf32>
    %180 = tpu.matmul %178, %179, %cst_74 {dimension_numbers = #tpu.dot_dimension_numbers<[1], [0], [0], [1], [0, 0, 1, 1], [], []>} : vector<16x32xbf16>, vector<32x64xbf16>, vector<16x64xf32> -> vector<16x64xf32>
    %c0_75 = arith.constant 0 : index
    %c0_76 = arith.constant 0 : index
    %181 = vector.load %arg64[%c0_75, %c0_76] : memref<1x64xf32, #tpu.memory_space<vmem>>, vector<1x64xf32>
    %182 = vector.broadcast %181 : vector<1x64xf32> to vector<16x64xf32>
    %183 = arith.addf %180, %182 : vector<16x64xf32>
    %cst_77 = arith.constant 0.000000e+00 : f32
    %184 = vector.broadcast %cst_77 : f32 to vector<16x64xf32>
    %185 = arith.maximumf %183, %184 : vector<16x64xf32>
    %186 = arith.truncf %185 : vector<16x64xf32> to vector<16x64xbf16>
    %c0_78 = arith.constant 0 : index
    %c0_79 = arith.constant 0 : index
    %187 = vector.load %arg67[%c0_78, %c0_79] : memref<64x32xbf16, #tpu.memory_space<vmem>>, vector<64x32xbf16>
    %cst_80 = arith.constant dense<0.000000e+00> : vector<16x32xf32>
    %188 = tpu.matmul %186, %187, %cst_80 {dimension_numbers = #tpu.dot_dimension_numbers<[1], [0], [0], [1], [0, 0, 1, 1], [], []>} : vector<16x64xbf16>, vector<64x32xbf16>, vector<16x32xf32> -> vector<16x32xf32>
    %c0_81 = arith.constant 0 : index
    %c0_82 = arith.constant 0 : index
    %189 = vector.load %arg65[%c0_81, %c0_82] : memref<1x32xf32, #tpu.memory_space<vmem>>, vector<1x32xf32>
    %190 = vector.broadcast %189 : vector<1x32xf32> to vector<16x32xf32>
    %191 = arith.addf %188, %190 : vector<16x32xf32>
    %192 = arith.addf %152, %191 : vector<16x32xf32>
    %c0_83 = arith.constant 0 : index
    %c0_84 = arith.constant 0 : index
    %193 = vector.load %arg84[%c0_83, %c0_84] : memref<1x32xf32, #tpu.memory_space<vmem>>, vector<1x32xf32>
    %c0_85 = arith.constant 0 : index
    %c0_86 = arith.constant 0 : index
    %194 = vector.load %arg85[%c0_85, %c0_86] : memref<1x32xf32, #tpu.memory_space<vmem>>, vector<1x32xf32>
    %cst_87 = arith.constant dense<0.000000e+00> : vector<16xf32>
    %195 = vector.multi_reduction <add>, %192, %cst_87 [1] : vector<16x32xf32> to vector<16xf32>
    %196 = vector.shape_cast %195 : vector<16xf32> to vector<16x1xf32>
    %cst_88 = arith.constant 3.200000e+01 : f32
    %197 = vector.broadcast %cst_88 : f32 to vector<16x1xf32>
    %198 = arith.divf %196, %197 : vector<16x1xf32>
    %199 = vector.broadcast %198 : vector<16x1xf32> to vector<16x32xf32>
    %200 = arith.subf %192, %199 : vector<16x32xf32>
    %201 = arith.mulf %200, %200 : vector<16x32xf32>
    %cst_89 = arith.constant dense<0.000000e+00> : vector<16xf32>
    %202 = vector.multi_reduction <add>, %201, %cst_89 [1] : vector<16x32xf32> to vector<16xf32>
    %203 = vector.shape_cast %202 : vector<16xf32> to vector<16x1xf32>
    %cst_90 = arith.constant 0.0322580636 : f32
    %204 = vector.broadcast %cst_90 : f32 to vector<16x1xf32>
    %205 = arith.mulf %203, %204 : vector<16x1xf32>
    %206 = math.sqrt %205 : vector<16x1xf32>
    %cst_91 = arith.constant 9.99999997E-7 : f32
    %207 = vector.broadcast %cst_91 : f32 to vector<16x1xf32>
    %208 = arith.addf %206, %207 : vector<16x1xf32>
    %209 = tpu.reciprocal %208 {approx = true} : vector<16x1xf32> -> vector<16x1xf32>
    %210 = vector.broadcast %198 : vector<16x1xf32> to vector<16x32xf32>
    %211 = arith.subf %192, %210 : vector<16x32xf32>
    %212 = vector.broadcast %193 : vector<1x32xf32> to vector<16x32xf32>
    %213 = arith.mulf %212, %211 : vector<16x32xf32>
    %214 = vector.broadcast %209 : vector<16x1xf32> to vector<16x32xf32>
    %215 = arith.mulf %213, %214 : vector<16x32xf32>
    %216 = vector.broadcast %194 : vector<1x32xf32> to vector<16x32xf32>
    %217 = arith.addf %215, %216 : vector<16x32xf32>
    %218 = arith.truncf %217 : vector<16x32xf32> to vector<16x32xbf16>
    %219 = arith.truncf %217 : vector<16x32xf32> to vector<16x32xbf16>
    %c0_92 = arith.constant 0 : index
    %c0_93 = arith.constant 0 : index
    %220 = vector.load %arg78[%c0_92, %c0_93] : memref<32x32xbf16, #tpu.memory_space<vmem>>, vector<32x32xbf16>
    %cst_94 = arith.constant dense<0.000000e+00> : vector<16x32xf32>
    %221 = tpu.matmul %218, %220, %cst_94 {dimension_numbers = #tpu.dot_dimension_numbers<[1], [0], [0], [1], [0, 0, 1, 1], [], []>} : vector<16x32xbf16>, vector<32x32xbf16>, vector<16x32xf32> -> vector<16x32xf32>
    %c0_95 = arith.constant 0 : index
    %c0_96 = arith.constant 0 : index
    %222 = vector.load %arg74[%c0_95, %c0_96] : memref<1x32xf32, #tpu.memory_space<vmem>>, vector<1x32xf32>
    %223 = vector.broadcast %222 : vector<1x32xf32> to vector<16x32xf32>
    %224 = arith.addf %221, %223 : vector<16x32xf32>
    %c0_97 = arith.constant 0 : index
    %c0_98 = arith.constant 0 : index
    %225 = vector.load %arg76[%c0_97, %c0_98] : memref<32x32xbf16, #tpu.memory_space<vmem>>, vector<32x32xbf16>
    %cst_99 = arith.constant dense<0.000000e+00> : vector<16x32xf32>
    %226 = tpu.matmul %219, %225, %cst_99 {dimension_numbers = #tpu.dot_dimension_numbers<[1], [0], [0], [1], [0, 0, 1, 1], [], []>} : vector<16x32xbf16>, vector<32x32xbf16>, vector<16x32xf32> -> vector<16x32xf32>
    %c0_100 = arith.constant 0 : index
    %c0_101 = arith.constant 0 : index
    %227 = vector.load %arg72[%c0_100, %c0_101] : memref<1x32xf32, #tpu.memory_space<vmem>>, vector<1x32xf32>
    %228 = vector.broadcast %227 : vector<1x32xf32> to vector<16x32xf32>
    %229 = arith.addf %226, %228 : vector<16x32xf32>
    %c0_102 = arith.constant 0 : index
    %c0_103 = arith.constant 0 : index
    %230 = vector.load %arg79[%c0_102, %c0_103] : memref<32x32xbf16, #tpu.memory_space<vmem>>, vector<32x32xbf16>
    %cst_104 = arith.constant dense<0.000000e+00> : vector<16x32xf32>
    %231 = tpu.matmul %219, %230, %cst_104 {dimension_numbers = #tpu.dot_dimension_numbers<[1], [0], [0], [1], [0, 0, 1, 1], [], []>} : vector<16x32xbf16>, vector<32x32xbf16>, vector<16x32xf32> -> vector<16x32xf32>
    %c0_105 = arith.constant 0 : index
    %c0_106 = arith.constant 0 : index
    %232 = vector.load %arg75[%c0_105, %c0_106] : memref<1x32xf32, #tpu.memory_space<vmem>>, vector<1x32xf32>
    %233 = vector.broadcast %232 : vector<1x32xf32> to vector<16x32xf32>
    %234 = arith.addf %231, %233 : vector<16x32xf32>
    %cst_107 = arith.constant 0.000000e+00 : f32
    %235 = vector.broadcast %cst_107 : f32 to vector<16x32xf32>
    %236 = vector.extract_strided_slice %224 {offsets = [0, 0], sizes = [16, 8], strides = [1, 1]} : vector<16x32xf32> to vector<16x8xf32>
    %237 = vector.shape_cast %236 : vector<16x8xf32> to vector<2x8x8xf32>
    %238 = vector.extract_strided_slice %229 {offsets = [0, 0], sizes = [16, 8], strides = [1, 1]} : vector<16x32xf32> to vector<16x8xf32>
    %239 = vector.shape_cast %238 : vector<16x8xf32> to vector<2x8x8xf32>
    %240 = vector.extract_strided_slice %234 {offsets = [0, 0], sizes = [16, 8], strides = [1, 1]} : vector<16x32xf32> to vector<16x8xf32>
    %241 = vector.shape_cast %240 : vector<16x8xf32> to vector<2x8x8xf32>
    "tpu.trace_start"() <{level = 10 : i32, message = "bqd,bkd->bqk"}> : () -> ()
    %cst_108 = arith.constant dense<0.000000e+00> : vector<2x8x8xf32>
    %242 = tpu.matmul %237, %239, %cst_108 {dimension_numbers = #tpu.dot_dimension_numbers<[2], [2], [1], [1], [0, 0, 0, 1, 1, 1], [0], [0]>} : vector<2x8x8xf32>, vector<2x8x8xf32>, vector<2x8x8xf32> -> vector<2x8x8xf32>
    "tpu.trace_stop"() : () -> ()
    %cst_109 = arith.constant 0.353553385 : f32
    %243 = vector.broadcast %cst_109 : f32 to vector<2x8x8xf32>
    %244 = arith.mulf %242, %243 : vector<2x8x8xf32>
    %245 = arith.addf %244, %1 : vector<2x8x8xf32>
    %cst_110 = arith.constant dense<0xFF800000> : vector<2x8xf32>
    %246 = vector.multi_reduction <maximumf>, %245, %cst_110 [2] : vector<2x8x8xf32> to vector<2x8xf32>
    %247 = vector.shape_cast %246 : vector<2x8xf32> to vector<2x8x1xf32>
    %248 = vector.broadcast %247 : vector<2x8x1xf32> to vector<2x8x8xf32>
    %249 = arith.subf %245, %248 : vector<2x8x8xf32>
    %250 = math.exp %249 : vector<2x8x8xf32>
    %cst_111 = arith.constant dense<0.000000e+00> : vector<2x8xf32>
    %251 = vector.multi_reduction <add>, %250, %cst_111 [2] : vector<2x8x8xf32> to vector<2x8xf32>
    %252 = vector.shape_cast %251 : vector<2x8xf32> to vector<2x8x1xf32>
    %253 = tpu.reciprocal %252 {approx = true} : vector<2x8x1xf32> -> vector<2x8x1xf32>
    %254 = vector.broadcast %253 : vector<2x8x1xf32> to vector<2x8x8xf32>
    %255 = arith.mulf %250, %254 : vector<2x8x8xf32>
    "tpu.trace_start"() <{level = 10 : i32, message = "bqk,bkd->bqd"}> : () -> ()
    %cst_112 = arith.constant dense<0.000000e+00> : vector<2x8x8xf32>
    %256 = tpu.matmul %255, %241, %cst_112 {dimension_numbers = #tpu.dot_dimension_numbers<[2], [1], [1], [2], [0, 0, 0, 1, 1, 2], [0], [0]>} : vector<2x8x8xf32>, vector<2x8x8xf32>, vector<2x8x8xf32> -> vector<2x8x8xf32>
    "tpu.trace_stop"() : () -> ()
    %257 = vector.shape_cast %256 : vector<2x8x8xf32> to vector<16x8xf32>
    %c0_113 = arith.constant 0 : index
    %c0_114 = arith.constant 0 : index
    %c0_115 = arith.constant 0 : index
    %258 = vector.load %arg77[%c0_113, %c0_114, %c0_115] : memref<4x8x32xf32, #tpu.memory_space<vmem>>, vector<1x8x32xf32>
    %259 = vector.shape_cast %258 : vector<1x8x32xf32> to vector<8x32xf32>
    %cst_116 = arith.constant dense<0.000000e+00> : vector<16x32xf32>
    %260 = tpu.matmul %257, %259, %cst_116 {dimension_numbers = #tpu.dot_dimension_numbers<[1], [0], [0], [1], [0, 0, 1, 1], [], []>} : vector<16x8xf32>, vector<8x32xf32>, vector<16x32xf32> -> vector<16x32xf32>
    %261 = arith.addf %235, %260 : vector<16x32xf32>
    %262 = vector.extract_strided_slice %224 {offsets = [0, 8], sizes = [16, 8], strides = [1, 1]} : vector<16x32xf32> to vector<16x8xf32>
    %263 = vector.shape_cast %262 : vector<16x8xf32> to vector<2x8x8xf32>
    %264 = vector.extract_strided_slice %229 {offsets = [0, 8], sizes = [16, 8], strides = [1, 1]} : vector<16x32xf32> to vector<16x8xf32>
    %265 = vector.shape_cast %264 : vector<16x8xf32> to vector<2x8x8xf32>
    %266 = vector.extract_strided_slice %234 {offsets = [0, 8], sizes = [16, 8], strides = [1, 1]} : vector<16x32xf32> to vector<16x8xf32>
    %267 = vector.shape_cast %266 : vector<16x8xf32> to vector<2x8x8xf32>
    "tpu.trace_start"() <{level = 10 : i32, message = "bqd,bkd->bqk"}> : () -> ()
    %cst_117 = arith.constant dense<0.000000e+00> : vector<2x8x8xf32>
    %268 = tpu.matmul %263, %265, %cst_117 {dimension_numbers = #tpu.dot_dimension_numbers<[2], [2], [1], [1], [0, 0, 0, 1, 1, 1], [0], [0]>} : vector<2x8x8xf32>, vector<2x8x8xf32>, vector<2x8x8xf32> -> vector<2x8x8xf32>
    "tpu.trace_stop"() : () -> ()
    %cst_118 = arith.constant 0.353553385 : f32
    %269 = vector.broadcast %cst_118 : f32 to vector<2x8x8xf32>
    %270 = arith.mulf %268, %269 : vector<2x8x8xf32>
    %271 = arith.addf %270, %1 : vector<2x8x8xf32>
    %cst_119 = arith.constant dense<0xFF800000> : vector<2x8xf32>
    %272 = vector.multi_reduction <maximumf>, %271, %cst_119 [2] : vector<2x8x8xf32> to vector<2x8xf32>
    %273 = vector.shape_cast %272 : vector<2x8xf32> to vector<2x8x1xf32>
    %274 = vector.broadcast %273 : vector<2x8x1xf32> to vector<2x8x8xf32>
    %275 = arith.subf %271, %274 : vector<2x8x8xf32>
    %276 = math.exp %275 : vector<2x8x8xf32>
    %cst_120 = arith.constant dense<0.000000e+00> : vector<2x8xf32>
    %277 = vector.multi_reduction <add>, %276, %cst_120 [2] : vector<2x8x8xf32> to vector<2x8xf32>
    %278 = vector.shape_cast %277 : vector<2x8xf32> to vector<2x8x1xf32>
    %279 = tpu.reciprocal %278 {approx = true} : vector<2x8x1xf32> -> vector<2x8x1xf32>
    %280 = vector.broadcast %279 : vector<2x8x1xf32> to vector<2x8x8xf32>
    %281 = arith.mulf %276, %280 : vector<2x8x8xf32>
    "tpu.trace_start"() <{level = 10 : i32, message = "bqk,bkd->bqd"}> : () -> ()
    %cst_121 = arith.constant dense<0.000000e+00> : vector<2x8x8xf32>
    %282 = tpu.matmul %281, %267, %cst_121 {dimension_numbers = #tpu.dot_dimension_numbers<[2], [1], [1], [2], [0, 0, 0, 1, 1, 2], [0], [0]>} : vector<2x8x8xf32>, vector<2x8x8xf32>, vector<2x8x8xf32> -> vector<2x8x8xf32>
    "tpu.trace_stop"() : () -> ()
    %283 = vector.shape_cast %282 : vector<2x8x8xf32> to vector<16x8xf32>
    %c1_122 = arith.constant 1 : index
    %c0_123 = arith.constant 0 : index
    %c0_124 = arith.constant 0 : index
    %284 = vector.load %arg77[%c1_122, %c0_123, %c0_124] : memref<4x8x32xf32, #tpu.memory_space<vmem>>, vector<1x8x32xf32>
    %285 = vector.shape_cast %284 : vector<1x8x32xf32> to vector<8x32xf32>
    %cst_125 = arith.constant dense<0.000000e+00> : vector<16x32xf32>
    %286 = tpu.matmul %283, %285, %cst_125 {dimension_numbers = #tpu.dot_dimension_numbers<[1], [0], [0], [1], [0, 0, 1, 1], [], []>} : vector<16x8xf32>, vector<8x32xf32>, vector<16x32xf32> -> vector<16x32xf32>
    %287 = arith.addf %261, %286 : vector<16x32xf32>
    %288 = vector.extract_strided_slice %224 {offsets = [0, 16], sizes = [16, 8], strides = [1, 1]} : vector<16x32xf32> to vector<16x8xf32>
    %289 = vector.shape_cast %288 : vector<16x8xf32> to vector<2x8x8xf32>
    %290 = vector.extract_strided_slice %229 {offsets = [0, 16], sizes = [16, 8], strides = [1, 1]} : vector<16x32xf32> to vector<16x8xf32>
    %291 = vector.shape_cast %290 : vector<16x8xf32> to vector<2x8x8xf32>
    %292 = vector.extract_strided_slice %234 {offsets = [0, 16], sizes = [16, 8], strides = [1, 1]} : vector<16x32xf32> to vector<16x8xf32>
    %293 = vector.shape_cast %292 : vector<16x8xf32> to vector<2x8x8xf32>
    "tpu.trace_start"() <{level = 10 : i32, message = "bqd,bkd->bqk"}> : () -> ()
    %cst_126 = arith.constant dense<0.000000e+00> : vector<2x8x8xf32>
    %294 = tpu.matmul %289, %291, %cst_126 {dimension_numbers = #tpu.dot_dimension_numbers<[2], [2], [1], [1], [0, 0, 0, 1, 1, 1], [0], [0]>} : vector<2x8x8xf32>, vector<2x8x8xf32>, vector<2x8x8xf32> -> vector<2x8x8xf32>
    "tpu.trace_stop"() : () -> ()
    %cst_127 = arith.constant 0.353553385 : f32
    %295 = vector.broadcast %cst_127 : f32 to vector<2x8x8xf32>
    %296 = arith.mulf %294, %295 : vector<2x8x8xf32>
    %297 = arith.addf %296, %1 : vector<2x8x8xf32>
    %cst_128 = arith.constant dense<0xFF800000> : vector<2x8xf32>
    %298 = vector.multi_reduction <maximumf>, %297, %cst_128 [2] : vector<2x8x8xf32> to vector<2x8xf32>
    %299 = vector.shape_cast %298 : vector<2x8xf32> to vector<2x8x1xf32>
    %300 = vector.broadcast %299 : vector<2x8x1xf32> to vector<2x8x8xf32>
    %301 = arith.subf %297, %300 : vector<2x8x8xf32>
    %302 = math.exp %301 : vector<2x8x8xf32>
    %cst_129 = arith.constant dense<0.000000e+00> : vector<2x8xf32>
    %303 = vector.multi_reduction <add>, %302, %cst_129 [2] : vector<2x8x8xf32> to vector<2x8xf32>
    %304 = vector.shape_cast %303 : vector<2x8xf32> to vector<2x8x1xf32>
    %305 = tpu.reciprocal %304 {approx = true} : vector<2x8x1xf32> -> vector<2x8x1xf32>
    %306 = vector.broadcast %305 : vector<2x8x1xf32> to vector<2x8x8xf32>
    %307 = arith.mulf %302, %306 : vector<2x8x8xf32>
    "tpu.trace_start"() <{level = 10 : i32, message = "bqk,bkd->bqd"}> : () -> ()
    %cst_130 = arith.constant dense<0.000000e+00> : vector<2x8x8xf32>
    %308 = tpu.matmul %307, %293, %cst_130 {dimension_numbers = #tpu.dot_dimension_numbers<[2], [1], [1], [2], [0, 0, 0, 1, 1, 2], [0], [0]>} : vector<2x8x8xf32>, vector<2x8x8xf32>, vector<2x8x8xf32> -> vector<2x8x8xf32>
    "tpu.trace_stop"() : () -> ()
    %309 = vector.shape_cast %308 : vector<2x8x8xf32> to vector<16x8xf32>
    %c2_131 = arith.constant 2 : index
    %c0_132 = arith.constant 0 : index
    %c0_133 = arith.constant 0 : index
    %310 = vector.load %arg77[%c2_131, %c0_132, %c0_133] : memref<4x8x32xf32, #tpu.memory_space<vmem>>, vector<1x8x32xf32>
    %311 = vector.shape_cast %310 : vector<1x8x32xf32> to vector<8x32xf32>
    %cst_134 = arith.constant dense<0.000000e+00> : vector<16x32xf32>
    %312 = tpu.matmul %309, %311, %cst_134 {dimension_numbers = #tpu.dot_dimension_numbers<[1], [0], [0], [1], [0, 0, 1, 1], [], []>} : vector<16x8xf32>, vector<8x32xf32>, vector<16x32xf32> -> vector<16x32xf32>
    %313 = arith.addf %287, %312 : vector<16x32xf32>
    %314 = vector.extract_strided_slice %224 {offsets = [0, 24], sizes = [16, 8], strides = [1, 1]} : vector<16x32xf32> to vector<16x8xf32>
    %315 = vector.shape_cast %314 : vector<16x8xf32> to vector<2x8x8xf32>
    %316 = vector.extract_strided_slice %229 {offsets = [0, 24], sizes = [16, 8], strides = [1, 1]} : vector<16x32xf32> to vector<16x8xf32>
    %317 = vector.shape_cast %316 : vector<16x8xf32> to vector<2x8x8xf32>
    %318 = vector.extract_strided_slice %234 {offsets = [0, 24], sizes = [16, 8], strides = [1, 1]} : vector<16x32xf32> to vector<16x8xf32>
    %319 = vector.shape_cast %318 : vector<16x8xf32> to vector<2x8x8xf32>
    "tpu.trace_start"() <{level = 10 : i32, message = "bqd,bkd->bqk"}> : () -> ()
    %cst_135 = arith.constant dense<0.000000e+00> : vector<2x8x8xf32>
    %320 = tpu.matmul %315, %317, %cst_135 {dimension_numbers = #tpu.dot_dimension_numbers<[2], [2], [1], [1], [0, 0, 0, 1, 1, 1], [0], [0]>} : vector<2x8x8xf32>, vector<2x8x8xf32>, vector<2x8x8xf32> -> vector<2x8x8xf32>
    "tpu.trace_stop"() : () -> ()
    %cst_136 = arith.constant 0.353553385 : f32
    %321 = vector.broadcast %cst_136 : f32 to vector<2x8x8xf32>
    %322 = arith.mulf %320, %321 : vector<2x8x8xf32>
    %323 = arith.addf %322, %1 : vector<2x8x8xf32>
    %cst_137 = arith.constant dense<0xFF800000> : vector<2x8xf32>
    %324 = vector.multi_reduction <maximumf>, %323, %cst_137 [2] : vector<2x8x8xf32> to vector<2x8xf32>
    %325 = vector.shape_cast %324 : vector<2x8xf32> to vector<2x8x1xf32>
    %326 = vector.broadcast %325 : vector<2x8x1xf32> to vector<2x8x8xf32>
    %327 = arith.subf %323, %326 : vector<2x8x8xf32>
    %328 = math.exp %327 : vector<2x8x8xf32>
    %cst_138 = arith.constant dense<0.000000e+00> : vector<2x8xf32>
    %329 = vector.multi_reduction <add>, %328, %cst_138 [2] : vector<2x8x8xf32> to vector<2x8xf32>
    %330 = vector.shape_cast %329 : vector<2x8xf32> to vector<2x8x1xf32>
    %331 = tpu.reciprocal %330 {approx = true} : vector<2x8x1xf32> -> vector<2x8x1xf32>
    %332 = vector.broadcast %331 : vector<2x8x1xf32> to vector<2x8x8xf32>
    %333 = arith.mulf %328, %332 : vector<2x8x8xf32>
    "tpu.trace_start"() <{level = 10 : i32, message = "bqk,bkd->bqd"}> : () -> ()
    %cst_139 = arith.constant dense<0.000000e+00> : vector<2x8x8xf32>
    %334 = tpu.matmul %333, %319, %cst_139 {dimension_numbers = #tpu.dot_dimension_numbers<[2], [1], [1], [2], [0, 0, 0, 1, 1, 2], [0], [0]>} : vector<2x8x8xf32>, vector<2x8x8xf32>, vector<2x8x8xf32> -> vector<2x8x8xf32>
    "tpu.trace_stop"() : () -> ()
    %335 = vector.shape_cast %334 : vector<2x8x8xf32> to vector<16x8xf32>
    %c3_140 = arith.constant 3 : index
    %c0_141 = arith.constant 0 : index
    %c0_142 = arith.constant 0 : index
    %336 = vector.load %arg77[%c3_140, %c0_141, %c0_142] : memref<4x8x32xf32, #tpu.memory_space<vmem>>, vector<1x8x32xf32>
    %337 = vector.shape_cast %336 : vector<1x8x32xf32> to vector<8x32xf32>
    %cst_143 = arith.constant dense<0.000000e+00> : vector<16x32xf32>
    %338 = tpu.matmul %335, %337, %cst_143 {dimension_numbers = #tpu.dot_dimension_numbers<[1], [0], [0], [1], [0, 0, 1, 1], [], []>} : vector<16x8xf32>, vector<8x32xf32>, vector<16x32xf32> -> vector<16x32xf32>
    %339 = arith.addf %313, %338 : vector<16x32xf32>
    %c0_144 = arith.constant 0 : index
    %c0_145 = arith.constant 0 : index
    %340 = vector.load %arg73[%c0_144, %c0_145] : memref<1x32xf32, #tpu.memory_space<vmem>>, vector<1x32xf32>
    %341 = vector.broadcast %340 : vector<1x32xf32> to vector<16x32xf32>
    %342 = arith.addf %339, %341 : vector<16x32xf32>
    %343 = arith.addf %192, %342 : vector<16x32xf32>
    %c0_146 = arith.constant 0 : index
    %c0_147 = arith.constant 0 : index
    %344 = vector.load %arg86[%c0_146, %c0_147] : memref<1x32xf32, #tpu.memory_space<vmem>>, vector<1x32xf32>
    %c0_148 = arith.constant 0 : index
    %c0_149 = arith.constant 0 : index
    %345 = vector.load %arg87[%c0_148, %c0_149] : memref<1x32xf32, #tpu.memory_space<vmem>>, vector<1x32xf32>
    %cst_150 = arith.constant dense<0.000000e+00> : vector<16xf32>
    %346 = vector.multi_reduction <add>, %343, %cst_150 [1] : vector<16x32xf32> to vector<16xf32>
    %347 = vector.shape_cast %346 : vector<16xf32> to vector<16x1xf32>
    %cst_151 = arith.constant 3.200000e+01 : f32
    %348 = vector.broadcast %cst_151 : f32 to vector<16x1xf32>
    %349 = arith.divf %347, %348 : vector<16x1xf32>
    %350 = vector.broadcast %349 : vector<16x1xf32> to vector<16x32xf32>
    %351 = arith.subf %343, %350 : vector<16x32xf32>
    %352 = arith.mulf %351, %351 : vector<16x32xf32>
    %cst_152 = arith.constant dense<0.000000e+00> : vector<16xf32>
    %353 = vector.multi_reduction <add>, %352, %cst_152 [1] : vector<16x32xf32> to vector<16xf32>
    %354 = vector.shape_cast %353 : vector<16xf32> to vector<16x1xf32>
    %cst_153 = arith.constant 0.0322580636 : f32
    %355 = vector.broadcast %cst_153 : f32 to vector<16x1xf32>
    %356 = arith.mulf %354, %355 : vector<16x1xf32>
    %357 = math.sqrt %356 : vector<16x1xf32>
    %cst_154 = arith.constant 9.99999997E-7 : f32
    %358 = vector.broadcast %cst_154 : f32 to vector<16x1xf32>
    %359 = arith.addf %357, %358 : vector<16x1xf32>
    %360 = tpu.reciprocal %359 {approx = true} : vector<16x1xf32> -> vector<16x1xf32>
    %361 = vector.broadcast %349 : vector<16x1xf32> to vector<16x32xf32>
    %362 = arith.subf %343, %361 : vector<16x32xf32>
    %363 = vector.broadcast %344 : vector<1x32xf32> to vector<16x32xf32>
    %364 = arith.mulf %363, %362 : vector<16x32xf32>
    %365 = vector.broadcast %360 : vector<16x1xf32> to vector<16x32xf32>
    %366 = arith.mulf %364, %365 : vector<16x32xf32>
    %367 = vector.broadcast %345 : vector<1x32xf32> to vector<16x32xf32>
    %368 = arith.addf %366, %367 : vector<16x32xf32>
    %369 = arith.truncf %368 : vector<16x32xf32> to vector<16x32xbf16>
    %c0_155 = arith.constant 0 : index
    %c0_156 = arith.constant 0 : index
    %370 = vector.load %arg82[%c0_155, %c0_156] : memref<32x64xbf16, #tpu.memory_space<vmem>>, vector<32x64xbf16>
    %cst_157 = arith.constant dense<0.000000e+00> : vector<16x64xf32>
    %371 = tpu.matmul %369, %370, %cst_157 {dimension_numbers = #tpu.dot_dimension_numbers<[1], [0], [0], [1], [0, 0, 1, 1], [], []>} : vector<16x32xbf16>, vector<32x64xbf16>, vector<16x64xf32> -> vector<16x64xf32>
    %c0_158 = arith.constant 0 : index
    %c0_159 = arith.constant 0 : index
    %372 = vector.load %arg80[%c0_158, %c0_159] : memref<1x64xf32, #tpu.memory_space<vmem>>, vector<1x64xf32>
    %373 = vector.broadcast %372 : vector<1x64xf32> to vector<16x64xf32>
    %374 = arith.addf %371, %373 : vector<16x64xf32>
    %cst_160 = arith.constant 0.000000e+00 : f32
    %375 = vector.broadcast %cst_160 : f32 to vector<16x64xf32>
    %376 = arith.maximumf %374, %375 : vector<16x64xf32>
    %377 = arith.truncf %376 : vector<16x64xf32> to vector<16x64xbf16>
    %c0_161 = arith.constant 0 : index
    %c0_162 = arith.constant 0 : index
    %378 = vector.load %arg83[%c0_161, %c0_162] : memref<64x32xbf16, #tpu.memory_space<vmem>>, vector<64x32xbf16>
    %cst_163 = arith.constant dense<0.000000e+00> : vector<16x32xf32>
    %379 = tpu.matmul %377, %378, %cst_163 {dimension_numbers = #tpu.dot_dimension_numbers<[1], [0], [0], [1], [0, 0, 1, 1], [], []>} : vector<16x64xbf16>, vector<64x32xbf16>, vector<16x32xf32> -> vector<16x32xf32>
    %c0_164 = arith.constant 0 : index
    %c0_165 = arith.constant 0 : index
    %380 = vector.load %arg81[%c0_164, %c0_165] : memref<1x32xf32, #tpu.memory_space<vmem>>, vector<1x32xf32>
    %381 = vector.broadcast %380 : vector<1x32xf32> to vector<16x32xf32>
    %382 = arith.addf %379, %381 : vector<16x32xf32>
    %383 = arith.addf %343, %382 : vector<16x32xf32>
    %c0_166 = arith.constant 0 : index
    %c0_167 = arith.constant 0 : index
    %384 = vector.load %arg88[%c0_166, %c0_167] : memref<1x32xf32, #tpu.memory_space<vmem>>, vector<1x32xf32>
    %c0_168 = arith.constant 0 : index
    %c0_169 = arith.constant 0 : index
    %385 = vector.load %arg89[%c0_168, %c0_169] : memref<1x32xf32, #tpu.memory_space<vmem>>, vector<1x32xf32>
    %cst_170 = arith.constant dense<0.000000e+00> : vector<16xf32>
    %386 = vector.multi_reduction <add>, %383, %cst_170 [1] : vector<16x32xf32> to vector<16xf32>
    %387 = vector.shape_cast %386 : vector<16xf32> to vector<16x1xf32>
    %cst_171 = arith.constant 3.200000e+01 : f32
    %388 = vector.broadcast %cst_171 : f32 to vector<16x1xf32>
    %389 = arith.divf %387, %388 : vector<16x1xf32>
    %390 = vector.broadcast %389 : vector<16x1xf32> to vector<16x32xf32>
    %391 = arith.subf %383, %390 : vector<16x32xf32>
    %392 = arith.mulf %391, %391 : vector<16x32xf32>
    %cst_172 = arith.constant dense<0.000000e+00> : vector<16xf32>
    %393 = vector.multi_reduction <add>, %392, %cst_172 [1] : vector<16x32xf32> to vector<16xf32>
    %394 = vector.shape_cast %393 : vector<16xf32> to vector<16x1xf32>
    %cst_173 = arith.constant 0.0322580636 : f32
    %395 = vector.broadcast %cst_173 : f32 to vector<16x1xf32>
    %396 = arith.mulf %394, %395 : vector<16x1xf32>
    %397 = math.sqrt %396 : vector<16x1xf32>
    %cst_174 = arith.constant 9.99999997E-7 : f32
    %398 = vector.broadcast %cst_174 : f32 to vector<16x1xf32>
    %399 = arith.addf %397, %398 : vector<16x1xf32>
    %400 = tpu.reciprocal %399 {approx = true} : vector<16x1xf32> -> vector<16x1xf32>
    %401 = vector.broadcast %389 : vector<16x1xf32> to vector<16x32xf32>
    %402 = arith.subf %383, %401 : vector<16x32xf32>
    %403 = vector.broadcast %384 : vector<1x32xf32> to vector<16x32xf32>
    %404 = arith.mulf %403, %402 : vector<16x32xf32>
    %405 = vector.broadcast %400 : vector<16x1xf32> to vector<16x32xf32>
    %406 = arith.mulf %404, %405 : vector<16x32xf32>
    %407 = vector.broadcast %385 : vector<1x32xf32> to vector<16x32xf32>
    %408 = arith.addf %406, %407 : vector<16x32xf32>
    %c0_175 = arith.constant 0 : index
    %c0_176 = arith.constant 0 : index
    %409 = vector.load %arg94[%c0_175, %c0_176] : memref<16x32xf32, #tpu.memory_space<vmem>>, vector<16x32xf32>
    %c0_177 = arith.constant 0 : index
    %c0_178 = arith.constant 0 : index
    %c0_179 = arith.constant 0 : index
    %410 = vector.load %arg92[%c0_177, %c0_178, %c0_179] : memref<2x8x8xf32, #tpu.memory_space<vmem>>, vector<2x8x8xf32>
    %c0_180 = arith.constant 0 : index
    %c0_181 = arith.constant 0 : index
    %c0_182 = arith.constant 0 : index
    %411 = vector.load %arg0[%c0_180, %c0_181, %c0_182] : memref<2x8x8xf32, #tpu.memory_space<vmem>>, vector<2x8x8xf32>
    %c0_183 = arith.constant 0 : index
    %c0_184 = arith.constant 0 : index
    %412 = vector.load %arg6[%c0_183, %c0_184] : memref<1x32xf32, #tpu.memory_space<vmem>>, vector<1x32xf32>
    %c0_185 = arith.constant 0 : index
    %c0_186 = arith.constant 0 : index
    %413 = vector.load %arg7[%c0_185, %c0_186] : memref<1x32xf32, #tpu.memory_space<vmem>>, vector<1x32xf32>
    %cst_187 = arith.constant dense<0.000000e+00> : vector<16xf32>
    %414 = vector.multi_reduction <add>, %409, %cst_187 [1] : vector<16x32xf32> to vector<16xf32>
    %415 = vector.shape_cast %414 : vector<16xf32> to vector<16x1xf32>
    %cst_188 = arith.constant 3.200000e+01 : f32
    %416 = vector.broadcast %cst_188 : f32 to vector<16x1xf32>
    %417 = arith.divf %415, %416 : vector<16x1xf32>
    %418 = vector.broadcast %417 : vector<16x1xf32> to vector<16x32xf32>
    %419 = arith.subf %409, %418 : vector<16x32xf32>
    %420 = arith.mulf %419, %419 : vector<16x32xf32>
    %cst_189 = arith.constant dense<0.000000e+00> : vector<16xf32>
    %421 = vector.multi_reduction <add>, %420, %cst_189 [1] : vector<16x32xf32> to vector<16xf32>
    %422 = vector.shape_cast %421 : vector<16xf32> to vector<16x1xf32>
    %cst_190 = arith.constant 0.0322580636 : f32
    %423 = vector.broadcast %cst_190 : f32 to vector<16x1xf32>
    %424 = arith.mulf %422, %423 : vector<16x1xf32>
    %425 = math.sqrt %424 : vector<16x1xf32>
    %cst_191 = arith.constant 9.99999997E-7 : f32
    %426 = vector.broadcast %cst_191 : f32 to vector<16x1xf32>
    %427 = arith.addf %425, %426 : vector<16x1xf32>
    %428 = tpu.reciprocal %427 {approx = true} : vector<16x1xf32> -> vector<16x1xf32>
    %429 = vector.broadcast %417 : vector<16x1xf32> to vector<16x32xf32>
    %430 = arith.subf %409, %429 : vector<16x32xf32>
    %431 = vector.broadcast %412 : vector<1x32xf32> to vector<16x32xf32>
    %432 = arith.mulf %431, %430 : vector<16x32xf32>
    %433 = vector.broadcast %428 : vector<16x1xf32> to vector<16x32xf32>
    %434 = arith.mulf %432, %433 : vector<16x32xf32>
    %435 = vector.broadcast %413 : vector<1x32xf32> to vector<16x32xf32>
    %436 = arith.addf %434, %435 : vector<16x32xf32>
    %437 = arith.truncf %436 : vector<16x32xf32> to vector<16x32xbf16>
    %438 = arith.truncf %436 : vector<16x32xf32> to vector<16x32xbf16>
    %c0_192 = arith.constant 0 : index
    %c0_193 = arith.constant 0 : index
    %439 = vector.load %arg18[%c0_192, %c0_193] : memref<32x32xbf16, #tpu.memory_space<vmem>>, vector<32x32xbf16>
    %cst_194 = arith.constant dense<0.000000e+00> : vector<16x32xf32>
    %440 = tpu.matmul %437, %439, %cst_194 {dimension_numbers = #tpu.dot_dimension_numbers<[1], [0], [0], [1], [0, 0, 1, 1], [], []>} : vector<16x32xbf16>, vector<32x32xbf16>, vector<16x32xf32> -> vector<16x32xf32>
    %c0_195 = arith.constant 0 : index
    %c0_196 = arith.constant 0 : index
    %441 = vector.load %arg14[%c0_195, %c0_196] : memref<1x32xf32, #tpu.memory_space<vmem>>, vector<1x32xf32>
    %442 = vector.broadcast %441 : vector<1x32xf32> to vector<16x32xf32>
    %443 = arith.addf %440, %442 : vector<16x32xf32>
    %c0_197 = arith.constant 0 : index
    %c0_198 = arith.constant 0 : index
    %444 = vector.load %arg16[%c0_197, %c0_198] : memref<32x32xbf16, #tpu.memory_space<vmem>>, vector<32x32xbf16>
    %cst_199 = arith.constant dense<0.000000e+00> : vector<16x32xf32>
    %445 = tpu.matmul %438, %444, %cst_199 {dimension_numbers = #tpu.dot_dimension_numbers<[1], [0], [0], [1], [0, 0, 1, 1], [], []>} : vector<16x32xbf16>, vector<32x32xbf16>, vector<16x32xf32> -> vector<16x32xf32>
    %c0_200 = arith.constant 0 : index
    %c0_201 = arith.constant 0 : index
    %446 = vector.load %arg12[%c0_200, %c0_201] : memref<1x32xf32, #tpu.memory_space<vmem>>, vector<1x32xf32>
    %447 = vector.broadcast %446 : vector<1x32xf32> to vector<16x32xf32>
    %448 = arith.addf %445, %447 : vector<16x32xf32>
    %c0_202 = arith.constant 0 : index
    %c0_203 = arith.constant 0 : index
    %449 = vector.load %arg19[%c0_202, %c0_203] : memref<32x32xbf16, #tpu.memory_space<vmem>>, vector<32x32xbf16>
    %cst_204 = arith.constant dense<0.000000e+00> : vector<16x32xf32>
    %450 = tpu.matmul %438, %449, %cst_204 {dimension_numbers = #tpu.dot_dimension_numbers<[1], [0], [0], [1], [0, 0, 1, 1], [], []>} : vector<16x32xbf16>, vector<32x32xbf16>, vector<16x32xf32> -> vector<16x32xf32>
    %c0_205 = arith.constant 0 : index
    %c0_206 = arith.constant 0 : index
    %451 = vector.load %arg15[%c0_205, %c0_206] : memref<1x32xf32, #tpu.memory_space<vmem>>, vector<1x32xf32>
    %452 = vector.broadcast %451 : vector<1x32xf32> to vector<16x32xf32>
    %453 = arith.addf %450, %452 : vector<16x32xf32>
    %cst_207 = arith.constant 0.000000e+00 : f32
    %454 = vector.broadcast %cst_207 : f32 to vector<16x32xf32>
    %455 = vector.extract_strided_slice %443 {offsets = [0, 0], sizes = [16, 8], strides = [1, 1]} : vector<16x32xf32> to vector<16x8xf32>
    %456 = vector.shape_cast %455 : vector<16x8xf32> to vector<2x8x8xf32>
    %457 = vector.extract_strided_slice %448 {offsets = [0, 0], sizes = [16, 8], strides = [1, 1]} : vector<16x32xf32> to vector<16x8xf32>
    %458 = vector.shape_cast %457 : vector<16x8xf32> to vector<2x8x8xf32>
    %459 = vector.extract_strided_slice %453 {offsets = [0, 0], sizes = [16, 8], strides = [1, 1]} : vector<16x32xf32> to vector<16x8xf32>
    %460 = vector.shape_cast %459 : vector<16x8xf32> to vector<2x8x8xf32>
    "tpu.trace_start"() <{level = 10 : i32, message = "bqd,bkd->bqk"}> : () -> ()
    %cst_208 = arith.constant dense<0.000000e+00> : vector<2x8x8xf32>
    %461 = tpu.matmul %456, %458, %cst_208 {dimension_numbers = #tpu.dot_dimension_numbers<[2], [2], [1], [1], [0, 0, 0, 1, 1, 1], [0], [0]>} : vector<2x8x8xf32>, vector<2x8x8xf32>, vector<2x8x8xf32> -> vector<2x8x8xf32>
    "tpu.trace_stop"() : () -> ()
    %cst_209 = arith.constant 0.353553385 : f32
    %462 = vector.broadcast %cst_209 : f32 to vector<2x8x8xf32>
    %463 = arith.mulf %461, %462 : vector<2x8x8xf32>
    %464 = arith.addf %463, %410 : vector<2x8x8xf32>
    %cst_210 = arith.constant dense<0xFF800000> : vector<2x8xf32>
    %465 = vector.multi_reduction <maximumf>, %464, %cst_210 [2] : vector<2x8x8xf32> to vector<2x8xf32>
    %466 = vector.shape_cast %465 : vector<2x8xf32> to vector<2x8x1xf32>
    %467 = vector.broadcast %466 : vector<2x8x1xf32> to vector<2x8x8xf32>
    %468 = arith.subf %464, %467 : vector<2x8x8xf32>
    %469 = math.exp %468 : vector<2x8x8xf32>
    %cst_211 = arith.constant dense<0.000000e+00> : vector<2x8xf32>
    %470 = vector.multi_reduction <add>, %469, %cst_211 [2] : vector<2x8x8xf32> to vector<2x8xf32>
    %471 = vector.shape_cast %470 : vector<2x8xf32> to vector<2x8x1xf32>
    %472 = tpu.reciprocal %471 {approx = true} : vector<2x8x1xf32> -> vector<2x8x1xf32>
    %473 = vector.broadcast %472 : vector<2x8x1xf32> to vector<2x8x8xf32>
    %474 = arith.mulf %469, %473 : vector<2x8x8xf32>
    "tpu.trace_start"() <{level = 10 : i32, message = "bqk,bkd->bqd"}> : () -> ()
    %cst_212 = arith.constant dense<0.000000e+00> : vector<2x8x8xf32>
    %475 = tpu.matmul %474, %460, %cst_212 {dimension_numbers = #tpu.dot_dimension_numbers<[2], [1], [1], [2], [0, 0, 0, 1, 1, 2], [0], [0]>} : vector<2x8x8xf32>, vector<2x8x8xf32>, vector<2x8x8xf32> -> vector<2x8x8xf32>
    "tpu.trace_stop"() : () -> ()
    %476 = vector.shape_cast %475 : vector<2x8x8xf32> to vector<16x8xf32>
    %c0_213 = arith.constant 0 : index
    %c0_214 = arith.constant 0 : index
    %c0_215 = arith.constant 0 : index
    %477 = vector.load %arg17[%c0_213, %c0_214, %c0_215] : memref<4x8x32xf32, #tpu.memory_space<vmem>>, vector<1x8x32xf32>
    %478 = vector.shape_cast %477 : vector<1x8x32xf32> to vector<8x32xf32>
    %cst_216 = arith.constant dense<0.000000e+00> : vector<16x32xf32>
    %479 = tpu.matmul %476, %478, %cst_216 {dimension_numbers = #tpu.dot_dimension_numbers<[1], [0], [0], [1], [0, 0, 1, 1], [], []>} : vector<16x8xf32>, vector<8x32xf32>, vector<16x32xf32> -> vector<16x32xf32>
    %480 = arith.addf %454, %479 : vector<16x32xf32>
    %481 = vector.extract_strided_slice %443 {offsets = [0, 8], sizes = [16, 8], strides = [1, 1]} : vector<16x32xf32> to vector<16x8xf32>
    %482 = vector.shape_cast %481 : vector<16x8xf32> to vector<2x8x8xf32>
    %483 = vector.extract_strided_slice %448 {offsets = [0, 8], sizes = [16, 8], strides = [1, 1]} : vector<16x32xf32> to vector<16x8xf32>
    %484 = vector.shape_cast %483 : vector<16x8xf32> to vector<2x8x8xf32>
    %485 = vector.extract_strided_slice %453 {offsets = [0, 8], sizes = [16, 8], strides = [1, 1]} : vector<16x32xf32> to vector<16x8xf32>
    %486 = vector.shape_cast %485 : vector<16x8xf32> to vector<2x8x8xf32>
    "tpu.trace_start"() <{level = 10 : i32, message = "bqd,bkd->bqk"}> : () -> ()
    %cst_217 = arith.constant dense<0.000000e+00> : vector<2x8x8xf32>
    %487 = tpu.matmul %482, %484, %cst_217 {dimension_numbers = #tpu.dot_dimension_numbers<[2], [2], [1], [1], [0, 0, 0, 1, 1, 1], [0], [0]>} : vector<2x8x8xf32>, vector<2x8x8xf32>, vector<2x8x8xf32> -> vector<2x8x8xf32>
    "tpu.trace_stop"() : () -> ()
    %cst_218 = arith.constant 0.353553385 : f32
    %488 = vector.broadcast %cst_218 : f32 to vector<2x8x8xf32>
    %489 = arith.mulf %487, %488 : vector<2x8x8xf32>
    %490 = arith.addf %489, %410 : vector<2x8x8xf32>
    %cst_219 = arith.constant dense<0xFF800000> : vector<2x8xf32>
    %491 = vector.multi_reduction <maximumf>, %490, %cst_219 [2] : vector<2x8x8xf32> to vector<2x8xf32>
    %492 = vector.shape_cast %491 : vector<2x8xf32> to vector<2x8x1xf32>
    %493 = vector.broadcast %492 : vector<2x8x1xf32> to vector<2x8x8xf32>
    %494 = arith.subf %490, %493 : vector<2x8x8xf32>
    %495 = math.exp %494 : vector<2x8x8xf32>
    %cst_220 = arith.constant dense<0.000000e+00> : vector<2x8xf32>
    %496 = vector.multi_reduction <add>, %495, %cst_220 [2] : vector<2x8x8xf32> to vector<2x8xf32>
    %497 = vector.shape_cast %496 : vector<2x8xf32> to vector<2x8x1xf32>
    %498 = tpu.reciprocal %497 {approx = true} : vector<2x8x1xf32> -> vector<2x8x1xf32>
    %499 = vector.broadcast %498 : vector<2x8x1xf32> to vector<2x8x8xf32>
    %500 = arith.mulf %495, %499 : vector<2x8x8xf32>
    "tpu.trace_start"() <{level = 10 : i32, message = "bqk,bkd->bqd"}> : () -> ()
    %cst_221 = arith.constant dense<0.000000e+00> : vector<2x8x8xf32>
    %501 = tpu.matmul %500, %486, %cst_221 {dimension_numbers = #tpu.dot_dimension_numbers<[2], [1], [1], [2], [0, 0, 0, 1, 1, 2], [0], [0]>} : vector<2x8x8xf32>, vector<2x8x8xf32>, vector<2x8x8xf32> -> vector<2x8x8xf32>
    "tpu.trace_stop"() : () -> ()
    %502 = vector.shape_cast %501 : vector<2x8x8xf32> to vector<16x8xf32>
    %c1_222 = arith.constant 1 : index
    %c0_223 = arith.constant 0 : index
    %c0_224 = arith.constant 0 : index
    %503 = vector.load %arg17[%c1_222, %c0_223, %c0_224] : memref<4x8x32xf32, #tpu.memory_space<vmem>>, vector<1x8x32xf32>
    %504 = vector.shape_cast %503 : vector<1x8x32xf32> to vector<8x32xf32>
    %cst_225 = arith.constant dense<0.000000e+00> : vector<16x32xf32>
    %505 = tpu.matmul %502, %504, %cst_225 {dimension_numbers = #tpu.dot_dimension_numbers<[1], [0], [0], [1], [0, 0, 1, 1], [], []>} : vector<16x8xf32>, vector<8x32xf32>, vector<16x32xf32> -> vector<16x32xf32>
    %506 = arith.addf %480, %505 : vector<16x32xf32>
    %507 = vector.extract_strided_slice %443 {offsets = [0, 16], sizes = [16, 8], strides = [1, 1]} : vector<16x32xf32> to vector<16x8xf32>
    %508 = vector.shape_cast %507 : vector<16x8xf32> to vector<2x8x8xf32>
    %509 = vector.extract_strided_slice %448 {offsets = [0, 16], sizes = [16, 8], strides = [1, 1]} : vector<16x32xf32> to vector<16x8xf32>
    %510 = vector.shape_cast %509 : vector<16x8xf32> to vector<2x8x8xf32>
    %511 = vector.extract_strided_slice %453 {offsets = [0, 16], sizes = [16, 8], strides = [1, 1]} : vector<16x32xf32> to vector<16x8xf32>
    %512 = vector.shape_cast %511 : vector<16x8xf32> to vector<2x8x8xf32>
    "tpu.trace_start"() <{level = 10 : i32, message = "bqd,bkd->bqk"}> : () -> ()
    %cst_226 = arith.constant dense<0.000000e+00> : vector<2x8x8xf32>
    %513 = tpu.matmul %508, %510, %cst_226 {dimension_numbers = #tpu.dot_dimension_numbers<[2], [2], [1], [1], [0, 0, 0, 1, 1, 1], [0], [0]>} : vector<2x8x8xf32>, vector<2x8x8xf32>, vector<2x8x8xf32> -> vector<2x8x8xf32>
    "tpu.trace_stop"() : () -> ()
    %cst_227 = arith.constant 0.353553385 : f32
    %514 = vector.broadcast %cst_227 : f32 to vector<2x8x8xf32>
    %515 = arith.mulf %513, %514 : vector<2x8x8xf32>
    %516 = arith.addf %515, %410 : vector<2x8x8xf32>
    %cst_228 = arith.constant dense<0xFF800000> : vector<2x8xf32>
    %517 = vector.multi_reduction <maximumf>, %516, %cst_228 [2] : vector<2x8x8xf32> to vector<2x8xf32>
    %518 = vector.shape_cast %517 : vector<2x8xf32> to vector<2x8x1xf32>
    %519 = vector.broadcast %518 : vector<2x8x1xf32> to vector<2x8x8xf32>
    %520 = arith.subf %516, %519 : vector<2x8x8xf32>
    %521 = math.exp %520 : vector<2x8x8xf32>
    %cst_229 = arith.constant dense<0.000000e+00> : vector<2x8xf32>
    %522 = vector.multi_reduction <add>, %521, %cst_229 [2] : vector<2x8x8xf32> to vector<2x8xf32>
    %523 = vector.shape_cast %522 : vector<2x8xf32> to vector<2x8x1xf32>
    %524 = tpu.reciprocal %523 {approx = true} : vector<2x8x1xf32> -> vector<2x8x1xf32>
    %525 = vector.broadcast %524 : vector<2x8x1xf32> to vector<2x8x8xf32>
    %526 = arith.mulf %521, %525 : vector<2x8x8xf32>
    "tpu.trace_start"() <{level = 10 : i32, message = "bqk,bkd->bqd"}> : () -> ()
    %cst_230 = arith.constant dense<0.000000e+00> : vector<2x8x8xf32>
    %527 = tpu.matmul %526, %512, %cst_230 {dimension_numbers = #tpu.dot_dimension_numbers<[2], [1], [1], [2], [0, 0, 0, 1, 1, 2], [0], [0]>} : vector<2x8x8xf32>, vector<2x8x8xf32>, vector<2x8x8xf32> -> vector<2x8x8xf32>
    "tpu.trace_stop"() : () -> ()
    %528 = vector.shape_cast %527 : vector<2x8x8xf32> to vector<16x8xf32>
    %c2_231 = arith.constant 2 : index
    %c0_232 = arith.constant 0 : index
    %c0_233 = arith.constant 0 : index
    %529 = vector.load %arg17[%c2_231, %c0_232, %c0_233] : memref<4x8x32xf32, #tpu.memory_space<vmem>>, vector<1x8x32xf32>
    %530 = vector.shape_cast %529 : vector<1x8x32xf32> to vector<8x32xf32>
    %cst_234 = arith.constant dense<0.000000e+00> : vector<16x32xf32>
    %531 = tpu.matmul %528, %530, %cst_234 {dimension_numbers = #tpu.dot_dimension_numbers<[1], [0], [0], [1], [0, 0, 1, 1], [], []>} : vector<16x8xf32>, vector<8x32xf32>, vector<16x32xf32> -> vector<16x32xf32>
    %532 = arith.addf %506, %531 : vector<16x32xf32>
    %533 = vector.extract_strided_slice %443 {offsets = [0, 24], sizes = [16, 8], strides = [1, 1]} : vector<16x32xf32> to vector<16x8xf32>
    %534 = vector.shape_cast %533 : vector<16x8xf32> to vector<2x8x8xf32>
    %535 = vector.extract_strided_slice %448 {offsets = [0, 24], sizes = [16, 8], strides = [1, 1]} : vector<16x32xf32> to vector<16x8xf32>
    %536 = vector.shape_cast %535 : vector<16x8xf32> to vector<2x8x8xf32>
    %537 = vector.extract_strided_slice %453 {offsets = [0, 24], sizes = [16, 8], strides = [1, 1]} : vector<16x32xf32> to vector<16x8xf32>
    %538 = vector.shape_cast %537 : vector<16x8xf32> to vector<2x8x8xf32>
    "tpu.trace_start"() <{level = 10 : i32, message = "bqd,bkd->bqk"}> : () -> ()
    %cst_235 = arith.constant dense<0.000000e+00> : vector<2x8x8xf32>
    %539 = tpu.matmul %534, %536, %cst_235 {dimension_numbers = #tpu.dot_dimension_numbers<[2], [2], [1], [1], [0, 0, 0, 1, 1, 1], [0], [0]>} : vector<2x8x8xf32>, vector<2x8x8xf32>, vector<2x8x8xf32> -> vector<2x8x8xf32>
    "tpu.trace_stop"() : () -> ()
    %cst_236 = arith.constant 0.353553385 : f32
    %540 = vector.broadcast %cst_236 : f32 to vector<2x8x8xf32>
    %541 = arith.mulf %539, %540 : vector<2x8x8xf32>
    %542 = arith.addf %541, %410 : vector<2x8x8xf32>
    %cst_237 = arith.constant dense<0xFF800000> : vector<2x8xf32>
    %543 = vector.multi_reduction <maximumf>, %542, %cst_237 [2] : vector<2x8x8xf32> to vector<2x8xf32>
    %544 = vector.shape_cast %543 : vector<2x8xf32> to vector<2x8x1xf32>
    %545 = vector.broadcast %544 : vector<2x8x1xf32> to vector<2x8x8xf32>
    %546 = arith.subf %542, %545 : vector<2x8x8xf32>
    %547 = math.exp %546 : vector<2x8x8xf32>
    %cst_238 = arith.constant dense<0.000000e+00> : vector<2x8xf32>
    %548 = vector.multi_reduction <add>, %547, %cst_238 [2] : vector<2x8x8xf32> to vector<2x8xf32>
    %549 = vector.shape_cast %548 : vector<2x8xf32> to vector<2x8x1xf32>
    %550 = tpu.reciprocal %549 {approx = true} : vector<2x8x1xf32> -> vector<2x8x1xf32>
    %551 = vector.broadcast %550 : vector<2x8x1xf32> to vector<2x8x8xf32>
    %552 = arith.mulf %547, %551 : vector<2x8x8xf32>
    "tpu.trace_start"() <{level = 10 : i32, message = "bqk,bkd->bqd"}> : () -> ()
    %cst_239 = arith.constant dense<0.000000e+00> : vector<2x8x8xf32>
    %553 = tpu.matmul %552, %538, %cst_239 {dimension_numbers = #tpu.dot_dimension_numbers<[2], [1], [1], [2], [0, 0, 0, 1, 1, 2], [0], [0]>} : vector<2x8x8xf32>, vector<2x8x8xf32>, vector<2x8x8xf32> -> vector<2x8x8xf32>
    "tpu.trace_stop"() : () -> ()
    %554 = vector.shape_cast %553 : vector<2x8x8xf32> to vector<16x8xf32>
    %c3_240 = arith.constant 3 : index
    %c0_241 = arith.constant 0 : index
    %c0_242 = arith.constant 0 : index
    %555 = vector.load %arg17[%c3_240, %c0_241, %c0_242] : memref<4x8x32xf32, #tpu.memory_space<vmem>>, vector<1x8x32xf32>
    %556 = vector.shape_cast %555 : vector<1x8x32xf32> to vector<8x32xf32>
    %cst_243 = arith.constant dense<0.000000e+00> : vector<16x32xf32>
    %557 = tpu.matmul %554, %556, %cst_243 {dimension_numbers = #tpu.dot_dimension_numbers<[1], [0], [0], [1], [0, 0, 1, 1], [], []>} : vector<16x8xf32>, vector<8x32xf32>, vector<16x32xf32> -> vector<16x32xf32>
    %558 = arith.addf %532, %557 : vector<16x32xf32>
    %c0_244 = arith.constant 0 : index
    %c0_245 = arith.constant 0 : index
    %559 = vector.load %arg13[%c0_244, %c0_245] : memref<1x32xf32, #tpu.memory_space<vmem>>, vector<1x32xf32>
    %560 = vector.broadcast %559 : vector<1x32xf32> to vector<16x32xf32>
    %561 = arith.addf %558, %560 : vector<16x32xf32>
    %562 = arith.addf %409, %561 : vector<16x32xf32>
    %c0_246 = arith.constant 0 : index
    %c0_247 = arith.constant 0 : index
    %563 = vector.load %arg8[%c0_246, %c0_247] : memref<1x32xf32, #tpu.memory_space<vmem>>, vector<1x32xf32>
    %c0_248 = arith.constant 0 : index
    %c0_249 = arith.constant 0 : index
    %564 = vector.load %arg9[%c0_248, %c0_249] : memref<1x32xf32, #tpu.memory_space<vmem>>, vector<1x32xf32>
    %cst_250 = arith.constant dense<0.000000e+00> : vector<16xf32>
    %565 = vector.multi_reduction <add>, %562, %cst_250 [1] : vector<16x32xf32> to vector<16xf32>
    %566 = vector.shape_cast %565 : vector<16xf32> to vector<16x1xf32>
    %cst_251 = arith.constant 3.200000e+01 : f32
    %567 = vector.broadcast %cst_251 : f32 to vector<16x1xf32>
    %568 = arith.divf %566, %567 : vector<16x1xf32>
    %569 = vector.broadcast %568 : vector<16x1xf32> to vector<16x32xf32>
    %570 = arith.subf %562, %569 : vector<16x32xf32>
    %571 = arith.mulf %570, %570 : vector<16x32xf32>
    %cst_252 = arith.constant dense<0.000000e+00> : vector<16xf32>
    %572 = vector.multi_reduction <add>, %571, %cst_252 [1] : vector<16x32xf32> to vector<16xf32>
    %573 = vector.shape_cast %572 : vector<16xf32> to vector<16x1xf32>
    %cst_253 = arith.constant 0.0322580636 : f32
    %574 = vector.broadcast %cst_253 : f32 to vector<16x1xf32>
    %575 = arith.mulf %573, %574 : vector<16x1xf32>
    %576 = math.sqrt %575 : vector<16x1xf32>
    %cst_254 = arith.constant 9.99999997E-7 : f32
    %577 = vector.broadcast %cst_254 : f32 to vector<16x1xf32>
    %578 = arith.addf %576, %577 : vector<16x1xf32>
    %579 = tpu.reciprocal %578 {approx = true} : vector<16x1xf32> -> vector<16x1xf32>
    %580 = vector.broadcast %568 : vector<16x1xf32> to vector<16x32xf32>
    %581 = arith.subf %562, %580 : vector<16x32xf32>
    %582 = vector.broadcast %563 : vector<1x32xf32> to vector<16x32xf32>
    %583 = arith.mulf %582, %581 : vector<16x32xf32>
    %584 = vector.broadcast %579 : vector<16x1xf32> to vector<16x32xf32>
    %585 = arith.mulf %583, %584 : vector<16x32xf32>
    %586 = vector.broadcast %564 : vector<1x32xf32> to vector<16x32xf32>
    %587 = arith.addf %585, %586 : vector<16x32xf32>
    %588 = arith.truncf %587 : vector<16x32xf32> to vector<16x32xbf16>
    %589 = arith.truncf %408 : vector<16x32xf32> to vector<16x32xbf16>
    %c0_255 = arith.constant 0 : index
    %c0_256 = arith.constant 0 : index
    %590 = vector.load %arg26[%c0_255, %c0_256] : memref<32x32xbf16, #tpu.memory_space<vmem>>, vector<32x32xbf16>
    %cst_257 = arith.constant dense<0.000000e+00> : vector<16x32xf32>
    %591 = tpu.matmul %588, %590, %cst_257 {dimension_numbers = #tpu.dot_dimension_numbers<[1], [0], [0], [1], [0, 0, 1, 1], [], []>} : vector<16x32xbf16>, vector<32x32xbf16>, vector<16x32xf32> -> vector<16x32xf32>
    %c0_258 = arith.constant 0 : index
    %c0_259 = arith.constant 0 : index
    %592 = vector.load %arg22[%c0_258, %c0_259] : memref<1x32xf32, #tpu.memory_space<vmem>>, vector<1x32xf32>
    %593 = vector.broadcast %592 : vector<1x32xf32> to vector<16x32xf32>
    %594 = arith.addf %591, %593 : vector<16x32xf32>
    %c0_260 = arith.constant 0 : index
    %c0_261 = arith.constant 0 : index
    %595 = vector.load %arg24[%c0_260, %c0_261] : memref<32x32xbf16, #tpu.memory_space<vmem>>, vector<32x32xbf16>
    %cst_262 = arith.constant dense<0.000000e+00> : vector<16x32xf32>
    %596 = tpu.matmul %589, %595, %cst_262 {dimension_numbers = #tpu.dot_dimension_numbers<[1], [0], [0], [1], [0, 0, 1, 1], [], []>} : vector<16x32xbf16>, vector<32x32xbf16>, vector<16x32xf32> -> vector<16x32xf32>
    %c0_263 = arith.constant 0 : index
    %c0_264 = arith.constant 0 : index
    %597 = vector.load %arg20[%c0_263, %c0_264] : memref<1x32xf32, #tpu.memory_space<vmem>>, vector<1x32xf32>
    %598 = vector.broadcast %597 : vector<1x32xf32> to vector<16x32xf32>
    %599 = arith.addf %596, %598 : vector<16x32xf32>
    %c0_265 = arith.constant 0 : index
    %c0_266 = arith.constant 0 : index
    %600 = vector.load %arg27[%c0_265, %c0_266] : memref<32x32xbf16, #tpu.memory_space<vmem>>, vector<32x32xbf16>
    %cst_267 = arith.constant dense<0.000000e+00> : vector<16x32xf32>
    %601 = tpu.matmul %589, %600, %cst_267 {dimension_numbers = #tpu.dot_dimension_numbers<[1], [0], [0], [1], [0, 0, 1, 1], [], []>} : vector<16x32xbf16>, vector<32x32xbf16>, vector<16x32xf32> -> vector<16x32xf32>
    %c0_268 = arith.constant 0 : index
    %c0_269 = arith.constant 0 : index
    %602 = vector.load %arg23[%c0_268, %c0_269] : memref<1x32xf32, #tpu.memory_space<vmem>>, vector<1x32xf32>
    %603 = vector.broadcast %602 : vector<1x32xf32> to vector<16x32xf32>
    %604 = arith.addf %601, %603 : vector<16x32xf32>
    %cst_270 = arith.constant 0.000000e+00 : f32
    %605 = vector.broadcast %cst_270 : f32 to vector<16x32xf32>
    %606 = vector.extract_strided_slice %594 {offsets = [0, 0], sizes = [16, 8], strides = [1, 1]} : vector<16x32xf32> to vector<16x8xf32>
    %607 = vector.shape_cast %606 : vector<16x8xf32> to vector<2x8x8xf32>
    %608 = vector.extract_strided_slice %599 {offsets = [0, 0], sizes = [16, 8], strides = [1, 1]} : vector<16x32xf32> to vector<16x8xf32>
    %609 = vector.shape_cast %608 : vector<16x8xf32> to vector<2x8x8xf32>
    %610 = vector.extract_strided_slice %604 {offsets = [0, 0], sizes = [16, 8], strides = [1, 1]} : vector<16x32xf32> to vector<16x8xf32>
    %611 = vector.shape_cast %610 : vector<16x8xf32> to vector<2x8x8xf32>
    "tpu.trace_start"() <{level = 10 : i32, message = "bqd,bkd->bqk"}> : () -> ()
    %cst_271 = arith.constant dense<0.000000e+00> : vector<2x8x8xf32>
    %612 = tpu.matmul %607, %609, %cst_271 {dimension_numbers = #tpu.dot_dimension_numbers<[2], [2], [1], [1], [0, 0, 0, 1, 1, 1], [0], [0]>} : vector<2x8x8xf32>, vector<2x8x8xf32>, vector<2x8x8xf32> -> vector<2x8x8xf32>
    "tpu.trace_stop"() : () -> ()
    %cst_272 = arith.constant 0.353553385 : f32
    %613 = vector.broadcast %cst_272 : f32 to vector<2x8x8xf32>
    %614 = arith.mulf %612, %613 : vector<2x8x8xf32>
    %615 = arith.addf %614, %411 : vector<2x8x8xf32>
    %cst_273 = arith.constant dense<0xFF800000> : vector<2x8xf32>
    %616 = vector.multi_reduction <maximumf>, %615, %cst_273 [2] : vector<2x8x8xf32> to vector<2x8xf32>
    %617 = vector.shape_cast %616 : vector<2x8xf32> to vector<2x8x1xf32>
    %618 = vector.broadcast %617 : vector<2x8x1xf32> to vector<2x8x8xf32>
    %619 = arith.subf %615, %618 : vector<2x8x8xf32>
    %620 = math.exp %619 : vector<2x8x8xf32>
    %cst_274 = arith.constant dense<0.000000e+00> : vector<2x8xf32>
    %621 = vector.multi_reduction <add>, %620, %cst_274 [2] : vector<2x8x8xf32> to vector<2x8xf32>
    %622 = vector.shape_cast %621 : vector<2x8xf32> to vector<2x8x1xf32>
    %623 = tpu.reciprocal %622 {approx = true} : vector<2x8x1xf32> -> vector<2x8x1xf32>
    %624 = vector.broadcast %623 : vector<2x8x1xf32> to vector<2x8x8xf32>
    %625 = arith.mulf %620, %624 : vector<2x8x8xf32>
    "tpu.trace_start"() <{level = 10 : i32, message = "bqk,bkd->bqd"}> : () -> ()
    %cst_275 = arith.constant dense<0.000000e+00> : vector<2x8x8xf32>
    %626 = tpu.matmul %625, %611, %cst_275 {dimension_numbers = #tpu.dot_dimension_numbers<[2], [1], [1], [2], [0, 0, 0, 1, 1, 2], [0], [0]>} : vector<2x8x8xf32>, vector<2x8x8xf32>, vector<2x8x8xf32> -> vector<2x8x8xf32>
    "tpu.trace_stop"() : () -> ()
    %627 = vector.shape_cast %626 : vector<2x8x8xf32> to vector<16x8xf32>
    %c0_276 = arith.constant 0 : index
    %c0_277 = arith.constant 0 : index
    %c0_278 = arith.constant 0 : index
    %628 = vector.load %arg25[%c0_276, %c0_277, %c0_278] : memref<4x8x32xf32, #tpu.memory_space<vmem>>, vector<1x8x32xf32>
    %629 = vector.shape_cast %628 : vector<1x8x32xf32> to vector<8x32xf32>
    %cst_279 = arith.constant dense<0.000000e+00> : vector<16x32xf32>
    %630 = tpu.matmul %627, %629, %cst_279 {dimension_numbers = #tpu.dot_dimension_numbers<[1], [0], [0], [1], [0, 0, 1, 1], [], []>} : vector<16x8xf32>, vector<8x32xf32>, vector<16x32xf32> -> vector<16x32xf32>
    %631 = arith.addf %605, %630 : vector<16x32xf32>
    %632 = vector.extract_strided_slice %594 {offsets = [0, 8], sizes = [16, 8], strides = [1, 1]} : vector<16x32xf32> to vector<16x8xf32>
    %633 = vector.shape_cast %632 : vector<16x8xf32> to vector<2x8x8xf32>
    %634 = vector.extract_strided_slice %599 {offsets = [0, 8], sizes = [16, 8], strides = [1, 1]} : vector<16x32xf32> to vector<16x8xf32>
    %635 = vector.shape_cast %634 : vector<16x8xf32> to vector<2x8x8xf32>
    %636 = vector.extract_strided_slice %604 {offsets = [0, 8], sizes = [16, 8], strides = [1, 1]} : vector<16x32xf32> to vector<16x8xf32>
    %637 = vector.shape_cast %636 : vector<16x8xf32> to vector<2x8x8xf32>
    "tpu.trace_start"() <{level = 10 : i32, message = "bqd,bkd->bqk"}> : () -> ()
    %cst_280 = arith.constant dense<0.000000e+00> : vector<2x8x8xf32>
    %638 = tpu.matmul %633, %635, %cst_280 {dimension_numbers = #tpu.dot_dimension_numbers<[2], [2], [1], [1], [0, 0, 0, 1, 1, 1], [0], [0]>} : vector<2x8x8xf32>, vector<2x8x8xf32>, vector<2x8x8xf32> -> vector<2x8x8xf32>
    "tpu.trace_stop"() : () -> ()
    %cst_281 = arith.constant 0.353553385 : f32
    %639 = vector.broadcast %cst_281 : f32 to vector<2x8x8xf32>
    %640 = arith.mulf %638, %639 : vector<2x8x8xf32>
    %641 = arith.addf %640, %411 : vector<2x8x8xf32>
    %cst_282 = arith.constant dense<0xFF800000> : vector<2x8xf32>
    %642 = vector.multi_reduction <maximumf>, %641, %cst_282 [2] : vector<2x8x8xf32> to vector<2x8xf32>
    %643 = vector.shape_cast %642 : vector<2x8xf32> to vector<2x8x1xf32>
    %644 = vector.broadcast %643 : vector<2x8x1xf32> to vector<2x8x8xf32>
    %645 = arith.subf %641, %644 : vector<2x8x8xf32>
    %646 = math.exp %645 : vector<2x8x8xf32>
    %cst_283 = arith.constant dense<0.000000e+00> : vector<2x8xf32>
    %647 = vector.multi_reduction <add>, %646, %cst_283 [2] : vector<2x8x8xf32> to vector<2x8xf32>
    %648 = vector.shape_cast %647 : vector<2x8xf32> to vector<2x8x1xf32>
    %649 = tpu.reciprocal %648 {approx = true} : vector<2x8x1xf32> -> vector<2x8x1xf32>
    %650 = vector.broadcast %649 : vector<2x8x1xf32> to vector<2x8x8xf32>
    %651 = arith.mulf %646, %650 : vector<2x8x8xf32>
    "tpu.trace_start"() <{level = 10 : i32, message = "bqk,bkd->bqd"}> : () -> ()
    %cst_284 = arith.constant dense<0.000000e+00> : vector<2x8x8xf32>
    %652 = tpu.matmul %651, %637, %cst_284 {dimension_numbers = #tpu.dot_dimension_numbers<[2], [1], [1], [2], [0, 0, 0, 1, 1, 2], [0], [0]>} : vector<2x8x8xf32>, vector<2x8x8xf32>, vector<2x8x8xf32> -> vector<2x8x8xf32>
    "tpu.trace_stop"() : () -> ()
    %653 = vector.shape_cast %652 : vector<2x8x8xf32> to vector<16x8xf32>
    %c1_285 = arith.constant 1 : index
    %c0_286 = arith.constant 0 : index
    %c0_287 = arith.constant 0 : index
    %654 = vector.load %arg25[%c1_285, %c0_286, %c0_287] : memref<4x8x32xf32, #tpu.memory_space<vmem>>, vector<1x8x32xf32>
    %655 = vector.shape_cast %654 : vector<1x8x32xf32> to vector<8x32xf32>
    %cst_288 = arith.constant dense<0.000000e+00> : vector<16x32xf32>
    %656 = tpu.matmul %653, %655, %cst_288 {dimension_numbers = #tpu.dot_dimension_numbers<[1], [0], [0], [1], [0, 0, 1, 1], [], []>} : vector<16x8xf32>, vector<8x32xf32>, vector<16x32xf32> -> vector<16x32xf32>
    %657 = arith.addf %631, %656 : vector<16x32xf32>
    %658 = vector.extract_strided_slice %594 {offsets = [0, 16], sizes = [16, 8], strides = [1, 1]} : vector<16x32xf32> to vector<16x8xf32>
    %659 = vector.shape_cast %658 : vector<16x8xf32> to vector<2x8x8xf32>
    %660 = vector.extract_strided_slice %599 {offsets = [0, 16], sizes = [16, 8], strides = [1, 1]} : vector<16x32xf32> to vector<16x8xf32>
    %661 = vector.shape_cast %660 : vector<16x8xf32> to vector<2x8x8xf32>
    %662 = vector.extract_strided_slice %604 {offsets = [0, 16], sizes = [16, 8], strides = [1, 1]} : vector<16x32xf32> to vector<16x8xf32>
    %663 = vector.shape_cast %662 : vector<16x8xf32> to vector<2x8x8xf32>
    "tpu.trace_start"() <{level = 10 : i32, message = "bqd,bkd->bqk"}> : () -> ()
    %cst_289 = arith.constant dense<0.000000e+00> : vector<2x8x8xf32>
    %664 = tpu.matmul %659, %661, %cst_289 {dimension_numbers = #tpu.dot_dimension_numbers<[2], [2], [1], [1], [0, 0, 0, 1, 1, 1], [0], [0]>} : vector<2x8x8xf32>, vector<2x8x8xf32>, vector<2x8x8xf32> -> vector<2x8x8xf32>
    "tpu.trace_stop"() : () -> ()
    %cst_290 = arith.constant 0.353553385 : f32
    %665 = vector.broadcast %cst_290 : f32 to vector<2x8x8xf32>
    %666 = arith.mulf %664, %665 : vector<2x8x8xf32>
    %667 = arith.addf %666, %411 : vector<2x8x8xf32>
    %cst_291 = arith.constant dense<0xFF800000> : vector<2x8xf32>
    %668 = vector.multi_reduction <maximumf>, %667, %cst_291 [2] : vector<2x8x8xf32> to vector<2x8xf32>
    %669 = vector.shape_cast %668 : vector<2x8xf32> to vector<2x8x1xf32>
    %670 = vector.broadcast %669 : vector<2x8x1xf32> to vector<2x8x8xf32>
    %671 = arith.subf %667, %670 : vector<2x8x8xf32>
    %672 = math.exp %671 : vector<2x8x8xf32>
    %cst_292 = arith.constant dense<0.000000e+00> : vector<2x8xf32>
    %673 = vector.multi_reduction <add>, %672, %cst_292 [2] : vector<2x8x8xf32> to vector<2x8xf32>
    %674 = vector.shape_cast %673 : vector<2x8xf32> to vector<2x8x1xf32>
    %675 = tpu.reciprocal %674 {approx = true} : vector<2x8x1xf32> -> vector<2x8x1xf32>
    %676 = vector.broadcast %675 : vector<2x8x1xf32> to vector<2x8x8xf32>
    %677 = arith.mulf %672, %676 : vector<2x8x8xf32>
    "tpu.trace_start"() <{level = 10 : i32, message = "bqk,bkd->bqd"}> : () -> ()
    %cst_293 = arith.constant dense<0.000000e+00> : vector<2x8x8xf32>
    %678 = tpu.matmul %677, %663, %cst_293 {dimension_numbers = #tpu.dot_dimension_numbers<[2], [1], [1], [2], [0, 0, 0, 1, 1, 2], [0], [0]>} : vector<2x8x8xf32>, vector<2x8x8xf32>, vector<2x8x8xf32> -> vector<2x8x8xf32>
    "tpu.trace_stop"() : () -> ()
    %679 = vector.shape_cast %678 : vector<2x8x8xf32> to vector<16x8xf32>
    %c2_294 = arith.constant 2 : index
    %c0_295 = arith.constant 0 : index
    %c0_296 = arith.constant 0 : index
    %680 = vector.load %arg25[%c2_294, %c0_295, %c0_296] : memref<4x8x32xf32, #tpu.memory_space<vmem>>, vector<1x8x32xf32>
    %681 = vector.shape_cast %680 : vector<1x8x32xf32> to vector<8x32xf32>
    %cst_297 = arith.constant dense<0.000000e+00> : vector<16x32xf32>
    %682 = tpu.matmul %679, %681, %cst_297 {dimension_numbers = #tpu.dot_dimension_numbers<[1], [0], [0], [1], [0, 0, 1, 1], [], []>} : vector<16x8xf32>, vector<8x32xf32>, vector<16x32xf32> -> vector<16x32xf32>
    %683 = arith.addf %657, %682 : vector<16x32xf32>
    %684 = vector.extract_strided_slice %594 {offsets = [0, 24], sizes = [16, 8], strides = [1, 1]} : vector<16x32xf32> to vector<16x8xf32>
    %685 = vector.shape_cast %684 : vector<16x8xf32> to vector<2x8x8xf32>
    %686 = vector.extract_strided_slice %599 {offsets = [0, 24], sizes = [16, 8], strides = [1, 1]} : vector<16x32xf32> to vector<16x8xf32>
    %687 = vector.shape_cast %686 : vector<16x8xf32> to vector<2x8x8xf32>
    %688 = vector.extract_strided_slice %604 {offsets = [0, 24], sizes = [16, 8], strides = [1, 1]} : vector<16x32xf32> to vector<16x8xf32>
    %689 = vector.shape_cast %688 : vector<16x8xf32> to vector<2x8x8xf32>
    "tpu.trace_start"() <{level = 10 : i32, message = "bqd,bkd->bqk"}> : () -> ()
    %cst_298 = arith.constant dense<0.000000e+00> : vector<2x8x8xf32>
    %690 = tpu.matmul %685, %687, %cst_298 {dimension_numbers = #tpu.dot_dimension_numbers<[2], [2], [1], [1], [0, 0, 0, 1, 1, 1], [0], [0]>} : vector<2x8x8xf32>, vector<2x8x8xf32>, vector<2x8x8xf32> -> vector<2x8x8xf32>
    "tpu.trace_stop"() : () -> ()
    %cst_299 = arith.constant 0.353553385 : f32
    %691 = vector.broadcast %cst_299 : f32 to vector<2x8x8xf32>
    %692 = arith.mulf %690, %691 : vector<2x8x8xf32>
    %693 = arith.addf %692, %411 : vector<2x8x8xf32>
    %cst_300 = arith.constant dense<0xFF800000> : vector<2x8xf32>
    %694 = vector.multi_reduction <maximumf>, %693, %cst_300 [2] : vector<2x8x8xf32> to vector<2x8xf32>
    %695 = vector.shape_cast %694 : vector<2x8xf32> to vector<2x8x1xf32>
    %696 = vector.broadcast %695 : vector<2x8x1xf32> to vector<2x8x8xf32>
    %697 = arith.subf %693, %696 : vector<2x8x8xf32>
    %698 = math.exp %697 : vector<2x8x8xf32>
    %cst_301 = arith.constant dense<0.000000e+00> : vector<2x8xf32>
    %699 = vector.multi_reduction <add>, %698, %cst_301 [2] : vector<2x8x8xf32> to vector<2x8xf32>
    %700 = vector.shape_cast %699 : vector<2x8xf32> to vector<2x8x1xf32>
    %701 = tpu.reciprocal %700 {approx = true} : vector<2x8x1xf32> -> vector<2x8x1xf32>
    %702 = vector.broadcast %701 : vector<2x8x1xf32> to vector<2x8x8xf32>
    %703 = arith.mulf %698, %702 : vector<2x8x8xf32>
    "tpu.trace_start"() <{level = 10 : i32, message = "bqk,bkd->bqd"}> : () -> ()
    %cst_302 = arith.constant dense<0.000000e+00> : vector<2x8x8xf32>
    %704 = tpu.matmul %703, %689, %cst_302 {dimension_numbers = #tpu.dot_dimension_numbers<[2], [1], [1], [2], [0, 0, 0, 1, 1, 2], [0], [0]>} : vector<2x8x8xf32>, vector<2x8x8xf32>, vector<2x8x8xf32> -> vector<2x8x8xf32>
    "tpu.trace_stop"() : () -> ()
    %705 = vector.shape_cast %704 : vector<2x8x8xf32> to vector<16x8xf32>
    %c3_303 = arith.constant 3 : index
    %c0_304 = arith.constant 0 : index
    %c0_305 = arith.constant 0 : index
    %706 = vector.load %arg25[%c3_303, %c0_304, %c0_305] : memref<4x8x32xf32, #tpu.memory_space<vmem>>, vector<1x8x32xf32>
    %707 = vector.shape_cast %706 : vector<1x8x32xf32> to vector<8x32xf32>
    %cst_306 = arith.constant dense<0.000000e+00> : vector<16x32xf32>
    %708 = tpu.matmul %705, %707, %cst_306 {dimension_numbers = #tpu.dot_dimension_numbers<[1], [0], [0], [1], [0, 0, 1, 1], [], []>} : vector<16x8xf32>, vector<8x32xf32>, vector<16x32xf32> -> vector<16x32xf32>
    %709 = arith.addf %683, %708 : vector<16x32xf32>
    %c0_307 = arith.constant 0 : index
    %c0_308 = arith.constant 0 : index
    %710 = vector.load %arg21[%c0_307, %c0_308] : memref<1x32xf32, #tpu.memory_space<vmem>>, vector<1x32xf32>
    %711 = vector.broadcast %710 : vector<1x32xf32> to vector<16x32xf32>
    %712 = arith.addf %709, %711 : vector<16x32xf32>
    %713 = arith.addf %562, %712 : vector<16x32xf32>
    %c0_309 = arith.constant 0 : index
    %c0_310 = arith.constant 0 : index
    %714 = vector.load %arg10[%c0_309, %c0_310] : memref<1x32xf32, #tpu.memory_space<vmem>>, vector<1x32xf32>
    %c0_311 = arith.constant 0 : index
    %c0_312 = arith.constant 0 : index
    %715 = vector.load %arg11[%c0_311, %c0_312] : memref<1x32xf32, #tpu.memory_space<vmem>>, vector<1x32xf32>
    %cst_313 = arith.constant dense<0.000000e+00> : vector<16xf32>
    %716 = vector.multi_reduction <add>, %713, %cst_313 [1] : vector<16x32xf32> to vector<16xf32>
    %717 = vector.shape_cast %716 : vector<16xf32> to vector<16x1xf32>
    %cst_314 = arith.constant 3.200000e+01 : f32
    %718 = vector.broadcast %cst_314 : f32 to vector<16x1xf32>
    %719 = arith.divf %717, %718 : vector<16x1xf32>
    %720 = vector.broadcast %719 : vector<16x1xf32> to vector<16x32xf32>
    %721 = arith.subf %713, %720 : vector<16x32xf32>
    %722 = arith.mulf %721, %721 : vector<16x32xf32>
    %cst_315 = arith.constant dense<0.000000e+00> : vector<16xf32>
    %723 = vector.multi_reduction <add>, %722, %cst_315 [1] : vector<16x32xf32> to vector<16xf32>
    %724 = vector.shape_cast %723 : vector<16xf32> to vector<16x1xf32>
    %cst_316 = arith.constant 0.0322580636 : f32
    %725 = vector.broadcast %cst_316 : f32 to vector<16x1xf32>
    %726 = arith.mulf %724, %725 : vector<16x1xf32>
    %727 = math.sqrt %726 : vector<16x1xf32>
    %cst_317 = arith.constant 9.99999997E-7 : f32
    %728 = vector.broadcast %cst_317 : f32 to vector<16x1xf32>
    %729 = arith.addf %727, %728 : vector<16x1xf32>
    %730 = tpu.reciprocal %729 {approx = true} : vector<16x1xf32> -> vector<16x1xf32>
    %731 = vector.broadcast %719 : vector<16x1xf32> to vector<16x32xf32>
    %732 = arith.subf %713, %731 : vector<16x32xf32>
    %733 = vector.broadcast %714 : vector<1x32xf32> to vector<16x32xf32>
    %734 = arith.mulf %733, %732 : vector<16x32xf32>
    %735 = vector.broadcast %730 : vector<16x1xf32> to vector<16x32xf32>
    %736 = arith.mulf %734, %735 : vector<16x32xf32>
    %737 = vector.broadcast %715 : vector<1x32xf32> to vector<16x32xf32>
    %738 = arith.addf %736, %737 : vector<16x32xf32>
    %739 = arith.truncf %738 : vector<16x32xf32> to vector<16x32xbf16>
    %c0_318 = arith.constant 0 : index
    %c0_319 = arith.constant 0 : index
    %740 = vector.load %arg4[%c0_318, %c0_319] : memref<32x64xbf16, #tpu.memory_space<vmem>>, vector<32x64xbf16>
    %cst_320 = arith.constant dense<0.000000e+00> : vector<16x64xf32>
    %741 = tpu.matmul %739, %740, %cst_320 {dimension_numbers = #tpu.dot_dimension_numbers<[1], [0], [0], [1], [0, 0, 1, 1], [], []>} : vector<16x32xbf16>, vector<32x64xbf16>, vector<16x64xf32> -> vector<16x64xf32>
    %c0_321 = arith.constant 0 : index
    %c0_322 = arith.constant 0 : index
    %742 = vector.load %arg2[%c0_321, %c0_322] : memref<1x64xf32, #tpu.memory_space<vmem>>, vector<1x64xf32>
    %743 = vector.broadcast %742 : vector<1x64xf32> to vector<16x64xf32>
    %744 = arith.addf %741, %743 : vector<16x64xf32>
    %cst_323 = arith.constant 0.000000e+00 : f32
    %745 = vector.broadcast %cst_323 : f32 to vector<16x64xf32>
    %746 = arith.maximumf %744, %745 : vector<16x64xf32>
    %747 = arith.truncf %746 : vector<16x64xf32> to vector<16x64xbf16>
    %c0_324 = arith.constant 0 : index
    %c0_325 = arith.constant 0 : index
    %748 = vector.load %arg5[%c0_324, %c0_325] : memref<64x32xbf16, #tpu.memory_space<vmem>>, vector<64x32xbf16>
    %cst_326 = arith.constant dense<0.000000e+00> : vector<16x32xf32>
    %749 = tpu.matmul %747, %748, %cst_326 {dimension_numbers = #tpu.dot_dimension_numbers<[1], [0], [0], [1], [0, 0, 1, 1], [], []>} : vector<16x64xbf16>, vector<64x32xbf16>, vector<16x32xf32> -> vector<16x32xf32>
    %c0_327 = arith.constant 0 : index
    %c0_328 = arith.constant 0 : index
    %750 = vector.load %arg3[%c0_327, %c0_328] : memref<1x32xf32, #tpu.memory_space<vmem>>, vector<1x32xf32>
    %751 = vector.broadcast %750 : vector<1x32xf32> to vector<16x32xf32>
    %752 = arith.addf %749, %751 : vector<16x32xf32>
    %753 = arith.addf %713, %752 : vector<16x32xf32>
    %c0_329 = arith.constant 0 : index
    %c0_330 = arith.constant 0 : index
    %754 = vector.load %arg32[%c0_329, %c0_330] : memref<1x32xf32, #tpu.memory_space<vmem>>, vector<1x32xf32>
    %c0_331 = arith.constant 0 : index
    %c0_332 = arith.constant 0 : index
    %755 = vector.load %arg33[%c0_331, %c0_332] : memref<1x32xf32, #tpu.memory_space<vmem>>, vector<1x32xf32>
    %cst_333 = arith.constant dense<0.000000e+00> : vector<16xf32>
    %756 = vector.multi_reduction <add>, %753, %cst_333 [1] : vector<16x32xf32> to vector<16xf32>
    %757 = vector.shape_cast %756 : vector<16xf32> to vector<16x1xf32>
    %cst_334 = arith.constant 3.200000e+01 : f32
    %758 = vector.broadcast %cst_334 : f32 to vector<16x1xf32>
    %759 = arith.divf %757, %758 : vector<16x1xf32>
    %760 = vector.broadcast %759 : vector<16x1xf32> to vector<16x32xf32>
    %761 = arith.subf %753, %760 : vector<16x32xf32>
    %762 = arith.mulf %761, %761 : vector<16x32xf32>
    %cst_335 = arith.constant dense<0.000000e+00> : vector<16xf32>
    %763 = vector.multi_reduction <add>, %762, %cst_335 [1] : vector<16x32xf32> to vector<16xf32>
    %764 = vector.shape_cast %763 : vector<16xf32> to vector<16x1xf32>
    %cst_336 = arith.constant 0.0322580636 : f32
    %765 = vector.broadcast %cst_336 : f32 to vector<16x1xf32>
    %766 = arith.mulf %764, %765 : vector<16x1xf32>
    %767 = math.sqrt %766 : vector<16x1xf32>
    %cst_337 = arith.constant 9.99999997E-7 : f32
    %768 = vector.broadcast %cst_337 : f32 to vector<16x1xf32>
    %769 = arith.addf %767, %768 : vector<16x1xf32>
    %770 = tpu.reciprocal %769 {approx = true} : vector<16x1xf32> -> vector<16x1xf32>
    %771 = vector.broadcast %759 : vector<16x1xf32> to vector<16x32xf32>
    %772 = arith.subf %753, %771 : vector<16x32xf32>
    %773 = vector.broadcast %754 : vector<1x32xf32> to vector<16x32xf32>
    %774 = arith.mulf %773, %772 : vector<16x32xf32>
    %775 = vector.broadcast %770 : vector<16x1xf32> to vector<16x32xf32>
    %776 = arith.mulf %774, %775 : vector<16x32xf32>
    %777 = vector.broadcast %755 : vector<1x32xf32> to vector<16x32xf32>
    %778 = arith.addf %776, %777 : vector<16x32xf32>
    %779 = arith.truncf %778 : vector<16x32xf32> to vector<16x32xbf16>
    %780 = arith.truncf %778 : vector<16x32xf32> to vector<16x32xbf16>
    %c0_338 = arith.constant 0 : index
    %c0_339 = arith.constant 0 : index
    %781 = vector.load %arg44[%c0_338, %c0_339] : memref<32x32xbf16, #tpu.memory_space<vmem>>, vector<32x32xbf16>
    %cst_340 = arith.constant dense<0.000000e+00> : vector<16x32xf32>
    %782 = tpu.matmul %779, %781, %cst_340 {dimension_numbers = #tpu.dot_dimension_numbers<[1], [0], [0], [1], [0, 0, 1, 1], [], []>} : vector<16x32xbf16>, vector<32x32xbf16>, vector<16x32xf32> -> vector<16x32xf32>
    %c0_341 = arith.constant 0 : index
    %c0_342 = arith.constant 0 : index
    %783 = vector.load %arg40[%c0_341, %c0_342] : memref<1x32xf32, #tpu.memory_space<vmem>>, vector<1x32xf32>
    %784 = vector.broadcast %783 : vector<1x32xf32> to vector<16x32xf32>
    %785 = arith.addf %782, %784 : vector<16x32xf32>
    %c0_343 = arith.constant 0 : index
    %c0_344 = arith.constant 0 : index
    %786 = vector.load %arg42[%c0_343, %c0_344] : memref<32x32xbf16, #tpu.memory_space<vmem>>, vector<32x32xbf16>
    %cst_345 = arith.constant dense<0.000000e+00> : vector<16x32xf32>
    %787 = tpu.matmul %780, %786, %cst_345 {dimension_numbers = #tpu.dot_dimension_numbers<[1], [0], [0], [1], [0, 0, 1, 1], [], []>} : vector<16x32xbf16>, vector<32x32xbf16>, vector<16x32xf32> -> vector<16x32xf32>
    %c0_346 = arith.constant 0 : index
    %c0_347 = arith.constant 0 : index
    %788 = vector.load %arg38[%c0_346, %c0_347] : memref<1x32xf32, #tpu.memory_space<vmem>>, vector<1x32xf32>
    %789 = vector.broadcast %788 : vector<1x32xf32> to vector<16x32xf32>
    %790 = arith.addf %787, %789 : vector<16x32xf32>
    %c0_348 = arith.constant 0 : index
    %c0_349 = arith.constant 0 : index
    %791 = vector.load %arg45[%c0_348, %c0_349] : memref<32x32xbf16, #tpu.memory_space<vmem>>, vector<32x32xbf16>
    %cst_350 = arith.constant dense<0.000000e+00> : vector<16x32xf32>
    %792 = tpu.matmul %780, %791, %cst_350 {dimension_numbers = #tpu.dot_dimension_numbers<[1], [0], [0], [1], [0, 0, 1, 1], [], []>} : vector<16x32xbf16>, vector<32x32xbf16>, vector<16x32xf32> -> vector<16x32xf32>
    %c0_351 = arith.constant 0 : index
    %c0_352 = arith.constant 0 : index
    %793 = vector.load %arg41[%c0_351, %c0_352] : memref<1x32xf32, #tpu.memory_space<vmem>>, vector<1x32xf32>
    %794 = vector.broadcast %793 : vector<1x32xf32> to vector<16x32xf32>
    %795 = arith.addf %792, %794 : vector<16x32xf32>
    %cst_353 = arith.constant 0.000000e+00 : f32
    %796 = vector.broadcast %cst_353 : f32 to vector<16x32xf32>
    %797 = vector.extract_strided_slice %785 {offsets = [0, 0], sizes = [16, 8], strides = [1, 1]} : vector<16x32xf32> to vector<16x8xf32>
    %798 = vector.shape_cast %797 : vector<16x8xf32> to vector<2x8x8xf32>
    %799 = vector.extract_strided_slice %790 {offsets = [0, 0], sizes = [16, 8], strides = [1, 1]} : vector<16x32xf32> to vector<16x8xf32>
    %800 = vector.shape_cast %799 : vector<16x8xf32> to vector<2x8x8xf32>
    %801 = vector.extract_strided_slice %795 {offsets = [0, 0], sizes = [16, 8], strides = [1, 1]} : vector<16x32xf32> to vector<16x8xf32>
    %802 = vector.shape_cast %801 : vector<16x8xf32> to vector<2x8x8xf32>
    "tpu.trace_start"() <{level = 10 : i32, message = "bqd,bkd->bqk"}> : () -> ()
    %cst_354 = arith.constant dense<0.000000e+00> : vector<2x8x8xf32>
    %803 = tpu.matmul %798, %800, %cst_354 {dimension_numbers = #tpu.dot_dimension_numbers<[2], [2], [1], [1], [0, 0, 0, 1, 1, 1], [0], [0]>} : vector<2x8x8xf32>, vector<2x8x8xf32>, vector<2x8x8xf32> -> vector<2x8x8xf32>
    "tpu.trace_stop"() : () -> ()
    %cst_355 = arith.constant 0.353553385 : f32
    %804 = vector.broadcast %cst_355 : f32 to vector<2x8x8xf32>
    %805 = arith.mulf %803, %804 : vector<2x8x8xf32>
    %806 = arith.addf %805, %410 : vector<2x8x8xf32>
    %cst_356 = arith.constant dense<0xFF800000> : vector<2x8xf32>
    %807 = vector.multi_reduction <maximumf>, %806, %cst_356 [2] : vector<2x8x8xf32> to vector<2x8xf32>
    %808 = vector.shape_cast %807 : vector<2x8xf32> to vector<2x8x1xf32>
    %809 = vector.broadcast %808 : vector<2x8x1xf32> to vector<2x8x8xf32>
    %810 = arith.subf %806, %809 : vector<2x8x8xf32>
    %811 = math.exp %810 : vector<2x8x8xf32>
    %cst_357 = arith.constant dense<0.000000e+00> : vector<2x8xf32>
    %812 = vector.multi_reduction <add>, %811, %cst_357 [2] : vector<2x8x8xf32> to vector<2x8xf32>
    %813 = vector.shape_cast %812 : vector<2x8xf32> to vector<2x8x1xf32>
    %814 = tpu.reciprocal %813 {approx = true} : vector<2x8x1xf32> -> vector<2x8x1xf32>
    %815 = vector.broadcast %814 : vector<2x8x1xf32> to vector<2x8x8xf32>
    %816 = arith.mulf %811, %815 : vector<2x8x8xf32>
    "tpu.trace_start"() <{level = 10 : i32, message = "bqk,bkd->bqd"}> : () -> ()
    %cst_358 = arith.constant dense<0.000000e+00> : vector<2x8x8xf32>
    %817 = tpu.matmul %816, %802, %cst_358 {dimension_numbers = #tpu.dot_dimension_numbers<[2], [1], [1], [2], [0, 0, 0, 1, 1, 2], [0], [0]>} : vector<2x8x8xf32>, vector<2x8x8xf32>, vector<2x8x8xf32> -> vector<2x8x8xf32>
    "tpu.trace_stop"() : () -> ()
    %818 = vector.shape_cast %817 : vector<2x8x8xf32> to vector<16x8xf32>
    %c0_359 = arith.constant 0 : index
    %c0_360 = arith.constant 0 : index
    %c0_361 = arith.constant 0 : index
    %819 = vector.load %arg43[%c0_359, %c0_360, %c0_361] : memref<4x8x32xf32, #tpu.memory_space<vmem>>, vector<1x8x32xf32>
    %820 = vector.shape_cast %819 : vector<1x8x32xf32> to vector<8x32xf32>
    %cst_362 = arith.constant dense<0.000000e+00> : vector<16x32xf32>
    %821 = tpu.matmul %818, %820, %cst_362 {dimension_numbers = #tpu.dot_dimension_numbers<[1], [0], [0], [1], [0, 0, 1, 1], [], []>} : vector<16x8xf32>, vector<8x32xf32>, vector<16x32xf32> -> vector<16x32xf32>
    %822 = arith.addf %796, %821 : vector<16x32xf32>
    %823 = vector.extract_strided_slice %785 {offsets = [0, 8], sizes = [16, 8], strides = [1, 1]} : vector<16x32xf32> to vector<16x8xf32>
    %824 = vector.shape_cast %823 : vector<16x8xf32> to vector<2x8x8xf32>
    %825 = vector.extract_strided_slice %790 {offsets = [0, 8], sizes = [16, 8], strides = [1, 1]} : vector<16x32xf32> to vector<16x8xf32>
    %826 = vector.shape_cast %825 : vector<16x8xf32> to vector<2x8x8xf32>
    %827 = vector.extract_strided_slice %795 {offsets = [0, 8], sizes = [16, 8], strides = [1, 1]} : vector<16x32xf32> to vector<16x8xf32>
    %828 = vector.shape_cast %827 : vector<16x8xf32> to vector<2x8x8xf32>
    "tpu.trace_start"() <{level = 10 : i32, message = "bqd,bkd->bqk"}> : () -> ()
    %cst_363 = arith.constant dense<0.000000e+00> : vector<2x8x8xf32>
    %829 = tpu.matmul %824, %826, %cst_363 {dimension_numbers = #tpu.dot_dimension_numbers<[2], [2], [1], [1], [0, 0, 0, 1, 1, 1], [0], [0]>} : vector<2x8x8xf32>, vector<2x8x8xf32>, vector<2x8x8xf32> -> vector<2x8x8xf32>
    "tpu.trace_stop"() : () -> ()
    %cst_364 = arith.constant 0.353553385 : f32
    %830 = vector.broadcast %cst_364 : f32 to vector<2x8x8xf32>
    %831 = arith.mulf %829, %830 : vector<2x8x8xf32>
    %832 = arith.addf %831, %410 : vector<2x8x8xf32>
    %cst_365 = arith.constant dense<0xFF800000> : vector<2x8xf32>
    %833 = vector.multi_reduction <maximumf>, %832, %cst_365 [2] : vector<2x8x8xf32> to vector<2x8xf32>
    %834 = vector.shape_cast %833 : vector<2x8xf32> to vector<2x8x1xf32>
    %835 = vector.broadcast %834 : vector<2x8x1xf32> to vector<2x8x8xf32>
    %836 = arith.subf %832, %835 : vector<2x8x8xf32>
    %837 = math.exp %836 : vector<2x8x8xf32>
    %cst_366 = arith.constant dense<0.000000e+00> : vector<2x8xf32>
    %838 = vector.multi_reduction <add>, %837, %cst_366 [2] : vector<2x8x8xf32> to vector<2x8xf32>
    %839 = vector.shape_cast %838 : vector<2x8xf32> to vector<2x8x1xf32>
    %840 = tpu.reciprocal %839 {approx = true} : vector<2x8x1xf32> -> vector<2x8x1xf32>
    %841 = vector.broadcast %840 : vector<2x8x1xf32> to vector<2x8x8xf32>
    %842 = arith.mulf %837, %841 : vector<2x8x8xf32>
    "tpu.trace_start"() <{level = 10 : i32, message = "bqk,bkd->bqd"}> : () -> ()
    %cst_367 = arith.constant dense<0.000000e+00> : vector<2x8x8xf32>
    %843 = tpu.matmul %842, %828, %cst_367 {dimension_numbers = #tpu.dot_dimension_numbers<[2], [1], [1], [2], [0, 0, 0, 1, 1, 2], [0], [0]>} : vector<2x8x8xf32>, vector<2x8x8xf32>, vector<2x8x8xf32> -> vector<2x8x8xf32>
    "tpu.trace_stop"() : () -> ()
    %844 = vector.shape_cast %843 : vector<2x8x8xf32> to vector<16x8xf32>
    %c1_368 = arith.constant 1 : index
    %c0_369 = arith.constant 0 : index
    %c0_370 = arith.constant 0 : index
    %845 = vector.load %arg43[%c1_368, %c0_369, %c0_370] : memref<4x8x32xf32, #tpu.memory_space<vmem>>, vector<1x8x32xf32>
    %846 = vector.shape_cast %845 : vector<1x8x32xf32> to vector<8x32xf32>
    %cst_371 = arith.constant dense<0.000000e+00> : vector<16x32xf32>
    %847 = tpu.matmul %844, %846, %cst_371 {dimension_numbers = #tpu.dot_dimension_numbers<[1], [0], [0], [1], [0, 0, 1, 1], [], []>} : vector<16x8xf32>, vector<8x32xf32>, vector<16x32xf32> -> vector<16x32xf32>
    %848 = arith.addf %822, %847 : vector<16x32xf32>
    %849 = vector.extract_strided_slice %785 {offsets = [0, 16], sizes = [16, 8], strides = [1, 1]} : vector<16x32xf32> to vector<16x8xf32>
    %850 = vector.shape_cast %849 : vector<16x8xf32> to vector<2x8x8xf32>
    %851 = vector.extract_strided_slice %790 {offsets = [0, 16], sizes = [16, 8], strides = [1, 1]} : vector<16x32xf32> to vector<16x8xf32>
    %852 = vector.shape_cast %851 : vector<16x8xf32> to vector<2x8x8xf32>
    %853 = vector.extract_strided_slice %795 {offsets = [0, 16], sizes = [16, 8], strides = [1, 1]} : vector<16x32xf32> to vector<16x8xf32>
    %854 = vector.shape_cast %853 : vector<16x8xf32> to vector<2x8x8xf32>
    "tpu.trace_start"() <{level = 10 : i32, message = "bqd,bkd->bqk"}> : () -> ()
    %cst_372 = arith.constant dense<0.000000e+00> : vector<2x8x8xf32>
    %855 = tpu.matmul %850, %852, %cst_372 {dimension_numbers = #tpu.dot_dimension_numbers<[2], [2], [1], [1], [0, 0, 0, 1, 1, 1], [0], [0]>} : vector<2x8x8xf32>, vector<2x8x8xf32>, vector<2x8x8xf32> -> vector<2x8x8xf32>
    "tpu.trace_stop"() : () -> ()
    %cst_373 = arith.constant 0.353553385 : f32
    %856 = vector.broadcast %cst_373 : f32 to vector<2x8x8xf32>
    %857 = arith.mulf %855, %856 : vector<2x8x8xf32>
    %858 = arith.addf %857, %410 : vector<2x8x8xf32>
    %cst_374 = arith.constant dense<0xFF800000> : vector<2x8xf32>
    %859 = vector.multi_reduction <maximumf>, %858, %cst_374 [2] : vector<2x8x8xf32> to vector<2x8xf32>
    %860 = vector.shape_cast %859 : vector<2x8xf32> to vector<2x8x1xf32>
    %861 = vector.broadcast %860 : vector<2x8x1xf32> to vector<2x8x8xf32>
    %862 = arith.subf %858, %861 : vector<2x8x8xf32>
    %863 = math.exp %862 : vector<2x8x8xf32>
    %cst_375 = arith.constant dense<0.000000e+00> : vector<2x8xf32>
    %864 = vector.multi_reduction <add>, %863, %cst_375 [2] : vector<2x8x8xf32> to vector<2x8xf32>
    %865 = vector.shape_cast %864 : vector<2x8xf32> to vector<2x8x1xf32>
    %866 = tpu.reciprocal %865 {approx = true} : vector<2x8x1xf32> -> vector<2x8x1xf32>
    %867 = vector.broadcast %866 : vector<2x8x1xf32> to vector<2x8x8xf32>
    %868 = arith.mulf %863, %867 : vector<2x8x8xf32>
    "tpu.trace_start"() <{level = 10 : i32, message = "bqk,bkd->bqd"}> : () -> ()
    %cst_376 = arith.constant dense<0.000000e+00> : vector<2x8x8xf32>
    %869 = tpu.matmul %868, %854, %cst_376 {dimension_numbers = #tpu.dot_dimension_numbers<[2], [1], [1], [2], [0, 0, 0, 1, 1, 2], [0], [0]>} : vector<2x8x8xf32>, vector<2x8x8xf32>, vector<2x8x8xf32> -> vector<2x8x8xf32>
    "tpu.trace_stop"() : () -> ()
    %870 = vector.shape_cast %869 : vector<2x8x8xf32> to vector<16x8xf32>
    %c2_377 = arith.constant 2 : index
    %c0_378 = arith.constant 0 : index
    %c0_379 = arith.constant 0 : index
    %871 = vector.load %arg43[%c2_377, %c0_378, %c0_379] : memref<4x8x32xf32, #tpu.memory_space<vmem>>, vector<1x8x32xf32>
    %872 = vector.shape_cast %871 : vector<1x8x32xf32> to vector<8x32xf32>
    %cst_380 = arith.constant dense<0.000000e+00> : vector<16x32xf32>
    %873 = tpu.matmul %870, %872, %cst_380 {dimension_numbers = #tpu.dot_dimension_numbers<[1], [0], [0], [1], [0, 0, 1, 1], [], []>} : vector<16x8xf32>, vector<8x32xf32>, vector<16x32xf32> -> vector<16x32xf32>
    %874 = arith.addf %848, %873 : vector<16x32xf32>
    %875 = vector.extract_strided_slice %785 {offsets = [0, 24], sizes = [16, 8], strides = [1, 1]} : vector<16x32xf32> to vector<16x8xf32>
    %876 = vector.shape_cast %875 : vector<16x8xf32> to vector<2x8x8xf32>
    %877 = vector.extract_strided_slice %790 {offsets = [0, 24], sizes = [16, 8], strides = [1, 1]} : vector<16x32xf32> to vector<16x8xf32>
    %878 = vector.shape_cast %877 : vector<16x8xf32> to vector<2x8x8xf32>
    %879 = vector.extract_strided_slice %795 {offsets = [0, 24], sizes = [16, 8], strides = [1, 1]} : vector<16x32xf32> to vector<16x8xf32>
    %880 = vector.shape_cast %879 : vector<16x8xf32> to vector<2x8x8xf32>
    "tpu.trace_start"() <{level = 10 : i32, message = "bqd,bkd->bqk"}> : () -> ()
    %cst_381 = arith.constant dense<0.000000e+00> : vector<2x8x8xf32>
    %881 = tpu.matmul %876, %878, %cst_381 {dimension_numbers = #tpu.dot_dimension_numbers<[2], [2], [1], [1], [0, 0, 0, 1, 1, 1], [0], [0]>} : vector<2x8x8xf32>, vector<2x8x8xf32>, vector<2x8x8xf32> -> vector<2x8x8xf32>
    "tpu.trace_stop"() : () -> ()
    %cst_382 = arith.constant 0.353553385 : f32
    %882 = vector.broadcast %cst_382 : f32 to vector<2x8x8xf32>
    %883 = arith.mulf %881, %882 : vector<2x8x8xf32>
    %884 = arith.addf %883, %410 : vector<2x8x8xf32>
    %cst_383 = arith.constant dense<0xFF800000> : vector<2x8xf32>
    %885 = vector.multi_reduction <maximumf>, %884, %cst_383 [2] : vector<2x8x8xf32> to vector<2x8xf32>
    %886 = vector.shape_cast %885 : vector<2x8xf32> to vector<2x8x1xf32>
    %887 = vector.broadcast %886 : vector<2x8x1xf32> to vector<2x8x8xf32>
    %888 = arith.subf %884, %887 : vector<2x8x8xf32>
    %889 = math.exp %888 : vector<2x8x8xf32>
    %cst_384 = arith.constant dense<0.000000e+00> : vector<2x8xf32>
    %890 = vector.multi_reduction <add>, %889, %cst_384 [2] : vector<2x8x8xf32> to vector<2x8xf32>
    %891 = vector.shape_cast %890 : vector<2x8xf32> to vector<2x8x1xf32>
    %892 = tpu.reciprocal %891 {approx = true} : vector<2x8x1xf32> -> vector<2x8x1xf32>
    %893 = vector.broadcast %892 : vector<2x8x1xf32> to vector<2x8x8xf32>
    %894 = arith.mulf %889, %893 : vector<2x8x8xf32>
    "tpu.trace_start"() <{level = 10 : i32, message = "bqk,bkd->bqd"}> : () -> ()
    %cst_385 = arith.constant dense<0.000000e+00> : vector<2x8x8xf32>
    %895 = tpu.matmul %894, %880, %cst_385 {dimension_numbers = #tpu.dot_dimension_numbers<[2], [1], [1], [2], [0, 0, 0, 1, 1, 2], [0], [0]>} : vector<2x8x8xf32>, vector<2x8x8xf32>, vector<2x8x8xf32> -> vector<2x8x8xf32>
    "tpu.trace_stop"() : () -> ()
    %896 = vector.shape_cast %895 : vector<2x8x8xf32> to vector<16x8xf32>
    %c3_386 = arith.constant 3 : index
    %c0_387 = arith.constant 0 : index
    %c0_388 = arith.constant 0 : index
    %897 = vector.load %arg43[%c3_386, %c0_387, %c0_388] : memref<4x8x32xf32, #tpu.memory_space<vmem>>, vector<1x8x32xf32>
    %898 = vector.shape_cast %897 : vector<1x8x32xf32> to vector<8x32xf32>
    %cst_389 = arith.constant dense<0.000000e+00> : vector<16x32xf32>
    %899 = tpu.matmul %896, %898, %cst_389 {dimension_numbers = #tpu.dot_dimension_numbers<[1], [0], [0], [1], [0, 0, 1, 1], [], []>} : vector<16x8xf32>, vector<8x32xf32>, vector<16x32xf32> -> vector<16x32xf32>
    %900 = arith.addf %874, %899 : vector<16x32xf32>
    %c0_390 = arith.constant 0 : index
    %c0_391 = arith.constant 0 : index
    %901 = vector.load %arg39[%c0_390, %c0_391] : memref<1x32xf32, #tpu.memory_space<vmem>>, vector<1x32xf32>
    %902 = vector.broadcast %901 : vector<1x32xf32> to vector<16x32xf32>
    %903 = arith.addf %900, %902 : vector<16x32xf32>
    %904 = arith.addf %753, %903 : vector<16x32xf32>
    %c0_392 = arith.constant 0 : index
    %c0_393 = arith.constant 0 : index
    %905 = vector.load %arg34[%c0_392, %c0_393] : memref<1x32xf32, #tpu.memory_space<vmem>>, vector<1x32xf32>
    %c0_394 = arith.constant 0 : index
    %c0_395 = arith.constant 0 : index
    %906 = vector.load %arg35[%c0_394, %c0_395] : memref<1x32xf32, #tpu.memory_space<vmem>>, vector<1x32xf32>
    %cst_396 = arith.constant dense<0.000000e+00> : vector<16xf32>
    %907 = vector.multi_reduction <add>, %904, %cst_396 [1] : vector<16x32xf32> to vector<16xf32>
    %908 = vector.shape_cast %907 : vector<16xf32> to vector<16x1xf32>
    %cst_397 = arith.constant 3.200000e+01 : f32
    %909 = vector.broadcast %cst_397 : f32 to vector<16x1xf32>
    %910 = arith.divf %908, %909 : vector<16x1xf32>
    %911 = vector.broadcast %910 : vector<16x1xf32> to vector<16x32xf32>
    %912 = arith.subf %904, %911 : vector<16x32xf32>
    %913 = arith.mulf %912, %912 : vector<16x32xf32>
    %cst_398 = arith.constant dense<0.000000e+00> : vector<16xf32>
    %914 = vector.multi_reduction <add>, %913, %cst_398 [1] : vector<16x32xf32> to vector<16xf32>
    %915 = vector.shape_cast %914 : vector<16xf32> to vector<16x1xf32>
    %cst_399 = arith.constant 0.0322580636 : f32
    %916 = vector.broadcast %cst_399 : f32 to vector<16x1xf32>
    %917 = arith.mulf %915, %916 : vector<16x1xf32>
    %918 = math.sqrt %917 : vector<16x1xf32>
    %cst_400 = arith.constant 9.99999997E-7 : f32
    %919 = vector.broadcast %cst_400 : f32 to vector<16x1xf32>
    %920 = arith.addf %918, %919 : vector<16x1xf32>
    %921 = tpu.reciprocal %920 {approx = true} : vector<16x1xf32> -> vector<16x1xf32>
    %922 = vector.broadcast %910 : vector<16x1xf32> to vector<16x32xf32>
    %923 = arith.subf %904, %922 : vector<16x32xf32>
    %924 = vector.broadcast %905 : vector<1x32xf32> to vector<16x32xf32>
    %925 = arith.mulf %924, %923 : vector<16x32xf32>
    %926 = vector.broadcast %921 : vector<16x1xf32> to vector<16x32xf32>
    %927 = arith.mulf %925, %926 : vector<16x32xf32>
    %928 = vector.broadcast %906 : vector<1x32xf32> to vector<16x32xf32>
    %929 = arith.addf %927, %928 : vector<16x32xf32>
    %930 = arith.truncf %929 : vector<16x32xf32> to vector<16x32xbf16>
    %931 = arith.truncf %408 : vector<16x32xf32> to vector<16x32xbf16>
    %c0_401 = arith.constant 0 : index
    %c0_402 = arith.constant 0 : index
    %932 = vector.load %arg52[%c0_401, %c0_402] : memref<32x32xbf16, #tpu.memory_space<vmem>>, vector<32x32xbf16>
    %cst_403 = arith.constant dense<0.000000e+00> : vector<16x32xf32>
    %933 = tpu.matmul %930, %932, %cst_403 {dimension_numbers = #tpu.dot_dimension_numbers<[1], [0], [0], [1], [0, 0, 1, 1], [], []>} : vector<16x32xbf16>, vector<32x32xbf16>, vector<16x32xf32> -> vector<16x32xf32>
    %c0_404 = arith.constant 0 : index
    %c0_405 = arith.constant 0 : index
    %934 = vector.load %arg48[%c0_404, %c0_405] : memref<1x32xf32, #tpu.memory_space<vmem>>, vector<1x32xf32>
    %935 = vector.broadcast %934 : vector<1x32xf32> to vector<16x32xf32>
    %936 = arith.addf %933, %935 : vector<16x32xf32>
    %c0_406 = arith.constant 0 : index
    %c0_407 = arith.constant 0 : index
    %937 = vector.load %arg50[%c0_406, %c0_407] : memref<32x32xbf16, #tpu.memory_space<vmem>>, vector<32x32xbf16>
    %cst_408 = arith.constant dense<0.000000e+00> : vector<16x32xf32>
    %938 = tpu.matmul %931, %937, %cst_408 {dimension_numbers = #tpu.dot_dimension_numbers<[1], [0], [0], [1], [0, 0, 1, 1], [], []>} : vector<16x32xbf16>, vector<32x32xbf16>, vector<16x32xf32> -> vector<16x32xf32>
    %c0_409 = arith.constant 0 : index
    %c0_410 = arith.constant 0 : index
    %939 = vector.load %arg46[%c0_409, %c0_410] : memref<1x32xf32, #tpu.memory_space<vmem>>, vector<1x32xf32>
    %940 = vector.broadcast %939 : vector<1x32xf32> to vector<16x32xf32>
    %941 = arith.addf %938, %940 : vector<16x32xf32>
    %c0_411 = arith.constant 0 : index
    %c0_412 = arith.constant 0 : index
    %942 = vector.load %arg53[%c0_411, %c0_412] : memref<32x32xbf16, #tpu.memory_space<vmem>>, vector<32x32xbf16>
    %cst_413 = arith.constant dense<0.000000e+00> : vector<16x32xf32>
    %943 = tpu.matmul %931, %942, %cst_413 {dimension_numbers = #tpu.dot_dimension_numbers<[1], [0], [0], [1], [0, 0, 1, 1], [], []>} : vector<16x32xbf16>, vector<32x32xbf16>, vector<16x32xf32> -> vector<16x32xf32>
    %c0_414 = arith.constant 0 : index
    %c0_415 = arith.constant 0 : index
    %944 = vector.load %arg49[%c0_414, %c0_415] : memref<1x32xf32, #tpu.memory_space<vmem>>, vector<1x32xf32>
    %945 = vector.broadcast %944 : vector<1x32xf32> to vector<16x32xf32>
    %946 = arith.addf %943, %945 : vector<16x32xf32>
    %cst_416 = arith.constant 0.000000e+00 : f32
    %947 = vector.broadcast %cst_416 : f32 to vector<16x32xf32>
    %948 = vector.extract_strided_slice %936 {offsets = [0, 0], sizes = [16, 8], strides = [1, 1]} : vector<16x32xf32> to vector<16x8xf32>
    %949 = vector.shape_cast %948 : vector<16x8xf32> to vector<2x8x8xf32>
    %950 = vector.extract_strided_slice %941 {offsets = [0, 0], sizes = [16, 8], strides = [1, 1]} : vector<16x32xf32> to vector<16x8xf32>
    %951 = vector.shape_cast %950 : vector<16x8xf32> to vector<2x8x8xf32>
    %952 = vector.extract_strided_slice %946 {offsets = [0, 0], sizes = [16, 8], strides = [1, 1]} : vector<16x32xf32> to vector<16x8xf32>
    %953 = vector.shape_cast %952 : vector<16x8xf32> to vector<2x8x8xf32>
    "tpu.trace_start"() <{level = 10 : i32, message = "bqd,bkd->bqk"}> : () -> ()
    %cst_417 = arith.constant dense<0.000000e+00> : vector<2x8x8xf32>
    %954 = tpu.matmul %949, %951, %cst_417 {dimension_numbers = #tpu.dot_dimension_numbers<[2], [2], [1], [1], [0, 0, 0, 1, 1, 1], [0], [0]>} : vector<2x8x8xf32>, vector<2x8x8xf32>, vector<2x8x8xf32> -> vector<2x8x8xf32>
    "tpu.trace_stop"() : () -> ()
    %cst_418 = arith.constant 0.353553385 : f32
    %955 = vector.broadcast %cst_418 : f32 to vector<2x8x8xf32>
    %956 = arith.mulf %954, %955 : vector<2x8x8xf32>
    %957 = arith.addf %956, %411 : vector<2x8x8xf32>
    %cst_419 = arith.constant dense<0xFF800000> : vector<2x8xf32>
    %958 = vector.multi_reduction <maximumf>, %957, %cst_419 [2] : vector<2x8x8xf32> to vector<2x8xf32>
    %959 = vector.shape_cast %958 : vector<2x8xf32> to vector<2x8x1xf32>
    %960 = vector.broadcast %959 : vector<2x8x1xf32> to vector<2x8x8xf32>
    %961 = arith.subf %957, %960 : vector<2x8x8xf32>
    %962 = math.exp %961 : vector<2x8x8xf32>
    %cst_420 = arith.constant dense<0.000000e+00> : vector<2x8xf32>
    %963 = vector.multi_reduction <add>, %962, %cst_420 [2] : vector<2x8x8xf32> to vector<2x8xf32>
    %964 = vector.shape_cast %963 : vector<2x8xf32> to vector<2x8x1xf32>
    %965 = tpu.reciprocal %964 {approx = true} : vector<2x8x1xf32> -> vector<2x8x1xf32>
    %966 = vector.broadcast %965 : vector<2x8x1xf32> to vector<2x8x8xf32>
    %967 = arith.mulf %962, %966 : vector<2x8x8xf32>
    "tpu.trace_start"() <{level = 10 : i32, message = "bqk,bkd->bqd"}> : () -> ()
    %cst_421 = arith.constant dense<0.000000e+00> : vector<2x8x8xf32>
    %968 = tpu.matmul %967, %953, %cst_421 {dimension_numbers = #tpu.dot_dimension_numbers<[2], [1], [1], [2], [0, 0, 0, 1, 1, 2], [0], [0]>} : vector<2x8x8xf32>, vector<2x8x8xf32>, vector<2x8x8xf32> -> vector<2x8x8xf32>
    "tpu.trace_stop"() : () -> ()
    %969 = vector.shape_cast %968 : vector<2x8x8xf32> to vector<16x8xf32>
    %c0_422 = arith.constant 0 : index
    %c0_423 = arith.constant 0 : index
    %c0_424 = arith.constant 0 : index
    %970 = vector.load %arg51[%c0_422, %c0_423, %c0_424] : memref<4x8x32xf32, #tpu.memory_space<vmem>>, vector<1x8x32xf32>
    %971 = vector.shape_cast %970 : vector<1x8x32xf32> to vector<8x32xf32>
    %cst_425 = arith.constant dense<0.000000e+00> : vector<16x32xf32>
    %972 = tpu.matmul %969, %971, %cst_425 {dimension_numbers = #tpu.dot_dimension_numbers<[1], [0], [0], [1], [0, 0, 1, 1], [], []>} : vector<16x8xf32>, vector<8x32xf32>, vector<16x32xf32> -> vector<16x32xf32>
    %973 = arith.addf %947, %972 : vector<16x32xf32>
    %974 = vector.extract_strided_slice %936 {offsets = [0, 8], sizes = [16, 8], strides = [1, 1]} : vector<16x32xf32> to vector<16x8xf32>
    %975 = vector.shape_cast %974 : vector<16x8xf32> to vector<2x8x8xf32>
    %976 = vector.extract_strided_slice %941 {offsets = [0, 8], sizes = [16, 8], strides = [1, 1]} : vector<16x32xf32> to vector<16x8xf32>
    %977 = vector.shape_cast %976 : vector<16x8xf32> to vector<2x8x8xf32>
    %978 = vector.extract_strided_slice %946 {offsets = [0, 8], sizes = [16, 8], strides = [1, 1]} : vector<16x32xf32> to vector<16x8xf32>
    %979 = vector.shape_cast %978 : vector<16x8xf32> to vector<2x8x8xf32>
    "tpu.trace_start"() <{level = 10 : i32, message = "bqd,bkd->bqk"}> : () -> ()
    %cst_426 = arith.constant dense<0.000000e+00> : vector<2x8x8xf32>
    %980 = tpu.matmul %975, %977, %cst_426 {dimension_numbers = #tpu.dot_dimension_numbers<[2], [2], [1], [1], [0, 0, 0, 1, 1, 1], [0], [0]>} : vector<2x8x8xf32>, vector<2x8x8xf32>, vector<2x8x8xf32> -> vector<2x8x8xf32>
    "tpu.trace_stop"() : () -> ()
    %cst_427 = arith.constant 0.353553385 : f32
    %981 = vector.broadcast %cst_427 : f32 to vector<2x8x8xf32>
    %982 = arith.mulf %980, %981 : vector<2x8x8xf32>
    %983 = arith.addf %982, %411 : vector<2x8x8xf32>
    %cst_428 = arith.constant dense<0xFF800000> : vector<2x8xf32>
    %984 = vector.multi_reduction <maximumf>, %983, %cst_428 [2] : vector<2x8x8xf32> to vector<2x8xf32>
    %985 = vector.shape_cast %984 : vector<2x8xf32> to vector<2x8x1xf32>
    %986 = vector.broadcast %985 : vector<2x8x1xf32> to vector<2x8x8xf32>
    %987 = arith.subf %983, %986 : vector<2x8x8xf32>
    %988 = math.exp %987 : vector<2x8x8xf32>
    %cst_429 = arith.constant dense<0.000000e+00> : vector<2x8xf32>
    %989 = vector.multi_reduction <add>, %988, %cst_429 [2] : vector<2x8x8xf32> to vector<2x8xf32>
    %990 = vector.shape_cast %989 : vector<2x8xf32> to vector<2x8x1xf32>
    %991 = tpu.reciprocal %990 {approx = true} : vector<2x8x1xf32> -> vector<2x8x1xf32>
    %992 = vector.broadcast %991 : vector<2x8x1xf32> to vector<2x8x8xf32>
    %993 = arith.mulf %988, %992 : vector<2x8x8xf32>
    "tpu.trace_start"() <{level = 10 : i32, message = "bqk,bkd->bqd"}> : () -> ()
    %cst_430 = arith.constant dense<0.000000e+00> : vector<2x8x8xf32>
    %994 = tpu.matmul %993, %979, %cst_430 {dimension_numbers = #tpu.dot_dimension_numbers<[2], [1], [1], [2], [0, 0, 0, 1, 1, 2], [0], [0]>} : vector<2x8x8xf32>, vector<2x8x8xf32>, vector<2x8x8xf32> -> vector<2x8x8xf32>
    "tpu.trace_stop"() : () -> ()
    %995 = vector.shape_cast %994 : vector<2x8x8xf32> to vector<16x8xf32>
    %c1_431 = arith.constant 1 : index
    %c0_432 = arith.constant 0 : index
    %c0_433 = arith.constant 0 : index
    %996 = vector.load %arg51[%c1_431, %c0_432, %c0_433] : memref<4x8x32xf32, #tpu.memory_space<vmem>>, vector<1x8x32xf32>
    %997 = vector.shape_cast %996 : vector<1x8x32xf32> to vector<8x32xf32>
    %cst_434 = arith.constant dense<0.000000e+00> : vector<16x32xf32>
    %998 = tpu.matmul %995, %997, %cst_434 {dimension_numbers = #tpu.dot_dimension_numbers<[1], [0], [0], [1], [0, 0, 1, 1], [], []>} : vector<16x8xf32>, vector<8x32xf32>, vector<16x32xf32> -> vector<16x32xf32>
    %999 = arith.addf %973, %998 : vector<16x32xf32>
    %1000 = vector.extract_strided_slice %936 {offsets = [0, 16], sizes = [16, 8], strides = [1, 1]} : vector<16x32xf32> to vector<16x8xf32>
    %1001 = vector.shape_cast %1000 : vector<16x8xf32> to vector<2x8x8xf32>
    %1002 = vector.extract_strided_slice %941 {offsets = [0, 16], sizes = [16, 8], strides = [1, 1]} : vector<16x32xf32> to vector<16x8xf32>
    %1003 = vector.shape_cast %1002 : vector<16x8xf32> to vector<2x8x8xf32>
    %1004 = vector.extract_strided_slice %946 {offsets = [0, 16], sizes = [16, 8], strides = [1, 1]} : vector<16x32xf32> to vector<16x8xf32>
    %1005 = vector.shape_cast %1004 : vector<16x8xf32> to vector<2x8x8xf32>
    "tpu.trace_start"() <{level = 10 : i32, message = "bqd,bkd->bqk"}> : () -> ()
    %cst_435 = arith.constant dense<0.000000e+00> : vector<2x8x8xf32>
    %1006 = tpu.matmul %1001, %1003, %cst_435 {dimension_numbers = #tpu.dot_dimension_numbers<[2], [2], [1], [1], [0, 0, 0, 1, 1, 1], [0], [0]>} : vector<2x8x8xf32>, vector<2x8x8xf32>, vector<2x8x8xf32> -> vector<2x8x8xf32>
    "tpu.trace_stop"() : () -> ()
    %cst_436 = arith.constant 0.353553385 : f32
    %1007 = vector.broadcast %cst_436 : f32 to vector<2x8x8xf32>
    %1008 = arith.mulf %1006, %1007 : vector<2x8x8xf32>
    %1009 = arith.addf %1008, %411 : vector<2x8x8xf32>
    %cst_437 = arith.constant dense<0xFF800000> : vector<2x8xf32>
    %1010 = vector.multi_reduction <maximumf>, %1009, %cst_437 [2] : vector<2x8x8xf32> to vector<2x8xf32>
    %1011 = vector.shape_cast %1010 : vector<2x8xf32> to vector<2x8x1xf32>
    %1012 = vector.broadcast %1011 : vector<2x8x1xf32> to vector<2x8x8xf32>
    %1013 = arith.subf %1009, %1012 : vector<2x8x8xf32>
    %1014 = math.exp %1013 : vector<2x8x8xf32>
    %cst_438 = arith.constant dense<0.000000e+00> : vector<2x8xf32>
    %1015 = vector.multi_reduction <add>, %1014, %cst_438 [2] : vector<2x8x8xf32> to vector<2x8xf32>
    %1016 = vector.shape_cast %1015 : vector<2x8xf32> to vector<2x8x1xf32>
    %1017 = tpu.reciprocal %1016 {approx = true} : vector<2x8x1xf32> -> vector<2x8x1xf32>
    %1018 = vector.broadcast %1017 : vector<2x8x1xf32> to vector<2x8x8xf32>
    %1019 = arith.mulf %1014, %1018 : vector<2x8x8xf32>
    "tpu.trace_start"() <{level = 10 : i32, message = "bqk,bkd->bqd"}> : () -> ()
    %cst_439 = arith.constant dense<0.000000e+00> : vector<2x8x8xf32>
    %1020 = tpu.matmul %1019, %1005, %cst_439 {dimension_numbers = #tpu.dot_dimension_numbers<[2], [1], [1], [2], [0, 0, 0, 1, 1, 2], [0], [0]>} : vector<2x8x8xf32>, vector<2x8x8xf32>, vector<2x8x8xf32> -> vector<2x8x8xf32>
    "tpu.trace_stop"() : () -> ()
    %1021 = vector.shape_cast %1020 : vector<2x8x8xf32> to vector<16x8xf32>
    %c2_440 = arith.constant 2 : index
    %c0_441 = arith.constant 0 : index
    %c0_442 = arith.constant 0 : index
    %1022 = vector.load %arg51[%c2_440, %c0_441, %c0_442] : memref<4x8x32xf32, #tpu.memory_space<vmem>>, vector<1x8x32xf32>
    %1023 = vector.shape_cast %1022 : vector<1x8x32xf32> to vector<8x32xf32>
    %cst_443 = arith.constant dense<0.000000e+00> : vector<16x32xf32>
    %1024 = tpu.matmul %1021, %1023, %cst_443 {dimension_numbers = #tpu.dot_dimension_numbers<[1], [0], [0], [1], [0, 0, 1, 1], [], []>} : vector<16x8xf32>, vector<8x32xf32>, vector<16x32xf32> -> vector<16x32xf32>
    %1025 = arith.addf %999, %1024 : vector<16x32xf32>
    %1026 = vector.extract_strided_slice %936 {offsets = [0, 24], sizes = [16, 8], strides = [1, 1]} : vector<16x32xf32> to vector<16x8xf32>
    %1027 = vector.shape_cast %1026 : vector<16x8xf32> to vector<2x8x8xf32>
    %1028 = vector.extract_strided_slice %941 {offsets = [0, 24], sizes = [16, 8], strides = [1, 1]} : vector<16x32xf32> to vector<16x8xf32>
    %1029 = vector.shape_cast %1028 : vector<16x8xf32> to vector<2x8x8xf32>
    %1030 = vector.extract_strided_slice %946 {offsets = [0, 24], sizes = [16, 8], strides = [1, 1]} : vector<16x32xf32> to vector<16x8xf32>
    %1031 = vector.shape_cast %1030 : vector<16x8xf32> to vector<2x8x8xf32>
    "tpu.trace_start"() <{level = 10 : i32, message = "bqd,bkd->bqk"}> : () -> ()
    %cst_444 = arith.constant dense<0.000000e+00> : vector<2x8x8xf32>
    %1032 = tpu.matmul %1027, %1029, %cst_444 {dimension_numbers = #tpu.dot_dimension_numbers<[2], [2], [1], [1], [0, 0, 0, 1, 1, 1], [0], [0]>} : vector<2x8x8xf32>, vector<2x8x8xf32>, vector<2x8x8xf32> -> vector<2x8x8xf32>
    "tpu.trace_stop"() : () -> ()
    %cst_445 = arith.constant 0.353553385 : f32
    %1033 = vector.broadcast %cst_445 : f32 to vector<2x8x8xf32>
    %1034 = arith.mulf %1032, %1033 : vector<2x8x8xf32>
    %1035 = arith.addf %1034, %411 : vector<2x8x8xf32>
    %cst_446 = arith.constant dense<0xFF800000> : vector<2x8xf32>
    %1036 = vector.multi_reduction <maximumf>, %1035, %cst_446 [2] : vector<2x8x8xf32> to vector<2x8xf32>
    %1037 = vector.shape_cast %1036 : vector<2x8xf32> to vector<2x8x1xf32>
    %1038 = vector.broadcast %1037 : vector<2x8x1xf32> to vector<2x8x8xf32>
    %1039 = arith.subf %1035, %1038 : vector<2x8x8xf32>
    %1040 = math.exp %1039 : vector<2x8x8xf32>
    %cst_447 = arith.constant dense<0.000000e+00> : vector<2x8xf32>
    %1041 = vector.multi_reduction <add>, %1040, %cst_447 [2] : vector<2x8x8xf32> to vector<2x8xf32>
    %1042 = vector.shape_cast %1041 : vector<2x8xf32> to vector<2x8x1xf32>
    %1043 = tpu.reciprocal %1042 {approx = true} : vector<2x8x1xf32> -> vector<2x8x1xf32>
    %1044 = vector.broadcast %1043 : vector<2x8x1xf32> to vector<2x8x8xf32>
    %1045 = arith.mulf %1040, %1044 : vector<2x8x8xf32>
    "tpu.trace_start"() <{level = 10 : i32, message = "bqk,bkd->bqd"}> : () -> ()
    %cst_448 = arith.constant dense<0.000000e+00> : vector<2x8x8xf32>
    %1046 = tpu.matmul %1045, %1031, %cst_448 {dimension_numbers = #tpu.dot_dimension_numbers<[2], [1], [1], [2], [0, 0, 0, 1, 1, 2], [0], [0]>} : vector<2x8x8xf32>, vector<2x8x8xf32>, vector<2x8x8xf32> -> vector<2x8x8xf32>
    "tpu.trace_stop"() : () -> ()
    %1047 = vector.shape_cast %1046 : vector<2x8x8xf32> to vector<16x8xf32>
    %c3_449 = arith.constant 3 : index
    %c0_450 = arith.constant 0 : index
    %c0_451 = arith.constant 0 : index
    %1048 = vector.load %arg51[%c3_449, %c0_450, %c0_451] : memref<4x8x32xf32, #tpu.memory_space<vmem>>, vector<1x8x32xf32>
    %1049 = vector.shape_cast %1048 : vector<1x8x32xf32> to vector<8x32xf32>
    %cst_452 = arith.constant dense<0.000000e+00> : vector<16x32xf32>
    %1050 = tpu.matmul %1047, %1049, %cst_452 {dimension_numbers = #tpu.dot_dimension_numbers<[1], [0], [0], [1], [0, 0, 1, 1], [], []>} : vector<16x8xf32>, vector<8x32xf32>, vector<16x32xf32> -> vector<16x32xf32>
    %1051 = arith.addf %1025, %1050 : vector<16x32xf32>
    %c0_453 = arith.constant 0 : index
    %c0_454 = arith.constant 0 : index
    %1052 = vector.load %arg47[%c0_453, %c0_454] : memref<1x32xf32, #tpu.memory_space<vmem>>, vector<1x32xf32>
    %1053 = vector.broadcast %1052 : vector<1x32xf32> to vector<16x32xf32>
    %1054 = arith.addf %1051, %1053 : vector<16x32xf32>
    %1055 = arith.addf %904, %1054 : vector<16x32xf32>
    %c0_455 = arith.constant 0 : index
    %c0_456 = arith.constant 0 : index
    %1056 = vector.load %arg36[%c0_455, %c0_456] : memref<1x32xf32, #tpu.memory_space<vmem>>, vector<1x32xf32>
    %c0_457 = arith.constant 0 : index
    %c0_458 = arith.constant 0 : index
    %1057 = vector.load %arg37[%c0_457, %c0_458] : memref<1x32xf32, #tpu.memory_space<vmem>>, vector<1x32xf32>
    %cst_459 = arith.constant dense<0.000000e+00> : vector<16xf32>
    %1058 = vector.multi_reduction <add>, %1055, %cst_459 [1] : vector<16x32xf32> to vector<16xf32>
    %1059 = vector.shape_cast %1058 : vector<16xf32> to vector<16x1xf32>
    %cst_460 = arith.constant 3.200000e+01 : f32
    %1060 = vector.broadcast %cst_460 : f32 to vector<16x1xf32>
    %1061 = arith.divf %1059, %1060 : vector<16x1xf32>
    %1062 = vector.broadcast %1061 : vector<16x1xf32> to vector<16x32xf32>
    %1063 = arith.subf %1055, %1062 : vector<16x32xf32>
    %1064 = arith.mulf %1063, %1063 : vector<16x32xf32>
    %cst_461 = arith.constant dense<0.000000e+00> : vector<16xf32>
    %1065 = vector.multi_reduction <add>, %1064, %cst_461 [1] : vector<16x32xf32> to vector<16xf32>
    %1066 = vector.shape_cast %1065 : vector<16xf32> to vector<16x1xf32>
    %cst_462 = arith.constant 0.0322580636 : f32
    %1067 = vector.broadcast %cst_462 : f32 to vector<16x1xf32>
    %1068 = arith.mulf %1066, %1067 : vector<16x1xf32>
    %1069 = math.sqrt %1068 : vector<16x1xf32>
    %cst_463 = arith.constant 9.99999997E-7 : f32
    %1070 = vector.broadcast %cst_463 : f32 to vector<16x1xf32>
    %1071 = arith.addf %1069, %1070 : vector<16x1xf32>
    %1072 = tpu.reciprocal %1071 {approx = true} : vector<16x1xf32> -> vector<16x1xf32>
    %1073 = vector.broadcast %1061 : vector<16x1xf32> to vector<16x32xf32>
    %1074 = arith.subf %1055, %1073 : vector<16x32xf32>
    %1075 = vector.broadcast %1056 : vector<1x32xf32> to vector<16x32xf32>
    %1076 = arith.mulf %1075, %1074 : vector<16x32xf32>
    %1077 = vector.broadcast %1072 : vector<16x1xf32> to vector<16x32xf32>
    %1078 = arith.mulf %1076, %1077 : vector<16x32xf32>
    %1079 = vector.broadcast %1057 : vector<1x32xf32> to vector<16x32xf32>
    %1080 = arith.addf %1078, %1079 : vector<16x32xf32>
    %1081 = arith.truncf %1080 : vector<16x32xf32> to vector<16x32xbf16>
    %c0_464 = arith.constant 0 : index
    %c0_465 = arith.constant 0 : index
    %1082 = vector.load %arg30[%c0_464, %c0_465] : memref<32x64xbf16, #tpu.memory_space<vmem>>, vector<32x64xbf16>
    %cst_466 = arith.constant dense<0.000000e+00> : vector<16x64xf32>
    %1083 = tpu.matmul %1081, %1082, %cst_466 {dimension_numbers = #tpu.dot_dimension_numbers<[1], [0], [0], [1], [0, 0, 1, 1], [], []>} : vector<16x32xbf16>, vector<32x64xbf16>, vector<16x64xf32> -> vector<16x64xf32>
    %c0_467 = arith.constant 0 : index
    %c0_468 = arith.constant 0 : index
    %1084 = vector.load %arg28[%c0_467, %c0_468] : memref<1x64xf32, #tpu.memory_space<vmem>>, vector<1x64xf32>
    %1085 = vector.broadcast %1084 : vector<1x64xf32> to vector<16x64xf32>
    %1086 = arith.addf %1083, %1085 : vector<16x64xf32>
    %cst_469 = arith.constant 0.000000e+00 : f32
    %1087 = vector.broadcast %cst_469 : f32 to vector<16x64xf32>
    %1088 = arith.maximumf %1086, %1087 : vector<16x64xf32>
    %1089 = arith.truncf %1088 : vector<16x64xf32> to vector<16x64xbf16>
    %c0_470 = arith.constant 0 : index
    %c0_471 = arith.constant 0 : index
    %1090 = vector.load %arg31[%c0_470, %c0_471] : memref<64x32xbf16, #tpu.memory_space<vmem>>, vector<64x32xbf16>
    %cst_472 = arith.constant dense<0.000000e+00> : vector<16x32xf32>
    %1091 = tpu.matmul %1089, %1090, %cst_472 {dimension_numbers = #tpu.dot_dimension_numbers<[1], [0], [0], [1], [0, 0, 1, 1], [], []>} : vector<16x64xbf16>, vector<64x32xbf16>, vector<16x32xf32> -> vector<16x32xf32>
    %c0_473 = arith.constant 0 : index
    %c0_474 = arith.constant 0 : index
    %1092 = vector.load %arg29[%c0_473, %c0_474] : memref<1x32xf32, #tpu.memory_space<vmem>>, vector<1x32xf32>
    %1093 = vector.broadcast %1092 : vector<1x32xf32> to vector<16x32xf32>
    %1094 = arith.addf %1091, %1093 : vector<16x32xf32>
    %1095 = arith.addf %1055, %1094 : vector<16x32xf32>
    %c0_475 = arith.constant 0 : index
    %c0_476 = arith.constant 0 : index
    %1096 = vector.load %arg54[%c0_475, %c0_476] : memref<1x32xf32, #tpu.memory_space<vmem>>, vector<1x32xf32>
    %c0_477 = arith.constant 0 : index
    %c0_478 = arith.constant 0 : index
    %1097 = vector.load %arg55[%c0_477, %c0_478] : memref<1x32xf32, #tpu.memory_space<vmem>>, vector<1x32xf32>
    %cst_479 = arith.constant dense<0.000000e+00> : vector<16xf32>
    %1098 = vector.multi_reduction <add>, %1095, %cst_479 [1] : vector<16x32xf32> to vector<16xf32>
    %1099 = vector.shape_cast %1098 : vector<16xf32> to vector<16x1xf32>
    %cst_480 = arith.constant 3.200000e+01 : f32
    %1100 = vector.broadcast %cst_480 : f32 to vector<16x1xf32>
    %1101 = arith.divf %1099, %1100 : vector<16x1xf32>
    %1102 = vector.broadcast %1101 : vector<16x1xf32> to vector<16x32xf32>
    %1103 = arith.subf %1095, %1102 : vector<16x32xf32>
    %1104 = arith.mulf %1103, %1103 : vector<16x32xf32>
    %cst_481 = arith.constant dense<0.000000e+00> : vector<16xf32>
    %1105 = vector.multi_reduction <add>, %1104, %cst_481 [1] : vector<16x32xf32> to vector<16xf32>
    %1106 = vector.shape_cast %1105 : vector<16xf32> to vector<16x1xf32>
    %cst_482 = arith.constant 0.0322580636 : f32
    %1107 = vector.broadcast %cst_482 : f32 to vector<16x1xf32>
    %1108 = arith.mulf %1106, %1107 : vector<16x1xf32>
    %1109 = math.sqrt %1108 : vector<16x1xf32>
    %cst_483 = arith.constant 9.99999997E-7 : f32
    %1110 = vector.broadcast %cst_483 : f32 to vector<16x1xf32>
    %1111 = arith.addf %1109, %1110 : vector<16x1xf32>
    %1112 = tpu.reciprocal %1111 {approx = true} : vector<16x1xf32> -> vector<16x1xf32>
    %1113 = vector.broadcast %1101 : vector<16x1xf32> to vector<16x32xf32>
    %1114 = arith.subf %1095, %1113 : vector<16x32xf32>
    %1115 = vector.broadcast %1096 : vector<1x32xf32> to vector<16x32xf32>
    %1116 = arith.mulf %1115, %1114 : vector<16x32xf32>
    %1117 = vector.broadcast %1112 : vector<16x1xf32> to vector<16x32xf32>
    %1118 = arith.mulf %1116, %1117 : vector<16x32xf32>
    %1119 = vector.broadcast %1097 : vector<1x32xf32> to vector<16x32xf32>
    %1120 = arith.addf %1118, %1119 : vector<16x32xf32>
    %1121 = arith.truncf %1120 : vector<16x32xf32> to vector<16x32xbf16>
    %c0_484 = arith.constant 0 : index
    %c0_485 = arith.constant 0 : index
    %1122 = vector.load %arg91[%c0_484, %c0_485] : memref<32x16xbf16, #tpu.memory_space<vmem>>, vector<32x16xbf16>
    %cst_486 = arith.constant dense<0.000000e+00> : vector<16x16xf32>
    %1123 = tpu.matmul %1121, %1122, %cst_486 {dimension_numbers = #tpu.dot_dimension_numbers<[1], [0], [0], [1], [0, 0, 1, 1], [], []>} : vector<16x32xbf16>, vector<32x16xbf16>, vector<16x16xf32> -> vector<16x16xf32>
    %c0_487 = arith.constant 0 : index
    %c0_488 = arith.constant 0 : index
    %1124 = vector.load %arg90[%c0_487, %c0_488] : memref<1x16xf32, #tpu.memory_space<vmem>>, vector<1x16xf32>
    %1125 = vector.broadcast %1124 : vector<1x16xf32> to vector<16x16xf32>
    %1126 = arith.addf %1123, %1125 : vector<16x16xf32>
    %cst_489 = arith.constant dense<0xFF800000> : vector<16xf32>
    %1127 = vector.multi_reduction <maximumf>, %1126, %cst_489 [1] : vector<16x16xf32> to vector<16xf32>
    %1128 = vector.shape_cast %1127 : vector<16xf32> to vector<16x1xf32>
    %1129 = vector.broadcast %1128 : vector<16x1xf32> to vector<16x16xf32>
    %1130 = arith.subf %1126, %1129 : vector<16x16xf32>
    %1131 = math.exp %1130 : vector<16x16xf32>
    %cst_490 = arith.constant dense<0.000000e+00> : vector<16xf32>
    %1132 = vector.multi_reduction <add>, %1131, %cst_490 [1] : vector<16x16xf32> to vector<16xf32>
    %1133 = vector.shape_cast %1132 : vector<16xf32> to vector<16x1xf32>
    %1134 = math.log %1133 : vector<16x1xf32>
    %1135 = vector.broadcast %1134 : vector<16x1xf32> to vector<16x16xf32>
    %1136 = arith.subf %1130, %1135 : vector<16x16xf32>
    %1137 = vector.shape_cast %1136 : vector<16x16xf32> to vector<2x8x16xf32>
    %c0_491 = arith.constant 0 : index
    %c0_492 = arith.constant 0 : index
    %c0_493 = arith.constant 0 : index
    %1138 = vector.load %arg95[%c0_491, %c0_492, %c0_493] : memref<2x8x16xf32, #tpu.memory_space<vmem>>, vector<2x8x16xf32>
    tpu.vector_store %arg95[%c0_491, %c0_492, %c0_493], %1137 {strides = array<i32>} : memref<2x8x16xf32, #tpu.memory_space<vmem>>, vector<2x8x16xf32>,
    return
  }
}

</mosaic_0001>

<bundles_post_ra>
// kernel: encoder_decoder_forward.1
= control target key start
LH: loop header
LB: loop body
LE: loop exit
PB: predicated region body
PF: predicated region fallthrough
CT: control target
= control target key end

     0   :  { %s16195_s6 = smov 1   ;;  %s16196_s10 = smov 2   ;;  %s18401_s0 = inlined_call_operand.smem [shape: u32[96], index: -1, kind: input, shape index: {}] }
   0x1   :  { %s16333_s5 = sld [smem:[%s18401_s0]]   ;;  %s16197_s14 = smov 3  }
   0x2   :  { %s16338_s9 = sld [smem:[%s18401_s0 + %s16195_s6]]   ;;  %s16198_s18 = smov 4  }
   0x3   :  { %s16343_s13 = sld [smem:[%s18401_s0 + %s16196_s10]]   ;;  %s16199_s22 = smov 5  }
   0x4   :  { %s16348_s17 = sld [smem:[%s18401_s0 + %s16197_s14]]   ;;  %s16200_s26 = smov 6  }
   0x5   :  { %s16353_s21 = sld [smem:[%s18401_s0 + %s16198_s18]]   ;;  %s16201_s30 = smov 7  }
   0x6   :  { %s16358_s25 = sld [smem:[%s18401_s0 + %s16199_s22]]   ;;  %s16202_s4 = smov 8  }
   0x7   :  { %18450 = sst [smem:[#allocation60_spill]] %s16333_s5  ;;  %s16203_s10 = smov 9  }
   0x8   :  { %18451 = sst [smem:[#allocation61_spill]] %s16338_s9  ;;  %s16204_s15 = smov 10  }
   0x9   :  { %18452 = sst [smem:[#allocation62_spill]] %s16343_s13  ;;  %s16205_s20 = smov 11  }
   0xa   :  { %18453 = sst [smem:[#allocation63_spill]] %s16348_s17  ;;  %s16207_s1 = smov 13  }
   0xb   :  { %18454 = sst [smem:[#allocation64_spill]] %s16353_s21  ;;  %s16208_s7 = smov 14  }
   0xc   :  { %18455 = sst [smem:[#allocation65_spill]] %s16358_s25  ;;  %s16210_s22 = smov 16  }
   0xd   :  { %s16363_s29 = sld [smem:[%s18401_s0 + %s16200_s26]]   ;;  %s16206_s26 = smov 12  }
   0xe   :  { %s16368_s3 = sld [smem:[%s18401_s0 + %s16201_s30]]   ;;  %s16211_s28 = smov 17  }
   0xf   :  { %s16373_s8 = sld [smem:[%s18401_s0 + %s16202_s4]]  }
  0x10   :  { %s16378_s14 = sld [smem:[%s18401_s0 + %s16203_s10]]  }
  0x11   :  { %s16383_s19 = sld [smem:[%s18401_s0 + %s16204_s15]]   ;;  %s16209_s15 = smov 15  }
  0x12   :  { %s16388_s24 = sld [smem:[%s18401_s0 + %s16205_s20]]  }
  0x13   :  { %18456 = sst [smem:[#allocation66_spill]] %s16363_s29 }
  0x14   :  { %18457 = sst [smem:[#allocation67_spill]] %s16368_s3 }
  0x15   :  { %18458 = sst [smem:[#allocation68_spill]] %s16373_s8 }
  0x16   :  { %18459 = sst [smem:[#allocation69_spill]] %s16378_s14 }
  0x17   :  { %18460 = sst [smem:[#allocation70_spill]] %s16383_s19 }
  0x18   :  { %18461 = sst [smem:[#allocation71_spill]] %s16388_s24 }
  0x19   :  { %s16393_s30 = sld [smem:[%s18401_s0 + %s16206_s26]]  }
  0x1a   :  { %s16398_s6 = sld [smem:[%s18401_s0 + %s16207_s1]]  }
  0x1b   :  { %s16403_s12 = sld [smem:[%s18401_s0 + %s16208_s7]]   ;;  %s16212_s7 = smov 18  }
  0x1c   :  { %s16408_s20 = sld [smem:[%s18401_s0 + %s16209_s15]]   ;;  %s16213_s15 = smov 19  }
  0x1d   :  { %s16413_s27 = sld [smem:[%s18401_s0 + %s16210_s22]]   ;;  %s16214_s22 = smov 20  }
  0x1e   :  { %s16418_s4 = sld [smem:[%s18401_s0 + %s16211_s28]]   ;;  %s16215_s28 = smov 21  }
  0x1f   :  { %18462 = sst [smem:[#allocation72_spill]] %s16393_s30 }
  0x20   :  { %18463 = sst [smem:[#allocation73_spill]] %s16398_s6 }
  0x21   :  { %18464 = sst [smem:[#allocation74_spill]] %s16403_s12 }
  0x22   :  { %18465 = sst [smem:[#allocation75_spill]] %s16408_s20 }
  0x23   :  { %18466 = sst [smem:[#allocation76_spill]] %s16413_s27 }
  0x24   :  { %18467 = sst [smem:[#allocation77_spill]] %s16418_s4 }
  0x25   :  { %s16423_s17 = sld [smem:[%s18401_s0 + %s16212_s7]]   ;;  %s16216_s7 = smov 22  }
  0x26   :  { %s16428_s13 = sld [smem:[%s18401_s0 + %s16213_s15]]   ;;  %s16217_s15 = smov 23  }
  0x27   :  { %s16433_s24 = sld [smem:[%s18401_s0 + %s16214_s22]]   ;;  %s16218_s22 = smov 24  }
  0x28   :  { %s16438_s19 = sld [smem:[%s18401_s0 + %s16215_s28]]   ;;  %s16219_s28 = smov 25  }
  0x29   :  { %s16443_s25 = sld [smem:[%s18401_s0 + %s16216_s7]]   ;;  %s16220_s7 = smov 26  }
  0x2a   :  { %s16448_s21 = sld [smem:[%s18401_s0 + %s16217_s15]]   ;;  %s16221_s15 = smov 27  }
  0x2b   :  { %18468 = sst [smem:[#allocation78_spill]] %s16423_s17 }
  0x2c   :  { %18469 = sst [smem:[#allocation79_spill]] %s16428_s13 }
  0x2d   :  { %18470 = sst [smem:[#allocation80_spill]] %s16433_s24 }
  0x2e   :  { %18471 = sst [smem:[#allocation81_spill]] %s16438_s19 }
  0x2f   :  { %18472 = sst [smem:[#allocation82_spill]] %s16443_s25 }
  0x30   :  { %18473 = sst [smem:[#allocation83_spill]] %s16448_s21 }
  0x31   :  { %s16453_s5 = sld [smem:[%s18401_s0 + %s16218_s22]]   ;;  %s16222_s22 = smov 28  }
  0x32   :  { %s16458_s19 = sld [smem:[%s18401_s0 + %s16219_s28]]   ;;  %s16223_s28 = smov 29  }
  0x33   :  { %s16463_s25 = sld [smem:[%s18401_s0 + %s16220_s7]]   ;;  %s16224_s7 = smov 30  }
  0x34   :  { %s16468_s21 = sld [smem:[%s18401_s0 + %s16221_s15]]   ;;  %s16225_s15 = smov 31  }
  0x35   :  { %s16473_s24 = sld [smem:[%s18401_s0 + %s16222_s22]]   ;;  %s16226_s22 = smov 32  }
  0x36   :  { %s16483_s14 = sld [smem:[%s18401_s0 + %s16224_s7]]   ;;  %s16228_s7 = smov 34  }
  0x37   :  { %18474 = sst [smem:[#allocation84_spill]] %s16453_s5 }
  0x38   :  { %18475 = sst [smem:[#allocation85_spill]] %s16458_s19 }
  0x39   :  { %18476 = sst [smem:[#allocation86_spill]] %s16463_s25 }
  0x3a   :  { %18477 = sst [smem:[#allocation87_spill]] %s16468_s21 }
  0x3b   :  { %18478 = sst [smem:[#allocation88_spill]] %s16473_s24 }
  0x3c   :  { %s16478_s19 = sld [smem:[%s18401_s0 + %s16223_s28]]   ;;  %s16227_s28 = smov 33  }
  0x3d   :  { %18480 = sst [smem:[#allocation90_spill]] %s16483_s14 }
  0x3e   :  { %s16488_s21 = sld [smem:[%s18401_s0 + %s16225_s15]]   ;;  %s16229_s15 = smov 35  }
  0x3f   :  { %s16493_s24 = sld [smem:[%s18401_s0 + %s16226_s22]]   ;;  %s16230_s22 = smov 36  }
  0x40   :  { %s16503_s14 = sld [smem:[%s18401_s0 + %s16228_s7]]   ;;  %s16232_s7 = smov 38  }
  0x42   :  { %18479 = sst [smem:[#allocation89_spill]] %s16478_s19 }
  0x43   :  { %s16498_s19 = sld [smem:[%s18401_s0 + %s16227_s28]]   ;;  %s16231_s28 = smov 37  }
  0x44   :  { %18481 = sst [smem:[#allocation91_spill]] %s16488_s21 }
  0x45   :  { %18482 = sst [smem:[#allocation92_spill]] %s16493_s24 }
  0x46   :  { %18484 = sst [smem:[#allocation94_spill]] %s16503_s14 }
  0x47   :  { %s16508_s21 = sld [smem:[%s18401_s0 + %s16229_s15]]   ;;  %s16233_s15 = smov 39  }
  0x48   :  { %s16513_s24 = sld [smem:[%s18401_s0 + %s16230_s22]]   ;;  %s16234_s22 = smov 40  }
  0x49   :  { %18483 = sst [smem:[#allocation93_spill]] %s16498_s19 }
  0x4a   :  { %s16518_s19 = sld [smem:[%s18401_s0 + %s16231_s28]]   ;;  %s16235_s28 = smov 41  }
  0x4b   :  { %s16523_s14 = sld [smem:[%s18401_s0 + %s16232_s7]]   ;;  %s16236_s7 = smov 42  }
  0x4d   :  { %18485 = sst [smem:[#allocation95_spill]] %s16508_s21 }
  0x4e   :  { %18486 = sst [smem:[#allocation96_spill]] %s16513_s24 }
  0x4f   :  { %s16528_s21 = sld [smem:[%s18401_s0 + %s16233_s15]]   ;;  %s16237_s15 = smov 43  }
  0x50   :  { %18487 = sst [smem:[#allocation97_spill]] %s16518_s19 }
  0x51   :  { %18488 = sst [smem:[#allocation98_spill]] %s16523_s14 }
  0x52   :  { %s16533_s24 = sld [smem:[%s18401_s0 + %s16234_s22]]   ;;  %s16238_s22 = smov 44  }
  0x53   :  { %s16538_s19 = sld [smem:[%s18401_s0 + %s16235_s28]]   ;;  %s16239_s28 = smov 45  }
  0x54   :  { %s16543_s14 = sld [smem:[%s18401_s0 + %s16236_s7]]   ;;  %s16240_s7 = smov 46  }
  0x55   :  { %18489 = sst [smem:[#allocation99_spill]] %s16528_s21 }
  0x56   :  { %s16548_s21 = sld [smem:[%s18401_s0 + %s16237_s15]]   ;;  %s16241_s15 = smov 47  }
  0x58   :  { %18490 = sst [smem:[#allocation100_spill]] %s16533_s24 }
  0x59   :  { %18491 = sst [smem:[#allocation101_spill]] %s16538_s19 }
  0x5a   :  { %18492 = sst [smem:[#allocation102_spill]] %s16543_s14 }
  0x5b   :  { %s16553_s24 = sld [smem:[%s18401_s0 + %s16238_s22]]   ;;  %s16242_s22 = smov 48  }
  0x5c   :  { %18493 = sst [smem:[#allocation103_spill]] %s16548_s21 }
  0x5d   :  { %s16558_s19 = sld [smem:[%s18401_s0 + %s16239_s28]]   ;;  %s16243_s28 = smov 49  }
  0x5e   :  { %s16563_s14 = sld [smem:[%s18401_s0 + %s16240_s7]]   ;;  %s16244_s7 = smov 50  }
  0x5f   :  { %s16568_s21 = sld [smem:[%s18401_s0 + %s16241_s15]]   ;;  %s16245_s15 = smov 51  }
  0x61   :  { %18494 = sst [smem:[#allocation104_spill]] %s16553_s24 }
  0x62   :  { %s16573_s24 = sld [smem:[%s18401_s0 + %s16242_s22]]   ;;  %s16246_s22 = smov 52  }
  0x63   :  { %18495 = sst [smem:[#allocation105_spill]] %s16558_s19 }
  0x64   :  { %18496 = sst [smem:[#allocation106_spill]] %s16563_s14 }
  0x65   :  { %18497 = sst [smem:[#allocation107_spill]] %s16568_s21 }
  0x66   :  { %s16578_s19 = sld [smem:[%s18401_s0 + %s16243_s28]]   ;;  %s16247_s28 = smov 53  }
  0x67   :  { %s16583_s14 = sld [smem:[%s18401_s0 + %s16244_s7]]   ;;  %s16248_s7 = smov 54  }
  0x68   :  { %s16588_s21 = sld [smem:[%s18401_s0 + %s16245_s15]]   ;;  %s16249_s15 = smov 55  }
  0x69   :  { %s16593_s8 = sld [smem:[%s18401_s0 + %s16246_s22]]   ;;  %s16250_s22 = smov 56  }
  0x6a   :  { %s16598_s25 = sld [smem:[%s18401_s0 + %s16247_s28]]   ;;  %s16251_s28 = smov 57  }
  0x6d   :  { %18498 = sst [smem:[#allocation108_spill]] %s16583_s14 }
  0x6e   :  { %18499 = sst [smem:[#allocation109_spill]] %s16588_s21 }
  0x6f   :  { %18500 = sst [smem:[#allocation110_spill]] %s16593_s8 }
  0x70   :  { %18501 = sst [smem:[#allocation111_spill]] %s16598_s25 }
  0x71   :  { %s16603_s14 = sld [smem:[%s18401_s0 + %s16248_s7]]   ;;  %s16252_s7 = smov 58  }
  0x72   :  { %s16608_s21 = sld [smem:[%s18401_s0 + %s16249_s15]]   ;;  %s16253_s15 = smov 59  }
  0x73   :  { %s16613_s8 = sld [smem:[%s18401_s0 + %s16250_s22]]   ;;  %s16254_s22 = smov 60  }
  0x74   :  { %s16618_s25 = sld [smem:[%s18401_s0 + %s16251_s28]]   ;;  %s16255_s28 = smov 61  }
  0x75   :  { %s16623_s5 = sld [smem:[%s18401_s0 + %s16252_s7]]   ;;  %s16256_s7 = smov 62  }
  0x76   :  { %s16628_s6 = sld [smem:[%s18401_s0 + %s16253_s15]]   ;;  %s16257_s15 = smov 63  }
  0x77   :  { %18502 = sst [smem:[#allocation112_spill]] %s16603_s14 }
  0x78   :  { %s16633_s4 = sld [smem:[%s18401_s0 + %s16254_s22]]   ;;  %s16258_s22 = smov 64  }
  0x79   :  { %18503 = sst [smem:[#allocation113_spill]] %s16613_s8 }
  0x7a   :  { %s16638_s20 = sld [smem:[%s18401_s0 + %s16255_s28]]   ;;  %s16259_s28 = smov 65  }
  0x7b   :  { %18504 = sst [smem:[#allocation114_spill]] %s16623_s5 }
  0x7c   :  { %s16643_s12 = sld [smem:[%s18401_s0 + %s16256_s7]]   ;;  %s16260_s7 = smov 66  }
  0x7d   :  { %s16648_s30 = sld [smem:[%s18401_s0 + %s16257_s15]]   ;;  %s16261_s15 = smov 67  }
  0x7e   :  { %18505 = sst [smem:[#allocation115_spill]] %s16633_s4 }
  0x7f   :  { %s16653_s13 = sld [smem:[%s18401_s0 + %s16258_s22]]   ;;  %s16262_s22 = smov 68  }
  0x80   :  { %18506 = sst [smem:[#allocation116_spill]] %s16638_s20 }
  0x81   :  { %s16658_s27 = sld [smem:[%s18401_s0 + %s16259_s28]]   ;;  %s16263_s28 = smov 69  }
  0x82   :  { %18507 = sst [smem:[#allocation117_spill]] %s16643_s12 }
  0x83   :  { %18508 = sst [smem:[#allocation118_spill]] %s16648_s30 }
  0x84   :  { %s16663_s3 = sld [smem:[%s18401_s0 + %s16260_s7]]   ;;  %s16264_s7 = smov 70  }
  0x85   :  { %18509 = sst [smem:[#allocation119_spill]] %s16653_s13 }
  0x86   :  { %s16668_s17 = sld [smem:[%s18401_s0 + %s16261_s15]]   ;;  %s16265_s15 = smov 71  }
  0x87   :  { %s16673_s29 = sld [smem:[%s18401_s0 + %s16262_s22]]   ;;  %s16266_s22 = smov 72  }
  0x88   :  { %s16678_s20 = sld [smem:[%s18401_s0 + %s16263_s28]]   ;;  %s16267_s28 = smov 73  }
  0x89   :  { %s16693_s9 = sld [smem:[%s18401_s0 + %s16266_s22]]   ;;  %s16270_s22 = smov 76  }
  0x8a   :  { %18510 = sst [smem:[#allocation120_spill]] %s16663_s3 }
  0x8b   :  { %s16683_s3 = sld [smem:[%s18401_s0 + %s16264_s7]]   ;;  %s16268_s7 = smov 74  }
  0x8c   :  { %18511 = sst [smem:[#allocation121_spill]] %s16668_s17 }
  0x8d   :  { %18512 = sst [smem:[#allocation122_spill]] %s16673_s29 }
  0x8e   :  { %s16688_s17 = sld [smem:[%s18401_s0 + %s16265_s15]]   ;;  %s16269_s15 = smov 75  }
  0x8f   :  { %18514 = sst [smem:[#allocation124_spill]] %s16693_s9 }
  0x90   :  { %s16698_s30 = sld [smem:[%s18401_s0 + %s16267_s28]]   ;;  %s16271_s28 = smov 77  }
  0x91   :  { %18513 = sst [smem:[#allocation123_spill]] %s16683_s3 }
  0x92   :  { %s16703_s4 = sld [smem:[%s18401_s0 + %s16268_s7]]   ;;  %s16272_s7 = smov 78  }
  0x93   :  { %s16708_s12 = sld [smem:[%s18401_s0 + %s16269_s15]]   ;;  %s16273_s15 = smov 79  }
  0x94   :  { %s16713_s9 = sld [smem:[%s18401_s0 + %s16270_s22]]   ;;  %s16274_s22 = smov 80  }
  0x95   :  { %s16718_s3 = sld [smem:[%s18401_s0 + %s16271_s28]]   ;;  %s16275_s28 = smov 81  }
  0x96   :  { %s16728_s29 = sld [smem:[%s18401_s0 + %s16273_s15]]   ;;  %s16277_s15 = smov 83  }
  0x98   :  { %18515 = sst [smem:[#allocation125_spill]] %s16703_s4 }
  0x99   :  { %s16723_s4 = sld [smem:[%s18401_s0 + %s16272_s7]]   ;;  %s16276_s7 = smov 82  }
  0x9a   :  { %18516 = sst [smem:[#allocation126_spill]] %s16713_s9 }
  0x9b   :  { %18517 = sst [smem:[#allocation127_spill]] %s16718_s3 }
  0x9c   :  { %18519 = sst [smem:[#allocation129_spill]] %s16728_s29 }
  0x9d   :  { %s16733_s9 = sld [smem:[%s18401_s0 + %s16274_s22]]   ;;  %s16278_s22 = smov 84  }
  0x9e   :  { %s16738_s3 = sld [smem:[%s18401_s0 + %s16275_s28]]   ;;  %s16279_s28 = smov 85  }
  0x9f   :  { %18518 = sst [smem:[#allocation128_spill]] %s16723_s4 }
  0xa0   :  { %s16743_s4 = sld [smem:[%s18401_s0 + %s16276_s7]]   ;;  %s16280_s7 = smov 86  }
  0xa1   :  { %s16748_s29 = sld [smem:[%s18401_s0 + %s16277_s15]]   ;;  %s16281_s15 = smov 87  }
  0xa2   :  { %s16758_s13 = sld [smem:[%s18401_s0 + %s16279_s28]]   ;;  %s16283_s28 = smov 89  }
  0xa3   :  { %18520 = sst [smem:[#allocation130_spill]] %s16733_s9 }
  0xa4   :  { %s16753_s9 = sld [smem:[%s18401_s0 + %s16278_s22]]   ;;  %s16282_s22 = smov 88  }
  0xa5   :  { %s16778_s5 = sld [smem:[%s18401_s0 + %s16283_s28]]   ;;  %s16287_s28 = smov 93  }
  0xa6   :  { %18521 = sst [smem:[#allocation131_spill]] %s16743_s4 }
  0xa7   :  { %18522 = sst [smem:[#allocation132_spill]] %s16748_s29 }
  0xa8   :  { %s16763_s4 = sld [smem:[%s18401_s0 + %s16280_s7]]   ;;  %s16284_s7 = smov 90  }
  0xa9   :  { %s16768_s29 = sld [smem:[%s18401_s0 + %s16281_s15]]   ;;  %s16285_s15 = smov 91  }
  0xaa   :  { %18523 = sst [smem:[#allocation133_spill]] %s16753_s9 }
  0xab   :  { %s16773_s9 = sld [smem:[%s18401_s0 + %s16282_s22]]   ;;  %s16286_s22 = smov 92  }
  0xac   :  { %s16788_s8 = sld [smem:[%s18401_s0 + %s16285_s15]]   ;;  %s16289_s15 = smov 95  }
  0xad   :  { %s16798_s14 = sld [smem:[%s18401_s0 + %s16287_s28]]  }
  0xae   :  { %18524 = sst [smem:[#allocation134_spill]] %s16763_s4 }
  0xaf   :  { %s16783_s4 = sld [smem:[%s18401_s0 + %s16284_s7]]   ;;  %s16288_s7 = smov 94  }
  0xb1   :  { %18525 = sst [smem:[#allocation135_spill]] %s16773_s9 }
  0xb2   :  { %18527 = sst [smem:[#allocation137_spill]] %s16788_s8 }
  0xb3   :  { %s16793_s9 = sld [smem:[%s18401_s0 + %s16286_s22]]  }
  0xb4   :  { %s16808_s8 = sld [smem:[%s18401_s0 + %s16289_s15]]  }
  0xb5   :  { %18526 = sst [smem:[#allocation136_spill]] %s16783_s4 }
  0xb6   :  { %s16803_s4 = sld [smem:[%s18401_s0 + %s16288_s7]]  }
  0xb7   :  { %196 = vsyncpa [#allocation3], 0 }
  0xb8   :  { %197 = vsyncpa [#allocation6], 0 }
  0xb9   :  { %198 = vsyncpa [#allocation9], 0 }
  0xba   :  { %199 = vsyncpa [#allocation12], 0 }
  0xbb   :  { %200 = vsyncpa [#allocation15], 0 }
  0xbc   :  { %201 = vsyncpa [#allocation18], 0 }
  0xbd   :  { %202 = vsyncpa [#allocation21], 0 }
  0xbe   :  { %203 = vsyncpa [#allocation24], 0 }
  0xbf   :  { %204 = vsyncpa [#allocation27], 0 }
  0xc0   :  { %205 = vsyncpa [#allocation30], 0 }
  0xc1   :  { %206 = vsyncpa [#allocation33], 0 }
  0xc2   :  { %207 = vsyncpa [#allocation36], 0 }
  0xc3   :  { %208 = vsyncpa [#allocation39], 0 }
  0xc4   :  { %209 = vsyncpa [#allocation42], 0 }
  0xc5   :  { %210 = vsyncpa [#allocation4], 0  ;;  %s16290_s0 = smov [#allocation5]   ;;  %s16291_s23 = smov [#allocation8]  }
  0xc6   :  { %s323_s22 = sshll.u32 %s16290_s0, 4  ;;  %s351_s26 = sshll.u32 %s16291_s23, 4  ;;  %s324_s22 = int_to_ptr.vmem [resolvable:$true] %s323_s22  ;;  %s352_s26 = int_to_ptr.vmem [resolvable:$true] %s351_s26 }
  0xc7   :  { %s15549_s28 = scalar_lea.hbm %s16578_s19, 16 }
  0xc8   :  { %p15550_p0 = scmp.ne.s32.totalorder %s16578_s19, %s15549_s28  ;;  %p15553_p1 = scmp.lt.u32.totalorder %s15549_s28, %s16578_s19 }
  0xca   :  { %p15555_p2 = pnand %p15553_p1, %p15550_p0 }
  0xcc   :  { %15558 = shalt.err (!%p15555_p2)
}
  0xcd   :  { %s15559_s1 = scalar_lea.vmem %s324_s22, 16  ;;  %s15563_s2 = scalar_lea.vmem %s324_s22, 32 }
  0xce   :  { %p15560_p3 = scmp.ne.s32.totalorder %s324_s22, %s15559_s1  ;;  %p15564_p4 = scmp.lt.s32.totalorder %s324_s22, %s324_s22 }
  0xcf   :  { %p15565_p5 = scmp.lt.s32.totalorder %s15563_s2, %s15559_s1 }
  0xd1   :  { %p15566_p6 = por %p15565_p5, %p15564_p4 }
  0xd3   :  { %p15567_p7 = pnand %p15566_p6, %p15560_p3 }
  0xd5   :  { %15570 = shalt.err (!%p15567_p7)
}
  0xd6   :  { %326 = dma.hbm_to_vmem [thread:$0]  %s16578_s19, 16, %s324_s22, [#allocation6]  }
  0xd7   :  { %s15571_s7 = scalar_lea.hbm %s16608_s21, 16 }
  0xd8   :  { %p15572_p8 = scmp.ne.s32.totalorder %s16608_s21, %s15571_s7  ;;  %p15575_p9 = scmp.lt.u32.totalorder %s15571_s7, %s16608_s21 }
  0xda   :  { %p15577_p10 = pnand %p15575_p9, %p15572_p8 }
  0xdc   :  { %15580 = shalt.err (!%p15577_p10)
}
  0xdd   :  { %s15581_s10 = scalar_lea.vmem %s352_s26, 16  ;;  %s15585_s11 = scalar_lea.vmem %s352_s26, 32 }
  0xde   :  { %p15582_p11 = scmp.ne.s32.totalorder %s352_s26, %s15581_s10  ;;  %p15586_p12 = scmp.lt.s32.totalorder %s352_s26, %s352_s26 }
  0xdf   :  { %p15587_p13 = scmp.lt.s32.totalorder %s15585_s11, %s15581_s10 }
  0xe1   :  { %p15588_p0 = por %p15587_p13, %p15586_p12 }
  0xe3   :  { %p15589_p1 = pnand %p15588_p0, %p15582_p11 }
  0xe5   :  { %15592 = shalt.err (!%p15589_p1)
}
  0xe6   :  { %354 = dma.hbm_to_vmem [thread:$0]  %s16608_s21, 16, %s352_s26, [#allocation9]  }
  0xe7   :  { %s16292_s15 = smov [#allocation11]   ;;  %s16293_s16 = smov [#allocation14]  }
  0xe8   :  { %s371_s19 = sshll.u32 %s16292_s15, 4  ;;  %s391_s18 = sshll.u32 %s16293_s16, 4  ;;  %s372_s19 = int_to_ptr.vmem [resolvable:$true] %s371_s19  ;;  %s392_s18 = int_to_ptr.vmem [resolvable:$true] %s391_s18 }
  0xe9   :  { %s15593_s0 = scalar_lea.hbm %s16618_s25, 16 }
  0xea   :  { %p15594_p2 = scmp.ne.s32.totalorder %s16618_s25, %s15593_s0  ;;  %p15597_p3 = scmp.lt.u32.totalorder %s15593_s0, %s16618_s25 }
  0xec   :  { %p15599_p4 = pnand %p15597_p3, %p15594_p2 }
  0xee   :  { %15602 = shalt.err (!%p15599_p4)
}
  0xef   :  { %s15603_s22 = scalar_lea.vmem %s372_s19, 16  ;;  %s15607_s23 = scalar_lea.vmem %s372_s19, 32 }
  0xf0   :  { %p15604_p5 = scmp.ne.s32.totalorder %s372_s19, %s15603_s22  ;;  %p15608_p6 = scmp.lt.s32.totalorder %s372_s19, %s372_s19 }
  0xf1   :  { %p15609_p7 = scmp.lt.s32.totalorder %s15607_s23, %s15603_s22 }
  0xf3   :  { %p15610_p8 = por %p15609_p7, %p15608_p6 }
  0xf5   :  { %p15611_p9 = pnand %p15610_p8, %p15604_p5 }
  0xf7   :  { %15614 = shalt.err (!%p15611_p9)
}
  0xf8   :  { %374 = dma.hbm_to_vmem [thread:$0]  %s16618_s25, 16, %s372_s19, [#allocation12]  }
  0xf9   :  { %s15615_s21 = scalar_lea.hbm %s16628_s6, 16 }
  0xfa   :  { %p15616_p10 = scmp.ne.s32.totalorder %s16628_s6, %s15615_s21  ;;  %p15619_p11 = scmp.lt.u32.totalorder %s15615_s21, %s16628_s6 }
  0xfc   :  { %p15621_p12 = pnand %p15619_p11, %p15616_p10 }
  0xfe   :  { %15624 = shalt.err (!%p15621_p12)
}
  0xff   :  { %s15625_s26 = scalar_lea.vmem %s392_s18, 16  ;;  %s15629_s28 = scalar_lea.vmem %s392_s18, 32 }
 0x100   :  { %p15626_p13 = scmp.ne.s32.totalorder %s392_s18, %s15625_s26  ;;  %p15630_p0 = scmp.lt.s32.totalorder %s392_s18, %s392_s18 }
 0x101   :  { %p15631_p1 = scmp.lt.s32.totalorder %s15629_s28, %s15625_s26 }
 0x103   :  { %p15632_p2 = por %p15631_p1, %p15630_p0 }
 0x105   :  { %p15633_p3 = pnand %p15632_p2, %p15626_p13 }
 0x107   :  { %15636 = shalt.err (!%p15633_p3)
}
 0x108   :  { %394 = dma.hbm_to_vmem [thread:$0]  %s16628_s6, 16, %s392_s18, [#allocation15]  }
 0x109   :  { %s16294_s1 = smov [#allocation17]   ;;  %s16295_s2 = smov [#allocation20]  }
 0x10a   :  { %s419_s25 = sshll.u32 %s16294_s1, 4  ;;  %s443_s7 = sshll.u32 %s16295_s2, 4  ;;  %s420_s25 = int_to_ptr.vmem [resolvable:$true] %s419_s25  ;;  %s444_s7 = int_to_ptr.vmem [resolvable:$true] %s443_s7 }
 0x10b   :  { %s15637_s10 = scalar_lea.hbm %s16658_s27, 16 }
 0x10c   :  { %p15638_p4 = scmp.ne.s32.totalorder %s16658_s27, %s15637_s10  ;;  %p15641_p5 = scmp.lt.u32.totalorder %s15637_s10, %s16658_s27 }
 0x10e   :  { %p15643_p6 = pnand %p15641_p5, %p15638_p4 }
 0x110   :  { %15646 = shalt.err (!%p15643_p6)
}
 0x111   :  { %s15647_s11 = scalar_lea.vmem %s420_s25, 16  ;;  %s15651_s15 = scalar_lea.vmem %s420_s25, 32 }
 0x112   :  { %p15648_p7 = scmp.ne.s32.totalorder %s420_s25, %s15647_s11  ;;  %p15652_p8 = scmp.lt.s32.totalorder %s420_s25, %s420_s25 }
 0x113   :  { %p15653_p9 = scmp.lt.s32.totalorder %s15651_s15, %s15647_s11 }
 0x115   :  { %p15654_p10 = por %p15653_p9, %p15652_p8 }
 0x117   :  { %p15655_p11 = pnand %p15654_p10, %p15648_p7 }
 0x119   :  { %15658 = shalt.err (!%p15655_p11)
}
 0x11a   :  { %422 = dma.hbm_to_vmem [thread:$0]  %s16658_s27, 16, %s420_s25, [#allocation18]  }
 0x11b   :  { %s15659_s6 = scalar_lea.hbm %s16678_s20, 16 }
 0x11c   :  { %p15660_p12 = scmp.ne.s32.totalorder %s16678_s20, %s15659_s6  ;;  %p15663_p13 = scmp.lt.u32.totalorder %s15659_s6, %s16678_s20 }
 0x11e   :  { %p15665_p0 = pnand %p15663_p13, %p15660_p12 }
 0x120   :  { %15668 = shalt.err (!%p15665_p0)
}
 0x121   :  { %s15669_s19 = scalar_lea.vmem %s444_s7, 16  ;;  %s15673_s16 = scalar_lea.vmem %s444_s7, 32 }
 0x122   :  { %p15670_p1 = scmp.ne.s32.totalorder %s444_s7, %s15669_s19  ;;  %p15674_p2 = scmp.lt.s32.totalorder %s444_s7, %s444_s7 }
 0x123   :  { %p15675_p3 = scmp.lt.s32.totalorder %s15673_s16, %s15669_s19 }
 0x125   :  { %p15676_p4 = por %p15675_p3, %p15674_p2 }
 0x127   :  { %p15677_p5 = pnand %p15676_p4, %p15670_p1 }
 0x129   :  { %15680 = shalt.err (!%p15677_p5)
}
 0x12a   :  { %446 = dma.hbm_to_vmem [thread:$0]  %s16678_s20, 16, %s444_s7, [#allocation21]  }
 0x12b   :  { %s16296_s18 = smov [#allocation23]   ;;  %s16297_s0 = smov [#allocation26]  }
 0x12c   :  { %s463_s27 = sshll.u32 %s16296_s18, 4  ;;  %s483_s22 = sshll.u32 %s16297_s0, 4  ;;  %s464_s27 = int_to_ptr.vmem [resolvable:$true] %s463_s27  ;;  %s484_s22 = int_to_ptr.vmem [resolvable:$true] %s483_s22 }
 0x12d   :  { %s15681_s23 = scalar_lea.hbm %s16688_s17, 16 }
 0x12e   :  { %p15682_p6 = scmp.ne.s32.totalorder %s16688_s17, %s15681_s23  ;;  %p15685_p7 = scmp.lt.u32.totalorder %s15681_s23, %s16688_s17 }
 0x130   :  { %p15687_p8 = pnand %p15685_p7, %p15682_p6 }
 0x132   :  { %15690 = shalt.err (!%p15687_p8)
}
 0x133   :  { %s15691_s21 = scalar_lea.vmem %s464_s27, 16  ;;  %s15695_s26 = scalar_lea.vmem %s464_s27, 32 }
 0x134   :  { %p15692_p9 = scmp.ne.s32.totalorder %s464_s27, %s15691_s21  ;;  %p15696_p10 = scmp.lt.s32.totalorder %s464_s27, %s464_s27 }
 0x135   :  { %p15697_p11 = scmp.lt.s32.totalorder %s15695_s26, %s15691_s21 }
 0x137   :  { %p15698_p12 = por %p15697_p11, %p15696_p10 }
 0x139   :  { %p15699_p13 = pnand %p15698_p12, %p15692_p9 }
 0x13b   :  { %15702 = shalt.err (!%p15699_p13)
}
 0x13c   :  { %466 = dma.hbm_to_vmem [thread:$0]  %s16688_s17, 16, %s464_s27, [#allocation24]  }
 0x13d   :  { %s15703_s20 = scalar_lea.hbm %s16698_s30, 16 }
 0x13e   :  { %p15704_p0 = scmp.ne.s32.totalorder %s16698_s30, %s15703_s20  ;;  %p15707_p1 = scmp.lt.u32.totalorder %s15703_s20, %s16698_s30 }
 0x140   :  { %p15709_p2 = pnand %p15707_p1, %p15704_p0 }
 0x142   :  { %15712 = shalt.err (!%p15709_p2)
}
 0x143   :  { %s15713_s28 = scalar_lea.vmem %s484_s22, 16  ;;  %s15717_s1 = scalar_lea.vmem %s484_s22, 32 }
 0x144   :  { %p15714_p3 = scmp.ne.s32.totalorder %s484_s22, %s15713_s28  ;;  %p15718_p4 = scmp.lt.s32.totalorder %s484_s22, %s484_s22 }
 0x145   :  { %p15719_p5 = scmp.lt.s32.totalorder %s15717_s1, %s15713_s28 }
 0x147   :  { %p15720_p6 = por %p15719_p5, %p15718_p4 }
 0x149   :  { %p15721_p7 = pnand %p15720_p6, %p15714_p3 }
 0x14b   :  { %15724 = shalt.err (!%p15721_p7)
}
 0x14c   :  { %486 = dma.hbm_to_vmem [thread:$0]  %s16698_s30, 16, %s484_s22, [#allocation27]  }
 0x14d   :  { %s16298_s25 = smov [#allocation29]   ;;  %s16299_s2 = smov [#allocation32]  }
 0x14e   :  { %s503_s17 = sshll.u32 %s16298_s25, 4  ;;  %s531_s7 = sshll.u32 %s16299_s2, 4  ;;  %s504_s17 = int_to_ptr.vmem [resolvable:$true] %s503_s17  ;;  %s532_s7 = int_to_ptr.vmem [resolvable:$true] %s531_s7 }
 0x14f   :  { %s15725_s10 = scalar_lea.hbm %s16708_s12, 16 }
 0x150   :  { %p15726_p8 = scmp.ne.s32.totalorder %s16708_s12, %s15725_s10  ;;  %p15729_p9 = scmp.lt.u32.totalorder %s15725_s10, %s16708_s12 }
 0x152   :  { %p15731_p10 = pnand %p15729_p9, %p15726_p8 }
 0x154   :  { %15734 = shalt.err (!%p15731_p10)
}
 0x155   :  { %s15735_s11 = scalar_lea.vmem %s504_s17, 16  ;;  %s15739_s15 = scalar_lea.vmem %s504_s17, 32 }
 0x156   :  { %p15736_p11 = scmp.ne.s32.totalorder %s504_s17, %s15735_s11  ;;  %p15740_p12 = scmp.lt.s32.totalorder %s504_s17, %s504_s17 }
 0x157   :  { %p15741_p13 = scmp.lt.s32.totalorder %s15739_s15, %s15735_s11 }
 0x159   :  { %p15742_p0 = por %p15741_p13, %p15740_p12 }
 0x15b   :  { %p15743_p1 = pnand %p15742_p0, %p15736_p11 }
 0x15d   :  { %15746 = shalt.err (!%p15743_p1)
}
 0x15e   :  { %506 = dma.hbm_to_vmem [thread:$0]  %s16708_s12, 16, %s504_s17, [#allocation30]  }
 0x15f   :  { %s15747_s30 = scalar_lea.hbm %s16738_s3, 16 }
 0x160   :  { %p15748_p2 = scmp.ne.s32.totalorder %s16738_s3, %s15747_s30  ;;  %p15751_p3 = scmp.lt.u32.totalorder %s15747_s30, %s16738_s3 }
 0x162   :  { %p15753_p4 = pnand %p15751_p3, %p15748_p2 }
 0x164   :  { %15756 = shalt.err (!%p15753_p4)
}
 0x165   :  { %s15757_s6 = scalar_lea.vmem %s532_s7, 16  ;;  %s15761_s19 = scalar_lea.vmem %s532_s7, 32 }
 0x166   :  { %p15758_p5 = scmp.ne.s32.totalorder %s532_s7, %s15757_s6  ;;  %p15762_p6 = scmp.lt.s32.totalorder %s532_s7, %s532_s7 }
 0x167   :  { %p15763_p7 = scmp.lt.s32.totalorder %s15761_s19, %s15757_s6 }
 0x169   :  { %p15764_p8 = por %p15763_p7, %p15762_p6 }
 0x16b   :  { %p15765_p9 = pnand %p15764_p8, %p15758_p5 }
 0x16d   :  { %15768 = shalt.err (!%p15765_p9)
}
 0x16e   :  { %534 = dma.hbm_to_vmem [thread:$0]  %s16738_s3, 16, %s532_s7, [#allocation33]  }
 0x16f   :  { %s16300_s16 = smov [#allocation35]   ;;  %s16301_s18 = smov [#allocation38]  }
 0x170   :  { %s555_s12 = sshll.u32 %s16300_s16, 4  ;;  %s575_s27 = sshll.u32 %s16301_s18, 4  ;;  %s556_s12 = int_to_ptr.vmem [resolvable:$true] %s555_s12  ;;  %s576_s27 = int_to_ptr.vmem [resolvable:$true] %s575_s27 }
 0x171   :  { %s15769_s0 = scalar_lea.hbm %s16758_s13, 16 }
 0x172   :  { %p15770_p10 = scmp.ne.s32.totalorder %s16758_s13, %s15769_s0  ;;  %p15773_p11 = scmp.lt.u32.totalorder %s15769_s0, %s16758_s13 }
 0x174   :  { %p15775_p12 = pnand %p15773_p11, %p15770_p10 }
 0x176   :  { %15778 = shalt.err (!%p15775_p12)
}
 0x177   :  { %s15779_s22 = scalar_lea.vmem %s556_s12, 16  ;;  %s15783_s23 = scalar_lea.vmem %s556_s12, 32 }
 0x178   :  { %p15780_p13 = scmp.ne.s32.totalorder %s556_s12, %s15779_s22  ;;  %p15784_p0 = scmp.lt.s32.totalorder %s556_s12, %s556_s12 }
 0x179   :  { %p15785_p1 = scmp.lt.s32.totalorder %s15783_s23, %s15779_s22 }
 0x17b   :  { %p15786_p2 = por %p15785_p1, %p15784_p0 }
 0x17d   :  { %p15787_p3 = pnand %p15786_p2, %p15780_p13 }
 0x17f   :  { %15790 = shalt.err (!%p15787_p3)
}
 0x180   :  { %558 = dma.hbm_to_vmem [thread:$0]  %s16758_s13, 16, %s556_s12, [#allocation36]  }
 0x181   :  { %s15791_s3 = scalar_lea.hbm %s16768_s29, 16 }
 0x182   :  { %p15792_p4 = scmp.ne.s32.totalorder %s16768_s29, %s15791_s3  ;;  %p15795_p5 = scmp.lt.u32.totalorder %s15791_s3, %s16768_s29 }
 0x184   :  { %p15797_p6 = pnand %p15795_p5, %p15792_p4 }
 0x186   :  { %15800 = shalt.err (!%p15797_p6)
}
 0x187   :  { %s15801_s21 = scalar_lea.vmem %s576_s27, 16  ;;  %s15805_s26 = scalar_lea.vmem %s576_s27, 32 }
 0x188   :  { %p15802_p7 = scmp.ne.s32.totalorder %s576_s27, %s15801_s21  ;;  %p15806_p8 = scmp.lt.s32.totalorder %s576_s27, %s576_s27 }
 0x189   :  { %p15807_p9 = scmp.lt.s32.totalorder %s15805_s26, %s15801_s21 }
 0x18b   :  { %p15808_p10 = por %p15807_p9, %p15806_p8 }
 0x18d   :  { %p15809_p11 = pnand %p15808_p10, %p15802_p7 }
 0x18f   :  { %15812 = shalt.err (!%p15809_p11)
}
 0x190   :  { %578 = dma.hbm_to_vmem [thread:$0]  %s16768_s29, 16, %s576_s27, [#allocation39]  }
 0x191   :  { %s16302_s20 = smov [#allocation41]   ;;  %s16303_s28 = smov [#allocation2]  }
 0x192   :  { %s595_s13 = sshll.u32 %s16302_s20, 4  ;;  %s313_s1 = sshll.u32 %s16303_s28, 4  ;;  %s596_s13 = int_to_ptr.vmem [resolvable:$true] %s595_s13  ;;  %s314_s1 = int_to_ptr.vmem [resolvable:$true] %s313_s1 }
 0x193   :  { %s15813_s25 = scalar_lea.hbm %s16778_s5, 16 }
 0x194   :  { %p15814_p12 = scmp.ne.s32.totalorder %s16778_s5, %s15813_s25  ;;  %p15817_p13 = scmp.lt.u32.totalorder %s15813_s25, %s16778_s5 }
 0x196   :  { %p15819_p0 = pnand %p15817_p13, %p15814_p12 }
 0x198   :  { %15822 = shalt.err (!%p15819_p0)
}
 0x199   :  { %s15823_s17 = scalar_lea.vmem %s596_s13, 16  ;;  %s15827_s2 = scalar_lea.vmem %s596_s13, 32 }
 0x19a   :  { %p15824_p1 = scmp.ne.s32.totalorder %s596_s13, %s15823_s17  ;;  %p15828_p2 = scmp.lt.s32.totalorder %s596_s13, %s596_s13 }
 0x19b   :  { %p15829_p3 = scmp.lt.s32.totalorder %s15827_s2, %s15823_s17 }
 0x19d   :  { %p15830_p4 = por %p15829_p3, %p15828_p2 }
 0x19f   :  { %p15831_p5 = pnand %p15830_p4, %p15824_p1 }
 0x1a1   :  { %15834 = shalt.err (!%p15831_p5)
}
 0x1a2   :  { %598 = dma.hbm_to_vmem [thread:$0]  %s16778_s5, 16, %s596_s13, [#allocation42]  }
 0x1a3   :  { %s15835_s29 = scalar_lea.hbm %s16573_s24, 16 }
 0x1a4   :  { %p15836_p6 = scmp.ne.s32.totalorder %s16573_s24, %s15835_s29  ;;  %p15839_p7 = scmp.lt.u32.totalorder %s15835_s29, %s16573_s24 }
 0x1a6   :  { %p15841_p8 = pnand %p15839_p7, %p15836_p6 }
 0x1a8   :  { %15844 = shalt.err (!%p15841_p8)
}
 0x1a9   :  { %s15845_s7 = scalar_lea.vmem %s314_s1, 16  ;;  %s15849_s10 = scalar_lea.vmem %s314_s1, 32 }
 0x1aa   :  { %p15846_p9 = scmp.ne.s32.totalorder %s314_s1, %s15845_s7  ;;  %p15850_p10 = scmp.lt.s32.totalorder %s314_s1, %s314_s1 }
 0x1ab   :  { %p15851_p11 = scmp.lt.s32.totalorder %s15849_s10, %s15845_s7 }
 0x1ad   :  { %p15852_p12 = por %p15851_p11, %p15850_p10 }
 0x1af   :  { %p15853_p13 = pnand %p15852_p12, %p15846_p9 }
 0x1b1   :  { %15856 = shalt.err (!%p15853_p13)
}
 0x1b2   :  { %s18528_s11 = sld [smem:[#allocation112_spill]]  ;;  %s16304_s15 = smov [#allocation7]  }
 0x1b3   :  { %316 = dma.hbm_to_vmem [thread:$0]  %s16573_s24, 16, %s314_s1, [#allocation3]  }
 0x1b4   :  { %s341_s5 = sshll.u32 %s16304_s15, 4  ;;  %s16305_s30 = smov [#allocation10]   ;;  %s342_s5 = int_to_ptr.vmem [resolvable:$true] %s341_s5 }
 0x1b5   :  { %s361_s6 = sshll.u32 %s16305_s30, 4  ;;  %s362_s6 = int_to_ptr.vmem [resolvable:$true] %s361_s6 }
 0x1b8   :  { %s15857_s19 = scalar_lea.hbm %s18528_s11, 16 }
 0x1b9   :  { %p15858_p0 = scmp.ne.s32.totalorder %s18528_s11, %s15857_s19  ;;  %p15861_p1 = scmp.lt.u32.totalorder %s15857_s19, %s18528_s11 }
 0x1bb   :  { %p15863_p2 = pnand %p15861_p1, %p15858_p0 }
 0x1bd   :  { %15866 = shalt.err (!%p15863_p2)
}
 0x1be   :  { %s15867_s16 = scalar_lea.vmem %s342_s5, 16  ;;  %s15871_s12 = scalar_lea.vmem %s342_s5, 32 }
 0x1bf   :  { %p15868_p3 = scmp.ne.s32.totalorder %s342_s5, %s15867_s16  ;;  %p15872_p4 = scmp.lt.s32.totalorder %s342_s5, %s342_s5 }
 0x1c0   :  { %p15873_p5 = scmp.lt.s32.totalorder %s15871_s12, %s15867_s16 }
 0x1c2   :  { %p15874_p6 = por %p15873_p5, %p15872_p4 }
 0x1c4   :  { %p15875_p7 = pnand %p15874_p6, %p15868_p3 }
 0x1c6   :  { %15878 = shalt.err (!%p15875_p7)
}
 0x1c7   :  { %s18529_s24 = sld [smem:[#allocation113_spill]] }
 0x1c8   :  { %344 = dma.hbm_to_vmem [thread:$0]  %s18528_s11, 16, %s342_s5, [#allocation6]  }
 0x1cd   :  { %s15879_s18 = scalar_lea.hbm %s18529_s24, 16 }
 0x1ce   :  { %p15880_p8 = scmp.ne.s32.totalorder %s18529_s24, %s15879_s18  ;;  %p15883_p9 = scmp.lt.u32.totalorder %s15879_s18, %s18529_s24 }
 0x1d0   :  { %p15885_p10 = pnand %p15883_p9, %p15880_p8 }
 0x1d2   :  { %15888 = shalt.err (!%p15885_p10)
}
 0x1d3   :  { %s15889_s27 = scalar_lea.vmem %s362_s6, 16  ;;  %s15893_s0 = scalar_lea.vmem %s362_s6, 32 }
 0x1d4   :  { %p15890_p11 = scmp.ne.s32.totalorder %s362_s6, %s15889_s27  ;;  %p15894_p12 = scmp.lt.s32.totalorder %s362_s6, %s362_s6 }
 0x1d5   :  { %p15895_p13 = scmp.lt.s32.totalorder %s15893_s0, %s15889_s27 }
 0x1d7   :  { %p15896_p0 = por %p15895_p13, %p15894_p12 }
 0x1d9   :  { %p15897_p1 = pnand %p15896_p0, %p15890_p11 }
 0x1db   :  { %15900 = shalt.err (!%p15897_p1)
}
 0x1dc   :  { %s18530_s22 = sld [smem:[#allocation114_spill]]  ;;  %s16306_s23 = smov [#allocation13]  }
 0x1dd   :  { %364 = dma.hbm_to_vmem [thread:$0]  %s18529_s24, 16, %s362_s6, [#allocation9]  }
 0x1de   :  { %s381_s3 = sshll.u32 %s16306_s23, 4  ;;  %s16307_s21 = smov [#allocation16]   ;;  %s382_s3 = int_to_ptr.vmem [resolvable:$true] %s381_s3 }
 0x1df   :  { %s409_s26 = sshll.u32 %s16307_s21, 4  ;;  %s410_s26 = int_to_ptr.vmem [resolvable:$true] %s409_s26 }
 0x1e2   :  { %s15901_s20 = scalar_lea.hbm %s18530_s22, 16 }
 0x1e3   :  { %p15902_p2 = scmp.ne.s32.totalorder %s18530_s22, %s15901_s20  ;;  %p15905_p3 = scmp.lt.u32.totalorder %s15901_s20, %s18530_s22 }
 0x1e5   :  { %p15907_p4 = pnand %p15905_p3, %p15902_p2 }
 0x1e7   :  { %15910 = shalt.err (!%p15907_p4)
}
 0x1e8   :  { %s15911_s13 = scalar_lea.vmem %s382_s3, 16  ;;  %s15915_s28 = scalar_lea.vmem %s382_s3, 32 }
 0x1e9   :  { %p15912_p5 = scmp.ne.s32.totalorder %s382_s3, %s15911_s13  ;;  %p15916_p6 = scmp.lt.s32.totalorder %s382_s3, %s382_s3 }
 0x1ea   :  { %p15917_p7 = scmp.lt.s32.totalorder %s15915_s28, %s15911_s13 }
 0x1ec   :  { %p15918_p8 = por %p15917_p7, %p15916_p6 }
 0x1ee   :  { %p15919_p9 = pnand %p15918_p8, %p15912_p5 }
 0x1f0   :  { %15922 = shalt.err (!%p15919_p9)
}
 0x1f1   :  { %s18531_s1 = sld [smem:[#allocation119_spill]] }
 0x1f2   :  { %384 = dma.hbm_to_vmem [thread:$0]  %s18530_s22, 16, %s382_s3, [#allocation12]  }
 0x1f7   :  { %s15923_s25 = scalar_lea.hbm %s18531_s1, 16 }
 0x1f8   :  { %p15924_p10 = scmp.ne.s32.totalorder %s18531_s1, %s15923_s25  ;;  %p15927_p11 = scmp.lt.u32.totalorder %s15923_s25, %s18531_s1 }
 0x1fa   :  { %p15929_p12 = pnand %p15927_p11, %p15924_p10 }
 0x1fc   :  { %15932 = shalt.err (!%p15929_p12)
}
 0x1fd   :  { %s15933_s17 = scalar_lea.vmem %s410_s26, 16  ;;  %s15937_s2 = scalar_lea.vmem %s410_s26, 32 }
 0x1fe   :  { %p15934_p13 = scmp.ne.s32.totalorder %s410_s26, %s15933_s17  ;;  %p15938_p0 = scmp.lt.s32.totalorder %s410_s26, %s410_s26 }
 0x1ff   :  { %p15939_p1 = scmp.lt.s32.totalorder %s15937_s2, %s15933_s17 }
 0x201   :  { %p15940_p2 = por %p15939_p1, %p15938_p0 }
 0x203   :  { %p15941_p3 = pnand %p15940_p2, %p15934_p13 }
 0x205   :  { %15944 = shalt.err (!%p15941_p3)
}
 0x206   :  { %s18532_s29 = sld [smem:[#allocation122_spill]]  ;;  %s16308_s7 = smov [#allocation19]  }
 0x207   :  { %412 = dma.hbm_to_vmem [thread:$0]  %s18531_s1, 16, %s410_s26, [#allocation15]  }
 0x208   :  { %s433_s10 = sshll.u32 %s16308_s7, 4  ;;  %s16309_s11 = smov [#allocation22]   ;;  %s434_s10 = int_to_ptr.vmem [resolvable:$true] %s433_s10 }
 0x209   :  { %s453_s15 = sshll.u32 %s16309_s11, 4  ;;  %s454_s15 = int_to_ptr.vmem [resolvable:$true] %s453_s15 }
 0x20c   :  { %s15945_s5 = scalar_lea.hbm %s18532_s29, 16 }
 0x20d   :  { %p15946_p4 = scmp.ne.s32.totalorder %s18532_s29, %s15945_s5  ;;  %p15949_p5 = scmp.lt.u32.totalorder %s15945_s5, %s18532_s29 }
 0x20f   :  { %p15951_p6 = pnand %p15949_p5, %p15946_p4 }
 0x211   :  { %15954 = shalt.err (!%p15951_p6)
}
 0x212   :  { %s15955_s30 = scalar_lea.vmem %s434_s10, 16  ;;  %s15959_s6 = scalar_lea.vmem %s434_s10, 32 }
 0x213   :  { %p15956_p7 = scmp.ne.s32.totalorder %s434_s10, %s15955_s30  ;;  %p15960_p8 = scmp.lt.s32.totalorder %s434_s10, %s434_s10 }
 0x214   :  { %p15961_p9 = scmp.lt.s32.totalorder %s15959_s6, %s15955_s30 }
 0x216   :  { %p15962_p10 = por %p15961_p9, %p15960_p8 }
 0x218   :  { %p15963_p11 = pnand %p15962_p10, %p15956_p7 }
 0x21a   :  { %15966 = shalt.err (!%p15963_p11)
}
 0x21b   :  { %s18533_s19 = sld [smem:[#allocation123_spill]] }
 0x21c   :  { %436 = dma.hbm_to_vmem [thread:$0]  %s18532_s29, 16, %s434_s10, [#allocation18]  }
 0x221   :  { %s15967_s16 = scalar_lea.hbm %s18533_s19, 16 }
 0x222   :  { %p15968_p12 = scmp.ne.s32.totalorder %s18533_s19, %s15967_s16  ;;  %p15971_p13 = scmp.lt.u32.totalorder %s15967_s16, %s18533_s19 }
 0x224   :  { %p15973_p0 = pnand %p15971_p13, %p15968_p12 }
 0x226   :  { %15976 = shalt.err (!%p15973_p0)
}
 0x227   :  { %s15977_s12 = scalar_lea.vmem %s454_s15, 16  ;;  %s15981_s24 = scalar_lea.vmem %s454_s15, 32 }
 0x228   :  { %p15978_p1 = scmp.ne.s32.totalorder %s454_s15, %s15977_s12  ;;  %p15982_p2 = scmp.lt.s32.totalorder %s454_s15, %s454_s15 }
 0x229   :  { %p15983_p3 = scmp.lt.s32.totalorder %s15981_s24, %s15977_s12 }
 0x22b   :  { %p15984_p4 = por %p15983_p3, %p15982_p2 }
 0x22d   :  { %p15985_p5 = pnand %p15984_p4, %p15978_p1 }
 0x22f   :  { %15988 = shalt.err (!%p15985_p5)
}
 0x230   :  { %s18534_s18 = sld [smem:[#allocation124_spill]]  ;;  %s16310_s27 = smov [#allocation25]  }
 0x231   :  { %456 = dma.hbm_to_vmem [thread:$0]  %s18533_s19, 16, %s454_s15, [#allocation21]  }
 0x232   :  { %s473_s0 = sshll.u32 %s16310_s27, 4  ;;  %s16311_s22 = smov [#allocation28]   ;;  %s474_s0 = int_to_ptr.vmem [resolvable:$true] %s473_s0 }
 0x233   :  { %s493_s23 = sshll.u32 %s16311_s22, 4  ;;  %s494_s23 = int_to_ptr.vmem [resolvable:$true] %s493_s23 }
 0x236   :  { %s15989_s3 = scalar_lea.hbm %s18534_s18, 16 }
 0x237   :  { %p15990_p6 = scmp.ne.s32.totalorder %s18534_s18, %s15989_s3  ;;  %p15993_p7 = scmp.lt.u32.totalorder %s15989_s3, %s18534_s18 }
 0x239   :  { %p15995_p8 = pnand %p15993_p7, %p15990_p6 }
 0x23b   :  { %15998 = shalt.err (!%p15995_p8)
}
 0x23c   :  { %s15999_s21 = scalar_lea.vmem %s474_s0, 16  ;;  %s16003_s26 = scalar_lea.vmem %s474_s0, 32 }
 0x23d   :  { %p16000_p9 = scmp.ne.s32.totalorder %s474_s0, %s15999_s21  ;;  %p16004_p10 = scmp.lt.s32.totalorder %s474_s0, %s474_s0 }
 0x23e   :  { %p16005_p11 = scmp.lt.s32.totalorder %s16003_s26, %s15999_s21 }
 0x240   :  { %p16006_p12 = por %p16005_p11, %p16004_p10 }
 0x242   :  { %p16007_p13 = pnand %p16006_p12, %p16000_p9 }
 0x244   :  { %16010 = shalt.err (!%p16007_p13)
}
 0x245   :  { %s18535_s20 = sld [smem:[#allocation125_spill]] }
 0x246   :  { %476 = dma.hbm_to_vmem [thread:$0]  %s18534_s18, 16, %s474_s0, [#allocation24]  }
 0x24b   :  { %s16011_s13 = scalar_lea.hbm %s18535_s20, 16 }
 0x24c   :  { %p16012_p0 = scmp.ne.s32.totalorder %s18535_s20, %s16011_s13  ;;  %p16015_p1 = scmp.lt.u32.totalorder %s16011_s13, %s18535_s20 }
 0x24e   :  { %p16017_p2 = pnand %p16015_p1, %p16012_p0 }
 0x250   :  { %16020 = shalt.err (!%p16017_p2)
}
 0x251   :  { %s16021_s28 = scalar_lea.vmem %s494_s23, 16  ;;  %s16025_s1 = scalar_lea.vmem %s494_s23, 32 }
 0x252   :  { %p16022_p3 = scmp.ne.s32.totalorder %s494_s23, %s16021_s28  ;;  %p16026_p4 = scmp.lt.s32.totalorder %s494_s23, %s494_s23 }
 0x253   :  { %p16027_p5 = scmp.lt.s32.totalorder %s16025_s1, %s16021_s28 }
 0x255   :  { %p16028_p6 = por %p16027_p5, %p16026_p4 }
 0x257   :  { %p16029_p7 = pnand %p16028_p6, %p16022_p3 }
 0x259   :  { %16032 = shalt.err (!%p16029_p7)
}
 0x25a   :  { %s18536_s25 = sld [smem:[#allocation130_spill]]  ;;  %s16312_s17 = smov [#allocation31]  }
 0x25b   :  { %496 = dma.hbm_to_vmem [thread:$0]  %s18535_s20, 16, %s494_s23, [#allocation27]  }
 0x25c   :  { %s521_s2 = sshll.u32 %s16312_s17, 4  ;;  %s16313_s29 = smov [#allocation34]   ;;  %s522_s2 = int_to_ptr.vmem [resolvable:$true] %s521_s2 }
 0x25d   :  { %s545_s7 = sshll.u32 %s16313_s29, 4  ;;  %s546_s7 = int_to_ptr.vmem [resolvable:$true] %s545_s7 }
 0x260   :  { %s16033_s10 = scalar_lea.hbm %s18536_s25, 16 }
 0x261   :  { %p16034_p8 = scmp.ne.s32.totalorder %s18536_s25, %s16033_s10  ;;  %p16037_p9 = scmp.lt.u32.totalorder %s16033_s10, %s18536_s25 }
 0x263   :  { %p16039_p10 = pnand %p16037_p9, %p16034_p8 }
 0x265   :  { %16042 = shalt.err (!%p16039_p10)
}
 0x266   :  { %s16043_s11 = scalar_lea.vmem %s522_s2, 16  ;;  %s16047_s15 = scalar_lea.vmem %s522_s2, 32 }
 0x267   :  { %p16044_p11 = scmp.ne.s32.totalorder %s522_s2, %s16043_s11  ;;  %p16048_p12 = scmp.lt.s32.totalorder %s522_s2, %s522_s2 }
 0x268   :  { %p16049_p13 = scmp.lt.s32.totalorder %s16047_s15, %s16043_s11 }
 0x26a   :  { %p16050_p0 = por %p16049_p13, %p16048_p12 }
 0x26c   :  { %p16051_p1 = pnand %p16050_p0, %p16044_p11 }
 0x26e   :  { %16054 = shalt.err (!%p16051_p1)
}
 0x26f   :  { %s18537_s5 = sld [smem:[#allocation133_spill]] }
 0x270   :  { %524 = dma.hbm_to_vmem [thread:$0]  %s18536_s25, 16, %s522_s2, [#allocation30]  }
 0x275   :  { %s16055_s30 = scalar_lea.hbm %s18537_s5, 16 }
 0x276   :  { %p16056_p2 = scmp.ne.s32.totalorder %s18537_s5, %s16055_s30  ;;  %p16059_p3 = scmp.lt.u32.totalorder %s16055_s30, %s18537_s5 }
 0x278   :  { %p16061_p4 = pnand %p16059_p3, %p16056_p2 }
 0x27a   :  { %16064 = shalt.err (!%p16061_p4)
}
 0x27b   :  { %s16065_s6 = scalar_lea.vmem %s546_s7, 16  ;;  %s16069_s19 = scalar_lea.vmem %s546_s7, 32 }
 0x27c   :  { %p16066_p5 = scmp.ne.s32.totalorder %s546_s7, %s16065_s6  ;;  %p16070_p6 = scmp.lt.s32.totalorder %s546_s7, %s546_s7 }
 0x27d   :  { %p16071_p7 = scmp.lt.s32.totalorder %s16069_s19, %s16065_s6 }
 0x27f   :  { %p16072_p8 = por %p16071_p7, %p16070_p6 }
 0x281   :  { %p16073_p9 = pnand %p16072_p8, %p16066_p5 }
 0x283   :  { %16076 = shalt.err (!%p16073_p9)
}
 0x284   :  { %s18538_s16 = sld [smem:[#allocation134_spill]]  ;;  %s16314_s12 = smov [#allocation37]  }
 0x285   :  { %548 = dma.hbm_to_vmem [thread:$0]  %s18537_s5, 16, %s546_s7, [#allocation33]  }
 0x286   :  { %s565_s24 = sshll.u32 %s16314_s12, 4  ;;  %s16315_s18 = smov [#allocation40]   ;;  %s566_s24 = int_to_ptr.vmem [resolvable:$true] %s565_s24 }
 0x287   :  { %s585_s27 = sshll.u32 %s16315_s18, 4  ;;  %s586_s27 = int_to_ptr.vmem [resolvable:$true] %s585_s27 }
 0x28a   :  { %s16077_s0 = scalar_lea.hbm %s18538_s16, 16 }
 0x28b   :  { %p16078_p10 = scmp.ne.s32.totalorder %s18538_s16, %s16077_s0  ;;  %p16081_p11 = scmp.lt.u32.totalorder %s16077_s0, %s18538_s16 }
 0x28d   :  { %p16083_p12 = pnand %p16081_p11, %p16078_p10 }
 0x28f   :  { %16086 = shalt.err (!%p16083_p12)
}
 0x290   :  { %s16087_s22 = scalar_lea.vmem %s566_s24, 16  ;;  %s16091_s23 = scalar_lea.vmem %s566_s24, 32 }
 0x291   :  { %p16088_p13 = scmp.ne.s32.totalorder %s566_s24, %s16087_s22  ;;  %p16092_p0 = scmp.lt.s32.totalorder %s566_s24, %s566_s24 }
 0x292   :  { %p16093_p1 = scmp.lt.s32.totalorder %s16091_s23, %s16087_s22 }
 0x294   :  { %p16094_p2 = por %p16093_p1, %p16092_p0 }
 0x296   :  { %p16095_p3 = pnand %p16094_p2, %p16088_p13 }
 0x298   :  { %16098 = shalt.err (!%p16095_p3)
}
 0x299   :  { %s18539_s3 = sld [smem:[#allocation135_spill]] }
 0x29a   :  { %568 = dma.hbm_to_vmem [thread:$0]  %s18538_s16, 16, %s566_s24, [#allocation36]  }
 0x29f   :  { %s16099_s21 = scalar_lea.hbm %s18539_s3, 16 }
 0x2a0   :  { %p16100_p4 = scmp.ne.s32.totalorder %s18539_s3, %s16099_s21  ;;  %p16103_p5 = scmp.lt.u32.totalorder %s16099_s21, %s18539_s3 }
 0x2a2   :  { %p16105_p6 = pnand %p16103_p5, %p16100_p4 }
 0x2a4   :  { %16108 = shalt.err (!%p16105_p6)
}
 0x2a5   :  { %s16109_s26 = scalar_lea.vmem %s586_s27, 16  ;;  %s16113_s20 = scalar_lea.vmem %s586_s27, 32 }
 0x2a6   :  { %p16110_p7 = scmp.ne.s32.totalorder %s586_s27, %s16109_s26  ;;  %p16114_p8 = scmp.lt.s32.totalorder %s586_s27, %s586_s27 }
 0x2a7   :  { %p16115_p9 = scmp.lt.s32.totalorder %s16113_s20, %s16109_s26 }
 0x2a9   :  { %p16116_p10 = por %p16115_p9, %p16114_p8 }
 0x2ab   :  { %p16117_p11 = pnand %p16116_p10, %p16110_p7 }
 0x2ad   :  { %16120 = shalt.err (!%p16117_p11)
}
 0x2ae   :  { %s18540_s13 = sld [smem:[#allocation136_spill]]  ;;  %s16316_s28 = smov [#allocation43]  }
 0x2af   :  { %588 = dma.hbm_to_vmem [thread:$0]  %s18539_s3, 16, %s586_s27, [#allocation39]  }
 0x2b0   :  { %s605_s1 = sshll.u32 %s16316_s28, 4  ;;  %s606_s1 = int_to_ptr.vmem [resolvable:$true] %s605_s1 }
 0x2b4   :  { %s16121_s25 = scalar_lea.hbm %s18540_s13, 16 }
 0x2b5   :  { %p16122_p12 = scmp.ne.s32.totalorder %s18540_s13, %s16121_s25  ;;  %p16125_p13 = scmp.lt.u32.totalorder %s16121_s25, %s18540_s13 }
 0x2b7   :  { %p16127_p0 = pnand %p16125_p13, %p16122_p12 }
 0x2b9   :  { %16130 = shalt.err (!%p16127_p0)
}
 0x2ba   :  { %s16131_s17 = scalar_lea.vmem %s606_s1, 16  ;;  %s16135_s2 = scalar_lea.vmem %s606_s1, 32 }
 0x2bb   :  { %p16132_p1 = scmp.ne.s32.totalorder %s606_s1, %s16131_s17  ;;  %p16136_p2 = scmp.lt.s32.totalorder %s606_s1, %s606_s1 }
 0x2bc   :  { %p16137_p3 = scmp.lt.s32.totalorder %s16135_s2, %s16131_s17 }
 0x2be   :  { %p16138_p4 = por %p16137_p3, %p16136_p2 }
 0x2c0   :  { %p16139_p5 = pnand %p16138_p4, %p16132_p1 }
 0x2c2   :  { %16142 = shalt.err (!%p16139_p5)
}
 0x2c3   :  { %608 = dma.hbm_to_vmem [thread:$0]  %s18540_s13, 16, %s606_s1, [#allocation42]  }
 0x2c4   :  { %16165 = dma.done.wait [#allocation3], 16  }
 0x2c5   :  { %16166 = vsyncadd [#allocation3], 4294967280 }
 0x2c6   :  { %16167 = dma.done.wait [#allocation6], 32  }
 0x2c7   :  { %16168 = vsyncadd [#allocation6], 4294967264 }
 0x2c8   :  { %16169 = dma.done.wait [#allocation9], 32  }
 0x2c9   :  { %16170 = vsyncadd [#allocation9], 4294967264 }
 0x2ca   :  { %16171 = dma.done.wait [#allocation12], 32  }
 0x2cb   :  { %16172 = vsyncadd [#allocation12], 4294967264 }
 0x2cc   :  { %16173 = dma.done.wait [#allocation15], 32  }
 0x2cd   :  { %16174 = vsyncadd [#allocation15], 4294967264 }
 0x2ce   :  { %16175 = dma.done.wait [#allocation18], 32  }
 0x2cf   :  { %16176 = vsyncadd [#allocation18], 4294967264 }
 0x2d0   :  { %16177 = dma.done.wait [#allocation21], 32  }
 0x2d1   :  { %16178 = vsyncadd [#allocation21], 4294967264 }
 0x2d2   :  { %16179 = dma.done.wait [#allocation24], 32  }
 0x2d3   :  { %16180 = vsyncadd [#allocation24], 4294967264 }
 0x2d4   :  { %16181 = dma.done.wait [#allocation27], 32  }
 0x2d5   :  { %16182 = vsyncadd [#allocation27], 4294967264 }
 0x2d6   :  { %16183 = dma.done.wait [#allocation30], 32  }
 0x2d7   :  { %16184 = vsyncadd [#allocation30], 4294967264 }
 0x2d8   :  { %16185 = dma.done.wait [#allocation33], 32  }
 0x2d9   :  { %16186 = vsyncadd [#allocation33], 4294967264 }
 0x2da   :  { %16187 = dma.done.wait [#allocation36], 32  }
 0x2db   :  { %16188 = vsyncadd [#allocation36], 4294967264 }
 0x2dc   :  { %16189 = dma.done.wait [#allocation39], 32  }
 0x2dd   :  { %16190 = vsyncadd [#allocation39], 4294967264 }
 0x2de   :  { %16191 = dma.done.wait [#allocation42], 32  }
 0x2df   :  { %16192 = vsyncadd [#allocation42], 4294967264  ;;  %vm705_vm0 = vcmask 261120   ;;  %v699_v0 = vld [vmem:[%s16798_s14] sm:$0xff]  ;;  %v16920_v1 = vld [vmem:[%s16798_s14 + $0x8] sm:$0xff]  ;;  %s18541_s29 = sld [smem:[#allocation117_spill]] }
 0x2e0   :  { %v706_v2 = vsel %vm705_vm0, %v699_v0, 0.0  ;;  %v709_v3 = vsel %vm705_vm0, %v16920_v1, 0.0  ;;  %s18542_s7 = sld [smem:[#allocation115_spill]]  ;;  %v16317_v16 = vmov 0.0   ;;  %vm16318_vm1 = vmmov 0   ;;  %s18543_s10 = sld [smem:[#allocation118_spill]] }
 0x2e1   :  { %707 = vadd.xlane.f32.xlu0 %v706_v2  ;;  %14186 = vmatprep.subr.bf16.mxu0 %v16317_v16  ;;  %v13477_v35 = vld [vmem:[#allocation19] ss:$0 sm:$0xff]  ;;  %v13478_v41 = vld [vmem:[#allocation20] ss:$0 sm:$0xff]  ;;  %v13483_v48 = vld [vmem:[#allocation10] ss:$0 sm:$0xff] }
 0x2e2   :  { %14194 = vmatprep.subr.bf16.mxu1 %v16317_v16  ;;  %14190 = vmatprep.mubr.msk.bf16.mxu0 %vm16318_vm1, %v16317_v16  ;;  %vm959_vm6 = vcmask 64512   ;;  %v13479_v51 = vld [vmem:[#allocation13] ss:$0 sm:$0xff]  ;;  %v13487_v61 = vld [vmem:[#allocation14] ss:$0 sm:$0xff]  ;;  %s18544_s11 = sld [smem:[#allocation61_spill]] }
 0x2e3   :  { %14198 = vmatprep.mubr.msk.bf16.mxu1 %vm16318_vm1, %v16317_v16  ;;  %s16319_s15 = smov 120   ;;  %s16320_s5 = smov 112   ;;  %vm2802_vm11 = vcmask 523264  }
 0x2e4   :  { %s16321_s30 = smov 104   ;;  %s18545_s6 = sld [smem:[#allocation116_spill]] }
 0x2e5   :  { %710 = vadd.xlane.f32.xlu0 %v709_v3  ;;  %v15184_v14 = vld [vmem:[%s18541_s29] sm:$0xff]   ;;  %v15186_v17 = vld [vmem:[%s18541_s29 + $0x8] sm:$0xff]   ;;  %s18546_s19 = sld [smem:[#allocation120_spill]]  ;;  %s18547_s16 = sld [smem:[#allocation121_spill]] }
 0x2e6   :  { %v15185_v15 = vld [vmem:[%s18542_s7] sm:$0xff]   ;;  %14187 = vmatpush3.bf16.msra.mxu0 %v15184_v14  ;;  %v15187_v18 = vld [vmem:[%s18542_s7 + $0x8] sm:$0xff]   ;;  %s18549_s12 = sld [smem:[#allocation129_spill]]  ;;  %s18550_s24 = sld [smem:[#allocation126_spill]] }
 0x2e7   :  { %14195 = vmatpush3.bf16.msra.mxu1 %v15185_v15  ;;  %14188 = vmatprep.subr.bf16.mxu0 %v16317_v16  ;;  %v15188_v45 = vld [vmem:[%s18543_s10] sm:$0xff]   ;;  %v15189_v47 = vld [vmem:[%s18543_s10 + $0x8] sm:$0xff]   ;;  %s18551_s18 = sld [smem:[#allocation127_spill]]  ;;  %s18553_s27 = sld [smem:[#allocation132_spill]] }
 0x2e8   :  { %14196 = vmatprep.subr.bf16.mxu1 %v16317_v16  ;;  %s18554_s0 = sld [smem:[#allocation66_spill]]  ;;  %s18555_s22 = sld [smem:[#allocation78_spill]] }
 0x2e9   :  { %s18556_s23 = sld [smem:[#allocation67_spill]]  ;;  %s18557_s3 = sld [smem:[#allocation76_spill]] }
 0x2ea   :  { %14189 = vmatpush3.bf16.msra.mxu0 %v15186_v17  ;;  %s18558_s21 = sld [smem:[#allocation79_spill]]  ;;  %s18559_s26 = sld [smem:[#allocation72_spill]] }
 0x2eb   :  { %14197 = vmatpush3.bf16.msra.mxu1 %v15187_v18  ;;  %14202 = vmatprep.subr.bf16.mxu0 %v16317_v16  ;;  %s18560_s20 = sld [smem:[#allocation74_spill]]  ;;  %s18561_s13 = sld [smem:[#allocation75_spill]] }
 0x2ec   :  { %14210 = vmatprep.subr.mxu1 %v16317_v16  ;;  %s18562_s28 = sld [smem:[#allocation77_spill]]  ;;  %s18563_s1 = sld [smem:[#allocation73_spill]] }
 0x2ed   :  { %s18564_s25 = sld [smem:[#allocation84_spill]]  ;;  %s18565_s17 = sld [smem:[#allocation86_spill]] }
 0x2ee   :  { %s18566_s2 = sld [smem:[#allocation68_spill]]  ;;  %s18567_s29 = sld [smem:[#allocation69_spill]] }
 0x2ef   :  { %s18568_s7 = sld [smem:[#allocation87_spill]]  ;;  %s18569_s10 = sld [smem:[#allocation80_spill]] }
 0x36e   :  { %v708_v4 = vpop.xlane.xlu0 %707 }
 0x36f   :  { %v713_v5 = vmul.f32 0.03125, %v708_v4 }
 0x371   :  { %v715_v6 = vsub.f32 %v699_v0, %v713_v5 }
 0x372   :  { %v711_v7 = vpop.xlane.xlu0 %710 }
 0x373   :  { %v714_v8 = vmul.f32 0.03125, %v711_v7  ;;  %v717_v9 = vmul.f32 %v715_v6, %v715_v6  ;;  %v751_v37 = vmul.f32 %v13477_v35, %v715_v6  ;;  %v16984_v7 = vld [vmem:[%s18544_s11] sm:$0xff] }
 0x375   :  { %v716_v10 = vsub.f32 %v16920_v1, %v714_v8  ;;  %v719_v11 = vsel %vm705_vm0, %v717_v9, 0.0 }
 0x376   :  { %720 = vadd.xlane.f32.xlu1 %v719_v11 }
 0x377   :  { %v718_v12 = vmul.f32 %v716_v10, %v716_v10  ;;  %v752_v38 = vmul.f32 %v13477_v35, %v716_v10 }
 0x379   :  { %v722_v13 = vsel %vm705_vm0, %v718_v12, 0.0  ;;  %v16988_v12 = vld [vmem:[%s18544_s11 + $0x8] sm:$0xff] }
 0x37a   :  { %723 = vadd.xlane.f32.xlu1 %v722_v13 }
 0x403   :  { %v721_v19 = vpop.xlane.xlu1 %720 }
 0x404   :  { %v725_v20 = vmul.f32 0.032258064, %v721_v19 }
 0x406   :  { %15246 = vrsqrt.f32 %v725_v20  ;;  %vm729_vm2 = vcmp.eq.f32.partialorder %v725_v20, inf  ;;  %v732_v25 = vand.u32 2147483648, %v725_v20  ;;  %vm731_vm3 = vcmp.eq.f32.partialorder %v725_v20, 0.0 }
 0x407   :  { %v724_v21 = vpop.xlane.xlu1 %723 }
 0x408   :  { %v726_v22 = vmul.f32 0.032258064, %v724_v21 }
 0x40a   :  { %15248 = vrsqrt.f32 %v726_v22  ;;  %vm736_vm4 = vcmp.eq.f32.partialorder %v726_v22, inf  ;;  %v739_v31 = vand.u32 2147483648, %v726_v22  ;;  %vm738_vm5 = vcmp.eq.f32.partialorder %v726_v22, 0.0 }
 0x410   :  { %v15247_v23 = vpop.eup %15246 }
 0x411   :  { %v728_v24 = vmul.f32 %v15247_v23, %v725_v20 }
 0x413   :  { %v730_v26 = vsel %vm729_vm2, %v725_v20, %v728_v24 }
 0x414   :  { %v15249_v27 = vpop.eup %15248  ;;  %v733_v28 = vsel %vm731_vm3, %v732_v25, %v730_v26 }
 0x415   :  { %v741_v29 = vadd.f32 1e-06, %v733_v28  ;;  %v735_v30 = vmul.f32 %v15249_v27, %v726_v22 }
 0x417   :  { %v737_v32 = vsel %vm736_vm4, %v726_v22, %v735_v30  ;;  %15250 = vrcp.f32 %v741_v29 }
 0x418   :  { %v740_v33 = vsel %vm738_vm5, %v739_v31, %v737_v32 }
 0x419   :  { %v742_v34 = vadd.f32 1e-06, %v740_v33 }
 0x41b   :  { %15252 = vrcp.f32 %v742_v34 }
 0x421   :  { %v15251_v36 = vpop.eup %15250 }
 0x422   :  { %v753_v39 = vmul.f32 %v15251_v36, %v751_v37 }
 0x424   :  { %v761_v43 = vadd.f32 %v13478_v41, %v753_v39 }
 0x425   :  { %v15253_v40 = vpop.eup %15252 }
 0x426   :  { %v754_v42 = vmul.f32 %v15253_v40, %v752_v38 }
 0x428   :  { %v762_v44 = vadd.f32 %v13478_v41, %v754_v42 }
 0x42a   :  { %v763_v46 = vpack.c.bf16 %v762_v44, %v761_v43 }
 0x42c   :  { %14191 = vmatmul.mubr.msk.bf16.vlgmr.msra.gmra.mrb[0].mxu0 %vm705_vm0, %v763_v46  ;;  %14199 = vmatmul.mubr.msk.bf16.vlgmr.msra.gmra.mrb[0].mxu1 %vm705_vm0, %v763_v46 }
 0x42d   :  { %14203 = vmatpush3.bf16.msra.mxu0 %v15188_v45  ;;  %14206 = vmatprep.mubr.msk.bf16.mxu0 %vm16318_vm1, %v16317_v16 }
 0x42e   :  { %14204 = vmatprep.subr.bf16.mxu0 %v16317_v16  ;;  %14212 = vmatprep.mubr.msk.f32.mxu1 %vm16318_vm1, %v16317_v16 }
 0x431   :  { %14205 = vmatpush3.bf16.msra.mxu0 %v15189_v47 }
 0x432   :  { %14230 = vmatprep.subr.mxu0 %v16317_v16 }
 0x434   :  { %14207 = vmatmul.mubr.msk.bf16.vlgmr.msra.gmra.mrb[4].mxu0 %vm705_vm0, %v763_v46 }
 0x435   :  { %14232 = vmatprep.mubr.msk.f32.mxu0 %vm16318_vm1, %v16317_v16 }
 0x4ff   :  { %v824_v49 = vpop.f32.mrb[0].mxu0  ;;  %v888_v50 = vpop.f32.mrb[0].mxu1 }
 0x500   :  { %v16955_v52 = vadd.f32 %v13483_v48, %v888_v50  ;;  %v14192_v53 = vpop.f32.mrb[1].mxu0  ;;  %v14200_v54 = vpop.f32.mrb[1].mxu1  ;;  %v16959_v59 = vadd.f32 %v13479_v51, %v824_v49 }
 0x501   :  { %v827_v55 = vpop.f32.mrb[2].mxu0  ;;  %v891_v56 = vpop.f32.mrb[2].mxu1 }
 0x502   :  { %v14193_v57 = vpop.f32.mrb[3].mxu0  ;;  %v14201_v58 = vpop.f32.mrb[3].mxu1  ;;  %14211 = vmatpush3.xpose.msk.msra.mxu1 %vm959_vm6, %v16955_v52  ;;  %v16962_v60 = vadd.f32 %v13483_v48, %v891_v56  ;;  %v16970_v62 = vadd.f32 %v13479_v51, %v827_v55 }
 0x503   :  { %14215 = vmatprep.subr.mxu1 %v16317_v16 }
 0x505   :  { %14213 = vmatmul.mubr.msk.f32.vlgmr.msra.gmra.mrb[4].mxu1 %vm959_vm6, %v16959_v59 }
 0x506   :  { %14216 = vmatpush3.xpose.msk.msra.mxu1 %vm959_vm6, %v16962_v60  ;;  %14217 = vmatprep.mubr.msk.f32.mxu1 %vm16318_vm1, %v16317_v16 }
 0x507   :  { %v952_v63 = vpop.f32.mrb[4].mxu0  ;;  %14220 = vmatprep.subr.mxu1 %v16317_v16 }
 0x508   :  { %v16973_v0 = vadd.f32 %v13487_v61, %v952_v63  ;;  %v14208_v2 = vpop.f32.mrb[5].mxu0 }
 0x509   :  { %v955_v3 = vpop.f32.mrb[6].mxu0  ;;  %14218 = vmatmul.mubr.msk.f32.vlgmr.msra.gmra.mrb[6].mxu1 %vm959_vm6, %v16970_v62 }
 0x50a   :  { %v16977_v4 = vadd.f32 %v13487_v61, %v955_v3  ;;  %v14209_v5 = vpop.f32.mrb[7].mxu0  ;;  %14221 = vmatpush3.msra.mxu1 %v16973_v0  ;;  %14222 = vmatprep.mubr.msk.f32.mxu1 %vm16318_vm1, %v16317_v16 }
 0x50b   :  { %14225 = vmatprep.subr.mxu1 %v16317_v16 }
 0x5d8   :  { %v1032_v6 = vpop.f32.mrb[4].mxu1 }
 0x5d9   :  { %v1112_v8 = vmul.f32 0.35355338, %v1032_v6  ;;  %v14214_v9 = vpop.f32.mrb[5].mxu1 }
 0x5db   :  { %v1114_v10 = vadd.f32 %v1112_v8, %v16984_v7 }
 0x5dc   :  { %v1108_v11 = vpop.f32.mrb[6].mxu1 }
 0x5dd   :  { %v1113_v13 = vmul.f32 0.35355338, %v1108_v11  ;;  %v14219_v14 = vpop.f32.mrb[7].mxu1  ;;  %v1116_v15 = vsel %vm959_vm6, %v1114_v10, -inf }
 0x5de   :  { %1117 = vmax.xlane.f32.xlu0 %v1116_v15 }
 0x5df   :  { %v1115_v17 = vadd.f32 %v1113_v13, %v16988_v12 }
 0x5e1   :  { %v1119_v18 = vsel %vm959_vm6, %v1115_v17, -inf }
 0x5e2   :  { %1120 = vmax.xlane.f32.xlu1 %v1119_v18 }
 0x66b   :  { %v1118_v19 = vpop.xlane.xlu0 %1117 }
 0x66c   :  { %v1122_v20 = vsub.f32 %v1114_v10, %v1118_v19 }
 0x66e   :  { %v1124_v21 = vmul.f32 1.442695, %v1122_v20 }
 0x66f   :  { %v1121_v22 = vpop.xlane.xlu1 %1120 }
 0x670   :  { %15254 = vpow2.f32 %v1124_v21  ;;  %v1123_v23 = vsub.f32 %v1115_v17, %v1121_v22 }
 0x672   :  { %v1126_v24 = vmul.f32 1.442695, %v1123_v23 }
 0x674   :  { %15256 = vpow2.f32 %v1126_v24 }
 0x67a   :  { %v15255_v25 = vpop.eup %15254 }
 0x67b   :  { %v1128_v26 = vsel %vm959_vm6, %v15255_v25, 0.0 }
 0x67c   :  { %1129 = vadd.xlane.f32.xlu0 %v1128_v26 }
 0x67e   :  { %v15257_v27 = vpop.eup %15256 }
 0x67f   :  { %v1131_v28 = vsel %vm959_vm6, %v15257_v27, 0.0 }
 0x680   :  { %1132 = vadd.xlane.f32.xlu1 %v1131_v28 }
 0x691   :  { %1363 = vrot.lane.b32.xlu1 %v16970_v62, %s16319_s15 }
 0x692   :  { %1365 = vrot.lane.b32.xlu0 %v16962_v60, %s16319_s15 }
 0x695   :  { %1287 = vrot.lane.b32.xlu1 %v16955_v52, %s16319_s15 }
 0x699   :  { %1285 = vrot.lane.b32.xlu1 %v16959_v59, %s16319_s15 }
 0x69d   :  { %1787 = vrot.lane.b32.xlu1 %v16955_v52, %s16320_s5 }
 0x709   :  { %v1130_v29 = vpop.xlane.xlu0 %1129 }
 0x70a   :  { %15258 = vrcp.f32 %v1130_v29 }
 0x70d   :  { %v1133_v30 = vpop.xlane.xlu1 %1132  ;;  %v1366_v38 = vpop.permute.xlu0 %1365 }
 0x70e   :  { %15260 = vrcp.f32 %v1133_v30 }
 0x711   :  { %v1364_v31 = vpop.permute.xlu1 %1363 }
 0x714   :  { %v15259_v32 = vpop.eup %15258 }
 0x715   :  { %v1288_v33 = vpop.permute.xlu1 %1287  ;;  %v1136_v34 = vmul.f32 %v15259_v32, %v15255_v25  ;;  %v1284_v32 = vld [vmem:[%s18545_s6] sm:$0xff] }
 0x716   :  { %14231 = vmatpush3.xpose.msk.msra.mxu0 %vm959_vm6, %v1288_v33 }
 0x717   :  { %14223 = vmatmul.mubr.msk.f32.vlgmr.msra.gmra.mrb[8].mxu1 %vm959_vm6, %v1136_v34  ;;  %14240 = vmatprep.subr.mxu0 %v16317_v16 }
 0x718   :  { %v15261_v35 = vpop.eup %15260  ;;  %14226 = vmatpush3.msra.mxu1 %v16977_v4  ;;  %14227 = vmatprep.mubr.msk.f32.mxu1 %vm16318_vm1, %v16317_v16 }
 0x719   :  { %v1286_v36 = vpop.permute.xlu1 %1285  ;;  %v1137_v37 = vmul.f32 %v15261_v35, %v15257_v27  ;;  %14235 = vmatprep.subr.mxu1 %v16317_v16 }
 0x71a   :  { %14233 = vmatmul.mubr.msk.f32.vlgmr.msra.gmra.mrb[8].mxu0 %vm959_vm6, %v1286_v36 }
 0x71b   :  { %14228 = vmatmul.mubr.msk.f32.vlgmr.msra.gmra.mrb[10].mxu1 %vm959_vm6, %v1137_v37  ;;  %14242 = vmatprep.mubr.msk.f32.mxu0 %vm16318_vm1, %v16317_v16 }
 0x71c   :  { %14237 = vmatprep.mubr.msk.f32.mxu1 %vm16318_vm1, %v16317_v16 }
 0x71d   :  { %v1788_v63 = vpop.permute.xlu1 %1787 }
 0x71f   :  { %14236 = vmatpush3.xpose.msk.msra.mxu1 %vm959_vm6, %v1366_v38 }
 0x720   :  { %14245 = vmatprep.subr.mxu1 %v16317_v16 }
 0x722   :  { %14238 = vmatmul.mubr.msk.f32.vlgmr.msra.gmra.mrb[12].mxu1 %vm959_vm6, %v1364_v31  ;;  %v13503_v31 = vld [vmem:[%s18545_s6 + $0x8] sm:$0xff] }
 0x723   :  { %14247 = vmatprep.mubr.msk.f32.mxu1 %vm16318_vm1, %v16317_v16 }
 0x7ea   :  { %v17023_v39 = vpop.f32.mrb[8].mxu1 }
 0x7eb   :  { %v14224_v40 = vpop.f32.mrb[9].mxu1 }
 0x7ed   :  { %v1359_v41 = vpop.f32.mrb[8].mxu0 }
 0x7ee   :  { %v17025_v42 = vpop.f32.mrb[10].mxu1  ;;  %v14234_v43 = vpop.f32.mrb[9].mxu0  ;;  %v1441_v57 = vmul.f32 0.35355338, %v1359_v41 }
 0x7ef   :  { %v14229_v44 = vpop.f32.mrb[11].mxu1 }
 0x7f0   :  { %v1443_v58 = vadd.f32 %v1441_v57, %v16984_v7 }
 0x7f2   :  { %v1445_v61 = vsel %vm959_vm6, %v1443_v58, -inf }
 0x7f5   :  { %v1437_v45 = vpop.f32.mrb[12].mxu1 }
 0x7f6   :  { %v1442_v46 = vmul.f32 0.35355338, %v1437_v45  ;;  %v14239_v47 = vpop.f32.mrb[13].mxu1 }
 0x7f8   :  { %v1444_v48 = vadd.f32 %v1442_v46, %v16988_v12 }
 0x7fa   :  { %v1448_v49 = vsel %vm959_vm6, %v1444_v48, -inf }
 0x7fb   :  { %1449 = vmax.xlane.f32.xlu0 %v1448_v49 }
 0x811   :  { %1545 = vrot.lane.b32.xlu0 %v16977_v4, %s16319_s15 }
 0x815   :  { %1785 = vrot.lane.b32.xlu0 %v16959_v59, %s16320_s5 }
 0x819   :  { %1863 = vrot.lane.b32.xlu0 %v16970_v62, %s16320_s5 }
 0x888   :  { %v1450_v50 = vpop.xlane.xlu0 %1449 }
 0x889   :  { %v1452_v51 = vsub.f32 %v1444_v48, %v1450_v50  ;;  %v13514_v48 = vld [vmem:[%s18545_s6 + $0x10] sm:$0xff] }
 0x88b   :  { %v1455_v53 = vmul.f32 1.442695, %v1452_v51 }
 0x88c   :  { %v1546_v54 = vpop.permute.xlu0 %1545 }
 0x88d   :  { %15262 = vpow2.f32 %v1455_v53  ;;  %14246 = vmatpush3.msra.mxu1 %v1546_v54 }
 0x88e   :  { %14260 = vmatprep.subr.mxu1 %v16317_v16 }
 0x890   :  { %v1786_v6 = vpop.permute.xlu0 %1785 }
 0x894   :  { %v1864_v9 = vpop.permute.xlu0 %1863 }
 0x897   :  { %v15263_v55 = vpop.eup %15262 }
 0x898   :  { %v1460_v56 = vsel %vm959_vm6, %v15263_v55, 0.0 }
 0x899   :  { %1461 = vadd.xlane.f32.xlu1 %v1460_v56 }
 0x8aa   :  { %1865 = vrot.lane.b32.xlu1 %v16962_v60, %s16320_s5 }
 0x8ce   :  { %1446 = vmax.xlane.f32.xlu1 %v1445_v61 }
 0x926   :  { %v1462_v2 = vpop.xlane.xlu1 %1461 }
 0x927   :  { %15264 = vrcp.f32 %v1462_v2 }
 0x92a   :  { %v1866_v8 = vpop.permute.xlu1 %1865 }
 0x931   :  { %v15265_v3 = vpop.eup %15264 }
 0x932   :  { %v1466_v5 = vmul.f32 %v15265_v3, %v15263_v55 }
 0x934   :  { %14248 = vmatmul.mubr.msk.f32.vlgmr.msra.gmra.mrb[14].mxu1 %vm959_vm6, %v1466_v5 }
 0x935   :  { %14261 = vmatpush3.xpose.msk.msra.mxu1 %vm959_vm6, %v1788_v63  ;;  %14262 = vmatprep.mubr.msk.f32.mxu1 %vm16318_vm1, %v16317_v16 }
 0x936   :  { %14265 = vmatprep.subr.mxu1 %v16317_v16 }
 0x938   :  { %14263 = vmatmul.mubr.msk.f32.vlgmr.msra.gmra.mrb[16].mxu1 %vm959_vm6, %v1786_v6 }
 0x939   :  { %14266 = vmatpush3.xpose.msk.msra.mxu1 %vm959_vm6, %v1866_v8  ;;  %14267 = vmatprep.mubr.msk.f32.mxu1 %vm16318_vm1, %v16317_v16 }
 0x93a   :  { %14275 = vmatprep.subr.mxu1 %v16317_v16 }
 0x93c   :  { %14268 = vmatmul.mubr.msk.f32.vlgmr.msra.gmra.mrb[18].mxu1 %vm959_vm6, %v1864_v9 }
 0x93d   :  { %14277 = vmatprep.mubr.msk.f32.mxu1 %vm16318_vm1, %v16317_v16 }
 0x95b   :  { %v1447_v10 = vpop.xlane.xlu1 %1446 }
 0x95c   :  { %v1451_v11 = vsub.f32 %v1443_v58, %v1447_v10 }
 0x95e   :  { %v1453_v13 = vmul.f32 1.442695, %v1451_v11 }
 0x960   :  { %15266 = vpow2.f32 %v1453_v13 }
 0x96a   :  { %v15267_v14 = vpop.eup %15266 }
 0x96b   :  { %v1457_v15 = vsel %vm959_vm6, %v15267_v14, 0.0 }
 0x96c   :  { %1458 = vadd.xlane.f32.xlu0 %v1457_v15 }
 0x982   :  { %1468 = vrot.lane.b32.xlu0 %v16973_v0, %s16319_s15 }
 0x986   :  { %2043 = vrot.lane.b32.xlu0 %v16977_v4, %s16320_s5 }
 0x98a   :  { %2206 = vrot.lane.b32.xlu0 %v16955_v52, %s16321_s30 }
 0x98e   :  { %2284 = vrot.lane.b32.xlu0 %v16962_v60, %s16321_s30 }
 0x992   :  { %2204 = vrot.lane.b32.xlu0 %v16959_v59, %s16321_s30 }
 0x9f9   :  { %v1459_v17 = vpop.xlane.xlu0 %1458 }
 0x9fa   :  { %15268 = vrcp.f32 %v1459_v17 }
 0x9fd   :  { %v1469_v18 = vpop.permute.xlu0 %1468 }
 0x9fe   :  { %14241 = vmatpush3.msra.mxu0 %v1469_v18 }
 0x9ff   :  { %14250 = vmatprep.subr.mxu0 %v13503_v31 }
 0xa01   :  { %v2044_v19 = vpop.permute.xlu0 %2043 }
 0xa02   :  { %14276 = vmatpush3.msra.mxu1 %v2044_v19 }
 0xa03   :  { %14285 = vmatprep.subr.mxu1 %v16317_v16 }
 0xa04   :  { %v15269_v20 = vpop.eup %15268 }
 0xa05   :  { %v1465_v21 = vmul.f32 %v15269_v20, %v15267_v14  ;;  %v2207_v50 = vpop.permute.xlu0 %2206 }
 0xa07   :  { %14243 = vmatmul.mubr.msk.f32.vlgmr.msra.gmra.mrb[10].mxu0 %vm959_vm6, %v1465_v21  ;;  %v1617_v52 = vpop.f32.mrb[14].mxu1 }
 0xa08   :  { %v14249_v22 = vpop.f32.mrb[15].mxu1  ;;  %14251 = vmatpush3.msra.mxu0 %v13503_v31 }
 0xa09   :  { %14255 = vmatprep.subr.mxu0 %v1284_v32  ;;  %v2285_v54 = vpop.permute.xlu0 %2284 }
 0xa0b   :  { %v1859_v60 = vpop.f32.mrb[16].mxu1 }
 0xa0c   :  { %v1941_v23 = vmul.f32 0.35355338, %v1859_v60  ;;  %v14264_v24 = vpop.f32.mrb[17].mxu1 }
 0xa0d   :  { %v2205_v55 = vpop.permute.xlu0 %2204 }
 0xa0e   :  { %v1943_v59 = vadd.f32 %v1941_v23, %v16984_v7 }
 0xa0f   :  { %v1937_v25 = vpop.f32.mrb[18].mxu1 }
 0xa10   :  { %v1942_v26 = vmul.f32 0.35355338, %v1937_v25  ;;  %v14269_v27 = vpop.f32.mrb[19].mxu1  ;;  %v1945_v28 = vsel %vm959_vm6, %v1943_v59, -inf }
 0xa11   :  { %1946 = vmax.xlane.f32.xlu1 %v1945_v28 }
 0xa12   :  { %v1944_v29 = vadd.f32 %v1942_v26, %v16988_v12 }
 0xa14   :  { %v1948_v30 = vsel %vm959_vm6, %v1944_v29, -inf }
 0xa15   :  { %1949 = vmax.xlane.f32.xlu1 %v1948_v30 }
 0xa9e   :  { %v1947_v33 = vpop.xlane.xlu1 %1946 }
 0xa9f   :  { %v1951_v34 = vsub.f32 %v1943_v59, %v1947_v33 }
 0xaa1   :  { %v1953_v35 = vmul.f32 1.442695, %v1951_v34  ;;  %v13526_v34 = vld [vmem:[#allocation11] ss:$0 sm:$0xff] }
 0xaa2   :  { %v1950_v36 = vpop.xlane.xlu1 %1949 }
 0xaa3   :  { %15270 = vpow2.f32 %v1953_v35  ;;  %v1952_v37 = vsub.f32 %v1944_v29, %v1950_v36 }
 0xaa5   :  { %v1955_v38 = vmul.f32 1.442695, %v1952_v37 }
 0xaa7   :  { %15272 = vpow2.f32 %v1955_v38 }
 0xaad   :  { %v15271_v40 = vpop.eup %15270 }
 0xaae   :  { %v1957_v41 = vsel %vm959_vm6, %v15271_v40, 0.0 }
 0xaaf   :  { %1958 = vadd.xlane.f32.xlu1 %v1957_v41  ;;  %v15542_v41 = vld [vmem:[%s16798_s14] sm:$0xff]  ;;  %s18548_s14 = sld [smem:[#allocation128_spill]] }
 0xab1   :  { %v15273_v43 = vpop.eup %15272 }
 0xab2   :  { %v1960_v44 = vsel %vm959_vm6, %v15273_v43, 0.0 }
 0xab3   :  { %1961 = vadd.xlane.f32.xlu1 %v1960_v44 }
 0xac4   :  { %1967 = vrot.lane.b32.xlu1 %v16973_v0, %s16320_s5 }
 0xac8   :  { %2282 = vrot.lane.b32.xlu1 %v16970_v62, %s16321_s30 }
 0xada   :  { %v1540_v45 = vpop.f32.mrb[10].mxu0 }
 0xadb   :  { %v14244_v46 = vpop.f32.mrb[11].mxu0  ;;  %14252 = vmatprep.mubr.msk.f32.mxu0 %vm959_vm6, %v1540_v45 }
 0xadc   :  { %14253 = vmatmul.mubr.msk.f32.vlgmr.msra.gmra.mrb[12].mxu0 %vm959_vm6, %v1617_v52 }
 0xadd   :  { %14257 = vmatprep.mubr.msk.f32.mxu0 %vm959_vm6, %v17023_v39  ;;  %14256 = vmatpush3.msra.mxu0 %v1284_v32 }
 0xade   :  { %14270 = vmatprep.subr.mxu0 %v16317_v16 }
 0xae4   :  { %14258 = vmatmul.mubr.msk.f32.vlgmr.msra.gmra.mrb[12].mxu0 %vm959_vm6, %v17025_v42 }
 0xae5   :  { %14272 = vmatprep.mubr.msk.f32.mxu0 %vm16318_vm1, %v16317_v16 }
 0xb3c   :  { %v1959_v47 = vpop.xlane.xlu1 %1958 }
 0xb3d   :  { %15274 = vrcp.f32 %v1959_v47 }
 0xb40   :  { %v1962_v62 = vpop.xlane.xlu1 %1961 }
 0xb41   :  { %15276 = vrcp.f32 %v1962_v62 }
 0xb44   :  { %v1968_v49 = vpop.permute.xlu1 %1967 }
 0xb45   :  { %14271 = vmatpush3.msra.mxu0 %v1968_v49 }
 0xb46   :  { %14280 = vmatprep.subr.mxu0 %v13514_v48 }
 0xb47   :  { %v15275_v51 = vpop.eup %15274 }
 0xb48   :  { %v1965_v39 = vmul.f32 %v15275_v51, %v15271_v40  ;;  %v2283_v63 = vpop.permute.xlu1 %2282 }
 0xb4a   :  { %14273 = vmatmul.mubr.msk.f32.vlgmr.msra.gmra.mrb[14].mxu0 %vm959_vm6, %v1965_v39 }
 0xb4b   :  { %v15277_v53 = vpop.eup %15276  ;;  %14281 = vmatpush3.msra.mxu0 %v13514_v48 }
 0xb4c   :  { %v1966_v42 = vmul.f32 %v15277_v53, %v15273_v43  ;;  %14290 = vmatprep.subr.mxu0 %v16317_v16 }
 0xb4e   :  { %14278 = vmatmul.mubr.msk.f32.vlgmr.msra.gmra.mrb[20].mxu1 %vm959_vm6, %v1966_v42  ;;  %v15191_v42 = vld [vmem:[%s18546_s19 + $0x8] sm:$0xff]  }
 0xb4f   :  { %14286 = vmatpush3.xpose.msk.msra.mxu1 %vm959_vm6, %v2207_v50  ;;  %14287 = vmatprep.mubr.msk.f32.mxu1 %vm16318_vm1, %v16317_v16 }
 0xb50   :  { %14295 = vmatprep.subr.mxu1 %v16317_v16 }
 0xb52   :  { %14288 = vmatmul.mubr.msk.f32.vlgmr.msra.gmra.mrb[22].mxu1 %vm959_vm6, %v2205_v55  ;;  %v15192_v55 = vld [vmem:[%s18547_s16] sm:$0xff]  }
 0xb53   :  { %14297 = vmatprep.mubr.msk.f32.mxu1 %vm16318_vm1, %v16317_v16 }
 0xc1d   :  { %v2039_v56 = vpop.f32.mrb[14].mxu0 }
 0xc1e   :  { %v14274_v57 = vpop.f32.mrb[15].mxu0  ;;  %14282 = vmatprep.mubr.msk.f32.mxu0 %vm959_vm6, %v2039_v56  ;;  %v15193_v56 = vld [vmem:[%s18547_s16 + $0x8] sm:$0xff]  }
 0xc21   :  { %v2115_v58 = vpop.f32.mrb[20].mxu1 }
 0xc22   :  { %v14279_v61 = vpop.f32.mrb[21].mxu1  ;;  %14283 = vmatmul.mubr.msk.f32.vlgmr.msra.gmra.mrb[12].mxu0 %vm959_vm6, %v2115_v58 }
 0xc23   :  { %14291 = vmatpush3.xpose.msk.msra.mxu0 %vm959_vm6, %v2285_v54  ;;  %14292 = vmatprep.mubr.msk.f32.mxu0 %vm16318_vm1, %v16317_v16  ;;  %v15190_v54 = vld [vmem:[%s18546_s19] sm:$0xff]   ;;  %s18572_s19 = sld [smem:[#allocation60_spill]] }
 0xc24   :  { %14300 = vmatprep.subr.mxu0 %v16317_v16 }
 0xc25   :  { %v2278_v2 = vpop.f32.mrb[22].mxu1 }
 0xc26   :  { %v2360_v3 = vmul.f32 0.35355338, %v2278_v2  ;;  %v14289_v5 = vpop.f32.mrb[23].mxu1  ;;  %14293 = vmatmul.mubr.msk.f32.vlgmr.msra.gmra.mrb[16].mxu0 %vm959_vm6, %v2283_v63 }
 0xc27   :  { %14302 = vmatprep.mubr.msk.f32.mxu0 %vm16318_vm1, %v16317_v16 }
 0xc28   :  { %v2362_v6 = vadd.f32 %v2360_v3, %v16984_v7 }
 0xc2a   :  { %v2364_v8 = vsel %vm959_vm6, %v2362_v6, -inf }
 0xc2b   :  { %2365 = vmax.xlane.f32.xlu0 %v2364_v8 }
 0xcb8   :  { %v2366_v9 = vpop.xlane.xlu0 %2365 }
 0xcb9   :  { %v2370_v10 = vsub.f32 %v2362_v6, %v2366_v9 }
 0xcbb   :  { %v2372_v11 = vmul.f32 1.442695, %v2370_v10 }
 0xcbd   :  { %15278 = vpow2.f32 %v2372_v11 }
 0xcc7   :  { %v15279_v13 = vpop.eup %15278 }
 0xcc8   :  { %v2376_v14 = vsel %vm959_vm6, %v15279_v13, 0.0 }
 0xcc9   :  { %2377 = vadd.xlane.f32.xlu0 %v2376_v14 }
 0xcf9   :  { %v2356_v15 = vpop.f32.mrb[16].mxu0 }
 0xcfa   :  { %v2361_v17 = vmul.f32 0.35355338, %v2356_v15  ;;  %v14294_v18 = vpop.f32.mrb[17].mxu0 }
 0xcfb   :  { %v13527_v18 = vld [vmem:[#allocation22] ss:$0 sm:$0xff] }
 0xcfc   :  { %v2363_v19 = vadd.f32 %v2361_v17, %v16988_v12 }
 0xcfe   :  { %v2367_v20 = vsel %vm959_vm6, %v2363_v19, -inf }
 0xcff   :  { %2368 = vmax.xlane.f32.xlu1 %v2367_v20 }
 0xd10   :  { %2462 = vrot.lane.b32.xlu1 %v16977_v4, %s16321_s30 }
 0xd56   :  { %v2378_v59 = vpop.xlane.xlu0 %2377 }
 0xd8c   :  { %v2369_v21 = vpop.xlane.xlu1 %2368 }
 0xd8d   :  { %v2371_v52 = vsub.f32 %v2363_v19, %v2369_v21 }
 0xd8f   :  { %v2374_v22 = vmul.f32 1.442695, %v2371_v52  ;;  %v13528_v52 = vld [vmem:[#allocation23] ss:$0 sm:$0xff] }
 0xd90   :  { %v2463_v60 = vpop.permute.xlu1 %2462 }
 0xd91   :  { %15280 = vpow2.f32 %v2374_v22  ;;  %14301 = vmatpush3.msra.mxu0 %v2463_v60 }
 0xd92   :  { %15282 = vrcp.f32 %v2378_v59 }
 0xd9b   :  { %v15281_v23 = vpop.eup %15280 }
 0xd9c   :  { %v2379_v24 = vsel %vm959_vm6, %v15281_v23, 0.0  ;;  %v15283_v26 = vpop.eup %15282 }
 0xd9d   :  { %2380 = vadd.xlane.f32.xlu0 %v2379_v24  ;;  %v2384_v27 = vmul.f32 %v15283_v26, %v15279_v13  ;;  %v15194_v26 = vld [vmem:[%s18547_s16 + $0x10] sm:$0xff]  }
 0xdb3   :  { %2386 = vrot.lane.b32.xlu0 %v16973_v0, %s16321_s30  ;;  %v13523_v0 = vld [vmem:[%s18545_s6 + $0x18] sm:$0xff]  ;;  %s18571_s6 = sld [smem:[#allocation83_spill]] }
 0xdb4   :  { %14305 = vmatprep.subr.mxu0 %v13523_v0 }
 0xe2a   :  { %v2381_v25 = vpop.xlane.xlu0 %2380 }
 0xe2b   :  { %15284 = vrcp.f32 %v2381_v25 }
 0xe2e   :  { %v2387_v4 = vpop.permute.xlu0 %2386 }
 0xe2f   :  { %14296 = vmatpush3.msra.mxu1 %v2387_v4  ;;  %v15195_v4 = vld [vmem:[%s18547_s16 + $0x18] sm:$0xff]   ;;  %s18573_s16 = sld [smem:[#allocation85_spill]] }
 0xe30   :  { %14298 = vmatmul.mubr.msk.f32.vlgmr.msra.gmra.mrb[24].mxu1 %vm959_vm6, %v2384_v27  ;;  %14310 = vmatprep.subr.bf16.mxu1 %v16317_v16  ;;  %v13529_v27 = vld [vmem:[#allocation16] ss:$0 sm:$0xff] }
 0xe31   :  { %14314 = vmatprep.mubr.msk.bf16.mxu1 %vm16318_vm1, %v16317_v16  ;;  %14311 = vmatpush3.bf16.msra.mxu1 %v15190_v54 }
 0xe32   :  { %14312 = vmatprep.subr.bf16.mxu1 %v16317_v16 }
 0xe35   :  { %v15285_v28 = vpop.eup %15284  ;;  %14313 = vmatpush3.bf16.msra.mxu1 %v15191_v42 }
 0xe36   :  { %v2385_v29 = vmul.f32 %v15285_v28, %v15281_v23  ;;  %14330 = vmatprep.subr.bf16.mxu1 %v16317_v16 }
 0xe38   :  { %14303 = vmatmul.mubr.msk.f32.vlgmr.msra.gmra.mrb[18].mxu0 %vm959_vm6, %v2385_v29 }
 0xe39   :  { %14306 = vmatpush3.msra.mxu0 %v13523_v0 }
 0xe3a   :  { %14318 = vmatprep.subr.bf16.mxu0 %v16317_v16 }
 0xf03   :  { %v2458_v30 = vpop.f32.mrb[24].mxu1 }
 0xf04   :  { %v14299_v31 = vpop.f32.mrb[25].mxu1  ;;  %14307 = vmatprep.mubr.msk.f32.mxu0 %vm959_vm6, %v2458_v30 }
 0xf0b   :  { %v2534_v32 = vpop.f32.mrb[18].mxu0 }
 0xf0c   :  { %v14304_v33 = vpop.f32.mrb[19].mxu0  ;;  %14308 = vmatmul.mubr.msk.f32.vlgmr.msra.gmra.mrb[12].mxu0 %vm959_vm6, %v2534_v32 }
 0xf0d   :  { %14326 = vmatprep.mubr.msk.bf16.mxu0 %vm16318_vm1, %v16317_v16  ;;  %14319 = vmatpush3.bf16.msra.mxu0 %v15192_v55 }
 0xf0e   :  { %14320 = vmatprep.subr.bf16.mxu0 %v16317_v16 }
 0xf11   :  { %14321 = vmatpush3.bf16.msra.mxu0 %v15193_v56  ;;  %v15196_v56 = vld [vmem:[%s18548_s14] sm:$0xff]  }
 0xf12   :  { %14322 = vmatprep.subr.bf16.mxu0 %v16317_v16 }
 0xf15   :  { %14323 = vmatpush3.bf16.msra.mxu0 %v15194_v26 }
 0xf16   :  { %14324 = vmatprep.subr.bf16.mxu0 %v16317_v16 }
 0xf19   :  { %14325 = vmatpush3.bf16.msra.mxu0 %v15195_v4 }
 0xf1a   :  { %14346 = vmatprep.subr.bf16.mxu0 %v16317_v16 }
 0xfdf   :  { %v14309_v35 = vpop.f32.mrb[12].mxu0 }
 0xfe0   :  { %v2631_v36 = vadd.f32 %v14309_v35, %v13526_v34  ;;  %v2612_v37 = vpop.f32.mrb[13].mxu0 }
 0xfe1   :  { %v2630_v38 = vadd.f32 %v13526_v34, %v2612_v37 }
 0xfe2   :  { %v17130_v40 = vadd.f32 %v2631_v36, %v16920_v1  ;;  %v13533_v36 = vld [vmem:[#allocation17] ss:$0 sm:$0xff] }
 0xfe3   :  { %v17133_v43 = vadd.f32 %v15542_v41, %v2630_v38 }
 0xfe4   :  { %v2639_v44 = vsel %vm705_vm0, %v17130_v40, 0.0 }
 0xfe5   :  { %2640 = vadd.xlane.f32.xlu0 %v2639_v44  ;;  %v2636_v45 = vsel %vm705_vm0, %v17133_v43, 0.0 }
 0xfe6   :  { %2637 = vadd.xlane.f32.xlu1 %v2636_v45 }
0x1072   :  { %v2641_v46 = vpop.xlane.xlu0 %2640 }
0x1073   :  { %v2643_v47 = vmul.f32 0.03125, %v2641_v46  ;;  %v2638_v62 = vpop.xlane.xlu1 %2637 }
0x1074   :  { %v2642_v48 = vmul.f32 0.03125, %v2638_v62 }
0x1075   :  { %v2645_v1 = vsub.f32 %v17130_v40, %v2643_v47 }
0x1076   :  { %v2644_v49 = vsub.f32 %v17133_v43, %v2642_v48 }
0x1077   :  { %v2647_v50 = vmul.f32 %v2645_v1, %v2645_v1  ;;  %v2681_v19 = vmul.f32 %v13527_v18, %v2645_v1 }
0x1078   :  { %v2646_v51 = vmul.f32 %v2644_v49, %v2644_v49  ;;  %v2680_v21 = vmul.f32 %v13527_v18, %v2644_v49 }
0x1079   :  { %v2651_v39 = vsel %vm705_vm0, %v2647_v50, 0.0 }
0x107a   :  { %2652 = vadd.xlane.f32.xlu1 %v2651_v39  ;;  %v2648_v53 = vsel %vm705_vm0, %v2646_v51, 0.0 }
0x107b   :  { %2649 = vadd.xlane.f32.xlu0 %v2648_v53 }
0x1107   :  { %v2653_v57 = vpop.xlane.xlu1 %2652 }
0x1108   :  { %v2655_v58 = vmul.f32 0.032258064, %v2653_v57  ;;  %v2650_v61 = vpop.xlane.xlu0 %2649  ;;  %v15197_v57 = vld [vmem:[%s18549_s12] sm:$0xff]  }
0x1109   :  { %v2654_v63 = vmul.f32 0.032258064, %v2650_v61  ;;  %v15199_v61 = vld [vmem:[%s18549_s12 + $0x8] sm:$0xff]   ;;  %s18575_s12 = sld [smem:[#allocation64_spill]] }
0x110a   :  { %15286 = vrsqrt.f32 %v2655_v58  ;;  %vm2665_vm7 = vcmp.eq.f32.partialorder %v2655_v58, inf  ;;  %v2668_v6 = vand.u32 2147483648, %v2655_v58  ;;  %vm2667_vm8 = vcmp.eq.f32.partialorder %v2655_v58, 0.0 }
0x110b   :  { %15288 = vrsqrt.f32 %v2654_v63  ;;  %vm2658_vm9 = vcmp.eq.f32.partialorder %v2654_v63, inf  ;;  %v2661_v10 = vand.u32 2147483648, %v2654_v63  ;;  %vm2660_vm10 = vcmp.eq.f32.partialorder %v2654_v63, 0.0 }
0x1114   :  { %v15287_v2 = vpop.eup %15286 }
0x1115   :  { %v15289_v3 = vpop.eup %15288  ;;  %v2664_v5 = vmul.f32 %v15287_v2, %v2655_v58 }
0x1116   :  { %v2657_v8 = vmul.f32 %v15289_v3, %v2654_v63 }
0x1117   :  { %v2666_v9 = vsel %vm2665_vm7, %v2655_v58, %v2664_v5  ;;  %v15198_v58 = vld [vmem:[%s18548_s14 + $0x8] sm:$0xff]   ;;  %s18574_s14 = sld [smem:[#allocation81_spill]] }
0x1118   :  { %v2669_v11 = vsel %vm2667_vm8, %v2668_v6, %v2666_v9  ;;  %v2659_v13 = vsel %vm2658_vm9, %v2654_v63, %v2657_v8 }
0x1119   :  { %v2671_v14 = vadd.f32 1e-06, %v2669_v11  ;;  %v2662_v15 = vsel %vm2660_vm10, %v2661_v10, %v2659_v13 }
0x111a   :  { %v2670_v17 = vadd.f32 1e-06, %v2662_v15 }
0x111b   :  { %15290 = vrcp.f32 %v2671_v14 }
0x111c   :  { %15292 = vrcp.f32 %v2670_v17 }
0x1125   :  { %v15291_v20 = vpop.eup %15290 }
0x1126   :  { %v15293_v22 = vpop.eup %15292  ;;  %v2683_v60 = vmul.f32 %v15291_v20, %v2681_v19 }
0x1127   :  { %v2682_v23 = vmul.f32 %v15293_v22, %v2680_v21  ;;  %v13539_v21 = vld [vmem:[#allocation34] ss:$0 sm:$0xff] }
0x1128   :  { %v2691_v24 = vadd.f32 %v13528_v52, %v2683_v60 }
0x1129   :  { %v2690_v59 = vadd.f32 %v13528_v52, %v2682_v23 }
0x112b   :  { %v2692_v25 = vpack.c.bf16 %v2691_v24, %v2690_v59  ;;  %v13540_v59 = vld [vmem:[#allocation35] ss:$0 sm:$0xff] }
0x112d   :  { %14315 = vmatmul.mubr.msk.bf16.vlgmr.msra.gmra.mrb[28].mxu1 %vm705_vm0, %v2692_v25 }
0x112e   :  { %14334 = vmatprep.mubr.msk.bf16.mxu1 %vm16318_vm1, %v16317_v16  ;;  %14331 = vmatpush3.bf16.msra.mxu1 %v15196_v56 }
0x112f   :  { %14332 = vmatprep.subr.bf16.mxu1 %v16317_v16 }
0x1132   :  { %14333 = vmatpush3.bf16.msra.mxu1 %v15198_v58 }
0x1133   :  { %14338 = vmatprep.subr.bf16.mxu1 %v16317_v16 }
0x1200   :  { %v2753_v28 = vpop.f32.mrb[28].mxu1 }
0x1201   :  { %v2754_v29 = vadd.f32 %v13529_v27, %v2753_v28  ;;  %v14316_v0 = vpop.f32.mrb[29].mxu1 }
0x1202   :  { %v2756_v30 = vpop.f32.mrb[30].mxu1  ;;  %v13549_v0 = vld [vmem:[#allocation29] ss:$0 sm:$0xff] }
0x1203   :  { %v2757_v31 = vadd.f32 %v13529_v27, %v2756_v30  ;;  %v14317_v32 = vpop.f32.mrb[31].mxu1  ;;  %v2760_v33 = vmax.f32 %v2754_v29, 0.0  ;;  %v15200_v27 = vld [vmem:[%s18550_s24] sm:$0xff]   ;;  %v15201_v29 = vld [vmem:[%s18550_s24 + $0x8] sm:$0xff]   ;;  %s18576_s24 = sld [smem:[#allocation65_spill]] }
0x1205   :  { %v2761_v34 = vmax.f32 %v2757_v31, 0.0 }
0x1207   :  { %v2762_v35 = vpack.c.bf16 %v2761_v34, %v2760_v33 }
0x1209   :  { %14327 = vmatmul.mubr.msk.bf16.vlgmr.msra.gmra.mrb[20].mxu0 %vm2802_vm11, %v2762_v35 }
0x120a   :  { %14350 = vmatprep.mubr.msk.bf16.mxu0 %vm16318_vm1, %v16317_v16  ;;  %14347 = vmatpush3.bf16.msra.mxu0 %v15197_v57 }
0x120b   :  { %14348 = vmatprep.subr.bf16.mxu0 %v16317_v16 }
0x120e   :  { %14349 = vmatpush3.bf16.msra.mxu0 %v15199_v61 }
0x120f   :  { %14364 = vmatprep.subr.mxu0 %v16317_v16 }
0x12dc   :  { %v2840_v37 = vpop.f32.mrb[20].mxu0 }
0x12dd   :  { %v2841_v38 = vadd.f32 %v13533_v36, %v2840_v37  ;;  %v14328_v41 = vpop.f32.mrb[21].mxu0 }
0x12de   :  { %v2843_v44 = vpop.f32.mrb[22].mxu0  ;;  %v13545_v41 = vld [vmem:[#allocation25] ss:$0 sm:$0xff] }
0x12df   :  { %v17162_v45 = vadd.f32 %v2841_v38, %v17133_v43  ;;  %v2844_v46 = vadd.f32 %v13533_v36, %v2843_v44  ;;  %v14329_v47 = vpop.f32.mrb[23].mxu0 }
0x12e1   :  { %v17165_v62 = vadd.f32 %v2844_v46, %v17130_v40  ;;  %v2851_v48 = vsel %vm705_vm0, %v17162_v45, 0.0  ;;  %v13541_v46 = vld [vmem:[#allocation28] ss:$0 sm:$0xff] }
0x12e2   :  { %2852 = vadd.xlane.f32.xlu0 %v2851_v48 }
0x12e3   :  { %v2854_v1 = vsel %vm705_vm0, %v17165_v62, 0.0 }
0x12e4   :  { %2855 = vadd.xlane.f32.xlu1 %v2854_v1 }
0x136f   :  { %v2853_v49 = vpop.xlane.xlu0 %2852 }
0x1370   :  { %v2857_v50 = vmul.f32 0.03125, %v2853_v49 }
0x1371   :  { %v2856_v43 = vpop.xlane.xlu1 %2855 }
0x1372   :  { %v2859_v51 = vsub.f32 %v17162_v45, %v2857_v50  ;;  %v2858_v39 = vmul.f32 0.03125, %v2856_v43 }
0x1374   :  { %v2860_v40 = vsub.f32 %v17165_v62, %v2858_v39  ;;  %v2861_v53 = vmul.f32 %v2859_v51, %v2859_v51  ;;  %v2895_v22 = vmul.f32 %v13539_v21, %v2859_v51 }
0x1376   :  { %v2863_v54 = vsel %vm705_vm0, %v2861_v53, 0.0  ;;  %v2862_v42 = vmul.f32 %v2860_v40, %v2860_v40  ;;  %v2896_v60 = vmul.f32 %v13539_v21, %v2860_v40 }
0x1377   :  { %2864 = vadd.xlane.f32.xlu0 %v2863_v54 }
0x1378   :  { %v2866_v55 = vsel %vm705_vm0, %v2862_v42, 0.0 }
0x1379   :  { %2867 = vadd.xlane.f32.xlu1 %v2866_v55 }
0x1404   :  { %v2865_v63 = vpop.xlane.xlu0 %2864 }
0x1405   :  { %v2869_v2 = vmul.f32 0.032258064, %v2865_v63 }
0x1406   :  { %v2868_v3 = vpop.xlane.xlu1 %2867 }
0x1407   :  { %15294 = vrsqrt.f32 %v2869_v2  ;;  %v2870_v5 = vmul.f32 0.032258064, %v2868_v3  ;;  %vm2873_vm12 = vcmp.eq.f32.partialorder %v2869_v2, inf  ;;  %v2876_v9 = vand.u32 2147483648, %v2869_v2 }
0x1408   :  { %vm2875_vm13 = vcmp.eq.f32.partialorder %v2869_v2, 0.0 }
0x1409   :  { %15296 = vrsqrt.f32 %v2870_v5  ;;  %vm2880_vm14 = vcmp.eq.f32.partialorder %v2870_v5, inf  ;;  %v2883_v17 = vand.u32 2147483648, %v2870_v5  ;;  %vm2882_vm15 = vcmp.eq.f32.partialorder %v2870_v5, 0.0 }
0x1411   :  { %v15295_v6 = vpop.eup %15294 }
0x1412   :  { %v2872_v8 = vmul.f32 %v15295_v6, %v2869_v2 }
0x1413   :  { %v15297_v10 = vpop.eup %15296 }
0x1414   :  { %v2874_v11 = vsel %vm2873_vm12, %v2869_v2, %v2872_v8  ;;  %v2879_v14 = vmul.f32 %v15297_v10, %v2870_v5 }
0x1415   :  { %v2877_v13 = vsel %vm2875_vm13, %v2876_v9, %v2874_v11 }
0x1416   :  { %v2885_v15 = vadd.f32 1e-06, %v2877_v13  ;;  %v2881_v18 = vsel %vm2880_vm14, %v2870_v5, %v2879_v14 }
0x1417   :  { %v2884_v19 = vsel %vm2882_vm15, %v2883_v17, %v2881_v18 }
0x1418   :  { %15298 = vrcp.f32 %v2885_v15  ;;  %v2886_v20 = vadd.f32 1e-06, %v2884_v19 }
0x141a   :  { %15300 = vrcp.f32 %v2886_v20 }
0x1422   :  { %v15299_v52 = vpop.eup %15298 }
0x1423   :  { %v2897_v23 = vmul.f32 %v15299_v52, %v2895_v22 }
0x1424   :  { %v15301_v24 = vpop.eup %15300 }
0x1425   :  { %v2898_v25 = vmul.f32 %v15301_v24, %v2896_v60  ;;  %v2905_v26 = vadd.f32 %v13540_v59, %v2897_v23 }
0x1427   :  { %v2906_v4 = vadd.f32 %v13540_v59, %v2898_v25 }
0x1429   :  { %v2907_v28 = vpack.c.bf16 %v2906_v4, %v2905_v26  ;;  %v17259_v26 = vld [vmem:[%s18544_s11 + $0x8] sm:$0xff] }
0x142b   :  { %14335 = vmatmul.mubr.msk.bf16.vlgmr.msra.gmra.mrb[32].mxu1 %vm705_vm0, %v2907_v28  ;;  %14351 = vmatmul.mubr.msk.bf16.vlgmr.msra.gmra.mrb[24].mxu0 %vm705_vm0, %v2907_v28 }
0x142c   :  { %14339 = vmatpush3.bf16.msra.mxu1 %v15200_v27  ;;  %14342 = vmatprep.mubr.msk.bf16.mxu1 %vm16318_vm1, %v16317_v16 }
0x142d   :  { %14340 = vmatprep.subr.bf16.mxu1 %v16317_v16  ;;  %14366 = vmatprep.mubr.msk.f32.mxu0 %vm16318_vm1, %v16317_v16 }
0x1430   :  { %14341 = vmatpush3.bf16.msra.mxu1 %v15201_v29 }
0x1431   :  { %14354 = vmatprep.subr.mxu1 %v16317_v16 }
0x1433   :  { %14343 = vmatmul.mubr.msk.bf16.vlgmr.msra.gmra.mrb[36].mxu1 %vm705_vm0, %v2907_v28 }
0x1434   :  { %14356 = vmatprep.mubr.msk.f32.mxu1 %vm16318_vm1, %v16317_v16 }
0x14fe   :  { %v2968_v30 = vpop.f32.mrb[32].mxu1  ;;  %v3096_v31 = vpop.f32.mrb[24].mxu0 }
0x14ff   :  { %v17196_v32 = vadd.f32 %v13549_v0, %v3096_v31  ;;  %v14336_v33 = vpop.f32.mrb[33].mxu1  ;;  %v14352_v34 = vpop.f32.mrb[25].mxu0  ;;  %v17204_v50 = vadd.f32 %v13541_v46, %v2968_v30 }
0x1500   :  { %v2971_v35 = vpop.f32.mrb[34].mxu1  ;;  %v3099_v36 = vpop.f32.mrb[26].mxu0 }
0x1501   :  { %v14337_v37 = vpop.f32.mrb[35].mxu1  ;;  %v14353_v38 = vpop.f32.mrb[27].mxu0  ;;  %14365 = vmatpush3.msra.mxu0 %v17196_v32  ;;  %v17215_v51 = vadd.f32 %v13541_v46, %v2971_v35  ;;  %v17218_v39 = vadd.f32 %v13549_v0, %v3099_v36 }
0x1502   :  { %14374 = vmatprep.subr.mxu0 %v16317_v16  ;;  %v17277_v38 = vld [vmem:[%s18544_s11] sm:$0xff]  ;;  %s18570_s11 = sld [smem:[#allocation82_spill]] }
0x1506   :  { %v3032_v44 = vpop.f32.mrb[36].mxu1 }
0x1507   :  { %v17200_v47 = vadd.f32 %v13545_v41, %v3032_v44  ;;  %v14344_v48 = vpop.f32.mrb[37].mxu1 }
0x1508   :  { %v3035_v1 = vpop.f32.mrb[38].mxu1 }
0x1509   :  { %v14345_v49 = vpop.f32.mrb[39].mxu1  ;;  %14355 = vmatpush3.xpose.msk.msra.mxu1 %vm959_vm6, %v17200_v47  ;;  %v17207_v43 = vadd.f32 %v13545_v41, %v3035_v1 }
0x150a   :  { %14359 = vmatprep.subr.mxu1 %v16317_v16 }
0x150c   :  { %14357 = vmatmul.mubr.msk.f32.vlgmr.msra.gmra.mrb[26].mxu1 %vm959_vm6, %v17204_v50 }
0x150d   :  { %14360 = vmatpush3.xpose.msk.msra.mxu1 %vm959_vm6, %v17207_v43  ;;  %14361 = vmatprep.mubr.msk.f32.mxu1 %vm16318_vm1, %v16317_v16 }
0x150e   :  { %14369 = vmatprep.subr.mxu1 %v16317_v16 }
0x1510   :  { %14362 = vmatmul.mubr.msk.f32.vlgmr.msra.gmra.mrb[40].mxu1 %vm959_vm6, %v17215_v51 }
0x1511   :  { %14370 = vmatpush3.msra.mxu1 %v17218_v39  ;;  %14371 = vmatprep.mubr.msk.f32.mxu1 %vm16318_vm1, %v16317_v16 }
0x1512   :  { %14379 = vmatprep.subr.mxu1 %v16317_v16 }
0x15df   :  { %v3175_v40 = vpop.f32.mrb[26].mxu1 }
0x15e0   :  { %v14358_v53 = vpop.f32.mrb[27].mxu1  ;;  %v3255_v5 = vmul.f32 0.35355338, %v3175_v40 }
0x15e3   :  { %v3251_v54 = vpop.f32.mrb[40].mxu1 }
0x15e4   :  { %v3256_v42 = vmul.f32 0.35355338, %v3251_v54  ;;  %v14363_v55 = vpop.f32.mrb[41].mxu1 }
0x15e6   :  { %v3258_v56 = vadd.f32 %v3256_v42, %v16988_v12  ;;  %v3257_v12 = vadd.f32 %v3255_v5, %v16984_v7 }
0x15e8   :  { %v3262_v57 = vsel %vm959_vm6, %v3258_v56, -inf  ;;  %v3259_v6 = vsel %vm959_vm6, %v3257_v12, -inf }
0x15e9   :  { %3263 = vmax.xlane.f32.xlu0 %v3262_v57 }
0x15ff   :  { %3508 = vrot.lane.b32.xlu0 %v17207_v43, %s16319_s15 }
0x1676   :  { %v3264_v58 = vpop.xlane.xlu0 %3263 }
0x1677   :  { %v3266_v61 = vsub.f32 %v3258_v56, %v3264_v58 }
0x1679   :  { %v3269_v63 = vmul.f32 1.442695, %v3266_v61 }
0x167a   :  { %v3509_v11 = vpop.permute.xlu0 %3508 }
0x167b   :  { %15302 = vpow2.f32 %v3269_v63 }
0x1685   :  { %v15303_v2 = vpop.eup %15302 }
0x1686   :  { %v3274_v3 = vsel %vm959_vm6, %v15303_v2, 0.0 }
0x1687   :  { %3275 = vadd.xlane.f32.xlu1 %v3274_v3 }
0x1698   :  { %3506 = vrot.lane.b32.xlu1 %v17215_v51, %s16319_s15 }
0x16bc   :  { %3260 = vmax.xlane.f32.xlu1 %v3259_v6 }
0x16cd   :  { %3428 = vrot.lane.b32.xlu1 %v17204_v50, %s16319_s15 }
0x1714   :  { %v3276_v8 = vpop.xlane.xlu1 %3275 }
0x1715   :  { %15304 = vrcp.f32 %v3276_v8 }
0x1718   :  { %v3507_v7 = vpop.permute.xlu1 %3506 }
0x171f   :  { %v15305_v9 = vpop.eup %15304 }
0x1720   :  { %v3280_v10 = vmul.f32 %v15305_v9, %v15303_v2 }
0x1722   :  { %14372 = vmatmul.mubr.msk.f32.vlgmr.msra.gmra.mrb[42].mxu1 %vm959_vm6, %v3280_v10 }
0x1723   :  { %14380 = vmatpush3.xpose.msk.msra.mxu1 %vm959_vm6, %v3509_v11  ;;  %14381 = vmatprep.mubr.msk.f32.mxu1 %vm16318_vm1, %v16317_v16 }
0x1724   :  { %14389 = vmatprep.subr.mxu1 %v16317_v16 }
0x1726   :  { %14382 = vmatmul.mubr.msk.f32.vlgmr.msra.gmra.mrb[44].mxu1 %vm959_vm6, %v3507_v7 }
0x1727   :  { %14391 = vmatprep.mubr.msk.f32.mxu1 %vm16318_vm1, %v16317_v16 }
0x1749   :  { %v3261_v13 = vpop.xlane.xlu1 %3260 }
0x174a   :  { %v3265_v14 = vsub.f32 %v3257_v12, %v3261_v13 }
0x174c   :  { %v3267_v15 = vmul.f32 1.442695, %v3265_v14 }
0x174d   :  { %v3429_v23 = vpop.permute.xlu1 %3428 }
0x174e   :  { %15306 = vpow2.f32 %v3267_v15 }
0x1758   :  { %v15307_v17 = vpop.eup %15306 }
0x1759   :  { %v3271_v18 = vsel %vm959_vm6, %v15307_v17, 0.0 }
0x175a   :  { %3272 = vadd.xlane.f32.xlu0 %v3271_v18  ;;  %v3427_v18 = vld [vmem:[%s18551_s18] sm:$0xff] }
0x1770   :  { %3430 = vrot.lane.b32.xlu0 %v17200_v47, %s16319_s15 }
0x17e7   :  { %v3273_v19 = vpop.xlane.xlu0 %3272 }
0x17e8   :  { %15308 = vrcp.f32 %v3273_v19 }
0x17eb   :  { %v3431_v52 = vpop.permute.xlu0 %3430 }
0x17f2   :  { %v15309_v20 = vpop.eup %15308 }
0x17f3   :  { %v3279_v21 = vmul.f32 %v15309_v20, %v15307_v17  ;;  %v13565_v17 = vld [vmem:[%s18551_s18 + $0x8] sm:$0xff] }
0x17f5   :  { %14367 = vmatmul.mubr.msk.f32.vlgmr.msra.gmra.mrb[28].mxu0 %vm959_vm6, %v3279_v21  ;;  %v17249_v22 = vpop.f32.mrb[42].mxu1 }
0x17f6   :  { %14375 = vmatpush3.xpose.msk.msra.mxu0 %vm959_vm6, %v3431_v52  ;;  %v14373_v60 = vpop.f32.mrb[43].mxu1  ;;  %14376 = vmatprep.mubr.msk.f32.mxu0 %vm16318_vm1, %v16317_v16 }
0x17f7   :  { %14384 = vmatprep.subr.mxu0 %v16317_v16 }
0x17f9   :  { %14377 = vmatmul.mubr.msk.f32.vlgmr.msra.gmra.mrb[30].mxu0 %vm959_vm6, %v3429_v23  ;;  %v3580_v24 = vpop.f32.mrb[44].mxu1 }
0x17fa   :  { %v3585_v59 = vmul.f32 0.35355338, %v3580_v24  ;;  %v14383_v25 = vpop.f32.mrb[45].mxu1  ;;  %14386 = vmatprep.mubr.msk.f32.mxu0 %vm16318_vm1, %v16317_v16 }
0x17fc   :  { %v3587_v4 = vadd.f32 %v17259_v26, %v3585_v59 }
0x17fe   :  { %v3591_v27 = vsel %vm959_vm6, %v3587_v4, -inf }
0x17ff   :  { %3592 = vmax.xlane.f32.xlu1 %v3591_v27 }
0x1810   :  { %3930 = vrot.lane.b32.xlu1 %v17200_v47, %s16320_s5 }
0x1814   :  { %3928 = vrot.lane.b32.xlu1 %v17204_v50, %s16320_s5 }
0x1818   :  { %4008 = vrot.lane.b32.xlu1 %v17207_v43, %s16320_s5 }
0x188c   :  { %v3593_v28 = vpop.xlane.xlu1 %3592 }
0x188d   :  { %v3595_v29 = vsub.f32 %v3587_v4, %v3593_v28 }
0x188f   :  { %v3598_v0 = vmul.f32 1.442695, %v3595_v29 }
0x1890   :  { %v3931_v1 = vpop.permute.xlu1 %3930 }
0x1891   :  { %15310 = vpow2.f32 %v3598_v0  ;;  %v13576_v0 = vld [vmem:[%s18551_s18 + $0x10] sm:$0xff] }
0x1894   :  { %v3929_v40 = vpop.permute.xlu1 %3928 }
0x1898   :  { %v4009_v54 = vpop.permute.xlu1 %4008 }
0x189b   :  { %v15311_v30 = vpop.eup %15310 }
0x189c   :  { %v3603_v31 = vsel %vm959_vm6, %v15311_v30, 0.0 }
0x189d   :  { %3604 = vadd.xlane.f32.xlu0 %v3603_v31 }
0x18b3   :  { %3688 = vrot.lane.b32.xlu0 %v17218_v39, %s16319_s15 }
0x18b7   :  { %4006 = vrot.lane.b32.xlu0 %v17215_v51, %s16320_s5 }
0x18c8   :  { %v17274_v33 = vpop.f32.mrb[28].mxu0 }
0x18c9   :  { %v14368_v34 = vpop.f32.mrb[29].mxu0 }
0x18cc   :  { %v3502_v35 = vpop.f32.mrb[30].mxu0 }
0x18cd   :  { %v3584_v36 = vmul.f32 0.35355338, %v3502_v35  ;;  %v14378_v37 = vpop.f32.mrb[31].mxu0 }
0x18cf   :  { %v3586_v41 = vadd.f32 %v17277_v38, %v3584_v36 }
0x18d1   :  { %v3588_v44 = vsel %vm959_vm6, %v3586_v41, -inf }
0x18d2   :  { %3589 = vmax.xlane.f32.xlu1 %v3588_v44 }
0x192a   :  { %v3605_v46 = vpop.xlane.xlu0 %3604 }
0x192b   :  { %15312 = vrcp.f32 %v3605_v46 }
0x192e   :  { %v3689_v48 = vpop.permute.xlu0 %3688 }
0x192f   :  { %14390 = vmatpush3.msra.mxu1 %v3689_v48 }
0x1930   :  { %14404 = vmatprep.subr.mxu1 %v16317_v16 }
0x1932   :  { %v4007_v42 = vpop.permute.xlu0 %4006 }
0x1935   :  { %v15313_v49 = vpop.eup %15312 }
0x1936   :  { %v3609_v53 = vmul.f32 %v15313_v49, %v15311_v30 }
0x1938   :  { %14392 = vmatmul.mubr.msk.f32.vlgmr.msra.gmra.mrb[46].mxu1 %vm959_vm6, %v3609_v53 }
0x1939   :  { %14405 = vmatpush3.xpose.msk.msra.mxu1 %vm959_vm6, %v3931_v1  ;;  %14406 = vmatprep.mubr.msk.f32.mxu1 %vm16318_vm1, %v16317_v16 }
0x193a   :  { %14409 = vmatprep.subr.mxu1 %v16317_v16 }
0x193c   :  { %14407 = vmatmul.mubr.msk.f32.vlgmr.msra.gmra.mrb[48].mxu1 %vm959_vm6, %v3929_v40 }
0x193d   :  { %14410 = vmatpush3.xpose.msk.msra.mxu1 %vm959_vm6, %v4009_v54  ;;  %14411 = vmatprep.mubr.msk.f32.mxu1 %vm16318_vm1, %v16317_v16 }
0x193e   :  { %14419 = vmatprep.subr.mxu1 %v16317_v16 }
0x1940   :  { %14412 = vmatmul.mubr.msk.f32.vlgmr.msra.gmra.mrb[50].mxu1 %vm959_vm6, %v4007_v42 }
0x1941   :  { %14421 = vmatprep.mubr.msk.f32.mxu1 %vm16318_vm1, %v16317_v16 }
0x195f   :  { %v3590_v55 = vpop.xlane.xlu1 %3589 }
0x1960   :  { %v3594_v56 = vsub.f32 %v3586_v41, %v3590_v55 }
0x1962   :  { %v3596_v57 = vmul.f32 1.442695, %v3594_v56 }
0x1964   :  { %15314 = vpow2.f32 %v3596_v57 }
0x196e   :  { %v15315_v58 = vpop.eup %15314 }
0x196f   :  { %v3600_v61 = vsel %vm959_vm6, %v15315_v58, 0.0 }
0x1970   :  { %3601 = vadd.xlane.f32.xlu0 %v3600_v61 }
0x1986   :  { %3611 = vrot.lane.b32.xlu0 %v17196_v32, %s16319_s15 }
0x198a   :  { %4186 = vrot.lane.b32.xlu0 %v17218_v39, %s16320_s5 }
0x198e   :  { %4349 = vrot.lane.b32.xlu0 %v17200_v47, %s16321_s30 }
0x1992   :  { %4427 = vrot.lane.b32.xlu0 %v17207_v43, %s16321_s30 }
0x1996   :  { %4347 = vrot.lane.b32.xlu0 %v17204_v50, %s16321_s30 }
0x19fd   :  { %v3602_v63 = vpop.xlane.xlu0 %3601 }
0x19fe   :  { %15316 = vrcp.f32 %v3602_v63 }
0x1a01   :  { %v3612_v2 = vpop.permute.xlu0 %3611 }
0x1a02   :  { %14385 = vmatpush3.msra.mxu0 %v3612_v2 }
0x1a03   :  { %14394 = vmatprep.subr.mxu0 %v13565_v17 }
0x1a05   :  { %v4187_v3 = vpop.permute.xlu0 %4186 }
0x1a06   :  { %14420 = vmatpush3.msra.mxu1 %v4187_v3 }
0x1a07   :  { %14429 = vmatprep.subr.mxu1 %v16317_v16 }
0x1a08   :  { %v15317_v5 = vpop.eup %15316 }
0x1a09   :  { %v3608_v12 = vmul.f32 %v15317_v5, %v15315_v58  ;;  %v4350_v31 = vpop.permute.xlu0 %4349 }
0x1a0b   :  { %14387 = vmatmul.mubr.msk.f32.vlgmr.msra.gmra.mrb[32].mxu0 %vm959_vm6, %v3608_v12  ;;  %v3760_v47 = vpop.f32.mrb[46].mxu1 }
0x1a0c   :  { %v14393_v6 = vpop.f32.mrb[47].mxu1  ;;  %14395 = vmatpush3.msra.mxu0 %v13565_v17 }
0x1a0d   :  { %14399 = vmatprep.subr.mxu0 %v3427_v18  ;;  %v4428_v36 = vpop.permute.xlu0 %4427 }
0x1a0f   :  { %v4002_v43 = vpop.f32.mrb[48].mxu1 }
0x1a10   :  { %v4084_v8 = vmul.f32 0.35355338, %v4002_v43  ;;  %v14408_v9 = vpop.f32.mrb[49].mxu1 }
0x1a11   :  { %v4348_v37 = vpop.permute.xlu0 %4347 }
0x1a12   :  { %v4086_v50 = vadd.f32 %v17277_v38, %v4084_v8 }
0x1a13   :  { %v4080_v10 = vpop.f32.mrb[50].mxu1 }
0x1a14   :  { %v4085_v11 = vmul.f32 0.35355338, %v4080_v10  ;;  %v14413_v7 = vpop.f32.mrb[51].mxu1  ;;  %v4088_v13 = vsel %vm959_vm6, %v4086_v50, -inf }
0x1a15   :  { %4089 = vmax.xlane.f32.xlu1 %v4088_v13 }
0x1a16   :  { %v4087_v14 = vadd.f32 %v17259_v26, %v4085_v11 }
0x1a18   :  { %v4091_v15 = vsel %vm959_vm6, %v4087_v14, -inf }
0x1a19   :  { %4092 = vmax.xlane.f32.xlu1 %v4091_v15 }
0x1aa2   :  { %v4090_v19 = vpop.xlane.xlu1 %4089 }
0x1aa3   :  { %v4094_v20 = vsub.f32 %v4086_v50, %v4090_v19  ;;  %v13588_v19 = vld [vmem:[#allocation26] ss:$0 sm:$0xff] }
0x1aa5   :  { %v4096_v21 = vmul.f32 1.442695, %v4094_v20 }
0x1aa6   :  { %v4093_v52 = vpop.xlane.xlu1 %4092 }
0x1aa7   :  { %15318 = vpow2.f32 %v4096_v21  ;;  %v4095_v60 = vsub.f32 %v4087_v14, %v4093_v52 }
0x1aa9   :  { %v4098_v23 = vmul.f32 1.442695, %v4095_v60 }
0x1aab   :  { %15320 = vpow2.f32 %v4098_v23 }
0x1ab1   :  { %v15319_v24 = vpop.eup %15318 }
0x1ab2   :  { %v4100_v59 = vsel %vm959_vm6, %v15319_v24, 0.0 }
0x1ab3   :  { %4101 = vadd.xlane.f32.xlu1 %v4100_v59  ;;  %v17377_v59 = vld [vmem:[%s16803_s4] sm:$0xff] }
0x1ab5   :  { %v15321_v25 = vpop.eup %15320 }
0x1ab6   :  { %v4103_v4 = vsel %vm959_vm6, %v15321_v25, 0.0 }
0x1ab7   :  { %4104 = vadd.xlane.f32.xlu1 %v4103_v4  ;;  %v17382_v4 = vld [vmem:[%s16803_s4 + $0x8] sm:$0xff]  ;;  %s18552_s4 = sld [smem:[#allocation131_spill]] }
0x1ac8   :  { %4110 = vrot.lane.b32.xlu1 %v17196_v32, %s16320_s5 }
0x1acc   :  { %4425 = vrot.lane.b32.xlu1 %v17215_v51, %s16321_s30 }
0x1ade   :  { %v3683_v27 = vpop.f32.mrb[32].mxu0 }
0x1adf   :  { %v14388_v28 = vpop.f32.mrb[33].mxu0  ;;  %14396 = vmatprep.mubr.msk.f32.mxu0 %vm959_vm6, %v3683_v27 }
0x1ae0   :  { %14397 = vmatmul.mubr.msk.f32.vlgmr.msra.gmra.mrb[34].mxu0 %vm959_vm6, %v3760_v47  ;;  %v5057_v28 = vsel %vm705_vm0, %v17377_v59, 0.0 }
0x1ae1   :  { %14401 = vmatprep.mubr.msk.f32.mxu0 %vm959_vm6, %v17274_v33  ;;  %14400 = vmatpush3.msra.mxu0 %v3427_v18 }
0x1ae2   :  { %14414 = vmatprep.subr.mxu0 %v16317_v16 }
0x1ae8   :  { %14402 = vmatmul.mubr.msk.f32.vlgmr.msra.gmra.mrb[34].mxu0 %vm959_vm6, %v17249_v22 }
0x1ae9   :  { %14416 = vmatprep.mubr.msk.f32.mxu0 %vm16318_vm1, %v16317_v16 }
0x1b40   :  { %v4102_v29 = vpop.xlane.xlu1 %4101 }
0x1b41   :  { %15322 = vrcp.f32 %v4102_v29 }
0x1b44   :  { %v4105_v51 = vpop.xlane.xlu1 %4104 }
0x1b45   :  { %15324 = vrcp.f32 %v4105_v51 }
0x1b48   :  { %v4111_v30 = vpop.permute.xlu1 %4110 }
0x1b49   :  { %14415 = vmatpush3.msra.mxu0 %v4111_v30 }
0x1b4a   :  { %14424 = vmatprep.subr.mxu0 %v13576_v0 }
0x1b4b   :  { %v15323_v34 = vpop.eup %15322 }
0x1b4c   :  { %v4108_v33 = vmul.f32 %v15323_v34, %v15319_v24  ;;  %v4426_v1 = vpop.permute.xlu1 %4425 }
0x1b4e   :  { %14417 = vmatmul.mubr.msk.f32.vlgmr.msra.gmra.mrb[36].mxu0 %vm959_vm6, %v4108_v33 }
0x1b4f   :  { %v15325_v35 = vpop.eup %15324  ;;  %14425 = vmatpush3.msra.mxu0 %v13576_v0 }
0x1b50   :  { %v4109_v22 = vmul.f32 %v15325_v35, %v15321_v25  ;;  %14434 = vmatprep.subr.mxu0 %v16317_v16 }
0x1b52   :  { %14422 = vmatmul.mubr.msk.f32.vlgmr.msra.gmra.mrb[52].mxu1 %vm959_vm6, %v4109_v22 }
0x1b53   :  { %14430 = vmatpush3.xpose.msk.msra.mxu1 %vm959_vm6, %v4350_v31  ;;  %14431 = vmatprep.mubr.msk.f32.mxu1 %vm16318_vm1, %v16317_v16 }
0x1b54   :  { %14439 = vmatprep.subr.mxu1 %v16317_v16 }
0x1b56   :  { %14432 = vmatmul.mubr.msk.f32.vlgmr.msra.gmra.mrb[54].mxu1 %vm959_vm6, %v4348_v37 }
0x1b57   :  { %14441 = vmatprep.mubr.msk.f32.mxu1 %vm16318_vm1, %v16317_v16 }
0x1c21   :  { %v4182_v41 = vpop.f32.mrb[36].mxu0 }
0x1c22   :  { %v14418_v44 = vpop.f32.mrb[37].mxu0  ;;  %14426 = vmatprep.mubr.msk.f32.mxu0 %vm959_vm6, %v4182_v41 }
0x1c25   :  { %v4258_v46 = vpop.f32.mrb[52].mxu1 }
0x1c26   :  { %v14423_v48 = vpop.f32.mrb[53].mxu1  ;;  %14427 = vmatmul.mubr.msk.f32.vlgmr.msra.gmra.mrb[34].mxu0 %vm959_vm6, %v4258_v46 }
0x1c27   :  { %14435 = vmatpush3.xpose.msk.msra.mxu0 %vm959_vm6, %v4428_v36  ;;  %14436 = vmatprep.mubr.msk.f32.mxu0 %vm16318_vm1, %v16317_v16 }
0x1c28   :  { %14444 = vmatprep.subr.mxu0 %v16317_v16 }
0x1c29   :  { %v4421_v49 = vpop.f32.mrb[54].mxu1 }
0x1c2a   :  { %v4503_v40 = vmul.f32 0.35355338, %v4421_v49  ;;  %v14433_v53 = vpop.f32.mrb[55].mxu1  ;;  %14437 = vmatmul.mubr.msk.f32.vlgmr.msra.gmra.mrb[38].mxu0 %vm959_vm6, %v4426_v1 }
0x1c2b   :  { %14446 = vmatprep.mubr.msk.f32.mxu0 %vm16318_vm1, %v16317_v16 }
0x1c2c   :  { %v4505_v54 = vadd.f32 %v17277_v38, %v4503_v40 }
0x1c2e   :  { %v4507_v42 = vsel %vm959_vm6, %v4505_v54, -inf }
0x1c2f   :  { %4508 = vmax.xlane.f32.xlu0 %v4507_v42  ;;  %v15203_v42 = vld [vmem:[%s18552_s4 + $0x8] sm:$0xff]  }
0x1cbc   :  { %v4509_v55 = vpop.xlane.xlu0 %4508 }
0x1cbd   :  { %v4513_v56 = vsub.f32 %v4505_v54, %v4509_v55  ;;  %v15202_v54 = vld [vmem:[%s18552_s4] sm:$0xff]   ;;  %s18578_s4 = sld [smem:[#allocation71_spill]] }
0x1cbe   :  { %v15208_v55 = vld [vmem:[%s18553_s27] sm:$0xff]  }
0x1cbf   :  { %v4515_v57 = vmul.f32 1.442695, %v4513_v56  ;;  %v15209_v56 = vld [vmem:[%s18553_s27 + $0x8] sm:$0xff]  }
0x1cc1   :  { %15326 = vpow2.f32 %v4515_v57 }
0x1ccb   :  { %v15327_v58 = vpop.eup %15326 }
0x1ccc   :  { %v4519_v61 = vsel %vm959_vm6, %v15327_v58, 0.0 }
0x1ccd   :  { %4520 = vadd.xlane.f32.xlu0 %v4519_v61 }
0x1cfd   :  { %v4499_v63 = vpop.f32.mrb[38].mxu0 }
0x1cfe   :  { %v4504_v2 = vmul.f32 0.35355338, %v4499_v63  ;;  %v14438_v3 = vpop.f32.mrb[39].mxu0 }
0x1d00   :  { %v4506_v5 = vadd.f32 %v17259_v26, %v4504_v2 }
0x1d02   :  { %v4510_v12 = vsel %vm959_vm6, %v4506_v5, -inf }
0x1d03   :  { %4511 = vmax.xlane.f32.xlu1 %v4510_v12 }
0x1d14   :  { %4605 = vrot.lane.b32.xlu1 %v17218_v39, %s16321_s30 }
0x1d5a   :  { %v4521_v26 = vpop.xlane.xlu0 %4520 }
0x1d90   :  { %v4512_v38 = vpop.xlane.xlu1 %4511 }
0x1d91   :  { %v4514_v47 = vsub.f32 %v4506_v5, %v4512_v38 }
0x1d93   :  { %v4517_v6 = vmul.f32 1.442695, %v4514_v47 }
0x1d94   :  { %v4606_v43 = vpop.permute.xlu1 %4605 }
0x1d95   :  { %15328 = vpow2.f32 %v4517_v6  ;;  %14445 = vmatpush3.msra.mxu0 %v4606_v43 }
0x1d96   :  { %15330 = vrcp.f32 %v4521_v26 }
0x1d9f   :  { %v15329_v8 = vpop.eup %15328 }
0x1da0   :  { %v4522_v9 = vsel %vm959_vm6, %v15329_v8, 0.0  ;;  %v15331_v10 = vpop.eup %15330 }
0x1da1   :  { %4523 = vadd.xlane.f32.xlu0 %v4522_v9  ;;  %v4527_v11 = vmul.f32 %v15331_v10, %v15327_v58 }
0x1db7   :  { %4529 = vrot.lane.b32.xlu0 %v17196_v32, %s16321_s30  ;;  %v13585_v32 = vld [vmem:[%s18551_s18 + $0x18] sm:$0xff]  ;;  %s18577_s18 = sld [smem:[#allocation70_spill]] }
0x1db8   :  { %14449 = vmatprep.subr.mxu0 %v13585_v32 }
0x1e2e   :  { %v4524_v50 = vpop.xlane.xlu0 %4523 }
0x1e2f   :  { %15332 = vrcp.f32 %v4524_v50 }
0x1e32   :  { %v4530_v39 = vpop.permute.xlu0 %4529 }
0x1e33   :  { %14440 = vmatpush3.msra.mxu1 %v4530_v39 }
0x1e34   :  { %14442 = vmatmul.mubr.msk.f32.vlgmr.msra.gmra.mrb[56].mxu1 %vm959_vm6, %v4527_v11  ;;  %14454 = vmatprep.subr.bf16.mxu1 %v16317_v16 }
0x1e35   :  { %14458 = vmatprep.mubr.msk.bf16.mxu1 %vm16318_vm1, %v16317_v16  ;;  %14455 = vmatpush3.bf16.msra.mxu1 %v15202_v54  ;;  %v15205_v54 = vld [vmem:[%s18555_s22 + $0x8] sm:$0xff]  }
0x1e36   :  { %14456 = vmatprep.subr.bf16.mxu1 %v16317_v16 }
0x1e39   :  { %v15333_v7 = vpop.eup %15332  ;;  %14457 = vmatpush3.bf16.msra.mxu1 %v15203_v42  ;;  %v15206_v42 = vld [vmem:[%s18557_s3] sm:$0xff]  }
0x1e3a   :  { %v4528_v13 = vmul.f32 %v15333_v7, %v15329_v8  ;;  %14474 = vmatprep.subr.bf16.mxu1 %v16317_v16 }
0x1e3c   :  { %14447 = vmatmul.mubr.msk.f32.vlgmr.msra.gmra.mrb[40].mxu0 %vm959_vm6, %v4528_v13 }
0x1e3d   :  { %14450 = vmatpush3.msra.mxu0 %v13585_v32 }
0x1e3e   :  { %14462 = vmatprep.subr.bf16.mxu0 %v16317_v16 }
0x1f07   :  { %v4601_v14 = vpop.f32.mrb[56].mxu1 }
0x1f08   :  { %v14443_v15 = vpop.f32.mrb[57].mxu1  ;;  %14451 = vmatprep.mubr.msk.f32.mxu0 %vm959_vm6, %v4601_v14 }
0x1f0f   :  { %v4677_v17 = vpop.f32.mrb[40].mxu0 }
0x1f10   :  { %v14448_v18 = vpop.f32.mrb[41].mxu0  ;;  %14452 = vmatmul.mubr.msk.f32.vlgmr.msra.gmra.mrb[34].mxu0 %vm959_vm6, %v4677_v17 }
0x1f11   :  { %14470 = vmatprep.mubr.msk.bf16.mxu0 %vm16318_vm1, %v16317_v16  ;;  %14463 = vmatpush3.bf16.msra.mxu0 %v15208_v55  ;;  %v15207_v55 = vld [vmem:[%s18557_s3 + $0x8] sm:$0xff]   ;;  %s18583_s3 = sld [smem:[#allocation92_spill]] }
0x1f12   :  { %14464 = vmatprep.subr.bf16.mxu0 %v16317_v16 }
0x1f15   :  { %14465 = vmatpush3.bf16.msra.mxu0 %v15209_v56  ;;  %v15210_v56 = vld [vmem:[%s18553_s27 + $0x10] sm:$0xff]  }
0x1f16   :  { %14466 = vmatprep.subr.bf16.mxu0 %v16317_v16 }
0x1f19   :  { %14467 = vmatpush3.bf16.msra.mxu0 %v15210_v56 }
0x1f1a   :  { %14468 = vmatprep.subr.bf16.mxu0 %v16317_v16 }
0x1fe3   :  { %v14453_v20 = vpop.f32.mrb[34].mxu0 }
0x1fe4   :  { %v4774_v21 = vadd.f32 %v14453_v20, %v13588_v19  ;;  %v4755_v52 = vpop.f32.mrb[35].mxu0 }
0x1fe5   :  { %v4773_v60 = vadd.f32 %v13588_v19, %v4755_v52 }
0x1fe6   :  { %v17371_v23 = vadd.f32 %v4774_v21, %v17165_v62  ;;  %v5060_v62 = vsel %vm705_vm0, %v17382_v4, 0.0 }
0x1fe7   :  { %v17374_v24 = vadd.f32 %v4773_v60, %v17162_v45 }
0x1fe8   :  { %v4782_v25 = vsel %vm705_vm0, %v17371_v23, 0.0 }
0x1fe9   :  { %4783 = vadd.xlane.f32.xlu0 %v4782_v25  ;;  %v4779_v27 = vsel %vm705_vm0, %v17374_v24, 0.0 }
0x1fea   :  { %4780 = vadd.xlane.f32.xlu1 %v4779_v27  ;;  %v13589_v27 = vld [vmem:[#allocation37] ss:$0 sm:$0xff] }
0x1fed   :  { %5058 = vadd.xlane.f32.xlu0 %v5057_v28 }
0x1fee   :  { %5061 = vadd.xlane.f32.xlu1 %v5060_v62 }
0x2076   :  { %v4784_v45 = vpop.xlane.xlu0 %4783 }
0x2077   :  { %v4786_v29 = vmul.f32 0.03125, %v4784_v45  ;;  %v4781_v51 = vpop.xlane.xlu1 %4780 }
0x2078   :  { %v4785_v0 = vmul.f32 0.03125, %v4781_v51 }
0x2079   :  { %v17391_v30 = vsub.f32 %v17371_v23, %v4786_v29  ;;  %v13590_v29 = vld [vmem:[#allocation38] ss:$0 sm:$0xff] }
0x207a   :  { %v17394_v31 = vsub.f32 %v17374_v24, %v4785_v0  ;;  %v5059_v34 = vpop.xlane.xlu0 %5058  ;;  %v13603_v0 = vld [vmem:[%s18554_s0] ss:$0 sm:$0xff]  ;;  %s18580_s0 = sld [smem:[#allocation63_spill]] }
0x207b   :  { %v5063_v33 = vmul.f32 0.03125, %v5059_v34  ;;  %v5062_v35 = vpop.xlane.xlu1 %5061  ;;  %v4790_v36 = vmul.f32 %v17391_v30, %v17391_v30  ;;  %v4824_v28 = vmul.f32 %v13589_v27, %v17391_v30 }
0x207c   :  { %v5064_v22 = vmul.f32 0.03125, %v5062_v35  ;;  %v4789_v37 = vmul.f32 %v17394_v31, %v17394_v31  ;;  %v4823_v45 = vmul.f32 %v13589_v27, %v17394_v31 }
0x207d   :  { %v17401_v41 = vsub.f32 %v17377_v59, %v5063_v33  ;;  %v4794_v44 = vsel %vm705_vm0, %v4790_v36, 0.0 }
0x207e   :  { %v17405_v46 = vsub.f32 %v17382_v4, %v5064_v22  ;;  %4795 = vadd.xlane.f32.xlu1 %v4794_v44  ;;  %v4791_v48 = vsel %vm705_vm0, %v4789_v37, 0.0 }
0x207f   :  { %4792 = vadd.xlane.f32.xlu0 %v4791_v48  ;;  %v5067_v1 = vmul.f32 %v17401_v41, %v17401_v41  ;;  %v5101_v36 = vmul.f32 %v13603_v0, %v17401_v41  ;;  %v15204_v48 = vld [vmem:[%s18555_s22] sm:$0xff]   ;;  %s18581_s22 = sld [smem:[#allocation104_spill]] }
0x2080   :  { %v5068_v49 = vmul.f32 %v17405_v46, %v17405_v46  ;;  %v5102_v44 = vmul.f32 %v13603_v0, %v17405_v46 }
0x2081   :  { %v5069_v40 = vsel %vm705_vm0, %v5067_v1, 0.0  ;;  %v13604_v1 = vld [vmem:[%s18556_s23] ss:$0 sm:$0xff]  ;;  %s18582_s23 = sld [smem:[#allocation105_spill]] }
0x2082   :  { %v5072_v53 = vsel %vm705_vm0, %v5068_v49, 0.0 }
0x2083   :  { %5070 = vadd.xlane.f32.xlu0 %v5069_v40  ;;  %5073 = vadd.xlane.f32.xlu1 %v5072_v53 }
0x210b   :  { %v4796_v57 = vpop.xlane.xlu1 %4795 }
0x210c   :  { %v4798_v58 = vmul.f32 0.032258064, %v4796_v57  ;;  %v4793_v61 = vpop.xlane.xlu0 %4792  ;;  %v15211_v57 = vld [vmem:[%s18553_s27 + $0x18] sm:$0xff]   ;;  %s18579_s27 = sld [smem:[#allocation62_spill]] }
0x210d   :  { %v4797_v63 = vmul.f32 0.032258064, %v4793_v61  ;;  %14469 = vmatpush3.bf16.msra.mxu0 %v15211_v57 }
0x210e   :  { %15334 = vrsqrt.f32 %v4798_v58  ;;  %vm4808_vm2 = vcmp.eq.f32.partialorder %v4798_v58, inf  ;;  %v4811_v43 = vand.u32 2147483648, %v4798_v58  ;;  %vm4810_vm3 = vcmp.eq.f32.partialorder %v4798_v58, 0.0  ;;  %14490 = vmatprep.subr.bf16.mxu0 %v16317_v16 }
0x210f   :  { %15336 = vrsqrt.f32 %v4797_v63  ;;  %vm4801_vm4 = vcmp.eq.f32.partialorder %v4797_v63, inf  ;;  %v4804_v26 = vand.u32 2147483648, %v4797_v63  ;;  %vm4803_vm5 = vcmp.eq.f32.partialorder %v4797_v63, 0.0 }
0x2110   :  { %v5071_v2 = vpop.xlane.xlu0 %5070  ;;  %v5074_v3 = vpop.xlane.xlu1 %5073 }
0x2111   :  { %v5075_v5 = vmul.f32 0.032258064, %v5071_v2  ;;  %v5076_v12 = vmul.f32 0.032258064, %v5074_v3 }
0x2113   :  { %15338 = vrsqrt.f32 %v5075_v5  ;;  %vm5079_vm7 = vcmp.eq.f32.partialorder %v5075_v5, inf  ;;  %vm5081_vm8 = vcmp.eq.f32.partialorder %v5075_v5, 0.0  ;;  %v5082_v15 = vand.u32 2147483648, %v5075_v5 }
0x2114   :  { %15340 = vrsqrt.f32 %v5076_v12  ;;  %vm5086_vm9 = vcmp.eq.f32.partialorder %v5076_v12, inf  ;;  %v5089_v19 = vand.u32 2147483648, %v5076_v12  ;;  %vm5088_vm10 = vcmp.eq.f32.partialorder %v5076_v12, 0.0 }
0x2118   :  { %v15335_v38 = vpop.eup %15334 }
0x2119   :  { %v15337_v47 = vpop.eup %15336  ;;  %v4807_v6 = vmul.f32 %v15335_v38, %v4798_v58 }
0x211a   :  { %v4800_v8 = vmul.f32 %v15337_v47, %v4797_v63 }
0x211b   :  { %v4809_v9 = vsel %vm4808_vm2, %v4798_v58, %v4807_v6  ;;  %v13591_v58 = vld [vmem:[#allocation31] ss:$0 sm:$0xff] }
0x211c   :  { %v4812_v50 = vsel %vm4810_vm3, %v4811_v43, %v4809_v9  ;;  %v4802_v10 = vsel %vm4801_vm4, %v4797_v63, %v4800_v8  ;;  %v15212_v6 = vld [vmem:[%s18558_s21] sm:$0xff]  }
0x211d   :  { %v15339_v39 = vpop.eup %15338  ;;  %v4814_v11 = vadd.f32 1e-06, %v4812_v50  ;;  %v4805_v7 = vsel %vm4803_vm5, %v4804_v26, %v4802_v10  ;;  %v15213_v50 = vld [vmem:[%s18558_s21 + $0x8] sm:$0xff]   ;;  %s18584_s21 = sld [smem:[#allocation93_spill]] }
0x211e   :  { %v15341_v13 = vpop.eup %15340  ;;  %v4813_v32 = vadd.f32 1e-06, %v4805_v7  ;;  %v5078_v14 = vmul.f32 %v15339_v39, %v5075_v5  ;;  %v13609_v39 = vld [vmem:[%s18559_s26] ss:$0 sm:$0xff]  ;;  %s18585_s26 = sld [smem:[#allocation102_spill]] }
0x211f   :  { %15342 = vrcp.f32 %v4814_v11  ;;  %v5085_v17 = vmul.f32 %v15341_v13, %v5076_v12  ;;  %v13605_v7 = vld [vmem:[%s18560_s20] ss:$0 sm:$0xff]  ;;  %s18586_s20 = sld [smem:[#allocation101_spill]] }
0x2120   :  { %15344 = vrcp.f32 %v4813_v32  ;;  %v5080_v18 = vsel %vm5079_vm7, %v5075_v5, %v5078_v14 }
0x2121   :  { %v5083_v20 = vsel %vm5081_vm8, %v5082_v15, %v5080_v18  ;;  %v5087_v21 = vsel %vm5086_vm9, %v5076_v12, %v5085_v17 }
0x2122   :  { %v5091_v52 = vadd.f32 1e-06, %v5083_v20  ;;  %v5090_v60 = vsel %vm5088_vm10, %v5089_v19, %v5087_v21 }
0x2123   :  { %v5092_v25 = vadd.f32 1e-06, %v5090_v60 }
0x2124   :  { %15346 = vrcp.f32 %v5091_v52  ;;  %v17485_v52 = vld [vmem:[#allocation32] ss:$0 sm:$0xff] }
0x2125   :  { %15348 = vrcp.f32 %v5092_v25 }
0x2129   :  { %v15343_v62 = vpop.eup %15342 }
0x212a   :  { %v15345_v51 = vpop.eup %15344  ;;  %v4826_v34 = vmul.f32 %v15343_v62, %v4824_v28  ;;  %v13613_v28 = vld [vmem:[%s18561_s13] ss:$0 sm:$0xff]  ;;  %s18587_s13 = sld [smem:[#allocation98_spill]] }
0x212b   :  { %v4825_v33 = vmul.f32 %v15345_v51, %v4823_v45 }
0x212c   :  { %v4834_v35 = vadd.f32 %v13590_v29, %v4826_v34 }
0x212d   :  { %v4833_v22 = vadd.f32 %v13590_v29, %v4825_v33 }
0x212e   :  { %v15347_v37 = vpop.eup %15346 }
0x212f   :  { %v15349_v30 = vpop.eup %15348  ;;  %v4835_v49 = vpack.c.bf16 %v4834_v35, %v4833_v22  ;;  %v5103_v31 = vmul.f32 %v15347_v37, %v5101_v36  ;;  %v17500_v22 = vld [vmem:[%s16793_s9 + $0x8] sm:$0xff] }
0x2130   :  { %v5104_v40 = vmul.f32 %v15349_v30, %v5102_v44 }
0x2131   :  { %14459 = vmatmul.mubr.msk.bf16.vlgmr.msra.gmra.mrb[60].mxu1 %vm705_vm0, %v4835_v49  ;;  %v5111_v53 = vadd.f32 %v13604_v1, %v5103_v31 }
0x2132   :  { %14475 = vmatpush3.bf16.msra.mxu1 %v15204_v48  ;;  %14478 = vmatprep.mubr.msk.bf16.mxu1 %vm16318_vm1, %v16317_v16  ;;  %v5112_v41 = vadd.f32 %v13604_v1, %v5104_v40 }
0x2133   :  { %14476 = vmatprep.subr.bf16.mxu1 %v16317_v16 }
0x2134   :  { %v5113_v46 = vpack.c.bf16 %v5112_v41, %v5111_v53  ;;  %v17510_v41 = vld [vmem:[%s16793_s9] sm:$0xff] }
0x2136   :  { %14477 = vmatpush3.bf16.msra.mxu1 %v15205_v54 }
0x2137   :  { %14482 = vmatprep.subr.bf16.mxu1 %v16317_v16 }
0x2139   :  { %14479 = vmatmul.mubr.msk.bf16.vlgmr.msra.gmra.mrb[64].mxu1 %vm705_vm0, %v5113_v46 }
0x213a   :  { %14483 = vmatpush3.bf16.msra.mxu1 %v15206_v42  ;;  %14486 = vmatprep.mubr.msk.bf16.mxu1 %vm16318_vm1, %v16317_v16 }
0x213b   :  { %14484 = vmatprep.subr.bf16.mxu1 %v16317_v16 }
0x213e   :  { %14485 = vmatpush3.bf16.msra.mxu1 %v15207_v55 }
0x213f   :  { %14498 = vmatprep.subr.mxu1 %v16317_v16 }
0x2141   :  { %14487 = vmatmul.mubr.msk.bf16.vlgmr.msra.gmra.mrb[68].mxu1 %vm705_vm0, %v5113_v46 }
0x2142   :  { %14500 = vmatprep.mubr.msk.f32.mxu1 %vm16318_vm1, %v16317_v16 }
0x2204   :  { %v4896_v61 = vpop.f32.mrb[60].mxu1 }
0x2205   :  { %v4897_v63 = vadd.f32 %v13591_v58, %v4896_v61  ;;  %v14460_v2 = vpop.f32.mrb[61].mxu1 }
0x2206   :  { %v4899_v3 = vpop.f32.mrb[62].mxu1 }
0x2207   :  { %v4900_v5 = vadd.f32 %v13591_v58, %v4899_v3  ;;  %v14461_v12 = vpop.f32.mrb[63].mxu1  ;;  %v4903_v38 = vmax.f32 %v4897_v63, 0.0 }
0x2209   :  { %v4904_v47 = vmax.f32 %v4900_v5, 0.0 }
0x220b   :  { %v4905_v43 = vpack.c.bf16 %v4904_v47, %v4903_v38 }
0x220c   :  { %v5174_v8 = vpop.f32.mrb[64].mxu1 }
0x220d   :  { %14471 = vmatmul.mubr.msk.bf16.vlgmr.msra.gmra.mrb[44].mxu0 %vm2802_vm11, %v4905_v43  ;;  %v14480_v9 = vpop.f32.mrb[65].mxu1  ;;  %v17465_v17 = vadd.f32 %v13605_v7, %v5174_v8 }
0x220e   :  { %v5177_v26 = vpop.f32.mrb[66].mxu1  ;;  %14491 = vmatpush3.bf16.msra.mxu0 %v15212_v6  ;;  %14494 = vmatprep.mubr.msk.bf16.mxu0 %vm16318_vm1, %v16317_v16 }
0x220f   :  { %v14481_v10 = vpop.f32.mrb[67].mxu1  ;;  %14492 = vmatprep.subr.bf16.mxu0 %v16317_v16  ;;  %v17476_v19 = vadd.f32 %v13605_v7, %v5177_v26 }
0x2212   :  { %14493 = vmatpush3.bf16.msra.mxu0 %v15213_v50 }
0x2213   :  { %14508 = vmatprep.subr.mxu0 %v16317_v16 }
0x2214   :  { %v5238_v11 = vpop.f32.mrb[68].mxu1 }
0x2215   :  { %v17458_v13 = vadd.f32 %v13609_v39, %v5238_v11  ;;  %v14488_v32 = vpop.f32.mrb[69].mxu1  ;;  %14495 = vmatmul.mubr.msk.bf16.vlgmr.msra.gmra.mrb[48].mxu0 %vm705_vm0, %v5113_v46 }
0x2216   :  { %v5241_v14 = vpop.f32.mrb[70].mxu1  ;;  %14510 = vmatprep.mubr.msk.f32.mxu0 %vm16318_vm1, %v16317_v16 }
0x2217   :  { %v14489_v15 = vpop.f32.mrb[71].mxu1  ;;  %14499 = vmatpush3.xpose.msk.msra.mxu1 %vm959_vm6, %v17458_v13  ;;  %v17468_v18 = vadd.f32 %v13609_v39, %v5241_v14 }
0x2218   :  { %14503 = vmatprep.subr.mxu1 %v16317_v16 }
0x221a   :  { %14501 = vmatmul.mubr.msk.f32.vlgmr.msra.gmra.mrb[58].mxu1 %vm959_vm6, %v17465_v17 }
0x221b   :  { %14504 = vmatpush3.xpose.msk.msra.mxu1 %vm959_vm6, %v17468_v18  ;;  %14505 = vmatprep.mubr.msk.f32.mxu1 %vm16318_vm1, %v16317_v16 }
0x221c   :  { %14513 = vmatprep.subr.mxu1 %v16317_v16 }
0x221e   :  { %14506 = vmatmul.mubr.msk.f32.vlgmr.msra.gmra.mrb[72].mxu1 %vm959_vm6, %v17476_v19 }
0x221f   :  { %14515 = vmatprep.mubr.msk.f32.mxu1 %vm16318_vm1, %v16317_v16 }
0x22e0   :  { %v17483_v20 = vpop.f32.mrb[44].mxu0 }
0x22e1   :  { %v14472_v21 = vpop.f32.mrb[45].mxu0 }
0x22e2   :  { %v4985_v60 = vpop.f32.mrb[46].mxu0 }
0x22e3   :  { %v17488_v25 = vadd.f32 %v17485_v52, %v4985_v60  ;;  %v14473_v27 = vpop.f32.mrb[47].mxu0 }
0x22e8   :  { %v5302_v62 = vpop.f32.mrb[48].mxu0 }
0x22e9   :  { %v17491_v45 = vadd.f32 %v13613_v28, %v5302_v62  ;;  %v14496_v29 = vpop.f32.mrb[49].mxu0 }
0x22ea   :  { %v5305_v51 = vpop.f32.mrb[50].mxu0 }
0x22eb   :  { %v17493_v0 = vadd.f32 %v13613_v28, %v5305_v51  ;;  %v14497_v34 = vpop.f32.mrb[51].mxu0  ;;  %14509 = vmatpush3.msra.mxu0 %v17491_v45 }
0x22ec   :  { %14518 = vmatprep.subr.mxu0 %v16317_v16 }
0x22ed   :  { %v5381_v33 = vpop.f32.mrb[58].mxu1  ;;  %14514 = vmatpush3.msra.mxu1 %v17493_v0 }
0x22ee   :  { %v14502_v35 = vpop.f32.mrb[59].mxu1  ;;  %14523 = vmatprep.subr.mxu1 %v16317_v16  ;;  %v5461_v54 = vmul.f32 0.35355338, %v5381_v33 }
0x22f0   :  { %v5463_v46 = vadd.f32 %v5461_v54, %v17510_v41 }
0x22f1   :  { %v5457_v36 = vpop.f32.mrb[72].mxu1 }
0x22f2   :  { %v5462_v37 = vmul.f32 0.35355338, %v5457_v36  ;;  %v14507_v44 = vpop.f32.mrb[73].mxu1  ;;  %v5465_v42 = vsel %vm959_vm6, %v5463_v46, -inf }
0x22f4   :  { %v5464_v48 = vadd.f32 %v5462_v37, %v17500_v22 }
0x22f6   :  { %v5468_v1 = vsel %vm959_vm6, %v5464_v48, -inf }
0x22f7   :  { %5469 = vmax.xlane.f32.xlu0 %v5468_v1 }
0x230d   :  { %5714 = vrot.lane.b32.xlu0 %v17468_v18, %s16319_s15 }
0x2384   :  { %v5470_v30 = vpop.xlane.xlu0 %5469 }
0x2385   :  { %v5472_v49 = vsub.f32 %v5464_v48, %v5470_v30 }
0x2387   :  { %v5475_v31 = vmul.f32 1.442695, %v5472_v49 }
0x2388   :  { %v5715_v58 = vpop.permute.xlu0 %5714 }
0x2389   :  { %15350 = vpow2.f32 %v5475_v31 }
0x2393   :  { %v15351_v40 = vpop.eup %15350 }
0x2394   :  { %v5480_v53 = vsel %vm959_vm6, %v15351_v40, 0.0 }
0x2395   :  { %5481 = vadd.xlane.f32.xlu1 %v5480_v53 }
0x23a6   :  { %5712 = vrot.lane.b32.xlu1 %v17476_v19, %s16319_s15 }
0x23ca   :  { %5466 = vmax.xlane.f32.xlu1 %v5465_v42 }
0x23db   :  { %5634 = vrot.lane.b32.xlu1 %v17465_v17, %s16319_s15 }
0x2422   :  { %v5482_v55 = vpop.xlane.xlu1 %5481 }
0x2423   :  { %15352 = vrcp.f32 %v5482_v55 }
0x2426   :  { %v5713_v61 = vpop.permute.xlu1 %5712 }
0x242d   :  { %v15353_v56 = vpop.eup %15352 }
0x242e   :  { %v5486_v57 = vmul.f32 %v15353_v56, %v15351_v40 }
0x2430   :  { %14516 = vmatmul.mubr.msk.f32.vlgmr.msra.gmra.mrb[74].mxu1 %vm959_vm6, %v5486_v57 }
0x2431   :  { %14524 = vmatpush3.xpose.msk.msra.mxu1 %vm959_vm6, %v5715_v58  ;;  %14525 = vmatprep.mubr.msk.f32.mxu1 %vm16318_vm1, %v16317_v16 }
0x2432   :  { %14533 = vmatprep.subr.mxu1 %v16317_v16 }
0x2434   :  { %14526 = vmatmul.mubr.msk.f32.vlgmr.msra.gmra.mrb[76].mxu1 %vm959_vm6, %v5713_v61 }
0x2435   :  { %14535 = vmatprep.mubr.msk.f32.mxu1 %vm16318_vm1, %v16317_v16 }
0x2457   :  { %v5467_v63 = vpop.xlane.xlu1 %5466 }
0x2458   :  { %v5471_v2 = vsub.f32 %v5463_v46, %v5467_v63 }
0x245a   :  { %v5473_v3 = vmul.f32 1.442695, %v5471_v2 }
0x245b   :  { %v5635_v26 = vpop.permute.xlu1 %5634 }
0x245c   :  { %15354 = vpow2.f32 %v5473_v3 }
0x2466   :  { %v15355_v5 = vpop.eup %15354 }
0x2467   :  { %v5477_v12 = vsel %vm959_vm6, %v15355_v5, 0.0 }
0x2468   :  { %5478 = vadd.xlane.f32.xlu0 %v5477_v12 }
0x247e   :  { %5636 = vrot.lane.b32.xlu0 %v17458_v13, %s16319_s15 }
0x24f5   :  { %v5479_v38 = vpop.xlane.xlu0 %5478 }
0x24f6   :  { %15356 = vrcp.f32 %v5479_v38 }
0x24f9   :  { %v5637_v43 = vpop.permute.xlu0 %5636 }
0x2500   :  { %v15357_v47 = vpop.eup %15356 }
0x2501   :  { %v5485_v6 = vmul.f32 %v15357_v47, %v15355_v5 }
0x2503   :  { %14511 = vmatmul.mubr.msk.f32.vlgmr.msra.gmra.mrb[42].mxu0 %vm959_vm6, %v5485_v6  ;;  %v17528_v8 = vpop.f32.mrb[74].mxu1 }
0x2504   :  { %14519 = vmatpush3.xpose.msk.msra.mxu0 %vm959_vm6, %v5637_v43  ;;  %v14517_v9 = vpop.f32.mrb[75].mxu1  ;;  %14520 = vmatprep.mubr.msk.f32.mxu0 %vm16318_vm1, %v16317_v16  ;;  %v13629_v43 = vld [vmem:[%s18562_s28 + $0x8] sm:$0xff] }
0x2505   :  { %14528 = vmatprep.subr.mxu0 %v16317_v16  ;;  %v5633_v9 = vld [vmem:[%s18562_s28] sm:$0xff] }
0x2507   :  { %14521 = vmatmul.mubr.msk.f32.vlgmr.msra.gmra.mrb[52].mxu0 %vm959_vm6, %v5635_v26  ;;  %v5786_v50 = vpop.f32.mrb[76].mxu1 }
0x2508   :  { %v5791_v10 = vmul.f32 0.35355338, %v5786_v50  ;;  %v14527_v39 = vpop.f32.mrb[77].mxu1  ;;  %14530 = vmatprep.mubr.msk.f32.mxu0 %vm16318_vm1, %v16317_v16 }
0x250a   :  { %v5793_v11 = vadd.f32 %v5791_v10, %v17500_v22 }
0x250c   :  { %v5797_v7 = vsel %vm959_vm6, %v5793_v11, -inf }
0x250d   :  { %5798 = vmax.xlane.f32.xlu1 %v5797_v7 }
0x251e   :  { %6136 = vrot.lane.b32.xlu1 %v17458_v13, %s16320_s5 }
0x2522   :  { %6134 = vrot.lane.b32.xlu1 %v17465_v17, %s16320_s5 }
0x2526   :  { %6214 = vrot.lane.b32.xlu1 %v17468_v18, %s16320_s5 }
0x259a   :  { %v5799_v32 = vpop.xlane.xlu1 %5798 }
0x259b   :  { %v5801_v14 = vsub.f32 %v5793_v11, %v5799_v32 }
0x259d   :  { %v5804_v15 = vmul.f32 1.442695, %v5801_v14 }
0x259e   :  { %v6137_v37 = vpop.permute.xlu1 %6136 }
0x259f   :  { %15358 = vpow2.f32 %v5804_v15 }
0x25a2   :  { %v6135_v48 = vpop.permute.xlu1 %6134 }
0x25a6   :  { %v6215_v30 = vpop.permute.xlu1 %6214 }
0x25a9   :  { %v15359_v21 = vpop.eup %15358 }
0x25aa   :  { %v5809_v60 = vsel %vm959_vm6, %v15359_v21, 0.0 }
0x25ab   :  { %5810 = vadd.xlane.f32.xlu0 %v5809_v60 }
0x25c1   :  { %5894 = vrot.lane.b32.xlu0 %v17493_v0, %s16319_s15 }
0x25c5   :  { %6212 = vrot.lane.b32.xlu0 %v17476_v19, %s16320_s5 }
0x25d6   :  { %v17550_v27 = vpop.f32.mrb[42].mxu0 }
0x25d7   :  { %v14512_v28 = vpop.f32.mrb[43].mxu0 }
0x25da   :  { %v5708_v62 = vpop.f32.mrb[52].mxu0 }
0x25db   :  { %v5790_v29 = vmul.f32 0.35355338, %v5708_v62  ;;  %v14522_v51 = vpop.f32.mrb[53].mxu0 }
0x25dd   :  { %v5792_v34 = vadd.f32 %v5790_v29, %v17510_v41  ;;  %v13640_v29 = vld [vmem:[%s18562_s28 + $0x10] sm:$0xff] }
0x25df   :  { %v5794_v33 = vsel %vm959_vm6, %v5792_v34, -inf }
0x25e0   :  { %5795 = vmax.xlane.f32.xlu1 %v5794_v33 }
0x2638   :  { %v5811_v35 = vpop.xlane.xlu0 %5810 }
0x2639   :  { %15360 = vrcp.f32 %v5811_v35 }
0x263c   :  { %v5895_v36 = vpop.permute.xlu0 %5894 }
0x263d   :  { %14534 = vmatpush3.msra.mxu1 %v5895_v36 }
0x263e   :  { %14548 = vmatprep.subr.mxu1 %v16317_v16 }
0x2640   :  { %v6213_v49 = vpop.permute.xlu0 %6212 }
0x2643   :  { %v15361_v44 = vpop.eup %15360 }
0x2644   :  { %v5815_v1 = vmul.f32 %v15361_v44, %v15359_v21 }
0x2646   :  { %14536 = vmatmul.mubr.msk.f32.vlgmr.msra.gmra.mrb[78].mxu1 %vm959_vm6, %v5815_v1 }
0x2647   :  { %14549 = vmatpush3.xpose.msk.msra.mxu1 %vm959_vm6, %v6137_v37  ;;  %14550 = vmatprep.mubr.msk.f32.mxu1 %vm16318_vm1, %v16317_v16 }
0x2648   :  { %14553 = vmatprep.subr.mxu1 %v16317_v16 }
0x264a   :  { %14551 = vmatmul.mubr.msk.f32.vlgmr.msra.gmra.mrb[80].mxu1 %vm959_vm6, %v6135_v48 }
0x264b   :  { %14554 = vmatpush3.xpose.msk.msra.mxu1 %vm959_vm6, %v6215_v30  ;;  %14555 = vmatprep.mubr.msk.f32.mxu1 %vm16318_vm1, %v16317_v16 }
0x264c   :  { %14563 = vmatprep.subr.mxu1 %v16317_v16 }
0x264e   :  { %14556 = vmatmul.mubr.msk.f32.vlgmr.msra.gmra.mrb[82].mxu1 %vm959_vm6, %v6213_v49 }
0x264f   :  { %14565 = vmatprep.mubr.msk.f32.mxu1 %vm16318_vm1, %v16317_v16 }
0x266d   :  { %v5796_v31 = vpop.xlane.xlu1 %5795 }
0x266e   :  { %v5800_v40 = vsub.f32 %v5792_v34, %v5796_v31 }
0x2670   :  { %v5802_v53 = vmul.f32 1.442695, %v5800_v40 }
0x2672   :  { %15362 = vpow2.f32 %v5802_v53 }
0x267c   :  { %v15363_v54 = vpop.eup %15362 }
0x267d   :  { %v5806_v46 = vsel %vm959_vm6, %v15363_v54, 0.0 }
0x267e   :  { %5807 = vadd.xlane.f32.xlu0 %v5806_v46 }
0x2694   :  { %5817 = vrot.lane.b32.xlu0 %v17491_v45, %s16319_s15 }
0x2698   :  { %6392 = vrot.lane.b32.xlu0 %v17493_v0, %s16320_s5 }
0x269c   :  { %6555 = vrot.lane.b32.xlu0 %v17458_v13, %s16321_s30 }
0x26a0   :  { %6633 = vrot.lane.b32.xlu0 %v17468_v18, %s16321_s30 }
0x26a4   :  { %6553 = vrot.lane.b32.xlu0 %v17465_v17, %s16321_s30 }
0x270b   :  { %v5808_v42 = vpop.xlane.xlu0 %5807 }
0x270c   :  { %15364 = vrcp.f32 %v5808_v42 }
0x270f   :  { %v5818_v55 = vpop.permute.xlu0 %5817 }
0x2710   :  { %14529 = vmatpush3.msra.mxu0 %v5818_v55 }
0x2711   :  { %14538 = vmatprep.subr.mxu0 %v13629_v43 }
0x2713   :  { %v6393_v56 = vpop.permute.xlu0 %6392 }
0x2714   :  { %14564 = vmatpush3.msra.mxu1 %v6393_v56 }
0x2715   :  { %14573 = vmatprep.subr.mxu1 %v16317_v16 }
0x2716   :  { %v15365_v57 = vpop.eup %15364 }
0x2717   :  { %v5814_v58 = vmul.f32 %v15365_v57, %v15363_v54  ;;  %v6556_v34 = vpop.permute.xlu0 %6555 }
0x2719   :  { %14531 = vmatmul.mubr.msk.f32.vlgmr.msra.gmra.mrb[54].mxu0 %vm959_vm6, %v5814_v58  ;;  %v5966_v13 = vpop.f32.mrb[78].mxu1 }
0x271a   :  { %v14537_v61 = vpop.f32.mrb[79].mxu1  ;;  %14539 = vmatpush3.msra.mxu0 %v13629_v43 }
0x271b   :  { %14543 = vmatprep.subr.mxu0 %v5633_v9  ;;  %v6634_v36 = vpop.permute.xlu0 %6633 }
0x271d   :  { %v6208_v18 = vpop.f32.mrb[80].mxu1 }
0x271e   :  { %v6290_v63 = vmul.f32 0.35355338, %v6208_v18  ;;  %v14552_v2 = vpop.f32.mrb[81].mxu1 }
0x271f   :  { %v6554_v37 = vpop.permute.xlu0 %6553 }
0x2720   :  { %v6292_v17 = vadd.f32 %v6290_v63, %v17510_v41 }
0x2721   :  { %v6286_v3 = vpop.f32.mrb[82].mxu1 }
0x2722   :  { %v6291_v5 = vmul.f32 0.35355338, %v6286_v3  ;;  %v14557_v12 = vpop.f32.mrb[83].mxu1  ;;  %v6294_v38 = vsel %vm959_vm6, %v6292_v17, -inf }
0x2723   :  { %6295 = vmax.xlane.f32.xlu1 %v6294_v38 }
0x2724   :  { %v6293_v47 = vadd.f32 %v6291_v5, %v17500_v22 }
0x2726   :  { %v6297_v6 = vsel %vm959_vm6, %v6293_v47, -inf }
0x2727   :  { %6298 = vmax.xlane.f32.xlu1 %v6297_v6 }
0x27b0   :  { %v6296_v26 = vpop.xlane.xlu1 %6295 }
0x27b1   :  { %v6300_v50 = vsub.f32 %v6292_v17, %v6296_v26 }
0x27b3   :  { %v6302_v10 = vmul.f32 1.442695, %v6300_v50 }
0x27b4   :  { %v6299_v39 = vpop.xlane.xlu1 %6298 }
0x27b5   :  { %15366 = vpow2.f32 %v6302_v10  ;;  %v6301_v11 = vsub.f32 %v6293_v47, %v6299_v39 }
0x27b7   :  { %v6304_v7 = vmul.f32 1.442695, %v6301_v11 }
0x27b9   :  { %15368 = vpow2.f32 %v6304_v7 }
0x27bf   :  { %v15367_v32 = vpop.eup %15366 }
0x27c0   :  { %v6306_v14 = vsel %vm959_vm6, %v15367_v32, 0.0 }
0x27c1   :  { %6307 = vadd.xlane.f32.xlu1 %v6306_v14 }
0x27c3   :  { %v15369_v15 = vpop.eup %15368 }
0x27c4   :  { %v6309_v21 = vsel %vm959_vm6, %v15369_v15, 0.0 }
0x27c5   :  { %6310 = vadd.xlane.f32.xlu1 %v6309_v21  ;;  %v13652_v21 = vld [vmem:[%s18563_s1] ss:$0 sm:$0xff]  ;;  %s18590_s1 = sld [smem:[#allocation108_spill]] }
0x27d6   :  { %6316 = vrot.lane.b32.xlu1 %v17491_v45, %s16320_s5 }
0x27da   :  { %6631 = vrot.lane.b32.xlu1 %v17476_v19, %s16321_s30 }
0x27ec   :  { %v5889_v60 = vpop.f32.mrb[54].mxu0 }
0x27ed   :  { %v14532_v28 = vpop.f32.mrb[55].mxu0  ;;  %14540 = vmatprep.mubr.msk.f32.mxu0 %vm959_vm6, %v5889_v60 }
0x27ee   :  { %14541 = vmatmul.mubr.msk.f32.vlgmr.msra.gmra.mrb[56].mxu0 %vm959_vm6, %v5966_v13 }
0x27ef   :  { %14545 = vmatprep.mubr.msk.f32.mxu0 %vm959_vm6, %v17550_v27  ;;  %14544 = vmatpush3.msra.mxu0 %v5633_v9 }
0x27f0   :  { %14558 = vmatprep.subr.mxu0 %v16317_v16 }
0x27f6   :  { %14546 = vmatmul.mubr.msk.f32.vlgmr.msra.gmra.mrb[56].mxu0 %vm959_vm6, %v17528_v8 }
0x27f7   :  { %14560 = vmatprep.mubr.msk.f32.mxu0 %vm16318_vm1, %v16317_v16 }
0x284e   :  { %v6308_v62 = vpop.xlane.xlu1 %6307 }
0x284f   :  { %15370 = vrcp.f32 %v6308_v62 }
0x2852   :  { %v6311_v19 = vpop.xlane.xlu1 %6310 }
0x2853   :  { %15372 = vrcp.f32 %v6311_v19 }
0x2856   :  { %v6317_v51 = vpop.permute.xlu1 %6316 }
0x2857   :  { %14559 = vmatpush3.msra.mxu0 %v6317_v51 }
0x2858   :  { %14568 = vmatprep.subr.mxu0 %v13640_v29 }
0x2859   :  { %v15371_v33 = vpop.eup %15370 }
0x285a   :  { %v6314_v27 = vmul.f32 %v15371_v33, %v15367_v32  ;;  %v6632_v49 = vpop.permute.xlu1 %6631 }
0x285c   :  { %14561 = vmatmul.mubr.msk.f32.vlgmr.msra.gmra.mrb[58].mxu0 %vm959_vm6, %v6314_v27 }
0x285d   :  { %v15373_v35 = vpop.eup %15372  ;;  %14569 = vmatpush3.msra.mxu0 %v13640_v29 }
0x285e   :  { %v6315_v8 = vmul.f32 %v15373_v35, %v15369_v15  ;;  %14578 = vmatprep.subr.mxu0 %v16317_v16 }
0x2860   :  { %14566 = vmatmul.mubr.msk.f32.vlgmr.msra.gmra.mrb[84].mxu1 %vm959_vm6, %v6315_v8 }
0x2861   :  { %14574 = vmatpush3.xpose.msk.msra.mxu1 %vm959_vm6, %v6556_v34  ;;  %14575 = vmatprep.mubr.msk.f32.mxu1 %vm16318_vm1, %v16317_v16 }
0x2862   :  { %14583 = vmatprep.subr.mxu1 %v16317_v16 }
0x2864   :  { %14576 = vmatmul.mubr.msk.f32.vlgmr.msra.gmra.mrb[86].mxu1 %vm959_vm6, %v6554_v37 }
0x2865   :  { %14585 = vmatprep.mubr.msk.f32.mxu1 %vm16318_vm1, %v16317_v16 }
0x292f   :  { %v6388_v44 = vpop.f32.mrb[58].mxu0 }
0x2930   :  { %v14562_v48 = vpop.f32.mrb[59].mxu0  ;;  %14570 = vmatprep.mubr.msk.f32.mxu0 %vm959_vm6, %v6388_v44 }
0x2933   :  { %v6464_v1 = vpop.f32.mrb[84].mxu1 }
0x2934   :  { %v14567_v30 = vpop.f32.mrb[85].mxu1  ;;  %14571 = vmatmul.mubr.msk.f32.vlgmr.msra.gmra.mrb[56].mxu0 %vm959_vm6, %v6464_v1 }
0x2935   :  { %14579 = vmatpush3.xpose.msk.msra.mxu0 %vm959_vm6, %v6634_v36  ;;  %14580 = vmatprep.mubr.msk.f32.mxu0 %vm16318_vm1, %v16317_v16 }
0x2936   :  { %14588 = vmatprep.subr.mxu0 %v16317_v16 }
0x2937   :  { %v6627_v31 = vpop.f32.mrb[86].mxu1 }
0x2938   :  { %v6709_v40 = vmul.f32 0.35355338, %v6627_v31  ;;  %v14577_v53 = vpop.f32.mrb[87].mxu1  ;;  %14581 = vmatmul.mubr.msk.f32.vlgmr.msra.gmra.mrb[60].mxu0 %vm959_vm6, %v6632_v49 }
0x2939   :  { %14590 = vmatprep.mubr.msk.f32.mxu0 %vm16318_vm1, %v16317_v16 }
0x293a   :  { %v6711_v54 = vadd.f32 %v6709_v40, %v17510_v41  ;;  %v4983_v41 = vadd.f32 %v17485_v52, %v17483_v20  ;;  %v4990_v20 = vadd.f32 %v17488_v25, %v17371_v23 }
0x293c   :  { %v6713_v46 = vsel %vm959_vm6, %v6711_v54, -inf  ;;  %v4989_v17 = vadd.f32 %v4983_v41, %v17374_v24  ;;  %v4996_v24 = vsel %vm705_vm0, %v4990_v20, 0.0 }
0x293d   :  { %6714 = vmax.xlane.f32.xlu0 %v6713_v46 }
0x293e   :  { %v4993_v3 = vsel %vm705_vm0, %v4989_v17, 0.0 }
0x29ca   :  { %v6715_v42 = vpop.xlane.xlu0 %6714 }
0x29cb   :  { %v6719_v55 = vsub.f32 %v6711_v54, %v6715_v42 }
0x29cd   :  { %v6721_v56 = vmul.f32 1.442695, %v6719_v55 }
0x29cf   :  { %15374 = vpow2.f32 %v6721_v56 }
0x29d9   :  { %v15375_v57 = vpop.eup %15374 }
0x29da   :  { %v6725_v58 = vsel %vm959_vm6, %v15375_v57, 0.0 }
0x29db   :  { %6726 = vadd.xlane.f32.xlu0 %v6725_v58 }
0x2a0b   :  { %v6705_v13 = vpop.f32.mrb[60].mxu0 }
0x2a0c   :  { %v6710_v61 = vmul.f32 0.35355338, %v6705_v13  ;;  %v14582_v18 = vpop.f32.mrb[61].mxu0 }
0x2a0e   :  { %v6712_v63 = vadd.f32 %v6710_v61, %v17500_v22 }
0x2a10   :  { %v6716_v2 = vsel %vm959_vm6, %v6712_v63, -inf }
0x2a11   :  { %6717 = vmax.xlane.f32.xlu1 %v6716_v2 }
0x2a22   :  { %6811 = vrot.lane.b32.xlu1 %v17493_v0, %s16321_s30 }
0x2a46   :  { %4994 = vadd.xlane.f32.xlu1 %v4993_v3 }
0x2a68   :  { %v6727_v52 = vpop.xlane.xlu0 %6726 }
0x2a9e   :  { %v6718_v5 = vpop.xlane.xlu1 %6717 }
0x2a9f   :  { %v6720_v12 = vsub.f32 %v6712_v63, %v6718_v5 }
0x2aa1   :  { %v6723_v38 = vmul.f32 1.442695, %v6720_v12 }
0x2aa2   :  { %v6812_v47 = vpop.permute.xlu1 %6811 }
0x2aa3   :  { %15376 = vpow2.f32 %v6723_v38  ;;  %14589 = vmatpush3.msra.mxu0 %v6812_v47 }
0x2aa4   :  { %15378 = vrcp.f32 %v6727_v52  ;;  %v13602_v52 = vld [vmem:[#allocation41] ss:$0 sm:$0xff] }
0x2aad   :  { %v15377_v22 = vpop.eup %15376 }
0x2aae   :  { %v6728_v6 = vsel %vm959_vm6, %v15377_v22, 0.0  ;;  %v15379_v43 = vpop.eup %15378 }
0x2aaf   :  { %6729 = vadd.xlane.f32.xlu0 %v6728_v6  ;;  %v6733_v26 = vmul.f32 %v15379_v43, %v15375_v57 }
0x2ac5   :  { %6735 = vrot.lane.b32.xlu0 %v17491_v45, %s16321_s30  ;;  %v13649_v45 = vld [vmem:[%s18562_s28 + $0x18] sm:$0xff]  ;;  %s18588_s28 = sld [smem:[#allocation100_spill]] }
0x2ac6   :  { %14593 = vmatprep.subr.mxu0 %v13649_v45 }
0x2ad3   :  { %v4995_v32 = vpop.xlane.xlu1 %4994 }
0x2ad4   :  { %v4999_v15 = vmul.f32 0.03125, %v4995_v32 }
0x2ad6   :  { %v5001_v29 = vsub.f32 %v4989_v17, %v4999_v15 }
0x2ad8   :  { %v5003_v8 = vmul.f32 %v5001_v29, %v5001_v29 }
0x2ada   :  { %v5005_v44 = vsel %vm705_vm0, %v5003_v8, 0.0 }
0x2ae4   :  { %4997 = vadd.xlane.f32.xlu0 %v4996_v24 }
0x2b3c   :  { %v6730_v0 = vpop.xlane.xlu0 %6729 }
0x2b3d   :  { %15380 = vrcp.f32 %v6730_v0 }
0x2b40   :  { %v6736_v9 = vpop.permute.xlu0 %6735 }
0x2b41   :  { %14584 = vmatpush3.msra.mxu1 %v6736_v9 }
0x2b42   :  { %14586 = vmatmul.mubr.msk.f32.vlgmr.msra.gmra.mrb[88].mxu1 %vm959_vm6, %v6733_v26  ;;  %14598 = vmatprep.subr.bf16.mxu1 %v16317_v16 }
0x2b43   :  { %14602 = vmatprep.mubr.msk.bf16.mxu1 %vm16318_vm1, %v16317_v16 }
0x2b47   :  { %v15381_v23 = vpop.eup %15380 }
0x2b48   :  { %v6734_v25 = vmul.f32 %v15381_v23, %v15377_v22  ;;  %v13601_v22 = vld [vmem:[#allocation40] ss:$0 sm:$0xff] }
0x2b49   :  { %v5037_v24 = vmul.f32 %v13601_v22, %v5001_v29 }
0x2b4a   :  { %14591 = vmatmul.mubr.msk.f32.vlgmr.msra.gmra.mrb[62].mxu0 %vm959_vm6, %v6734_v25 }
0x2b4b   :  { %14594 = vmatpush3.msra.mxu0 %v13649_v45  ;;  %v15216_v45 = vld [vmem:[%s18565_s17] sm:$0xff]  }
0x2b4c   :  { %14606 = vmatprep.subr.bf16.mxu0 %v16317_v16  ;;  %14599 = vmatpush3.bf16.msra.mxu1 %v15216_v45 }
0x2b4d   :  { %14600 = vmatprep.subr.bf16.mxu1 %v16317_v16 }
0x2b71   :  { %v4998_v7 = vpop.xlane.xlu0 %4997 }
0x2b72   :  { %v5000_v14 = vmul.f32 0.03125, %v4998_v7 }
0x2b74   :  { %v5002_v28 = vsub.f32 %v4990_v20, %v5000_v14 }
0x2b76   :  { %v5004_v35 = vmul.f32 %v5002_v28, %v5002_v28  ;;  %v5038_v6 = vmul.f32 %v13601_v22, %v5002_v28 }
0x2b78   :  { %v5008_v37 = vsel %vm705_vm0, %v5004_v35, 0.0 }
0x2c15   :  { %v6807_v50 = vpop.f32.mrb[88].mxu1 }
0x2c16   :  { %v14587_v10 = vpop.f32.mrb[89].mxu1  ;;  %14595 = vmatprep.mubr.msk.f32.mxu0 %vm959_vm6, %v6807_v50  ;;  %v15217_v50 = vld [vmem:[%s18565_s17 + $0x8] sm:$0xff]   ;;  %s18592_s17 = sld [smem:[#allocation106_spill]] }
0x2c17   :  { %14601 = vmatpush3.bf16.msra.mxu1 %v15217_v50 }
0x2c18   :  { %14614 = vmatprep.subr.bf16.mxu1 %v16317_v16 }
0x2c1d   :  { %v6883_v39 = vpop.f32.mrb[62].mxu0 }
0x2c1e   :  { %v14592_v11 = vpop.f32.mrb[63].mxu0  ;;  %14596 = vmatmul.mubr.msk.f32.vlgmr.msra.gmra.mrb[56].mxu0 %vm959_vm6, %v6883_v39 }
0x2c1f   :  { %14610 = vmatprep.mubr.msk.bf16.mxu0 %vm16318_vm1, %v16317_v16 }
0x2cf1   :  { %v14597_v60 = vpop.f32.mrb[56].mxu0 }
0x2cf2   :  { %v6980_v62 = vadd.f32 %v14597_v60, %v13652_v21  ;;  %v6961_v19 = vpop.f32.mrb[57].mxu0 }
0x2cf3   :  { %v6979_v51 = vadd.f32 %v13652_v21, %v6961_v19 }
0x2cf4   :  { %v17652_v34 = vadd.f32 %v6980_v62, %v17382_v4  ;;  %v15214_v4 = vld [vmem:[%s18564_s25] sm:$0xff]  }
0x2cf5   :  { %v17655_v33 = vadd.f32 %v6979_v51, %v17377_v59  ;;  %14607 = vmatpush3.bf16.msra.mxu0 %v15214_v4  ;;  %v15215_v59 = vld [vmem:[%s18564_s25 + $0x8] sm:$0xff]   ;;  %v13654_v4 = vld [vmem:[%s18567_s29] ss:$0 sm:$0xff]  ;;  %s18591_s25 = sld [smem:[#allocation99_spill]]  ;;  %s18594_s29 = sld [smem:[#allocation94_spill]] }
0x2cf6   :  { %v6988_v27 = vsel %vm705_vm0, %v17652_v34, 0.0  ;;  %14608 = vmatprep.subr.bf16.mxu0 %v16317_v16 }
0x2cf7   :  { %6989 = vadd.xlane.f32.xlu1 %v6988_v27  ;;  %v6985_v36 = vsel %vm705_vm0, %v17655_v33, 0.0 }
0x2cf8   :  { %6986 = vadd.xlane.f32.xlu0 %v6985_v36  ;;  %v13653_v36 = vld [vmem:[%s18566_s2] ss:$0 sm:$0xff]  ;;  %s18593_s2 = sld [smem:[#allocation110_spill]] }
0x2cf9   :  { %14609 = vmatpush3.bf16.msra.mxu0 %v15215_v59 }
0x2cfa   :  { %14622 = vmatprep.subr.mxu0 %v16317_v16 }
0x2cfb   :  { %5009 = vadd.xlane.f32.xlu1 %v5008_v37 }
0x2cfc   :  { %5006 = vadd.xlane.f32.xlu0 %v5005_v44 }
0x2d84   :  { %v6990_v48 = vpop.xlane.xlu1 %6989 }
0x2d85   :  { %v6992_v1 = vmul.f32 0.03125, %v6990_v48  ;;  %v6987_v30 = vpop.xlane.xlu0 %6986 }
0x2d86   :  { %v6991_v49 = vmul.f32 0.03125, %v6987_v30 }
0x2d87   :  { %v17668_v31 = vsub.f32 %v17652_v34, %v6992_v1 }
0x2d88   :  { %v17671_v40 = vsub.f32 %v17655_v33, %v6991_v49  ;;  %v5010_v53 = vpop.xlane.xlu1 %5009 }
0x2d89   :  { %v5012_v54 = vmul.f32 0.032258064, %v5010_v53  ;;  %v5007_v46 = vpop.xlane.xlu0 %5006  ;;  %v6996_v42 = vmul.f32 %v17668_v31, %v17668_v31  ;;  %v7030_v8 = vmul.f32 %v13653_v36, %v17668_v31  ;;  %v15218_v53 = vld [vmem:[%s18568_s7] sm:$0xff]  }
0x2d8a   :  { %v5011_v55 = vmul.f32 0.032258064, %v5007_v46  ;;  %v6995_v56 = vmul.f32 %v17671_v40, %v17671_v40  ;;  %v7029_v44 = vmul.f32 %v13653_v36, %v17671_v40  ;;  %v15219_v46 = vld [vmem:[%s18568_s7 + $0x8] sm:$0xff]   ;;  %v13659_v31 = vld [vmem:[%s18569_s10] ss:$0 sm:$0xff]  ;;  %s18595_s7 = sld [smem:[#allocation95_spill]] }
0x2d8b   :  { %15382 = vrsqrt.f32 %v5012_v54  ;;  %v7000_v57 = vsel %vm705_vm0, %v6996_v42, 0.0  ;;  %vm5022_vm12 = vcmp.eq.f32.partialorder %v5012_v54, inf  ;;  %v5025_v63 = vand.u32 2147483648, %v5012_v54  ;;  %s18596_s10 = sld [smem:[#allocation111_spill]] }
0x2d8c   :  { %15384 = vrsqrt.f32 %v5011_v55  ;;  %v6997_v58 = vsel %vm705_vm0, %v6995_v56, 0.0  ;;  %7001 = vadd.xlane.f32.xlu1 %v7000_v57  ;;  %vm5024_vm13 = vcmp.eq.f32.partialorder %v5012_v54, 0.0  ;;  %vm5015_vm14 = vcmp.eq.f32.partialorder %v5011_v55, inf }
0x2d8d   :  { %6998 = vadd.xlane.f32.xlu0 %v6997_v58  ;;  %v5018_v17 = vand.u32 2147483648, %v5011_v55  ;;  %vm5017_vm15 = vcmp.eq.f32.partialorder %v5011_v55, 0.0 }
0x2d95   :  { %v15383_v13 = vpop.eup %15382 }
0x2d96   :  { %v15385_v61 = vpop.eup %15384  ;;  %v5021_v18 = vmul.f32 %v15383_v13, %v5012_v54  ;;  %v13655_v13 = vld [vmem:[%s18570_s11] ss:$0 sm:$0xff]  ;;  %s18600_s11 = sld [smem:[#allocation91_spill]] }
0x2d97   :  { %v5014_v2 = vmul.f32 %v15385_v61, %v5011_v55 }
0x2d98   :  { %v5023_v41 = vsel %vm5022_vm12, %v5012_v54, %v5021_v18 }
0x2d99   :  { %v5026_v3 = vsel %vm5024_vm13, %v5025_v63, %v5023_v41  ;;  %v5016_v5 = vsel %vm5015_vm14, %v5011_v55, %v5014_v2 }
0x2d9a   :  { %v5028_v12 = vadd.f32 1e-06, %v5026_v3  ;;  %v5019_v38 = vsel %vm5017_vm15, %v5018_v17, %v5016_v5  ;;  %v13663_v3 = vld [vmem:[%s18571_s6] ss:$0 sm:$0xff]  ;;  %s18601_s6 = sld [smem:[#allocation96_spill]] }
0x2d9b   :  { %v5027_v47 = vadd.f32 1e-06, %v5019_v38 }
0x2d9c   :  { %15386 = vrcp.f32 %v5028_v12 }
0x2d9d   :  { %15388 = vrcp.f32 %v5027_v47 }
0x2da6   :  { %v15387_v20 = vpop.eup %15386 }
0x2da7   :  { %v15389_v0 = vpop.eup %15388  ;;  %v5040_v43 = vmul.f32 %v15387_v20, %v5038_v6 }
0x2da8   :  { %v5039_v9 = vmul.f32 %v15389_v0, %v5037_v24 }
0x2da9   :  { %v5048_v26 = vadd.f32 %v13602_v52, %v5040_v43 }
0x2daa   :  { %v5047_v23 = vadd.f32 %v13602_v52, %v5039_v9  ;;  %v17738_v52 = vld [vmem:[%s18572_s19 + $0x8] sm:$0xff] }
0x2dac   :  { %v17679_v25 = vpack.c.bf16 %v5048_v26, %v5047_v23 }
0x2dae   :  { %14611 = vmatmul.mubr.msk.bf16.vlgmr.msra.gmra.mrb[64].mxu0 %vm705_vm0, %v17679_v25 }
0x2daf   :  { %14624 = vmatprep.mubr.msk.f32.mxu0 %vm16318_vm1, %v16317_v16 }
0x2e19   :  { %v7002_v10 = vpop.xlane.xlu1 %7001 }
0x2e1a   :  { %v6999_v39 = vpop.xlane.xlu0 %6998  ;;  %v7004_v11 = vmul.f32 0.032258064, %v7002_v10 }
0x2e1b   :  { %v7003_v7 = vmul.f32 0.032258064, %v6999_v39 }
0x2e1c   :  { %15390 = vrsqrt.f32 %v7004_v11  ;;  %vm7014_vm2 = vcmp.eq.f32.partialorder %v7004_v11, inf  ;;  %v7017_v21 = vand.u32 2147483648, %v7004_v11  ;;  %vm7016_vm3 = vcmp.eq.f32.partialorder %v7004_v11, 0.0 }
0x2e1d   :  { %15392 = vrsqrt.f32 %v7003_v7  ;;  %vm7007_vm4 = vcmp.eq.f32.partialorder %v7003_v7, inf  ;;  %v7010_v62 = vand.u32 2147483648, %v7003_v7  ;;  %vm7009_vm5 = vcmp.eq.f32.partialorder %v7003_v7, 0.0 }
0x2e26   :  { %v15391_v32 = vpop.eup %15390 }
0x2e27   :  { %v15393_v14 = vpop.eup %15392  ;;  %v7013_v15 = vmul.f32 %v15391_v32, %v7004_v11  ;;  %v17748_v32 = vld [vmem:[%s18572_s19] sm:$0xff] }
0x2e28   :  { %v7006_v60 = vmul.f32 %v15393_v14, %v7003_v7 }
0x2e29   :  { %v7015_v28 = vsel %vm7014_vm2, %v7004_v11, %v7013_v15 }
0x2e2a   :  { %v7018_v19 = vsel %vm7016_vm3, %v7017_v21, %v7015_v28  ;;  %v7008_v29 = vsel %vm7007_vm4, %v7003_v7, %v7006_v60 }
0x2e2b   :  { %v7020_v51 = vadd.f32 1e-06, %v7018_v19  ;;  %v7011_v27 = vsel %vm7009_vm5, %v7010_v62, %v7008_v29 }
0x2e2c   :  { %v7019_v35 = vadd.f32 1e-06, %v7011_v27 }
0x2e2d   :  { %15394 = vrcp.f32 %v7020_v51 }
0x2e2e   :  { %15396 = vrcp.f32 %v7019_v35 }
0x2e37   :  { %v15395_v37 = vpop.eup %15394 }
0x2e38   :  { %v15397_v59 = vpop.eup %15396  ;;  %v7032_v48 = vmul.f32 %v15395_v37, %v7030_v8 }
0x2e39   :  { %v7031_v1 = vmul.f32 %v15397_v59, %v7029_v44 }
0x2e3a   :  { %v7040_v30 = vadd.f32 %v13654_v4, %v7032_v48 }
0x2e3b   :  { %v7039_v49 = vadd.f32 %v13654_v4, %v7031_v1 }
0x2e3d   :  { %v7041_v54 = vpack.c.bf16 %v7040_v30, %v7039_v49 }
0x2e3f   :  { %14603 = vmatmul.mubr.msk.bf16.vlgmr.msra.gmra.mrb[92].mxu1 %vm705_vm0, %v7041_v54 }
0x2e40   :  { %14615 = vmatpush3.bf16.msra.mxu1 %v15218_v53  ;;  %14618 = vmatprep.mubr.msk.bf16.mxu1 %vm16318_vm1, %v16317_v16 }
0x2e41   :  { %14616 = vmatprep.subr.bf16.mxu1 %v16317_v16 }
0x2e44   :  { %14617 = vmatpush3.bf16.msra.mxu1 %v15219_v46 }
0x2e45   :  { %14627 = vmatprep.subr.mxu1 %v16317_v16 }
0x2e47   :  { %14619 = vmatmul.mubr.msk.bf16.vlgmr.msra.gmra.mrb[96].mxu1 %vm705_vm0, %v17679_v25 }
0x2e48   :  { %14629 = vmatprep.mubr.msk.f32.mxu1 %vm16318_vm1, %v16317_v16 }
0x2e81   :  { %v7170_v40 = vpop.f32.mrb[64].mxu0 }
0x2e82   :  { %v17705_v42 = vadd.f32 %v13659_v31, %v7170_v40  ;;  %v14612_v55 = vpop.f32.mrb[65].mxu0 }
0x2e83   :  { %v7173_v56 = vpop.f32.mrb[66].mxu0 }
0x2e84   :  { %v17707_v57 = vadd.f32 %v13659_v31, %v7173_v56  ;;  %v14613_v58 = vpop.f32.mrb[67].mxu0  ;;  %14623 = vmatpush3.xpose.msk.msra.mxu0 %vm959_vm6, %v17705_v42 }
0x2e85   :  { %14632 = vmatprep.subr.mxu0 %v16317_v16 }
0x2e86   :  { %14628 = vmatpush3.xpose.msk.msra.mxu1 %vm959_vm6, %v17707_v57 }
0x2e87   :  { %14637 = vmatprep.subr.mxu1 %v16317_v16 }
0x2f12   :  { %v7103_v61 = vpop.f32.mrb[92].mxu1 }
0x2f13   :  { %v17716_v18 = vadd.f32 %v13655_v13, %v7103_v61  ;;  %v14604_v63 = vpop.f32.mrb[93].mxu1 }
0x2f14   :  { %v7106_v2 = vpop.f32.mrb[94].mxu1 }
0x2f15   :  { %v17718_v41 = vadd.f32 %v13655_v13, %v7106_v2  ;;  %v14605_v17 = vpop.f32.mrb[95].mxu1  ;;  %14625 = vmatmul.mubr.msk.f32.vlgmr.msra.gmra.mrb[68].mxu0 %vm959_vm6, %v17716_v18 }
0x2f16   :  { %14634 = vmatprep.mubr.msk.f32.mxu0 %vm16318_vm1, %v16317_v16 }
0x2f17   :  { %14630 = vmatmul.mubr.msk.f32.vlgmr.msra.gmra.mrb[90].mxu1 %vm959_vm6, %v17718_v41 }
0x2f18   :  { %14639 = vmatprep.mubr.msk.f32.mxu1 %vm16318_vm1, %v16317_v16 }
0x2f1a   :  { %v7234_v5 = vpop.f32.mrb[96].mxu1 }
0x2f1b   :  { %v17729_v12 = vadd.f32 %v13663_v3, %v7234_v5  ;;  %v14620_v38 = vpop.f32.mrb[97].mxu1 }
0x2f1c   :  { %v7237_v47 = vpop.f32.mrb[98].mxu1 }
0x2f1d   :  { %v17731_v22 = vadd.f32 %v13663_v3, %v7237_v47  ;;  %v14621_v6 = vpop.f32.mrb[99].mxu1  ;;  %14633 = vmatpush3.msra.mxu0 %v17729_v12 }
0x2f1e   :  { %14642 = vmatprep.subr.mxu0 %v16317_v16 }
0x2f1f   :  { %14638 = vmatpush3.msra.mxu1 %v17731_v22 }
0x2f20   :  { %14647 = vmatprep.subr.mxu1 %v16317_v16 }
0x2fe8   :  { %v7313_v20 = vpop.f32.mrb[68].mxu0 }
0x2fe9   :  { %v14626_v24 = vpop.f32.mrb[69].mxu0  ;;  %v7393_v7 = vmul.f32 0.35355338, %v7313_v20 }
0x2fea   :  { %v7389_v0 = vpop.f32.mrb[90].mxu1 }
0x2feb   :  { %v7394_v43 = vmul.f32 0.35355338, %v7389_v0  ;;  %v14631_v9 = vpop.f32.mrb[91].mxu1  ;;  %v7395_v14 = vadd.f32 %v7393_v7, %v17748_v32 }
0x2fed   :  { %v7396_v26 = vadd.f32 %v7394_v43, %v17738_v52  ;;  %v7397_v15 = vsel %vm959_vm6, %v7395_v14, -inf }
0x2fef   :  { %v7400_v23 = vsel %vm959_vm6, %v7396_v26, -inf }
0x2ff0   :  { %7401 = vmax.xlane.f32.xlu0 %v7400_v23 }
0x3006   :  { %7646 = vrot.lane.b32.xlu0 %v17707_v57, %s16319_s15 }
0x307d   :  { %v7402_v45 = vpop.xlane.xlu0 %7401 }
0x307e   :  { %v7404_v50 = vsub.f32 %v7396_v26, %v7402_v45 }
0x3080   :  { %v7407_v10 = vmul.f32 1.442695, %v7404_v50 }
0x3081   :  { %v7647_v62 = vpop.permute.xlu0 %7646 }
0x3082   :  { %15398 = vpow2.f32 %v7407_v10 }
0x308c   :  { %v15399_v39 = vpop.eup %15398 }
0x308d   :  { %v7412_v11 = vsel %vm959_vm6, %v15399_v39, 0.0 }
0x308e   :  { %7413 = vadd.xlane.f32.xlu1 %v7412_v11 }
0x309f   :  { %7644 = vrot.lane.b32.xlu1 %v17718_v41, %s16319_s15 }
0x30c3   :  { %7398 = vmax.xlane.f32.xlu1 %v7397_v15 }
0x30d4   :  { %7566 = vrot.lane.b32.xlu1 %v17716_v18, %s16319_s15 }
0x311b   :  { %v7414_v21 = vpop.xlane.xlu1 %7413 }
0x311c   :  { %15400 = vrcp.f32 %v7414_v21 }
0x311f   :  { %v7645_v19 = vpop.permute.xlu1 %7644 }
0x3126   :  { %v15401_v60 = vpop.eup %15400 }
0x3127   :  { %v7418_v28 = vmul.f32 %v15401_v60, %v15399_v39 }
0x3129   :  { %14640 = vmatmul.mubr.msk.f32.vlgmr.msra.gmra.mrb[100].mxu1 %vm959_vm6, %v7418_v28 }
0x312a   :  { %14648 = vmatpush3.xpose.msk.msra.mxu1 %vm959_vm6, %v7647_v62  ;;  %14649 = vmatprep.mubr.msk.f32.mxu1 %vm16318_vm1, %v16317_v16 }
0x312b   :  { %14657 = vmatprep.subr.mxu1 %v16317_v16 }
0x312d   :  { %14650 = vmatmul.mubr.msk.f32.vlgmr.msra.gmra.mrb[102].mxu1 %vm959_vm6, %v7645_v19 }
0x312e   :  { %14659 = vmatprep.mubr.msk.f32.mxu1 %vm16318_vm1, %v16317_v16 }
0x3150   :  { %v7399_v29 = vpop.xlane.xlu1 %7398 }
0x3151   :  { %v7403_v51 = vsub.f32 %v7395_v14, %v7399_v29 }
0x3153   :  { %v7405_v27 = vmul.f32 1.442695, %v7403_v51 }
0x3154   :  { %v7567_v1 = vpop.permute.xlu1 %7566 }
0x3155   :  { %15402 = vpow2.f32 %v7405_v27 }
0x315f   :  { %v15403_v35 = vpop.eup %15402 }
0x3160   :  { %v7409_v36 = vsel %vm959_vm6, %v15403_v35, 0.0 }
0x3161   :  { %7410 = vadd.xlane.f32.xlu0 %v7409_v36  ;;  %v13679_v36 = vld [vmem:[%s18573_s16 + $0x8] sm:$0xff] }
0x3177   :  { %7568 = vrot.lane.b32.xlu0 %v17705_v42, %s16319_s15 }
0x31ee   :  { %v7411_v8 = vpop.xlane.xlu0 %7410 }
0x31ef   :  { %15404 = vrcp.f32 %v7411_v8  ;;  %v7565_v8 = vld [vmem:[%s18573_s16] sm:$0xff] }
0x31f2   :  { %v7569_v4 = vpop.permute.xlu0 %7568 }
0x31f9   :  { %v15405_v37 = vpop.eup %15404 }
0x31fa   :  { %v7417_v44 = vmul.f32 %v15405_v37, %v15403_v35 }
0x31fc   :  { %14635 = vmatmul.mubr.msk.f32.vlgmr.msra.gmra.mrb[70].mxu0 %vm959_vm6, %v7417_v44  ;;  %v17766_v59 = vpop.f32.mrb[100].mxu1 }
0x31fd   :  { %14643 = vmatpush3.xpose.msk.msra.mxu0 %vm959_vm6, %v7569_v4  ;;  %v14641_v48 = vpop.f32.mrb[101].mxu1  ;;  %14644 = vmatprep.mubr.msk.f32.mxu0 %vm16318_vm1, %v16317_v16 }
0x31fe   :  { %14652 = vmatprep.subr.mxu0 %v16317_v16 }
0x3200   :  { %14645 = vmatmul.mubr.msk.f32.vlgmr.msra.gmra.mrb[72].mxu0 %vm959_vm6, %v7567_v1  ;;  %v7718_v30 = vpop.f32.mrb[102].mxu1 }
0x3201   :  { %v7723_v49 = vmul.f32 0.35355338, %v7718_v30  ;;  %v14651_v53 = vpop.f32.mrb[103].mxu1  ;;  %14654 = vmatprep.mubr.msk.f32.mxu0 %vm16318_vm1, %v16317_v16 }
0x3203   :  { %v7725_v54 = vadd.f32 %v7723_v49, %v17738_v52 }
0x3205   :  { %v7729_v46 = vsel %vm959_vm6, %v7725_v54, -inf }
0x3206   :  { %7730 = vmax.xlane.f32.xlu1 %v7729_v46 }
0x3217   :  { %8068 = vrot.lane.b32.xlu1 %v17705_v42, %s16320_s5 }
0x321b   :  { %8066 = vrot.lane.b32.xlu1 %v17716_v18, %s16320_s5 }
0x321f   :  { %8146 = vrot.lane.b32.xlu1 %v17707_v57, %s16320_s5 }
0x3293   :  { %v7731_v31 = vpop.xlane.xlu1 %7730 }
0x3294   :  { %v7733_v40 = vsub.f32 %v7725_v54, %v7731_v31 }
0x3296   :  { %v7736_v55 = vmul.f32 1.442695, %v7733_v40 }
0x3297   :  { %v8069_v6 = vpop.permute.xlu1 %8068 }
0x3298   :  { %15406 = vpow2.f32 %v7736_v55 }
0x329b   :  { %v8067_v24 = vpop.permute.xlu1 %8066 }
0x329f   :  { %v8147_v43 = vpop.permute.xlu1 %8146 }
0x32a2   :  { %v15407_v56 = vpop.eup %15406 }
0x32a3   :  { %v7741_v58 = vsel %vm959_vm6, %v15407_v56, 0.0 }
0x32a4   :  { %7742 = vadd.xlane.f32.xlu0 %v7741_v58 }
0x32ba   :  { %7826 = vrot.lane.b32.xlu0 %v17731_v22, %s16319_s15 }
0x32be   :  { %8144 = vrot.lane.b32.xlu0 %v17718_v41, %s16320_s5 }
0x32cf   :  { %v17788_v13 = vpop.f32.mrb[70].mxu0 }
0x32d0   :  { %v14636_v61 = vpop.f32.mrb[71].mxu0 }
0x32d3   :  { %v7640_v63 = vpop.f32.mrb[72].mxu0 }
0x32d4   :  { %v7722_v2 = vmul.f32 0.35355338, %v7640_v63  ;;  %v14646_v17 = vpop.f32.mrb[73].mxu0 }
0x32d6   :  { %v7724_v3 = vadd.f32 %v7722_v2, %v17748_v32 }
0x32d8   :  { %v7726_v5 = vsel %vm959_vm6, %v7724_v3, -inf }
0x32d9   :  { %7727 = vmax.xlane.f32.xlu1 %v7726_v5 }
0x3331   :  { %v7743_v38 = vpop.xlane.xlu0 %7742 }
0x3332   :  { %15408 = vrcp.f32 %v7743_v38 }
0x3335   :  { %v7827_v47 = vpop.permute.xlu0 %7826 }
0x3336   :  { %14658 = vmatpush3.msra.mxu1 %v7827_v47 }
0x3337   :  { %14672 = vmatprep.subr.mxu1 %v16317_v16 }
0x3339   :  { %v8145_v9 = vpop.permute.xlu0 %8144 }
0x333c   :  { %v15409_v20 = vpop.eup %15408 }
0x333d   :  { %v7747_v0 = vmul.f32 %v15409_v20, %v15407_v56  ;;  %v13690_v56 = vld [vmem:[%s18573_s16 + $0x10] sm:$0xff] }
0x333f   :  { %14660 = vmatmul.mubr.msk.f32.vlgmr.msra.gmra.mrb[104].mxu1 %vm959_vm6, %v7747_v0 }
0x3340   :  { %14673 = vmatpush3.xpose.msk.msra.mxu1 %vm959_vm6, %v8069_v6  ;;  %14674 = vmatprep.mubr.msk.f32.mxu1 %vm16318_vm1, %v16317_v16 }
0x3341   :  { %14677 = vmatprep.subr.mxu1 %v16317_v16 }
0x3343   :  { %14675 = vmatmul.mubr.msk.f32.vlgmr.msra.gmra.mrb[106].mxu1 %vm959_vm6, %v8067_v24 }
0x3344   :  { %14678 = vmatpush3.xpose.msk.msra.mxu1 %vm959_vm6, %v8147_v43  ;;  %14679 = vmatprep.mubr.msk.f32.mxu1 %vm16318_vm1, %v16317_v16 }
0x3345   :  { %14687 = vmatprep.subr.mxu1 %v16317_v16 }
0x3347   :  { %14680 = vmatmul.mubr.msk.f32.vlgmr.msra.gmra.mrb[108].mxu1 %vm959_vm6, %v8145_v9 }
0x3348   :  { %14689 = vmatprep.mubr.msk.f32.mxu1 %vm16318_vm1, %v16317_v16 }
0x3366   :  { %v7728_v26 = vpop.xlane.xlu1 %7727 }
0x3367   :  { %v7732_v23 = vsub.f32 %v7724_v3, %v7728_v26 }
0x3369   :  { %v7734_v45 = vmul.f32 1.442695, %v7732_v23 }
0x336b   :  { %15410 = vpow2.f32 %v7734_v45 }
0x3375   :  { %v15411_v50 = vpop.eup %15410 }
0x3376   :  { %v7738_v10 = vsel %vm959_vm6, %v15411_v50, 0.0 }
0x3377   :  { %7739 = vadd.xlane.f32.xlu0 %v7738_v10 }
0x338d   :  { %7749 = vrot.lane.b32.xlu0 %v17729_v12, %s16319_s15 }
0x3391   :  { %8324 = vrot.lane.b32.xlu0 %v17731_v22, %s16320_s5 }
0x3395   :  { %8487 = vrot.lane.b32.xlu0 %v17705_v42, %s16321_s30 }
0x3399   :  { %8565 = vrot.lane.b32.xlu0 %v17707_v57, %s16321_s30 }
0x339d   :  { %8485 = vrot.lane.b32.xlu0 %v17716_v18, %s16321_s30 }
0x3404   :  { %v7740_v39 = vpop.xlane.xlu0 %7739 }
0x3405   :  { %15412 = vrcp.f32 %v7740_v39 }
0x3408   :  { %v7750_v11 = vpop.permute.xlu0 %7749 }
0x3409   :  { %14653 = vmatpush3.msra.mxu0 %v7750_v11 }
0x340a   :  { %14662 = vmatprep.subr.mxu0 %v13679_v36 }
0x340c   :  { %v8325_v7 = vpop.permute.xlu0 %8324 }
0x340d   :  { %14688 = vmatpush3.msra.mxu1 %v8325_v7 }
0x340e   :  { %14697 = vmatprep.subr.mxu1 %v16317_v16 }
0x340f   :  { %v15413_v14 = vpop.eup %15412 }
0x3410   :  { %v7746_v15 = vmul.f32 %v15413_v14, %v15411_v50  ;;  %v8488_v61 = vpop.permute.xlu0 %8487 }
0x3412   :  { %14655 = vmatmul.mubr.msk.f32.vlgmr.msra.gmra.mrb[74].mxu0 %vm959_vm6, %v7746_v15  ;;  %v7898_v42 = vpop.f32.mrb[104].mxu1 }
0x3413   :  { %v14661_v21 = vpop.f32.mrb[105].mxu1  ;;  %14663 = vmatpush3.msra.mxu0 %v13679_v36 }
0x3414   :  { %14667 = vmatprep.subr.mxu0 %v7565_v8  ;;  %v8566_v17 = vpop.permute.xlu0 %8565 }
0x3416   :  { %v8140_v57 = vpop.f32.mrb[106].mxu1 }
0x3417   :  { %v8222_v60 = vmul.f32 0.35355338, %v8140_v57  ;;  %v14676_v28 = vpop.f32.mrb[107].mxu1 }
0x3418   :  { %v8486_v3 = vpop.permute.xlu0 %8485 }
0x3419   :  { %v8224_v18 = vadd.f32 %v8222_v60, %v17748_v32 }
0x341a   :  { %v8218_v62 = vpop.f32.mrb[108].mxu1 }
0x341b   :  { %v8223_v19 = vmul.f32 0.35355338, %v8218_v62  ;;  %v14681_v29 = vpop.f32.mrb[109].mxu1  ;;  %v8226_v51 = vsel %vm959_vm6, %v8224_v18, -inf }
0x341c   :  { %8227 = vmax.xlane.f32.xlu1 %v8226_v51 }
0x341d   :  { %v8225_v27 = vadd.f32 %v8223_v19, %v17738_v52 }
0x341f   :  { %v8229_v35 = vsel %vm959_vm6, %v8225_v27, -inf }
0x3420   :  { %8230 = vmax.xlane.f32.xlu1 %v8229_v35 }
0x34a9   :  { %v8228_v37 = vpop.xlane.xlu1 %8227 }
0x34aa   :  { %v8232_v44 = vsub.f32 %v8224_v18, %v8228_v37 }
0x34ac   :  { %v8234_v4 = vmul.f32 1.442695, %v8232_v44  ;;  %v13702_v44 = vld [vmem:[%s18574_s14] ss:$0 sm:$0xff]  ;;  %s18604_s14 = sld [smem:[#allocation89_spill]] }
0x34ad   :  { %v8231_v48 = vpop.xlane.xlu1 %8230 }
0x34ae   :  { %15414 = vpow2.f32 %v8234_v4  ;;  %v8233_v1 = vsub.f32 %v8225_v27, %v8231_v48 }
0x34b0   :  { %v8236_v30 = vmul.f32 1.442695, %v8233_v1 }
0x34b2   :  { %15416 = vpow2.f32 %v8236_v30 }
0x34b8   :  { %v15415_v49 = vpop.eup %15414 }
0x34b9   :  { %v8238_v53 = vsel %vm959_vm6, %v15415_v49, 0.0 }
0x34ba   :  { %8239 = vadd.xlane.f32.xlu1 %v8238_v53 }
0x34bc   :  { %v15417_v54 = vpop.eup %15416 }
0x34bd   :  { %v8241_v46 = vsel %vm959_vm6, %v15417_v54, 0.0 }
0x34be   :  { %8242 = vadd.xlane.f32.xlu1 %v8241_v46 }
0x34cf   :  { %8248 = vrot.lane.b32.xlu1 %v17729_v12, %s16320_s5 }
0x34d3   :  { %8563 = vrot.lane.b32.xlu1 %v17718_v41, %s16321_s30 }
0x34e5   :  { %v7821_v31 = vpop.f32.mrb[74].mxu0 }
0x34e6   :  { %v14656_v40 = vpop.f32.mrb[75].mxu0  ;;  %14664 = vmatprep.mubr.msk.f32.mxu0 %vm959_vm6, %v7821_v31 }
0x34e7   :  { %14665 = vmatmul.mubr.msk.f32.vlgmr.msra.gmra.mrb[76].mxu0 %vm959_vm6, %v7898_v42 }
0x34e8   :  { %14669 = vmatprep.mubr.msk.f32.mxu0 %vm959_vm6, %v17788_v13  ;;  %14668 = vmatpush3.msra.mxu0 %v7565_v8 }
0x34e9   :  { %14682 = vmatprep.subr.mxu0 %v16317_v16 }
0x34ef   :  { %14670 = vmatmul.mubr.msk.f32.vlgmr.msra.gmra.mrb[76].mxu0 %vm959_vm6, %v17766_v59 }
0x34f0   :  { %14684 = vmatprep.mubr.msk.f32.mxu0 %vm16318_vm1, %v16317_v16 }
0x3547   :  { %v8240_v55 = vpop.xlane.xlu1 %8239 }
0x3548   :  { %15418 = vrcp.f32 %v8240_v55 }
0x354b   :  { %v8243_v41 = vpop.xlane.xlu1 %8242 }
0x354c   :  { %15420 = vrcp.f32 %v8243_v41 }
0x354f   :  { %v8249_v58 = vpop.permute.xlu1 %8248 }
0x3550   :  { %14683 = vmatpush3.msra.mxu0 %v8249_v58 }
0x3551   :  { %14692 = vmatprep.subr.mxu0 %v13690_v56 }
0x3552   :  { %v15419_v63 = vpop.eup %15418 }
0x3553   :  { %v8246_v13 = vmul.f32 %v15419_v63, %v15415_v49  ;;  %v8564_v20 = vpop.permute.xlu1 %8563 }
0x3555   :  { %14685 = vmatmul.mubr.msk.f32.vlgmr.msra.gmra.mrb[78].mxu0 %vm959_vm6, %v8246_v13  ;;  %v15220_v13 = vld [vmem:[%s18575_s12] sm:$0xff]  }
0x3556   :  { %v15421_v2 = vpop.eup %15420  ;;  %14693 = vmatpush3.msra.mxu0 %v13690_v56 }
0x3557   :  { %v8247_v59 = vmul.f32 %v15421_v2, %v15417_v54  ;;  %14702 = vmatprep.subr.mxu0 %v16317_v16  ;;  %v15221_v2 = vld [vmem:[%s18575_s12 + $0x8] sm:$0xff]   ;;  %s18605_s12 = sld [smem:[#allocation137_spill]] }
0x3559   :  { %14690 = vmatmul.mubr.msk.f32.vlgmr.msra.gmra.mrb[110].mxu1 %vm959_vm6, %v8247_v59  ;;  %v15223_v59 = vld [vmem:[%s18576_s24 + $0x8] sm:$0xff]  }
0x355a   :  { %14698 = vmatpush3.xpose.msk.msra.mxu1 %vm959_vm6, %v8488_v61  ;;  %14699 = vmatprep.mubr.msk.f32.mxu1 %vm16318_vm1, %v16317_v16 }
0x355b   :  { %14707 = vmatprep.subr.mxu1 %v16317_v16 }
0x355d   :  { %14700 = vmatmul.mubr.msk.f32.vlgmr.msra.gmra.mrb[112].mxu1 %vm959_vm6, %v8486_v3 }
0x355e   :  { %14709 = vmatprep.mubr.msk.f32.mxu1 %vm16318_vm1, %v16317_v16 }
0x3628   :  { %v8320_v5 = vpop.f32.mrb[78].mxu0 }
0x3629   :  { %v14686_v38 = vpop.f32.mrb[79].mxu0  ;;  %14694 = vmatprep.mubr.msk.f32.mxu0 %vm959_vm6, %v8320_v5 }
0x362c   :  { %v8396_v47 = vpop.f32.mrb[110].mxu1 }
0x362d   :  { %v14691_v6 = vpop.f32.mrb[111].mxu1  ;;  %14695 = vmatmul.mubr.msk.f32.vlgmr.msra.gmra.mrb[76].mxu0 %vm959_vm6, %v8396_v47 }
0x362e   :  { %14703 = vmatpush3.xpose.msk.msra.mxu0 %vm959_vm6, %v8566_v17  ;;  %14704 = vmatprep.mubr.msk.f32.mxu0 %vm16318_vm1, %v16317_v16  ;;  %v15222_v17 = vld [vmem:[%s18576_s24] sm:$0xff]  }
0x362f   :  { %14712 = vmatprep.subr.mxu0 %v16317_v16 }
0x3630   :  { %v8559_v24 = vpop.f32.mrb[112].mxu1 }
0x3631   :  { %v8641_v0 = vmul.f32 0.35355338, %v8559_v24  ;;  %v14701_v43 = vpop.f32.mrb[113].mxu1  ;;  %14705 = vmatmul.mubr.msk.f32.vlgmr.msra.gmra.mrb[80].mxu0 %vm959_vm6, %v8564_v20 }
0x3632   :  { %14714 = vmatprep.mubr.msk.f32.mxu0 %vm16318_vm1, %v16317_v16 }
0x3633   :  { %v8643_v9 = vadd.f32 %v8641_v0, %v17748_v32 }
0x3635   :  { %v8645_v26 = vsel %vm959_vm6, %v8643_v9, -inf }
0x3636   :  { %8646 = vmax.xlane.f32.xlu0 %v8645_v26 }
0x36c3   :  { %v8647_v23 = vpop.xlane.xlu0 %8646 }
0x36c4   :  { %v8651_v45 = vsub.f32 %v8643_v9, %v8647_v23 }
0x36c6   :  { %v8653_v50 = vmul.f32 1.442695, %v8651_v45 }
0x36c8   :  { %15422 = vpow2.f32 %v8653_v50 }
0x36d2   :  { %v15423_v10 = vpop.eup %15422 }
0x36d3   :  { %v8657_v39 = vsel %vm959_vm6, %v15423_v10, 0.0 }
0x36d4   :  { %8658 = vadd.xlane.f32.xlu0 %v8657_v39 }
0x3704   :  { %v8637_v11 = vpop.f32.mrb[80].mxu0 }
0x3705   :  { %v8642_v7 = vmul.f32 0.35355338, %v8637_v11  ;;  %v14706_v14 = vpop.f32.mrb[81].mxu0  ;;  %v13703_v11 = vld [vmem:[%s18577_s18] ss:$0 sm:$0xff] }
0x3707   :  { %v8644_v15 = vadd.f32 %v8642_v7, %v17738_v52 }
0x3709   :  { %v8648_v42 = vsel %vm959_vm6, %v8644_v15, -inf }
0x370a   :  { %8649 = vmax.xlane.f32.xlu1 %v8648_v42  ;;  %v13704_v42 = vld [vmem:[%s18578_s4] ss:$0 sm:$0xff] }
0x371b   :  { %8743 = vrot.lane.b32.xlu1 %v17731_v22, %s16321_s30 }
0x3761   :  { %v8659_v52 = vpop.xlane.xlu0 %8658 }
0x3797   :  { %v8650_v32 = vpop.xlane.xlu1 %8649 }
0x3798   :  { %v8652_v21 = vsub.f32 %v8644_v15, %v8650_v32 }
0x379a   :  { %v8655_v57 = vmul.f32 1.442695, %v8652_v21 }
0x379b   :  { %v8744_v60 = vpop.permute.xlu1 %8743 }
0x379c   :  { %15424 = vpow2.f32 %v8655_v57  ;;  %14713 = vmatpush3.msra.mxu0 %v8744_v60 }
0x379d   :  { %15426 = vrcp.f32 %v8659_v52  ;;  %v15224_v52 = vld [vmem:[%s18576_s24 + $0x10] sm:$0xff]  }
0x37a6   :  { %v15425_v28 = vpop.eup %15424 }
0x37a7   :  { %v8660_v18 = vsel %vm959_vm6, %v15425_v28, 0.0  ;;  %v15427_v19 = vpop.eup %15426 }
0x37a8   :  { %8661 = vadd.xlane.f32.xlu0 %v8660_v18  ;;  %v8665_v22 = vmul.f32 %v15427_v19, %v15423_v10  ;;  %v13705_v19 = vld [vmem:[%s18579_s27] ss:$0 sm:$0xff] }
0x37be   :  { %8667 = vrot.lane.b32.xlu0 %v17729_v12, %s16321_s30  ;;  %v13699_v12 = vld [vmem:[%s18573_s16 + $0x18] sm:$0xff]  ;;  %s18603_s16 = sld [smem:[#allocation88_spill]] }
0x37bf   :  { %14717 = vmatprep.subr.mxu0 %v13699_v12 }
0x3835   :  { %v8662_v62 = vpop.xlane.xlu0 %8661 }
0x3836   :  { %15428 = vrcp.f32 %v8662_v62  ;;  %v15225_v62 = vld [vmem:[%s18576_s24 + $0x18] sm:$0xff]   ;;  %s16322_s24 = smov [#allocation44]  }
0x3837   :  { %s13357_s18 = sshll.u32 %s16322_s24, 4  ;;  %s13358_s18 = int_to_ptr.vmem [resolvable:$true] %s13357_s18 }
0x3838   :  { %s16143_s4 = scalar_lea.vmem %s13358_s18, 256  ;;  %p16148_p7 = scmp.lt.s32.totalorder %s13358_s18, %s13358_s18 }
0x3839   :  { %v8668_v29 = vpop.permute.xlu0 %8667  ;;  %p16144_p6 = scmp.ne.s32.totalorder %s13358_s18, %s16143_s4  ;;  %p16149_p8 = scmp.lt.s32.totalorder %s16143_s4, %s16143_s4 }
0x383a   :  { %14708 = vmatpush3.msra.mxu1 %v8668_v29 }
0x383b   :  { %14710 = vmatmul.mubr.msk.f32.vlgmr.msra.gmra.mrb[114].mxu1 %vm959_vm6, %v8665_v22  ;;  %14722 = vmatprep.subr.bf16.mxu1 %v16317_v16  ;;  %p16150_p9 = por %p16149_p8, %p16148_p7 }
0x383c   :  { %14726 = vmatprep.mubr.msk.bf16.mxu1 %vm16318_vm1, %v16317_v16  ;;  %14723 = vmatpush3.bf16.msra.mxu1 %v15220_v13 }
0x383d   :  { %14724 = vmatprep.subr.bf16.mxu1 %v16317_v16  ;;  %p16151_p10 = pnand %p16150_p9, %p16144_p6 }
0x3840   :  { %v15429_v51 = vpop.eup %15428  ;;  %14725 = vmatpush3.bf16.msra.mxu1 %v15221_v2 }
0x3841   :  { %v8666_v27 = vmul.f32 %v15429_v51, %v15425_v28  ;;  %14742 = vmatprep.subr.bf16.mxu1 %v16317_v16 }
0x3843   :  { %14715 = vmatmul.mubr.msk.f32.vlgmr.msra.gmra.mrb[82].mxu0 %vm959_vm6, %v8666_v27 }
0x3844   :  { %14718 = vmatpush3.msra.mxu0 %v13699_v12 }
0x3845   :  { %14730 = vmatprep.subr.bf16.mxu0 %v16317_v16 }
0x390e   :  { %v8739_v35 = vpop.f32.mrb[114].mxu1 }
0x390f   :  { %v14711_v36 = vpop.f32.mrb[115].mxu1  ;;  %14719 = vmatprep.mubr.msk.f32.mxu0 %vm959_vm6, %v8739_v35 }
0x3916   :  { %v8815_v8 = vpop.f32.mrb[82].mxu0 }
0x3917   :  { %v14716_v37 = vpop.f32.mrb[83].mxu0  ;;  %14720 = vmatmul.mubr.msk.f32.vlgmr.msra.gmra.mrb[76].mxu0 %vm959_vm6, %v8815_v8 }
0x3918   :  { %14738 = vmatprep.mubr.msk.bf16.mxu0 %vm16318_vm1, %v16317_v16  ;;  %14731 = vmatpush3.bf16.msra.mxu0 %v15222_v17  ;;  %v15226_v17 = vld [vmem:[%s18581_s22] sm:$0xff]  }
0x3919   :  { %14732 = vmatprep.subr.bf16.mxu0 %v16317_v16 }
0x391c   :  { %14733 = vmatpush3.bf16.msra.mxu0 %v15223_v59  ;;  %v15227_v59 = vld [vmem:[%s18582_s23] sm:$0xff]  }
0x391d   :  { %14734 = vmatprep.subr.bf16.mxu0 %v16317_v16 }
0x3920   :  { %14735 = vmatpush3.bf16.msra.mxu0 %v15224_v52 }
0x3921   :  { %14736 = vmatprep.subr.bf16.mxu0 %v16317_v16 }
0x3924   :  { %14737 = vmatpush3.bf16.msra.mxu0 %v15225_v62  ;;  %v15230_v62 = vld [vmem:[%s18585_s26] sm:$0xff]  }
0x3925   :  { %14758 = vmatprep.subr.bf16.mxu0 %v16317_v16 }
0x39ea   :  { %v14721_v4 = vpop.f32.mrb[76].mxu0 }
0x39eb   :  { %v8912_v48 = vadd.f32 %v14721_v4, %v13702_v44  ;;  %v8893_v1 = vpop.f32.mrb[77].mxu0 }
0x39ec   :  { %v8911_v30 = vadd.f32 %v13702_v44, %v8893_v1  ;;  %v13709_v44 = vld [vmem:[%s18580_s0] ss:$0 sm:$0xff] }
0x39ed   :  { %v17883_v49 = vadd.f32 %v8912_v48, %v17652_v34 }
0x39ee   :  { %v17886_v53 = vadd.f32 %v8911_v30, %v17655_v33 }
0x39ef   :  { %v8920_v54 = vsel %vm705_vm0, %v17883_v49, 0.0 }
0x39f0   :  { %8921 = vadd.xlane.f32.xlu0 %v8920_v54  ;;  %v8917_v46 = vsel %vm705_vm0, %v17886_v53, 0.0 }
0x39f1   :  { %8918 = vadd.xlane.f32.xlu1 %v8917_v46 }
0x3a7d   :  { %v8922_v31 = vpop.xlane.xlu0 %8921 }
0x3a7e   :  { %v8924_v40 = vmul.f32 0.03125, %v8922_v31  ;;  %v8919_v55 = vpop.xlane.xlu1 %8918 }
0x3a7f   :  { %v8923_v41 = vmul.f32 0.03125, %v8919_v55 }
0x3a80   :  { %v8926_v34 = vsub.f32 %v17883_v49, %v8924_v40 }
0x3a81   :  { %v8925_v33 = vsub.f32 %v17886_v53, %v8923_v41 }
0x3a82   :  { %v8928_v56 = vmul.f32 %v8926_v34, %v8926_v34  ;;  %v8962_v7 = vmul.f32 %v13703_v11, %v8926_v34 }
0x3a83   :  { %v8927_v58 = vmul.f32 %v8925_v33, %v8925_v33  ;;  %v8961_v15 = vmul.f32 %v13703_v11, %v8925_v33 }
0x3a84   :  { %v8932_v61 = vsel %vm705_vm0, %v8928_v56, 0.0 }
0x3a85   :  { %8933 = vadd.xlane.f32.xlu1 %v8932_v61  ;;  %v8929_v63 = vsel %vm705_vm0, %v8927_v58, 0.0 }
0x3a86   :  { %8930 = vadd.xlane.f32.xlu0 %v8929_v63 }
0x3b12   :  { %v8934_v3 = vpop.xlane.xlu1 %8933 }
0x3b13   :  { %v8936_v5 = vmul.f32 0.032258064, %v8934_v3  ;;  %v8931_v38 = vpop.xlane.xlu0 %8930  ;;  %v15228_v3 = vld [vmem:[%s18581_s22 + $0x8] sm:$0xff]  }
0x3b14   :  { %v8935_v47 = vmul.f32 0.032258064, %v8931_v38 }
0x3b15   :  { %15430 = vrsqrt.f32 %v8936_v5  ;;  %vm8946_vm7 = vcmp.eq.f32.partialorder %v8936_v5, inf  ;;  %v8949_v0 = vand.u32 2147483648, %v8936_v5  ;;  %vm8948_vm8 = vcmp.eq.f32.partialorder %v8936_v5, 0.0 }
0x3b16   :  { %15432 = vrsqrt.f32 %v8935_v47  ;;  %vm8939_vm9 = vcmp.eq.f32.partialorder %v8935_v47, inf  ;;  %v8942_v26 = vand.u32 2147483648, %v8935_v47  ;;  %vm8941_vm10 = vcmp.eq.f32.partialorder %v8935_v47, 0.0 }
0x3b1f   :  { %v15431_v6 = vpop.eup %15430 }
0x3b20   :  { %v15433_v20 = vpop.eup %15432  ;;  %v8945_v24 = vmul.f32 %v15431_v6, %v8936_v5 }
0x3b21   :  { %v8938_v43 = vmul.f32 %v15433_v20, %v8935_v47 }
0x3b22   :  { %v8947_v9 = vsel %vm8946_vm7, %v8936_v5, %v8945_v24  ;;  %v15229_v5 = vld [vmem:[%s18582_s23 + $0x8] sm:$0xff]  }
0x3b23   :  { %v8950_v23 = vsel %vm8948_vm8, %v8949_v0, %v8947_v9  ;;  %v8940_v45 = vsel %vm8939_vm9, %v8935_v47, %v8938_v43 }
0x3b24   :  { %v8952_v50 = vadd.f32 1e-06, %v8950_v23  ;;  %v8943_v10 = vsel %vm8941_vm10, %v8942_v26, %v8940_v45 }
0x3b25   :  { %v8951_v39 = vadd.f32 1e-06, %v8943_v10 }
0x3b26   :  { %15434 = vrcp.f32 %v8952_v50 }
0x3b27   :  { %15436 = vrcp.f32 %v8951_v39 }
0x3b30   :  { %v15435_v14 = vpop.eup %15434 }
0x3b31   :  { %v15437_v32 = vpop.eup %15436  ;;  %v8964_v21 = vmul.f32 %v15435_v14, %v8962_v7  ;;  %v13715_v14 = vld [vmem:[%s18583_s3] ss:$0 sm:$0xff] }
0x3b32   :  { %v8963_v57 = vmul.f32 %v15437_v32, %v8961_v15 }
0x3b33   :  { %v8972_v60 = vadd.f32 %v13704_v42, %v8964_v21 }
0x3b34   :  { %v8971_v28 = vadd.f32 %v13704_v42, %v8963_v57 }
0x3b36   :  { %v8973_v18 = vpack.c.bf16 %v8972_v60, %v8971_v28  ;;  %v13716_v60 = vld [vmem:[%s18584_s21] ss:$0 sm:$0xff] }
0x3b38   :  { %14727 = vmatmul.mubr.msk.bf16.vlgmr.msra.gmra.mrb[116].mxu1 %vm705_vm0, %v8973_v18 }
0x3b39   :  { %14746 = vmatprep.mubr.msk.bf16.mxu1 %vm16318_vm1, %v16317_v16  ;;  %14743 = vmatpush3.bf16.msra.mxu1 %v15226_v17 }
0x3b3a   :  { %14744 = vmatprep.subr.bf16.mxu1 %v16317_v16 }
0x3b3d   :  { %14745 = vmatpush3.bf16.msra.mxu1 %v15228_v3 }
0x3b3e   :  { %14750 = vmatprep.subr.bf16.mxu1 %v16317_v16 }
0x3c0b   :  { %v9034_v22 = vpop.f32.mrb[116].mxu1 }
0x3c0c   :  { %v9035_v29 = vadd.f32 %v13705_v19, %v9034_v22  ;;  %v14728_v51 = vpop.f32.mrb[117].mxu1  ;;  %v15231_v22 = vld [vmem:[%s18585_s26 + $0x8] sm:$0xff]  }
0x3c0d   :  { %v9037_v27 = vpop.f32.mrb[118].mxu1 }
0x3c0e   :  { %v9038_v12 = vadd.f32 %v13705_v19, %v9037_v27  ;;  %v14729_v35 = vpop.f32.mrb[119].mxu1  ;;  %v9041_v36 = vmax.f32 %v9035_v29, 0.0  ;;  %v13725_v29 = vld [vmem:[%s18586_s20] ss:$0 sm:$0xff] }
0x3c10   :  { %v9042_v8 = vmax.f32 %v9038_v12, 0.0 }
0x3c12   :  { %v9043_v37 = vpack.c.bf16 %v9042_v8, %v9041_v36 }
0x3c14   :  { %14739 = vmatmul.mubr.msk.bf16.vlgmr.msra.gmra.mrb[84].mxu0 %vm2802_vm11, %v9043_v37 }
0x3c15   :  { %14762 = vmatprep.mubr.msk.bf16.mxu0 %vm16318_vm1, %v16317_v16  ;;  %14759 = vmatpush3.bf16.msra.mxu0 %v15227_v59 }
0x3c16   :  { %14760 = vmatprep.subr.bf16.mxu0 %v16317_v16 }
0x3c19   :  { %14761 = vmatpush3.bf16.msra.mxu0 %v15229_v5 }
0x3c1a   :  { %14776 = vmatprep.subr.mxu0 %v16317_v16 }
0x3ce7   :  { %v9120_v4 = vpop.f32.mrb[84].mxu0 }
0x3ce8   :  { %v9121_v48 = vadd.f32 %v13709_v44, %v9120_v4  ;;  %v14740_v1 = vpop.f32.mrb[85].mxu0 }
0x3ce9   :  { %v9123_v30 = vpop.f32.mrb[86].mxu0 }
0x3cea   :  { %v17919_v54 = vadd.f32 %v9121_v48, %v17886_v53  ;;  %v9124_v46 = vadd.f32 %v13709_v44, %v9123_v30  ;;  %v14741_v31 = vpop.f32.mrb[87].mxu0  ;;  %v13721_v48 = vld [vmem:[%s18587_s13] ss:$0 sm:$0xff] }
0x3ceb   :  { %v13717_v30 = vld [vmem:[%s18588_s28] ss:$0 sm:$0xff] }
0x3cec   :  { %v17922_v40 = vadd.f32 %v9124_v46, %v17883_v49  ;;  %v9131_v55 = vsel %vm705_vm0, %v17919_v54, 0.0 }
0x3ced   :  { %9132 = vadd.xlane.f32.xlu0 %v9131_v55 }
0x3cee   :  { %v9134_v41 = vsel %vm705_vm0, %v17922_v40, 0.0 }
0x3cef   :  { %9135 = vadd.xlane.f32.xlu1 %v9134_v41 }
0x3d7a   :  { %v9133_v34 = vpop.xlane.xlu0 %9132 }
0x3d7b   :  { %v9137_v33 = vmul.f32 0.03125, %v9133_v34 }
0x3d7c   :  { %v9136_v53 = vpop.xlane.xlu1 %9135 }
0x3d7d   :  { %v9139_v56 = vsub.f32 %v17919_v54, %v9137_v33  ;;  %v9138_v58 = vmul.f32 0.03125, %v9136_v53 }
0x3d7f   :  { %v9140_v49 = vsub.f32 %v17922_v40, %v9138_v58  ;;  %v9141_v61 = vmul.f32 %v9139_v56, %v9139_v56  ;;  %v9175_v42 = vmul.f32 %v13715_v14, %v9139_v56 }
0x3d81   :  { %v9143_v63 = vsel %vm705_vm0, %v9141_v61, 0.0  ;;  %v9142_v13 = vmul.f32 %v9140_v49, %v9140_v49  ;;  %v9176_v32 = vmul.f32 %v13715_v14, %v9140_v49 }
0x3d82   :  { %9144 = vadd.xlane.f32.xlu0 %v9143_v63 }
0x3d83   :  { %v9146_v2 = vsel %vm705_vm0, %v9142_v13, 0.0 }
0x3d84   :  { %9147 = vadd.xlane.f32.xlu1 %v9146_v2  ;;  %v17989_v2 = vld [vmem:[%s16793_s9 + $0x8] sm:$0xff] }
0x3e0f   :  { %v9145_v38 = vpop.xlane.xlu0 %9144 }
0x3e10   :  { %v9149_v47 = vmul.f32 0.032258064, %v9145_v38 }
0x3e11   :  { %v9148_v6 = vpop.xlane.xlu1 %9147 }
0x3e12   :  { %15438 = vrsqrt.f32 %v9149_v47  ;;  %v9150_v20 = vmul.f32 0.032258064, %v9148_v6  ;;  %vm9153_vm12 = vcmp.eq.f32.partialorder %v9149_v47, inf  ;;  %v9156_v43 = vand.u32 2147483648, %v9149_v47 }
0x3e13   :  { %vm9155_vm13 = vcmp.eq.f32.partialorder %v9149_v47, 0.0 }
0x3e14   :  { %15440 = vrsqrt.f32 %v9150_v20  ;;  %vm9160_vm14 = vcmp.eq.f32.partialorder %v9150_v20, inf  ;;  %v9163_v10 = vand.u32 2147483648, %v9150_v20  ;;  %vm9162_vm15 = vcmp.eq.f32.partialorder %v9150_v20, 0.0 }
0x3e1c   :  { %v15439_v24 = vpop.eup %15438 }
0x3e1d   :  { %v9152_v0 = vmul.f32 %v15439_v24, %v9149_v47  ;;  %v17999_v24 = vld [vmem:[%s16793_s9] sm:$0xff]  ;;  %s18589_s9 = sld [smem:[#allocation103_spill]] }
0x3e1e   :  { %v15441_v9 = vpop.eup %15440 }
0x3e1f   :  { %v9154_v26 = vsel %vm9153_vm12, %v9149_v47, %v9152_v0  ;;  %v9159_v45 = vmul.f32 %v15441_v9, %v9150_v20 }
0x3e20   :  { %v9157_v23 = vsel %vm9155_vm13, %v9156_v43, %v9154_v26  ;;  %vm13325_vm13 = vcmask 130048  }
0x3e21   :  { %v9165_v50 = vadd.f32 1e-06, %v9157_v23  ;;  %v9161_v39 = vsel %vm9160_vm14, %v9150_v20, %v9159_v45 }
0x3e22   :  { %v9164_v11 = vsel %vm9162_vm15, %v9163_v10, %v9161_v39 }
0x3e23   :  { %15442 = vrcp.f32 %v9165_v50  ;;  %v9166_v7 = vadd.f32 1e-06, %v9164_v11 }
0x3e25   :  { %15444 = vrcp.f32 %v9166_v7 }
0x3e2d   :  { %v15443_v15 = vpop.eup %15442 }
0x3e2e   :  { %v9177_v21 = vmul.f32 %v15443_v15, %v9175_v42 }
0x3e2f   :  { %v15445_v57 = vpop.eup %15444 }
0x3e30   :  { %v9178_v28 = vmul.f32 %v15445_v57, %v9176_v32  ;;  %v9185_v18 = vadd.f32 %v13716_v60, %v9177_v21 }
0x3e32   :  { %v9186_v52 = vadd.f32 %v13716_v60, %v9178_v28 }
0x3e34   :  { %v9187_v19 = vpack.c.bf16 %v9186_v52, %v9185_v18 }
0x3e36   :  { %14747 = vmatmul.mubr.msk.bf16.vlgmr.msra.gmra.mrb[120].mxu1 %vm705_vm0, %v9187_v19  ;;  %14763 = vmatmul.mubr.msk.bf16.vlgmr.msra.gmra.mrb[88].mxu0 %vm705_vm0, %v9187_v19 }
0x3e37   :  { %14751 = vmatpush3.bf16.msra.mxu1 %v15230_v62  ;;  %14754 = vmatprep.mubr.msk.bf16.mxu1 %vm16318_vm1, %v16317_v16 }
0x3e38   :  { %14752 = vmatprep.subr.bf16.mxu1 %v16317_v16  ;;  %14778 = vmatprep.mubr.msk.f32.mxu0 %vm16318_vm1, %v16317_v16 }
0x3e3b   :  { %14753 = vmatpush3.bf16.msra.mxu1 %v15231_v22 }
0x3e3c   :  { %14766 = vmatprep.subr.mxu1 %v16317_v16 }
0x3e3e   :  { %14755 = vmatmul.mubr.msk.bf16.vlgmr.msra.gmra.mrb[124].mxu1 %vm705_vm0, %v9187_v19 }
0x3e3f   :  { %14768 = vmatprep.mubr.msk.f32.mxu1 %vm16318_vm1, %v16317_v16 }
0x3f09   :  { %v9248_v51 = vpop.f32.mrb[120].mxu1  ;;  %v9376_v27 = vpop.f32.mrb[88].mxu0 }
0x3f0a   :  { %v17956_v12 = vadd.f32 %v13725_v29, %v9376_v27  ;;  %v14748_v35 = vpop.f32.mrb[121].mxu1  ;;  %v14764_v36 = vpop.f32.mrb[89].mxu0  ;;  %v17966_v34 = vadd.f32 %v13717_v30, %v9248_v51 }
0x3f0b   :  { %v9251_v8 = vpop.f32.mrb[122].mxu1  ;;  %v9379_v37 = vpop.f32.mrb[90].mxu0 }
0x3f0c   :  { %v14749_v44 = vpop.f32.mrb[123].mxu1  ;;  %v14765_v4 = vpop.f32.mrb[91].mxu0  ;;  %14777 = vmatpush3.msra.mxu0 %v17956_v12  ;;  %v17977_v53 = vadd.f32 %v13717_v30, %v9251_v8  ;;  %v17980_v56 = vadd.f32 %v13725_v29, %v9379_v37 }
0x3f0d   :  { %14786 = vmatprep.subr.mxu0 %v16317_v16 }
0x3f11   :  { %v9312_v1 = vpop.f32.mrb[124].mxu1 }
0x3f12   :  { %v17962_v46 = vadd.f32 %v13721_v48, %v9312_v1  ;;  %v14756_v31 = vpop.f32.mrb[125].mxu1 }
0x3f13   :  { %v9315_v55 = vpop.f32.mrb[126].mxu1 }
0x3f14   :  { %v14757_v41 = vpop.f32.mrb[127].mxu1  ;;  %14767 = vmatpush3.xpose.msk.msra.mxu1 %vm959_vm6, %v17962_v46  ;;  %v17969_v33 = vadd.f32 %v13721_v48, %v9315_v55 }
0x3f15   :  { %14771 = vmatprep.subr.mxu1 %v16317_v16 }
0x3f17   :  { %14769 = vmatmul.mubr.msk.f32.vlgmr.msra.gmra.mrb[128].mxu1 %vm959_vm6, %v17966_v34 }
0x3f18   :  { %14772 = vmatpush3.xpose.msk.msra.mxu1 %vm959_vm6, %v17969_v33  ;;  %14773 = vmatprep.mubr.msk.f32.mxu1 %vm16318_vm1, %v16317_v16 }
0x3f19   :  { %14781 = vmatprep.subr.mxu1 %v16317_v16 }
0x3f1b   :  { %14774 = vmatmul.mubr.msk.f32.vlgmr.msra.gmra.mrb[130].mxu1 %vm959_vm6, %v17977_v53 }
0x3f1c   :  { %14782 = vmatpush3.msra.mxu1 %v17980_v56  ;;  %14783 = vmatprep.mubr.msk.f32.mxu1 %vm16318_vm1, %v16317_v16 }
0x3f1d   :  { %14791 = vmatprep.subr.mxu1 %v16317_v16 }
0x3fea   :  { %v9455_v58 = vpop.f32.mrb[128].mxu1 }
0x3feb   :  { %v14770_v49 = vpop.f32.mrb[129].mxu1  ;;  %v9535_v20 = vmul.f32 0.35355338, %v9455_v58 }
0x3fed   :  { %v9537_v0 = vadd.f32 %v17999_v24, %v9535_v20 }
0x3fee   :  { %v9531_v61 = vpop.f32.mrb[130].mxu1 }
0x3fef   :  { %v9536_v63 = vmul.f32 0.35355338, %v9531_v61  ;;  %v14775_v13 = vpop.f32.mrb[131].mxu1  ;;  %v9539_v43 = vsel %vm959_vm6, %v9537_v0, -inf }
0x3ff1   :  { %v9538_v17 = vadd.f32 %v17989_v2, %v9536_v63 }
0x3ff3   :  { %v9542_v59 = vsel %vm959_vm6, %v9538_v17, -inf }
0x3ff4   :  { %9543 = vmax.xlane.f32.xlu0 %v9542_v59 }
0x400a   :  { %9788 = vrot.lane.b32.xlu0 %v17969_v33, %s16319_s15 }
0x4081   :  { %v9544_v3 = vpop.xlane.xlu0 %9543 }
0x4082   :  { %v9546_v5 = vsub.f32 %v9538_v17, %v9544_v3 }
0x4084   :  { %v9549_v38 = vmul.f32 1.442695, %v9546_v5 }
0x4085   :  { %v9789_v45 = vpop.permute.xlu0 %9788 }
0x4086   :  { %15446 = vpow2.f32 %v9549_v38 }
0x4090   :  { %v15447_v47 = vpop.eup %15446 }
0x4091   :  { %v9554_v6 = vsel %vm959_vm6, %v15447_v47, 0.0 }
0x4092   :  { %9555 = vadd.xlane.f32.xlu1 %v9554_v6 }
0x40a3   :  { %9786 = vrot.lane.b32.xlu1 %v17977_v53, %s16319_s15 }
0x40c7   :  { %9540 = vmax.xlane.f32.xlu1 %v9539_v43 }
0x40d8   :  { %9708 = vrot.lane.b32.xlu1 %v17966_v34, %s16319_s15 }
0x411f   :  { %v9556_v9 = vpop.xlane.xlu1 %9555 }
0x4120   :  { %15448 = vrcp.f32 %v9556_v9 }
0x4123   :  { %v9787_v50 = vpop.permute.xlu1 %9786 }
0x412a   :  { %v15449_v26 = vpop.eup %15448 }
0x412b   :  { %v9560_v23 = vmul.f32 %v15449_v26, %v15447_v47 }
0x412d   :  { %14784 = vmatmul.mubr.msk.f32.vlgmr.msra.gmra.mrb[132].mxu1 %vm959_vm6, %v9560_v23 }
0x412e   :  { %14792 = vmatpush3.xpose.msk.msra.mxu1 %vm959_vm6, %v9789_v45  ;;  %14793 = vmatprep.mubr.msk.f32.mxu1 %vm16318_vm1, %v16317_v16 }
0x412f   :  { %14801 = vmatprep.subr.mxu1 %v16317_v16 }
0x4131   :  { %14794 = vmatmul.mubr.msk.f32.vlgmr.msra.gmra.mrb[134].mxu1 %vm959_vm6, %v9787_v50 }
0x4132   :  { %14803 = vmatprep.mubr.msk.f32.mxu1 %vm16318_vm1, %v16317_v16 }
0x4154   :  { %v9541_v10 = vpop.xlane.xlu1 %9540 }
0x4155   :  { %v9545_v39 = vsub.f32 %v9537_v0, %v9541_v10 }
0x4157   :  { %v9547_v11 = vmul.f32 1.442695, %v9545_v39 }
0x4158   :  { %v9709_v28 = vpop.permute.xlu1 %9708 }
0x4159   :  { %15450 = vpow2.f32 %v9547_v11 }
0x4163   :  { %v15451_v7 = vpop.eup %15450 }
0x4164   :  { %v9551_v14 = vsel %vm959_vm6, %v15451_v7, 0.0 }
0x4165   :  { %9552 = vadd.xlane.f32.xlu0 %v9551_v14  ;;  %v13741_v14 = vld [vmem:[%s18589_s9 + $0x8] sm:$0xff] }
0x417b   :  { %9710 = vrot.lane.b32.xlu0 %v17962_v46, %s16319_s15 }
0x41f2   :  { %v9553_v15 = vpop.xlane.xlu0 %9552 }
0x41f3   :  { %15452 = vrcp.f32 %v9553_v15  ;;  %v9707_v15 = vld [vmem:[%s18589_s9] sm:$0xff] }
0x41f6   :  { %v9711_v21 = vpop.permute.xlu0 %9710 }
0x41fd   :  { %v15453_v42 = vpop.eup %15452 }
0x41fe   :  { %v9559_v32 = vmul.f32 %v15453_v42, %v15451_v7 }
0x4200   :  { %14779 = vmatmul.mubr.msk.f32.vlgmr.msra.gmra.mrb[92].mxu0 %vm959_vm6, %v9559_v32  ;;  %v18017_v57 = vpop.f32.mrb[132].mxu1 }
0x4201   :  { %14787 = vmatpush3.xpose.msk.msra.mxu0 %vm959_vm6, %v9711_v21  ;;  %v14785_v60 = vpop.f32.mrb[133].mxu1  ;;  %14788 = vmatprep.mubr.msk.f32.mxu0 %vm16318_vm1, %v16317_v16 }
0x4202   :  { %14796 = vmatprep.subr.mxu0 %v16317_v16 }
0x4204   :  { %14789 = vmatmul.mubr.msk.f32.vlgmr.msra.gmra.mrb[94].mxu0 %vm959_vm6, %v9709_v28  ;;  %v9860_v18 = vpop.f32.mrb[134].mxu1 }
0x4205   :  { %v9865_v52 = vmul.f32 0.35355338, %v9860_v18  ;;  %v14795_v62 = vpop.f32.mrb[135].mxu1  ;;  %14798 = vmatprep.mubr.msk.f32.mxu0 %vm16318_vm1, %v16317_v16 }
0x4207   :  { %v9867_v19 = vadd.f32 %v17989_v2, %v9865_v52 }
0x4209   :  { %v9871_v22 = vsel %vm959_vm6, %v9867_v19, -inf }
0x420a   :  { %9872 = vmax.xlane.f32.xlu1 %v9871_v22 }
0x421b   :  { %10210 = vrot.lane.b32.xlu1 %v17962_v46, %s16320_s5 }
0x421f   :  { %10208 = vrot.lane.b32.xlu1 %v17966_v34, %s16320_s5 }
0x4223   :  { %10288 = vrot.lane.b32.xlu1 %v17969_v33, %s16320_s5 }
0x4297   :  { %v9873_v29 = vpop.xlane.xlu1 %9872 }
0x4298   :  { %v9875_v51 = vsub.f32 %v9867_v19, %v9873_v29 }
0x429a   :  { %v9878_v27 = vmul.f32 1.442695, %v9875_v51 }
0x429b   :  { %v10211_v41 = vpop.permute.xlu1 %10210 }
0x429c   :  { %15454 = vpow2.f32 %v9878_v27 }
0x429f   :  { %v10209_v49 = vpop.permute.xlu1 %10208 }
0x42a3   :  { %v10289_v63 = vpop.permute.xlu1 %10288 }
0x42a6   :  { %v15455_v35 = vpop.eup %15454 }
0x42a7   :  { %v9883_v36 = vsel %vm959_vm6, %v15455_v35, 0.0 }
0x42a8   :  { %9884 = vadd.xlane.f32.xlu0 %v9883_v36 }
0x42be   :  { %9968 = vrot.lane.b32.xlu0 %v17980_v56, %s16319_s15 }
0x42c2   :  { %10286 = vrot.lane.b32.xlu0 %v17977_v53, %s16320_s5 }
0x42d3   :  { %v18039_v8 = vpop.f32.mrb[92].mxu0 }
0x42d4   :  { %v14780_v37 = vpop.f32.mrb[93].mxu0 }
0x42d7   :  { %v9782_v44 = vpop.f32.mrb[94].mxu0 }
0x42d8   :  { %v9864_v4 = vmul.f32 0.35355338, %v9782_v44  ;;  %v14790_v48 = vpop.f32.mrb[95].mxu0 }
0x42da   :  { %v9866_v1 = vadd.f32 %v17999_v24, %v9864_v4 }
0x42dc   :  { %v9868_v30 = vsel %vm959_vm6, %v9866_v1, -inf }
0x42dd   :  { %9869 = vmax.xlane.f32.xlu1 %v9868_v30 }
0x4335   :  { %v9885_v31 = vpop.xlane.xlu0 %9884 }
0x4336   :  { %15456 = vrcp.f32 %v9885_v31 }
0x4339   :  { %v9969_v55 = vpop.permute.xlu0 %9968 }
0x433a   :  { %14802 = vmatpush3.msra.mxu1 %v9969_v55 }
0x433b   :  { %14816 = vmatprep.subr.mxu1 %v16317_v16 }
0x433d   :  { %v10287_v13 = vpop.permute.xlu0 %10286 }
0x4340   :  { %v15457_v58 = vpop.eup %15456 }
0x4341   :  { %v9889_v61 = vmul.f32 %v15457_v58, %v15455_v35  ;;  %v13752_v35 = vld [vmem:[%s18589_s9 + $0x10] sm:$0xff] }
0x4343   :  { %14804 = vmatmul.mubr.msk.f32.vlgmr.msra.gmra.mrb[136].mxu1 %vm959_vm6, %v9889_v61 }
0x4344   :  { %14817 = vmatpush3.xpose.msk.msra.mxu1 %vm959_vm6, %v10211_v41  ;;  %14818 = vmatprep.mubr.msk.f32.mxu1 %vm16318_vm1, %v16317_v16 }
0x4345   :  { %14821 = vmatprep.subr.mxu1 %v16317_v16 }
0x4347   :  { %14819 = vmatmul.mubr.msk.f32.vlgmr.msra.gmra.mrb[138].mxu1 %vm959_vm6, %v10209_v49 }
0x4348   :  { %14822 = vmatpush3.xpose.msk.msra.mxu1 %vm959_vm6, %v10289_v63  ;;  %14823 = vmatprep.mubr.msk.f32.mxu1 %vm16318_vm1, %v16317_v16 }
0x4349   :  { %14831 = vmatprep.subr.mxu1 %v16317_v16 }
0x434b   :  { %14824 = vmatmul.mubr.msk.f32.vlgmr.msra.gmra.mrb[140].mxu1 %vm959_vm6, %v10287_v13 }
0x434c   :  { %14833 = vmatprep.mubr.msk.f32.mxu1 %vm16318_vm1, %v16317_v16 }
0x436a   :  { %v9870_v17 = vpop.xlane.xlu1 %9869 }
0x436b   :  { %v9874_v59 = vsub.f32 %v9866_v1, %v9870_v17 }
0x436d   :  { %v9876_v3 = vmul.f32 1.442695, %v9874_v59 }
0x436f   :  { %15458 = vpow2.f32 %v9876_v3 }
0x4379   :  { %v15459_v5 = vpop.eup %15458 }
0x437a   :  { %v9880_v38 = vsel %vm959_vm6, %v15459_v5, 0.0 }
0x437b   :  { %9881 = vadd.xlane.f32.xlu0 %v9880_v38 }
0x4391   :  { %9891 = vrot.lane.b32.xlu0 %v17956_v12, %s16319_s15 }
0x4395   :  { %10466 = vrot.lane.b32.xlu0 %v17980_v56, %s16320_s5 }
0x4399   :  { %10629 = vrot.lane.b32.xlu0 %v17962_v46, %s16321_s30 }
0x439d   :  { %10707 = vrot.lane.b32.xlu0 %v17969_v33, %s16321_s30 }
0x43a1   :  { %10627 = vrot.lane.b32.xlu0 %v17966_v34, %s16321_s30 }
0x4408   :  { %v9882_v47 = vpop.xlane.xlu0 %9881 }
0x4409   :  { %15460 = vrcp.f32 %v9882_v47 }
0x440c   :  { %v9892_v6 = vpop.permute.xlu0 %9891 }
0x440d   :  { %14797 = vmatpush3.msra.mxu0 %v9892_v6 }
0x440e   :  { %14806 = vmatprep.subr.mxu0 %v13741_v14 }
0x4410   :  { %v10467_v20 = vpop.permute.xlu0 %10466 }
0x4411   :  { %14832 = vmatpush3.msra.mxu1 %v10467_v20 }
0x4412   :  { %14841 = vmatprep.subr.mxu1 %v16317_v16 }
0x4413   :  { %v15461_v0 = vpop.eup %15460 }
0x4414   :  { %v9888_v43 = vmul.f32 %v15461_v0, %v15459_v5  ;;  %v10630_v37 = vpop.permute.xlu0 %10629 }
0x4416   :  { %14799 = vmatmul.mubr.msk.f32.vlgmr.msra.gmra.mrb[96].mxu0 %vm959_vm6, %v9888_v43  ;;  %v10040_v46 = vpop.f32.mrb[136].mxu1 }
0x4417   :  { %v14805_v9 = vpop.f32.mrb[137].mxu1  ;;  %14807 = vmatpush3.msra.mxu0 %v13741_v14 }
0x4418   :  { %14811 = vmatprep.subr.mxu0 %v9707_v15  ;;  %v10708_v48 = vpop.permute.xlu0 %10707 }
0x441a   :  { %v10282_v33 = vpop.f32.mrb[138].mxu1 }
0x441b   :  { %v10364_v26 = vmul.f32 0.35355338, %v10282_v33  ;;  %v14820_v23 = vpop.f32.mrb[139].mxu1 }
0x441c   :  { %v10628_v1 = vpop.permute.xlu0 %10627 }
0x441d   :  { %v10366_v34 = vadd.f32 %v17999_v24, %v10364_v26 }
0x441e   :  { %v10360_v45 = vpop.f32.mrb[140].mxu1 }
0x441f   :  { %v10365_v50 = vmul.f32 0.35355338, %v10360_v45  ;;  %v14825_v10 = vpop.f32.mrb[141].mxu1  ;;  %v10368_v39 = vsel %vm959_vm6, %v10366_v34, -inf }
0x4420   :  { %10369 = vmax.xlane.f32.xlu1 %v10368_v39 }
0x4421   :  { %v10367_v11 = vadd.f32 %v17989_v2, %v10365_v50 }
0x4423   :  { %v10371_v7 = vsel %vm959_vm6, %v10367_v11, -inf }
0x4424   :  { %10372 = vmax.xlane.f32.xlu1 %v10371_v7 }
0x44ad   :  { %v10370_v42 = vpop.xlane.xlu1 %10369 }
0x44ae   :  { %v10374_v32 = vsub.f32 %v10366_v34, %v10370_v42 }
0x44b0   :  { %v10376_v21 = vmul.f32 1.442695, %v10374_v32 }
0x44b1   :  { %v10373_v60 = vpop.xlane.xlu1 %10372 }
0x44b2   :  { %15462 = vpow2.f32 %v10376_v21  ;;  %v10375_v28 = vsub.f32 %v10367_v11, %v10373_v60  ;;  %v15233_v21 = vld [vmem:[%s18590_s1 + $0x8] sm:$0xff]   ;;  %v13764_v60 = vld [vmem:[%s18591_s25] ss:$0 sm:$0xff] }
0x44b4   :  { %v10378_v18 = vmul.f32 1.442695, %v10375_v28 }
0x44b6   :  { %15464 = vpow2.f32 %v10378_v18 }
0x44bc   :  { %v15463_v52 = vpop.eup %15462 }
0x44bd   :  { %v10380_v62 = vsel %vm959_vm6, %v15463_v52, 0.0 }
0x44be   :  { %10381 = vadd.xlane.f32.xlu1 %v10380_v62 }
0x44c0   :  { %v15465_v19 = vpop.eup %15464 }
0x44c1   :  { %v10383_v22 = vsel %vm959_vm6, %v15465_v19, 0.0 }
0x44c2   :  { %10384 = vadd.xlane.f32.xlu1 %v10383_v22 }
0x44d3   :  { %10390 = vrot.lane.b32.xlu1 %v17956_v12, %s16320_s5 }
0x44d7   :  { %10705 = vrot.lane.b32.xlu1 %v17977_v53, %s16321_s30 }
0x44e9   :  { %v9963_v29 = vpop.f32.mrb[96].mxu0 }
0x44ea   :  { %v14800_v51 = vpop.f32.mrb[97].mxu0  ;;  %14808 = vmatprep.mubr.msk.f32.mxu0 %vm959_vm6, %v9963_v29 }
0x44eb   :  { %14809 = vmatmul.mubr.msk.f32.vlgmr.msra.gmra.mrb[98].mxu0 %vm959_vm6, %v10040_v46  ;;  %v13771_v51 = vld [vmem:[%s18592_s17] ss:$0 sm:$0xff] }
0x44ec   :  { %14813 = vmatprep.mubr.msk.f32.mxu0 %vm959_vm6, %v18039_v8  ;;  %14812 = vmatpush3.msra.mxu0 %v9707_v15  ;;  %v15232_v15 = vld [vmem:[%s18590_s1] sm:$0xff]  }
0x44ed   :  { %14826 = vmatprep.subr.mxu0 %v16317_v16 }
0x44f3   :  { %14814 = vmatmul.mubr.msk.f32.vlgmr.msra.gmra.mrb[98].mxu0 %vm959_vm6, %v18017_v57 }
0x44f4   :  { %14828 = vmatprep.mubr.msk.f32.mxu0 %vm16318_vm1, %v16317_v16 }
0x454b   :  { %v10382_v27 = vpop.xlane.xlu1 %10381 }
0x454c   :  { %15466 = vrcp.f32 %v10382_v27 }
0x454f   :  { %v10385_v53 = vpop.xlane.xlu1 %10384 }
0x4550   :  { %15468 = vrcp.f32 %v10385_v53 }
0x4553   :  { %v10391_v36 = vpop.permute.xlu1 %10390 }
0x4554   :  { %14827 = vmatpush3.msra.mxu0 %v10391_v36 }
0x4555   :  { %14836 = vmatprep.subr.mxu0 %v13752_v35 }
0x4556   :  { %v15467_v44 = vpop.eup %15466 }
0x4557   :  { %v10388_v8 = vmul.f32 %v15467_v44, %v15463_v52  ;;  %v10706_v58 = vpop.permute.xlu1 %10705 }
0x4559   :  { %14829 = vmatmul.mubr.msk.f32.vlgmr.msra.gmra.mrb[100].mxu0 %vm959_vm6, %v10388_v8 }
0x455a   :  { %v15469_v4 = vpop.eup %15468  ;;  %14837 = vmatpush3.msra.mxu0 %v13752_v35 }
0x455b   :  { %v10389_v57 = vmul.f32 %v15469_v4, %v15465_v19  ;;  %14846 = vmatprep.subr.mxu0 %v16317_v16 }
0x455d   :  { %14834 = vmatmul.mubr.msk.f32.vlgmr.msra.gmra.mrb[142].mxu1 %vm959_vm6, %v10389_v57 }
0x455e   :  { %14842 = vmatpush3.xpose.msk.msra.mxu1 %vm959_vm6, %v10630_v37  ;;  %14843 = vmatprep.mubr.msk.f32.mxu1 %vm16318_vm1, %v16317_v16 }
0x455f   :  { %14851 = vmatprep.subr.mxu1 %v16317_v16 }
0x4561   :  { %14844 = vmatmul.mubr.msk.f32.vlgmr.msra.gmra.mrb[144].mxu1 %vm959_vm6, %v10628_v1 }
0x4562   :  { %14853 = vmatprep.mubr.msk.f32.mxu1 %vm16318_vm1, %v16317_v16 }
0x462c   :  { %v10462_v30 = vpop.f32.mrb[100].mxu0 }
0x462d   :  { %v14830_v31 = vpop.f32.mrb[101].mxu0  ;;  %14838 = vmatprep.mubr.msk.f32.mxu0 %vm959_vm6, %v10462_v30 }
0x4630   :  { %v10538_v55 = vpop.f32.mrb[142].mxu1 }
0x4631   :  { %v14835_v41 = vpop.f32.mrb[143].mxu1  ;;  %14839 = vmatmul.mubr.msk.f32.vlgmr.msra.gmra.mrb[98].mxu0 %vm959_vm6, %v10538_v55 }
0x4632   :  { %14847 = vmatpush3.xpose.msk.msra.mxu0 %vm959_vm6, %v10708_v48  ;;  %14848 = vmatprep.mubr.msk.f32.mxu0 %vm16318_vm1, %v16317_v16 }
0x4633   :  { %14856 = vmatprep.subr.mxu0 %v16317_v16 }
0x4634   :  { %v10701_v49 = vpop.f32.mrb[144].mxu1 }
0x4635   :  { %v10783_v61 = vmul.f32 0.35355338, %v10701_v49  ;;  %v14845_v63 = vpop.f32.mrb[145].mxu1  ;;  %14849 = vmatmul.mubr.msk.f32.vlgmr.msra.gmra.mrb[102].mxu0 %vm959_vm6, %v10706_v58  ;;  %v15234_v58 = vld [vmem:[%s18593_s2] sm:$0xff]   ;;  %v15235_v49 = vld [vmem:[%s18593_s2 + $0x8] sm:$0xff]  }
0x4636   :  { %14858 = vmatprep.mubr.msk.f32.mxu0 %vm16318_vm1, %v16317_v16 }
0x4637   :  { %v10785_v13 = vadd.f32 %v17999_v24, %v10783_v61 }
0x4639   :  { %v10787_v17 = vsel %vm959_vm6, %v10785_v13, -inf }
0x463a   :  { %10788 = vmax.xlane.f32.xlu0 %v10787_v17 }
0x46c7   :  { %v10789_v59 = vpop.xlane.xlu0 %10788 }
0x46c8   :  { %v10793_v3 = vsub.f32 %v10785_v13, %v10789_v59 }
0x46ca   :  { %v10795_v5 = vmul.f32 1.442695, %v10793_v3 }
0x46cc   :  { %15470 = vpow2.f32 %v10795_v5 }
0x46d6   :  { %v15471_v38 = vpop.eup %15470 }
0x46d7   :  { %v10799_v47 = vsel %vm959_vm6, %v15471_v38, 0.0 }
0x46d8   :  { %10800 = vadd.xlane.f32.xlu0 %v10799_v47 }
0x4708   :  { %v10779_v6 = vpop.f32.mrb[102].mxu0 }
0x4709   :  { %v10784_v20 = vmul.f32 0.35355338, %v10779_v6  ;;  %v14850_v0 = vpop.f32.mrb[103].mxu0 }
0x470b   :  { %v10786_v43 = vadd.f32 %v17989_v2, %v10784_v20 }
0x470d   :  { %v10790_v46 = vsel %vm959_vm6, %v10786_v43, -inf }
0x470e   :  { %10791 = vmax.xlane.f32.xlu1 %v10790_v46 }
0x471f   :  { %10885 = vrot.lane.b32.xlu1 %v17980_v56, %s16321_s30 }
0x4765   :  { %v10801_v2 = vpop.xlane.xlu0 %10800 }
0x479b   :  { %v10792_v24 = vpop.xlane.xlu1 %10791 }
0x479c   :  { %v10794_v9 = vsub.f32 %v10786_v43, %v10792_v24 }
0x479e   :  { %v10797_v33 = vmul.f32 1.442695, %v10794_v9 }
0x479f   :  { %v10886_v26 = vpop.permute.xlu1 %10885 }
0x47a0   :  { %15472 = vpow2.f32 %v10797_v33  ;;  %14857 = vmatpush3.msra.mxu0 %v10886_v26  ;;  %v13765_v33 = vld [vmem:[%s18594_s29] ss:$0 sm:$0xff] }
0x47a1   :  { %15474 = vrcp.f32 %v10801_v2  ;;  %v13766_v2 = vld [vmem:[%s18595_s7] ss:$0 sm:$0xff] }
0x47aa   :  { %v15473_v23 = vpop.eup %15472 }
0x47ab   :  { %v10802_v34 = vsel %vm959_vm6, %v15473_v23, 0.0  ;;  %v15475_v50 = vpop.eup %15474 }
0x47ac   :  { %10803 = vadd.xlane.f32.xlu0 %v10802_v34  ;;  %v10807_v56 = vmul.f32 %v15475_v50, %v15471_v38 }
0x47c2   :  { %10809 = vrot.lane.b32.xlu0 %v17956_v12, %s16321_s30  ;;  %v13761_v12 = vld [vmem:[%s18589_s9 + $0x18] sm:$0xff] }
0x47c3   :  { %14861 = vmatprep.subr.mxu0 %v13761_v12 }
0x4839   :  { %v10804_v45 = vpop.xlane.xlu0 %10803 }
0x483a   :  { %15476 = vrcp.f32 %v10804_v45 }
0x483d   :  { %v10810_v10 = vpop.permute.xlu0 %10809 }
0x483e   :  { %14852 = vmatpush3.msra.mxu1 %v10810_v10 }
0x483f   :  { %14854 = vmatmul.mubr.msk.f32.vlgmr.msra.gmra.mrb[146].mxu1 %vm959_vm6, %v10807_v56  ;;  %14866 = vmatprep.subr.bf16.mxu1 %v16317_v16 }
0x4840   :  { %14870 = vmatprep.mubr.msk.bf16.mxu1 %vm16318_vm1, %v16317_v16  ;;  %14867 = vmatpush3.bf16.msra.mxu1 %v15234_v58  ;;  %v18214_v58 = vld [vmem:[%s18572_s19] sm:$0xff] }
0x4841   :  { %14868 = vmatprep.subr.bf16.mxu1 %v16317_v16 }
0x4844   :  { %v15477_v39 = vpop.eup %15476  ;;  %14869 = vmatpush3.bf16.msra.mxu1 %v15235_v49 }
0x4845   :  { %v10808_v11 = vmul.f32 %v15477_v39, %v15473_v23  ;;  %14882 = vmatprep.subr.bf16.mxu1 %v16317_v16 }
0x4847   :  { %14859 = vmatmul.mubr.msk.f32.vlgmr.msra.gmra.mrb[104].mxu0 %vm959_vm6, %v10808_v11  ;;  %v15236_v11 = vld [vmem:[%s18596_s10] sm:$0xff]  }
0x4848   :  { %14862 = vmatpush3.msra.mxu0 %v13761_v12 }
0x4849   :  { %14874 = vmatprep.subr.bf16.mxu0 %v16317_v16 }
0x4912   :  { %v10881_v7 = vpop.f32.mrb[146].mxu1 }
0x4913   :  { %v14855_v14 = vpop.f32.mrb[147].mxu1  ;;  %14863 = vmatprep.mubr.msk.f32.mxu0 %vm959_vm6, %v10881_v7  ;;  %v15237_v7 = vld [vmem:[%s18596_s10 + $0x8] sm:$0xff]  }
0x4914   :  { %v13767_v14 = vld [vmem:[#allocation2] ss:$0 sm:$0xff] }
0x491a   :  { %v10957_v42 = vpop.f32.mrb[104].mxu0 }
0x491b   :  { %v14860_v32 = vpop.f32.mrb[105].mxu0  ;;  %14864 = vmatmul.mubr.msk.f32.vlgmr.msra.gmra.mrb[98].mxu0 %vm959_vm6, %v10957_v42 }
0x491c   :  { %14875 = vmatpush3.bf16.msra.mxu0 %v15232_v15  ;;  %14878 = vmatprep.mubr.msk.bf16.mxu0 %vm16318_vm1, %v16317_v16 }
0x491d   :  { %14876 = vmatprep.subr.bf16.mxu0 %v16317_v16 }
0x4920   :  { %14877 = vmatpush3.bf16.msra.mxu0 %v15233_v21 }
0x4921   :  { %14890 = vmatprep.subr.mxu0 %v16317_v16 }
0x4923   :  { %14879 = vmatmul.mubr.msk.bf16.vlgmr.msra.gmra.mrb[108].mxu0 %vm705_vm0, %v17679_v25 }
0x4924   :  { %14892 = vmatprep.mubr.msk.f32.mxu0 %vm16318_vm1, %v16317_v16 }
0x49ee   :  { %v14865_v28 = vpop.f32.mrb[98].mxu0 }
0x49ef   :  { %v11054_v18 = vadd.f32 %v14865_v28, %v13764_v60  ;;  %v11035_v52 = vpop.f32.mrb[99].mxu0 }
0x49f0   :  { %v11053_v62 = vadd.f32 %v13764_v60, %v11035_v52 }
0x49f1   :  { %v18142_v19 = vadd.f32 %v11054_v18, %v17922_v40 }
0x49f2   :  { %v18145_v22 = vadd.f32 %v11053_v62, %v17919_v54 }
0x49f3   :  { %v11062_v29 = vsel %vm705_vm0, %v18142_v19, 0.0 }
0x49f4   :  { %11063 = vadd.xlane.f32.xlu0 %v11062_v29  ;;  %v11059_v27 = vsel %vm705_vm0, %v18145_v22, 0.0 }
0x49f5   :  { %11060 = vadd.xlane.f32.xlu1 %v11059_v27 }
0x49f6   :  { %v11240_v53 = vpop.f32.mrb[108].mxu0 }
0x49f7   :  { %v18152_v35 = vadd.f32 %v13771_v51, %v11240_v53  ;;  %v14880_v36 = vpop.f32.mrb[109].mxu0 }
0x49f8   :  { %v11243_v37 = vpop.f32.mrb[110].mxu0 }
0x49f9   :  { %v18154_v44 = vadd.f32 %v13771_v51, %v11243_v37  ;;  %v14881_v40 = vpop.f32.mrb[111].mxu0  ;;  %14891 = vmatpush3.xpose.msk.msra.mxu0 %vm959_vm6, %v18152_v35 }
0x49fa   :  { %14900 = vmatprep.subr.mxu0 %v16317_v16 }
0x4a81   :  { %v11064_v54 = vpop.xlane.xlu0 %11063 }
0x4a82   :  { %v11066_v8 = vmul.f32 0.03125, %v11064_v54  ;;  %v11061_v4 = vpop.xlane.xlu1 %11060 }
0x4a83   :  { %v11065_v48 = vmul.f32 0.03125, %v11061_v4 }
0x4a84   :  { %v11068_v57 = vsub.f32 %v18142_v19, %v11066_v8  ;;  %v18204_v8 = vld [vmem:[%s18572_s19 + $0x8] sm:$0xff]  ;;  %s18602_s19 = sld [smem:[#allocation97_spill]] }
0x4a85   :  { %v11067_v1 = vsub.f32 %v18145_v22, %v11065_v48 }
0x4a86   :  { %v11070_v30 = vmul.f32 %v11068_v57, %v11068_v57  ;;  %v11104_v26 = vmul.f32 %v13765_v33, %v11068_v57 }
0x4a87   :  { %v11069_v31 = vmul.f32 %v11067_v1, %v11067_v1  ;;  %v11103_v34 = vmul.f32 %v13765_v33, %v11067_v1 }
0x4a88   :  { %v11074_v55 = vsel %vm705_vm0, %v11070_v30, 0.0 }
0x4a89   :  { %11075 = vadd.xlane.f32.xlu1 %v11074_v55  ;;  %v11071_v41 = vsel %vm705_vm0, %v11069_v31, 0.0 }
0x4a8a   :  { %11072 = vadd.xlane.f32.xlu0 %v11071_v41 }
0x4b16   :  { %v11076_v61 = vpop.xlane.xlu1 %11075 }
0x4b17   :  { %v11078_v63 = vmul.f32 0.032258064, %v11076_v61  ;;  %v11073_v13 = vpop.xlane.xlu0 %11072 }
0x4b18   :  { %v11077_v17 = vmul.f32 0.032258064, %v11073_v13 }
0x4b19   :  { %15478 = vrsqrt.f32 %v11078_v63  ;;  %vm11088_vm2 = vcmp.eq.f32.partialorder %v11078_v63, inf  ;;  %v11091_v38 = vand.u32 2147483648, %v11078_v63  ;;  %vm11090_vm3 = vcmp.eq.f32.partialorder %v11078_v63, 0.0 }
0x4b1a   :  { %15480 = vrsqrt.f32 %v11077_v17  ;;  %vm11081_vm4 = vcmp.eq.f32.partialorder %v11077_v17, inf  ;;  %v11084_v20 = vand.u32 2147483648, %v11077_v17  ;;  %vm11083_vm5 = vcmp.eq.f32.partialorder %v11077_v17, 0.0 }
0x4b23   :  { %v15479_v59 = vpop.eup %15478 }
0x4b24   :  { %v15481_v3 = vpop.eup %15480  ;;  %v11087_v5 = vmul.f32 %v15479_v59, %v11078_v63 }
0x4b25   :  { %v11080_v47 = vmul.f32 %v15481_v3, %v11077_v17 }
0x4b26   :  { %v11089_v6 = vsel %vm11088_vm2, %v11078_v63, %v11087_v5 }
0x4b27   :  { %v11092_v0 = vsel %vm11090_vm3, %v11091_v38, %v11089_v6  ;;  %v11082_v43 = vsel %vm11081_vm4, %v11077_v17, %v11080_v47 }
0x4b28   :  { %v11094_v46 = vadd.f32 1e-06, %v11092_v0  ;;  %v11085_v24 = vsel %vm11083_vm5, %v11084_v20, %v11082_v43 }
0x4b29   :  { %v11093_v9 = vadd.f32 1e-06, %v11085_v24 }
0x4b2a   :  { %15482 = vrcp.f32 %v11094_v46 }
0x4b2b   :  { %15484 = vrcp.f32 %v11093_v9 }
0x4b34   :  { %v15483_v23 = vpop.eup %15482 }
0x4b35   :  { %v15485_v45 = vpop.eup %15484  ;;  %v11106_v50 = vmul.f32 %v15483_v23, %v11104_v26 }
0x4b36   :  { %v11105_v56 = vmul.f32 %v15485_v45, %v11103_v34 }
0x4b37   :  { %v11114_v10 = vadd.f32 %v13766_v2, %v11106_v50 }
0x4b38   :  { %v11113_v39 = vadd.f32 %v13766_v2, %v11105_v56 }
0x4b3a   :  { %v11115_v12 = vpack.c.bf16 %v11114_v10, %v11113_v39 }
0x4b3c   :  { %14871 = vmatmul.mubr.msk.bf16.vlgmr.msra.gmra.mrb[148].mxu1 %vm705_vm0, %v11115_v12 }
0x4b3d   :  { %14883 = vmatpush3.bf16.msra.mxu1 %v15236_v11  ;;  %14886 = vmatprep.mubr.msk.bf16.mxu1 %vm16318_vm1, %v16317_v16 }
0x4b3e   :  { %14884 = vmatprep.subr.bf16.mxu1 %v16317_v16 }
0x4b41   :  { %14885 = vmatpush3.bf16.msra.mxu1 %v15237_v7 }
0x4b42   :  { %14895 = vmatprep.subr.mxu1 %v16317_v16 }
0x4b44   :  { %14887 = vmatmul.mubr.msk.bf16.vlgmr.msra.gmra.mrb[152].mxu1 %vm705_vm0, %v17679_v25  ;;  %v13775_v25 = vld [vmem:[#allocation5] ss:$0 sm:$0xff] }
0x4b45   :  { %14897 = vmatprep.mubr.msk.f32.mxu1 %vm16318_vm1, %v16317_v16 }
0x4b4a   :  { %14896 = vmatpush3.xpose.msk.msra.mxu1 %vm959_vm6, %v18154_v44 }
0x4b4b   :  { %14905 = vmatprep.subr.mxu1 %v16317_v16 }
0x4c0f   :  { %v11176_v15 = vpop.f32.mrb[148].mxu1 }
0x4c10   :  { %v18183_v42 = vadd.f32 %v13767_v14, %v11176_v15  ;;  %v14872_v32 = vpop.f32.mrb[149].mxu1 }
0x4c11   :  { %v11179_v21 = vpop.f32.mrb[150].mxu1 }
0x4c12   :  { %v18185_v60 = vadd.f32 %v13767_v14, %v11179_v21  ;;  %v14873_v28 = vpop.f32.mrb[151].mxu1  ;;  %14893 = vmatmul.mubr.msk.f32.vlgmr.msra.gmra.mrb[106].mxu0 %vm959_vm6, %v18183_v42 }
0x4c13   :  { %14902 = vmatprep.mubr.msk.f32.mxu0 %vm16318_vm1, %v16317_v16 }
0x4c14   :  { %14898 = vmatmul.mubr.msk.f32.vlgmr.msra.gmra.mrb[156].mxu1 %vm959_vm6, %v18185_v60 }
0x4c15   :  { %14907 = vmatprep.mubr.msk.f32.mxu1 %vm16318_vm1, %v16317_v16 }
0x4c17   :  { %v11304_v18 = vpop.f32.mrb[152].mxu1 }
0x4c18   :  { %v18195_v52 = vadd.f32 %v13775_v25, %v11304_v18  ;;  %v14888_v62 = vpop.f32.mrb[153].mxu1 }
0x4c19   :  { %v11307_v29 = vpop.f32.mrb[154].mxu1 }
0x4c1a   :  { %v18197_v51 = vadd.f32 %v13775_v25, %v11307_v29  ;;  %v14889_v27 = vpop.f32.mrb[155].mxu1  ;;  %14901 = vmatpush3.msra.mxu0 %v18195_v52 }
0x4c1b   :  { %14910 = vmatprep.subr.mxu0 %v16317_v16 }
0x4c1c   :  { %14906 = vmatpush3.msra.mxu1 %v18197_v51 }
0x4c1d   :  { %14915 = vmatprep.subr.mxu1 %v16317_v16 }
0x4ce5   :  { %v11383_v53 = vpop.f32.mrb[106].mxu0 }
0x4ce6   :  { %v14894_v36 = vpop.f32.mrb[107].mxu0  ;;  %v11463_v41 = vmul.f32 0.35355338, %v11383_v53 }
0x4ce7   :  { %v11459_v37 = vpop.f32.mrb[156].mxu1 }
0x4ce8   :  { %v11464_v40 = vmul.f32 0.35355338, %v11459_v37  ;;  %v14899_v54 = vpop.f32.mrb[157].mxu1  ;;  %v11465_v49 = vadd.f32 %v18214_v58, %v11463_v41 }
0x4cea   :  { %v11466_v4 = vadd.f32 %v18204_v8, %v11464_v40  ;;  %v11467_v61 = vsel %vm959_vm6, %v11465_v49, -inf }
0x4cec   :  { %v11470_v48 = vsel %vm959_vm6, %v11466_v4, -inf }
0x4ced   :  { %11471 = vmax.xlane.f32.xlu0 %v11470_v48 }
0x4d03   :  { %11716 = vrot.lane.b32.xlu0 %v18154_v44, %s16319_s15 }
0x4d7a   :  { %v11472_v57 = vpop.xlane.xlu0 %11471 }
0x4d7b   :  { %v11474_v1 = vsub.f32 %v11466_v4, %v11472_v57 }
0x4d7d   :  { %v11477_v30 = vmul.f32 1.442695, %v11474_v1 }
0x4d7e   :  { %v11717_v59 = vpop.permute.xlu0 %11716 }
0x4d7f   :  { %15486 = vpow2.f32 %v11477_v30 }
0x4d89   :  { %v15487_v31 = vpop.eup %15486 }
0x4d8a   :  { %v11482_v55 = vsel %vm959_vm6, %v15487_v31, 0.0 }
0x4d8b   :  { %11483 = vadd.xlane.f32.xlu1 %v11482_v55 }
0x4d9c   :  { %11714 = vrot.lane.b32.xlu1 %v18185_v60, %s16319_s15 }
0x4dc0   :  { %11468 = vmax.xlane.f32.xlu1 %v11467_v61 }
0x4dd1   :  { %11636 = vrot.lane.b32.xlu1 %v18183_v42, %s16319_s15 }
0x4e18   :  { %v11484_v63 = vpop.xlane.xlu1 %11483 }
0x4e19   :  { %15488 = vrcp.f32 %v11484_v63 }
0x4e1c   :  { %v11715_v3 = vpop.permute.xlu1 %11714 }
0x4e23   :  { %v15489_v13 = vpop.eup %15488 }
0x4e24   :  { %v11488_v17 = vmul.f32 %v15489_v13, %v15487_v31 }
0x4e26   :  { %14908 = vmatmul.mubr.msk.f32.vlgmr.msra.gmra.mrb[158].mxu1 %vm959_vm6, %v11488_v17 }
0x4e27   :  { %14916 = vmatpush3.xpose.msk.msra.mxu1 %vm959_vm6, %v11717_v59  ;;  %14917 = vmatprep.mubr.msk.f32.mxu1 %vm16318_vm1, %v16317_v16 }
0x4e28   :  { %14925 = vmatprep.subr.mxu1 %v16317_v16 }
0x4e2a   :  { %14918 = vmatmul.mubr.msk.f32.vlgmr.msra.gmra.mrb[160].mxu1 %vm959_vm6, %v11715_v3 }
0x4e2b   :  { %14927 = vmatprep.mubr.msk.f32.mxu1 %vm16318_vm1, %v16317_v16 }
0x4e4d   :  { %v11469_v5 = vpop.xlane.xlu1 %11468 }
0x4e4e   :  { %v11473_v38 = vsub.f32 %v11465_v49, %v11469_v5 }
0x4e50   :  { %v11475_v47 = vmul.f32 1.442695, %v11473_v38 }
0x4e51   :  { %v11637_v26 = vpop.permute.xlu1 %11636 }
0x4e52   :  { %15490 = vpow2.f32 %v11475_v47 }
0x4e5c   :  { %v15491_v6 = vpop.eup %15490 }
0x4e5d   :  { %v11479_v20 = vsel %vm959_vm6, %v15491_v6, 0.0 }
0x4e5e   :  { %11480 = vadd.xlane.f32.xlu0 %v11479_v20 }
0x4e74   :  { %11638 = vrot.lane.b32.xlu0 %v18152_v35, %s16319_s15 }
0x4eeb   :  { %v11481_v0 = vpop.xlane.xlu0 %11480 }
0x4eec   :  { %15492 = vrcp.f32 %v11481_v0 }
0x4eef   :  { %v11639_v24 = vpop.permute.xlu0 %11638 }
0x4ef6   :  { %v15493_v43 = vpop.eup %15492 }
0x4ef7   :  { %v11487_v46 = vmul.f32 %v15493_v43, %v15491_v6 }
0x4ef9   :  { %14903 = vmatmul.mubr.msk.f32.vlgmr.msra.gmra.mrb[112].mxu0 %vm959_vm6, %v11487_v46  ;;  %v18232_v9 = vpop.f32.mrb[158].mxu1 }
0x4efa   :  { %14911 = vmatpush3.xpose.msk.msra.mxu0 %vm959_vm6, %v11639_v24  ;;  %v14909_v33 = vpop.f32.mrb[159].mxu1  ;;  %14912 = vmatprep.mubr.msk.f32.mxu0 %vm16318_vm1, %v16317_v16 }
0x4efb   :  { %14920 = vmatprep.subr.mxu0 %v16317_v16 }
0x4efd   :  { %14913 = vmatmul.mubr.msk.f32.vlgmr.msra.gmra.mrb[114].mxu0 %vm959_vm6, %v11637_v26  ;;  %v11788_v23 = vpop.f32.mrb[160].mxu1 }
0x4efe   :  { %v11793_v34 = vmul.f32 0.35355338, %v11788_v23  ;;  %v14919_v2 = vpop.f32.mrb[161].mxu1  ;;  %14922 = vmatprep.mubr.msk.f32.mxu0 %vm16318_vm1, %v16317_v16 }
0x4f00   :  { %v11795_v45 = vadd.f32 %v18204_v8, %v11793_v34 }
0x4f02   :  { %v11799_v50 = vsel %vm959_vm6, %v11795_v45, -inf }
0x4f03   :  { %11800 = vmax.xlane.f32.xlu1 %v11799_v50 }
0x4f14   :  { %12138 = vrot.lane.b32.xlu1 %v18152_v35, %s16320_s5 }
0x4f18   :  { %12136 = vrot.lane.b32.xlu1 %v18183_v42, %s16320_s5 }
0x4f1c   :  { %12216 = vrot.lane.b32.xlu1 %v18154_v44, %s16320_s5 }
0x4f90   :  { %v11801_v56 = vpop.xlane.xlu1 %11800 }
0x4f91   :  { %v11803_v10 = vsub.f32 %v11795_v45, %v11801_v56 }
0x4f93   :  { %v11806_v39 = vmul.f32 1.442695, %v11803_v10 }
0x4f94   :  { %v12139_v29 = vpop.permute.xlu1 %12138 }
0x4f95   :  { %15494 = vpow2.f32 %v11806_v39 }
0x4f98   :  { %v12137_v53 = vpop.permute.xlu1 %12136 }
0x4f9c   :  { %v12217_v37 = vpop.permute.xlu1 %12216 }
0x4f9f   :  { %v15495_v11 = vpop.eup %15494 }
0x4fa0   :  { %v11811_v12 = vsel %vm959_vm6, %v15495_v11, 0.0 }
0x4fa1   :  { %11812 = vadd.xlane.f32.xlu0 %v11811_v12 }
0x4fb7   :  { %11896 = vrot.lane.b32.xlu0 %v18197_v51, %s16319_s15 }
0x4fbb   :  { %12214 = vrot.lane.b32.xlu0 %v18185_v60, %s16320_s5 }
0x4fcc   :  { %v18254_v7 = vpop.f32.mrb[112].mxu0 }
0x4fcd   :  { %v14904_v14 = vpop.f32.mrb[113].mxu0 }
0x4fd0   :  { %v11710_v15 = vpop.f32.mrb[114].mxu0 }
0x4fd1   :  { %v11792_v32 = vmul.f32 0.35355338, %v11710_v15  ;;  %v14914_v21 = vpop.f32.mrb[115].mxu0 }
0x4fd3   :  { %v11794_v28 = vadd.f32 %v18214_v58, %v11792_v32 }
0x4fd5   :  { %v11796_v25 = vsel %vm959_vm6, %v11794_v28, -inf }
0x4fd6   :  { %11797 = vmax.xlane.f32.xlu1 %v11796_v25 }
0x502e   :  { %v11813_v18 = vpop.xlane.xlu0 %11812 }
0x502f   :  { %15496 = vrcp.f32 %v11813_v18 }
0x5032   :  { %v11897_v62 = vpop.permute.xlu0 %11896 }
0x5033   :  { %14926 = vmatpush3.msra.mxu1 %v11897_v62 }
0x5034   :  { %14940 = vmatprep.subr.mxu1 %v16317_v16 }
0x5036   :  { %v12215_v40 = vpop.permute.xlu0 %12214 }
0x5039   :  { %v15497_v27 = vpop.eup %15496 }
0x503a   :  { %v11817_v36 = vmul.f32 %v15497_v27, %v15495_v11 }
0x503c   :  { %14928 = vmatmul.mubr.msk.f32.vlgmr.msra.gmra.mrb[162].mxu1 %vm959_vm6, %v11817_v36 }
0x503d   :  { %14941 = vmatpush3.xpose.msk.msra.mxu1 %vm959_vm6, %v12139_v29  ;;  %14942 = vmatprep.mubr.msk.f32.mxu1 %vm16318_vm1, %v16317_v16 }
0x503e   :  { %14945 = vmatprep.subr.mxu1 %v16317_v16 }
0x5040   :  { %14943 = vmatmul.mubr.msk.f32.vlgmr.msra.gmra.mrb[164].mxu1 %vm959_vm6, %v12137_v53 }
0x5041   :  { %14946 = vmatpush3.xpose.msk.msra.mxu1 %vm959_vm6, %v12217_v37  ;;  %14947 = vmatprep.mubr.msk.f32.mxu1 %vm16318_vm1, %v16317_v16 }
0x5042   :  { %14955 = vmatprep.subr.mxu1 %v16317_v16 }
0x5044   :  { %14948 = vmatmul.mubr.msk.f32.vlgmr.msra.gmra.mrb[166].mxu1 %vm959_vm6, %v12215_v40 }
0x5045   :  { %14957 = vmatprep.mubr.msk.f32.mxu1 %vm16318_vm1, %v16317_v16 }
0x5063   :  { %v11798_v54 = vpop.xlane.xlu1 %11797 }
0x5064   :  { %v11802_v4 = vsub.f32 %v11794_v28, %v11798_v54 }
0x5066   :  { %v11804_v48 = vmul.f32 1.442695, %v11802_v4 }
0x5068   :  { %15498 = vpow2.f32 %v11804_v48 }
0x5072   :  { %v15499_v57 = vpop.eup %15498 }
0x5073   :  { %v11808_v1 = vsel %vm959_vm6, %v15499_v57, 0.0 }
0x5074   :  { %11809 = vadd.xlane.f32.xlu0 %v11808_v1 }
0x508a   :  { %11819 = vrot.lane.b32.xlu0 %v18195_v52, %s16319_s15  ;;  %s18597_s15 = sld [smem:[#allocation109_spill]] }
0x508e   :  { %12394 = vrot.lane.b32.xlu0 %v18197_v51, %s16320_s5 }
0x5090   :  { %v13791_v6 = vld [vmem:[%s18597_s15 + $0x8] sm:$0xff]  ;;  %v11635_v20 = vld [vmem:[%s18597_s15] sm:$0xff]  ;;  %v13802_v39 = vld [vmem:[%s18597_s15 + $0x10] sm:$0xff] }
0x5092   :  { %12557 = vrot.lane.b32.xlu0 %v18152_v35, %s16321_s30 }
0x5096   :  { %12635 = vrot.lane.b32.xlu0 %v18154_v44, %s16321_s30 }
0x509a   :  { %12555 = vrot.lane.b32.xlu0 %v18183_v42, %s16321_s30 }
0x5101   :  { %v11810_v30 = vpop.xlane.xlu0 %11809 }
0x5102   :  { %15500 = vrcp.f32 %v11810_v30 }
0x5105   :  { %v11820_v31 = vpop.permute.xlu0 %11819 }
0x5106   :  { %14921 = vmatpush3.msra.mxu0 %v11820_v31 }
0x5107   :  { %14930 = vmatprep.subr.mxu0 %v13791_v6 }
0x5109   :  { %v12395_v55 = vpop.permute.xlu0 %12394 }
0x510a   :  { %14956 = vmatpush3.msra.mxu1 %v12395_v55 }
0x510b   :  { %14965 = vmatprep.subr.mxu1 %v16317_v16 }
0x510c   :  { %v15501_v41 = vpop.eup %15500 }
0x510d   :  { %v11816_v49 = vmul.f32 %v15501_v41, %v15499_v57  ;;  %v12558_v12 = vpop.permute.xlu0 %12557 }
0x510f   :  { %14923 = vmatmul.mubr.msk.f32.vlgmr.msra.gmra.mrb[116].mxu0 %vm959_vm6, %v11816_v49  ;;  %v11968_v35 = vpop.f32.mrb[162].mxu1 }
0x5110   :  { %v14929_v61 = vpop.f32.mrb[163].mxu1  ;;  %14931 = vmatpush3.msra.mxu0 %v13791_v6 }
0x5111   :  { %14935 = vmatprep.subr.mxu0 %v11635_v20  ;;  %v12636_v32 = vpop.permute.xlu0 %12635 }
0x5113   :  { %v12210_v44 = vpop.f32.mrb[164].mxu1 }
0x5114   :  { %v12292_v63 = vmul.f32 0.35355338, %v12210_v44  ;;  %v14944_v13 = vpop.f32.mrb[165].mxu1 }
0x5115   :  { %v12556_v21 = vpop.permute.xlu0 %12555 }
0x5116   :  { %v12294_v42 = vadd.f32 %v18214_v58, %v12292_v63 }
0x5117   :  { %v12288_v17 = vpop.f32.mrb[166].mxu1 }
0x5118   :  { %v12293_v59 = vmul.f32 0.35355338, %v12288_v17  ;;  %v14949_v3 = vpop.f32.mrb[167].mxu1  ;;  %v12296_v5 = vsel %vm959_vm6, %v12294_v42, -inf }
0x5119   :  { %12297 = vmax.xlane.f32.xlu1 %v12296_v5 }
0x511a   :  { %v12295_v38 = vadd.f32 %v18204_v8, %v12293_v59 }
0x511c   :  { %v12299_v47 = vsel %vm959_vm6, %v12295_v38, -inf }
0x511d   :  { %12300 = vmax.xlane.f32.xlu1 %v12299_v47 }
0x51a6   :  { %v12298_v0 = vpop.xlane.xlu1 %12297 }
0x51a7   :  { %v12302_v43 = vsub.f32 %v12294_v42, %v12298_v0 }
0x51a9   :  { %v12304_v46 = vmul.f32 1.442695, %v12302_v43 }
0x51aa   :  { %v12301_v24 = vpop.xlane.xlu1 %12300 }
0x51ab   :  { %15502 = vpow2.f32 %v12304_v46  ;;  %v12303_v33 = vsub.f32 %v12295_v38, %v12301_v24 }
0x51ad   :  { %v12306_v26 = vmul.f32 1.442695, %v12303_v33 }
0x51af   :  { %15504 = vpow2.f32 %v12306_v26 }
0x51b5   :  { %v15503_v23 = vpop.eup %15502 }
0x51b6   :  { %v12308_v34 = vsel %vm959_vm6, %v15503_v23, 0.0 }
0x51b7   :  { %12309 = vadd.xlane.f32.xlu1 %v12308_v34 }
0x51b9   :  { %v15505_v2 = vpop.eup %15504 }
0x51ba   :  { %v12311_v45 = vsel %vm959_vm6, %v15505_v2, 0.0 }
0x51bb   :  { %12312 = vadd.xlane.f32.xlu1 %v12311_v45 }
0x51cc   :  { %12318 = vrot.lane.b32.xlu1 %v18195_v52, %s16320_s5  ;;  %s18598_s5 = sld [smem:[#allocation107_spill]] }
0x51d0   :  { %12633 = vrot.lane.b32.xlu1 %v18185_v60, %s16321_s30 }
0x51d2   :  { %v13814_v0 = vld [vmem:[%s18598_s5] ss:$0 sm:$0xff] }
0x51e2   :  { %v11891_v50 = vpop.f32.mrb[116].mxu0 }
0x51e3   :  { %v14924_v56 = vpop.f32.mrb[117].mxu0  ;;  %14932 = vmatprep.mubr.msk.f32.mxu0 %vm959_vm6, %v11891_v50 }
0x51e4   :  { %14933 = vmatmul.mubr.msk.f32.vlgmr.msra.gmra.mrb[118].mxu0 %vm959_vm6, %v11968_v35 }
0x51e5   :  { %14937 = vmatprep.mubr.msk.f32.mxu0 %vm959_vm6, %v18254_v7  ;;  %14936 = vmatpush3.msra.mxu0 %v11635_v20 }
0x51e6   :  { %14950 = vmatprep.subr.mxu0 %v16317_v16 }
0x51ec   :  { %14938 = vmatmul.mubr.msk.f32.vlgmr.msra.gmra.mrb[118].mxu0 %vm959_vm6, %v18232_v9 }
0x51ed   :  { %14952 = vmatprep.mubr.msk.f32.mxu0 %vm16318_vm1, %v16317_v16 }
0x5244   :  { %v12310_v10 = vpop.xlane.xlu1 %12309 }
0x5245   :  { %15506 = vrcp.f32 %v12310_v10 }
0x5248   :  { %v12313_v60 = vpop.xlane.xlu1 %12312 }
0x5249   :  { %15508 = vrcp.f32 %v12313_v60 }
0x524c   :  { %v12319_v11 = vpop.permute.xlu1 %12318 }
0x524d   :  { %14951 = vmatpush3.msra.mxu0 %v12319_v11 }
0x524e   :  { %14960 = vmatprep.subr.mxu0 %v13802_v39 }
0x524f   :  { %v15507_v14 = vpop.eup %15506 }
0x5250   :  { %v12316_v7 = vmul.f32 %v15507_v14, %v15503_v23  ;;  %v12634_v29 = vpop.permute.xlu1 %12633 }
0x5252   :  { %14953 = vmatmul.mubr.msk.f32.vlgmr.msra.gmra.mrb[120].mxu0 %vm959_vm6, %v12316_v7 }
0x5253   :  { %v15509_v15 = vpop.eup %15508  ;;  %14961 = vmatpush3.msra.mxu0 %v13802_v39 }
0x5254   :  { %v12317_v9 = vmul.f32 %v15509_v15, %v15505_v2  ;;  %14970 = vmatprep.subr.mxu0 %v16317_v16  ;;  %v15240_v15 = vld [vmem:[%s18600_s11] sm:$0xff]  }
0x5256   :  { %14958 = vmatmul.mubr.msk.f32.vlgmr.msra.gmra.mrb[168].mxu1 %vm959_vm6, %v12317_v9 }
0x5257   :  { %14966 = vmatpush3.xpose.msk.msra.mxu1 %vm959_vm6, %v12558_v12  ;;  %14967 = vmatprep.mubr.msk.f32.mxu1 %vm16318_vm1, %v16317_v16 }
0x5258   :  { %14975 = vmatprep.subr.mxu1 %v16317_v16 }
0x525a   :  { %14968 = vmatmul.mubr.msk.f32.vlgmr.msra.gmra.mrb[170].mxu1 %vm959_vm6, %v12556_v21 }
0x525b   :  { %14977 = vmatprep.mubr.msk.f32.mxu1 %vm16318_vm1, %v16317_v16 }
0x5325   :  { %v12390_v28 = vpop.f32.mrb[120].mxu0 }
0x5326   :  { %v14954_v25 = vpop.f32.mrb[121].mxu0  ;;  %14962 = vmatprep.mubr.msk.f32.mxu0 %vm959_vm6, %v12390_v28 }
0x5329   :  { %v12466_v18 = vpop.f32.mrb[168].mxu1 }
0x532a   :  { %v14959_v62 = vpop.f32.mrb[169].mxu1  ;;  %14963 = vmatmul.mubr.msk.f32.vlgmr.msra.gmra.mrb[118].mxu0 %vm959_vm6, %v12466_v18 }
0x532b   :  { %14971 = vmatpush3.xpose.msk.msra.mxu0 %vm959_vm6, %v12636_v32  ;;  %14972 = vmatprep.mubr.msk.f32.mxu0 %vm16318_vm1, %v16317_v16  ;;  %v15241_v32 = vld [vmem:[%s18600_s11 + $0x8] sm:$0xff]  }
0x532c   :  { %14980 = vmatprep.subr.mxu0 %v16317_v16 }
0x532d   :  { %v12629_v27 = vpop.f32.mrb[170].mxu1 }
0x532e   :  { %v12711_v53 = vmul.f32 0.35355338, %v12629_v27  ;;  %v14969_v36 = vpop.f32.mrb[171].mxu1  ;;  %14973 = vmatmul.mubr.msk.f32.vlgmr.msra.gmra.mrb[122].mxu0 %vm959_vm6, %v12634_v29 }
0x532f   :  { %14982 = vmatprep.mubr.msk.f32.mxu0 %vm16318_vm1, %v16317_v16 }
0x5330   :  { %v12713_v37 = vadd.f32 %v18214_v58, %v12711_v53 }
0x5332   :  { %v12715_v40 = vsel %vm959_vm6, %v12713_v37, -inf }
0x5333   :  { %12716 = vmax.xlane.f32.xlu0 %v12715_v40 }
0x53c0   :  { %v12717_v54 = vpop.xlane.xlu0 %12716 }
0x53c1   :  { %v12721_v4 = vsub.f32 %v12713_v37, %v12717_v54 }
0x53c3   :  { %v12723_v48 = vmul.f32 1.442695, %v12721_v4 }
0x53c5   :  { %15510 = vpow2.f32 %v12723_v48 }
0x53cf   :  { %v15511_v57 = vpop.eup %15510 }
0x53d0   :  { %v12727_v1 = vsel %vm959_vm6, %v15511_v57, 0.0 }
0x53d1   :  { %12728 = vadd.xlane.f32.xlu0 %v12727_v1  ;;  %v13815_v1 = vld [vmem:[%s18601_s6] ss:$0 sm:$0xff] }
0x5401   :  { %v12707_v30 = vpop.f32.mrb[122].mxu0 }
0x5402   :  { %v12712_v31 = vmul.f32 0.35355338, %v12707_v30  ;;  %v14974_v55 = vpop.f32.mrb[123].mxu0 }
0x5404   :  { %v12714_v41 = vadd.f32 %v18204_v8, %v12712_v31 }
0x5406   :  { %v12718_v49 = vsel %vm959_vm6, %v12714_v41, -inf }
0x5407   :  { %12719 = vmax.xlane.f32.xlu1 %v12718_v49 }
0x5418   :  { %12813 = vrot.lane.b32.xlu1 %v18197_v51, %s16321_s30 }
0x545e   :  { %v12729_v8 = vpop.xlane.xlu0 %12728 }
0x5494   :  { %v12720_v58 = vpop.xlane.xlu1 %12719 }
0x5495   :  { %v12722_v35 = vsub.f32 %v12714_v41, %v12720_v58  ;;  %v13816_v41 = vld [vmem:[%s18602_s19] ss:$0 sm:$0xff] }
0x5497   :  { %v12725_v61 = vmul.f32 1.442695, %v12722_v35 }
0x5498   :  { %v12814_v44 = vpop.permute.xlu1 %12813 }
0x5499   :  { %15512 = vpow2.f32 %v12725_v61  ;;  %14981 = vmatpush3.msra.mxu0 %v12814_v44 }
0x549a   :  { %15514 = vrcp.f32 %v12729_v8  ;;  %v15243_v8 = vld [vmem:[%s18600_s11 + $0x18] sm:$0xff]  }
0x54a3   :  { %v15513_v63 = vpop.eup %15512 }
0x54a4   :  { %v12730_v13 = vsel %vm959_vm6, %v15513_v63, 0.0  ;;  %v15515_v17 = vpop.eup %15514 }
0x54a5   :  { %12731 = vadd.xlane.f32.xlu0 %v12730_v13  ;;  %v12735_v51 = vmul.f32 %v15515_v17, %v15511_v57  ;;  %v15242_v13 = vld [vmem:[%s18600_s11 + $0x10] sm:$0xff]  }
0x54bb   :  { %12737 = vrot.lane.b32.xlu0 %v18195_v52, %s16321_s30  ;;  %v13811_v52 = vld [vmem:[%s18597_s15 + $0x18] sm:$0xff]  ;;  %s18599_s30 = sld [smem:[#allocation90_spill]] }
0x54bc   :  { %14985 = vmatprep.subr.mxu0 %v13811_v52 }
0x54c1   :  { %v15238_v14 = vld [vmem:[%s18599_s30] sm:$0xff]   ;;  %v15239_v7 = vld [vmem:[%s18599_s30 + $0x8] sm:$0xff]  }
0x5532   :  { %v12732_v42 = vpop.xlane.xlu0 %12731 }
0x5533   :  { %15516 = vrcp.f32 %v12732_v42  ;;  %v13817_v42 = vld [vmem:[%s18603_s16] ss:$0 sm:$0xff] }
0x5536   :  { %v12738_v59 = vpop.permute.xlu0 %12737 }
0x5537   :  { %14976 = vmatpush3.msra.mxu1 %v12738_v59 }
0x5538   :  { %14978 = vmatmul.mubr.msk.f32.vlgmr.msra.gmra.mrb[172].mxu1 %vm959_vm6, %v12735_v51  ;;  %14990 = vmatprep.subr.bf16.mxu1 %v16317_v16 }
0x5539   :  { %14994 = vmatprep.mubr.msk.bf16.mxu1 %vm16318_vm1, %v16317_v16  ;;  %14991 = vmatpush3.bf16.msra.mxu1 %v15238_v14 }
0x553a   :  { %14992 = vmatprep.subr.bf16.mxu1 %v16317_v16 }
0x553d   :  { %v15517_v3 = vpop.eup %15516  ;;  %14993 = vmatpush3.bf16.msra.mxu1 %v15239_v7  ;;  %v15244_v7 = vld [vmem:[%s18605_s12] sm:$0xff]  }
0x553e   :  { %v12736_v5 = vmul.f32 %v15517_v3, %v15513_v63  ;;  %15010 = vmatprep.subr.bf16.mxu1 %v16317_v16 }
0x5540   :  { %14983 = vmatmul.mubr.msk.f32.vlgmr.msra.gmra.mrb[124].mxu0 %vm959_vm6, %v12736_v5 }
0x5541   :  { %14986 = vmatpush3.msra.mxu0 %v13811_v52 }
0x5542   :  { %14998 = vmatprep.subr.bf16.mxu0 %v16317_v16 }
0x560b   :  { %v12809_v38 = vpop.f32.mrb[172].mxu1 }
0x560c   :  { %v14979_v47 = vpop.f32.mrb[173].mxu1  ;;  %14987 = vmatprep.mubr.msk.f32.mxu0 %vm959_vm6, %v12809_v38 }
0x5613   :  { %v12885_v6 = vpop.f32.mrb[124].mxu0 }
0x5614   :  { %v14984_v20 = vpop.f32.mrb[125].mxu0  ;;  %14988 = vmatmul.mubr.msk.f32.vlgmr.msra.gmra.mrb[118].mxu0 %vm959_vm6, %v12885_v6 }
0x5615   :  { %15006 = vmatprep.mubr.msk.bf16.mxu0 %vm16318_vm1, %v16317_v16  ;;  %14999 = vmatpush3.bf16.msra.mxu0 %v15240_v15  ;;  %v13821_v20 = vld [vmem:[%s18604_s14] ss:$0 sm:$0xff]  ;;  %v15245_v15 = vld [vmem:[%s18605_s12 + $0x8] sm:$0xff]  }
0x5616   :  { %15000 = vmatprep.subr.bf16.mxu0 %v16317_v16 }
0x5619   :  { %15001 = vmatpush3.bf16.msra.mxu0 %v15241_v32 }
0x561a   :  { %15002 = vmatprep.subr.bf16.mxu0 %v16317_v16 }
0x561d   :  { %15003 = vmatpush3.bf16.msra.mxu0 %v15242_v13 }
0x561e   :  { %15004 = vmatprep.subr.bf16.mxu0 %v16317_v16 }
0x5621   :  { %15005 = vmatpush3.bf16.msra.mxu0 %v15243_v8 }
0x56e7   :  { %v14989_v43 = vpop.f32.mrb[118].mxu0 }
0x56e8   :  { %v12982_v46 = vadd.f32 %v14989_v43, %v13814_v0  ;;  %v12963_v24 = vpop.f32.mrb[119].mxu0 }
0x56e9   :  { %v12981_v33 = vadd.f32 %v13814_v0, %v12963_v24 }
0x56ea   :  { %v18349_v26 = vadd.f32 %v12982_v46, %v18142_v19 }
0x56eb   :  { %v18352_v23 = vadd.f32 %v12981_v33, %v18145_v22 }
0x56ec   :  { %v12990_v34 = vsel %vm705_vm0, %v18349_v26, 0.0 }
0x56ed   :  { %12991 = vadd.xlane.f32.xlu0 %v12990_v34  ;;  %v12987_v2 = vsel %vm705_vm0, %v18352_v23, 0.0 }
0x56ee   :  { %12988 = vadd.xlane.f32.xlu1 %v12987_v2 }
0x577a   :  { %v12992_v45 = vpop.xlane.xlu0 %12991 }
0x577b   :  { %v12994_v50 = vmul.f32 0.03125, %v12992_v45  ;;  %v12989_v56 = vpop.xlane.xlu1 %12988 }
0x577c   :  { %v12993_v10 = vmul.f32 0.03125, %v12989_v56 }
0x577d   :  { %v12996_v19 = vsub.f32 %v18349_v26, %v12994_v50 }
0x577e   :  { %v12995_v22 = vsub.f32 %v18352_v23, %v12993_v10 }
0x577f   :  { %v12998_v60 = vmul.f32 %v12996_v19, %v12996_v19  ;;  %v13032_v30 = vmul.f32 %v13815_v1, %v12996_v19 }
0x5780   :  { %v12997_v39 = vmul.f32 %v12995_v22, %v12995_v22  ;;  %v13031_v55 = vmul.f32 %v13815_v1, %v12995_v22 }
0x5781   :  { %v13002_v11 = vsel %vm705_vm0, %v12998_v60, 0.0 }
0x5782   :  { %13003 = vadd.xlane.f32.xlu1 %v13002_v11  ;;  %v12999_v12 = vsel %vm705_vm0, %v12997_v39, 0.0 }
0x5783   :  { %13000 = vadd.xlane.f32.xlu0 %v12999_v12 }
0x580f   :  { %v13004_v9 = vpop.xlane.xlu1 %13003 }
0x5810   :  { %v13006_v21 = vmul.f32 0.032258064, %v13004_v9  ;;  %v13001_v28 = vpop.xlane.xlu0 %13000 }
0x5811   :  { %v13005_v25 = vmul.f32 0.032258064, %v13001_v28 }
0x5812   :  { %15518 = vrsqrt.f32 %v13006_v21  ;;  %vm13016_vm6 = vcmp.eq.f32.partialorder %v13006_v21, inf  ;;  %v13019_v27 = vand.u32 2147483648, %v13006_v21  ;;  %vm13018_vm7 = vcmp.eq.f32.partialorder %v13006_v21, 0.0 }
0x5813   :  { %15520 = vrsqrt.f32 %v13005_v25  ;;  %vm13009_vm8 = vcmp.eq.f32.partialorder %v13005_v25, inf  ;;  %v13012_v37 = vand.u32 2147483648, %v13005_v25  ;;  %vm13011_vm9 = vcmp.eq.f32.partialorder %v13005_v25, 0.0 }
0x581c   :  { %v15519_v18 = vpop.eup %15518 }
0x581d   :  { %v15521_v62 = vpop.eup %15520  ;;  %v13015_v29 = vmul.f32 %v15519_v18, %v13006_v21 }
0x581e   :  { %v13008_v53 = vmul.f32 %v15521_v62, %v13005_v25 }
0x581f   :  { %v13017_v36 = vsel %vm13016_vm6, %v13006_v21, %v13015_v29 }
0x5820   :  { %v13020_v40 = vsel %vm13018_vm7, %v13019_v27, %v13017_v36  ;;  %v13010_v54 = vsel %vm13009_vm8, %v13005_v25, %v13008_v53 }
0x5821   :  { %v13022_v4 = vadd.f32 1e-06, %v13020_v40  ;;  %v13013_v48 = vsel %vm13011_vm9, %v13012_v37, %v13010_v54 }
0x5822   :  { %v13021_v57 = vadd.f32 1e-06, %v13013_v48  ;;  %v13827_v48 = vld [vmem:[#allocation7] ss:$0 sm:$0xff] }
0x5823   :  { %15522 = vrcp.f32 %v13022_v4 }
0x5824   :  { %15524 = vrcp.f32 %v13021_v57 }
0x582d   :  { %v15523_v31 = vpop.eup %15522 }
0x582e   :  { %v15525_v49 = vpop.eup %15524  ;;  %v13034_v58 = vmul.f32 %v15523_v31, %v13032_v30 }
0x582f   :  { %v13033_v35 = vmul.f32 %v15525_v49, %v13031_v55 }
0x5830   :  { %v13042_v61 = vadd.f32 %v13816_v41, %v13034_v58 }
0x5831   :  { %v13041_v44 = vadd.f32 %v13816_v41, %v13033_v35  ;;  %v13828_v41 = vld [vmem:[#allocation8] ss:$0 sm:$0xff] }
0x5833   :  { %v13043_v63 = vpack.c.bf16 %v13042_v61, %v13041_v44  ;;  %v13829_v44 = vld [vmem:[#allocation43] ss:$0 sm:$0xff] }
0x5835   :  { %14995 = vmatmul.mubr.msk.bf16.vlgmr.msra.gmra.mrb[176].mxu1 %vm705_vm0, %v13043_v63 }
0x5836   :  { %15014 = vmatprep.mubr.msk.bf16.mxu1 %vm16318_vm1, %v16317_v16  ;;  %15011 = vmatpush3.bf16.msra.mxu1 %v15244_v7 }
0x5837   :  { %15012 = vmatprep.subr.bf16.mxu1 %v16317_v16 }
0x583a   :  { %15013 = vmatpush3.bf16.msra.mxu1 %v15245_v15 }
0x5908   :  { %v13104_v17 = vpop.f32.mrb[176].mxu1 }
0x5909   :  { %v13105_v51 = vadd.f32 %v13817_v42, %v13104_v17  ;;  %v14996_v59 = vpop.f32.mrb[177].mxu1 }
0x590a   :  { %v13107_v3 = vpop.f32.mrb[178].mxu1 }
0x590b   :  { %v13108_v5 = vadd.f32 %v13817_v42, %v13107_v3  ;;  %v14997_v52 = vpop.f32.mrb[179].mxu1  ;;  %v13111_v38 = vmax.f32 %v13105_v51, 0.0 }
0x590d   :  { %v13112_v47 = vmax.f32 %v13108_v5, 0.0 }
0x590f   :  { %v13113_v6 = vpack.c.bf16 %v13112_v47, %v13111_v38 }
0x5911   :  { %15007 = vmatmul.mubr.msk.bf16.vlgmr.msra.gmra.mrb[128].mxu0 %vm2802_vm11, %v13113_v6 }
0x59e4   :  { %v13190_v0 = vpop.f32.mrb[128].mxu0 }
0x59e5   :  { %v13191_v43 = vadd.f32 %v13821_v20, %v13190_v0  ;;  %v15008_v46 = vpop.f32.mrb[129].mxu0 }
0x59e6   :  { %v13193_v24 = vpop.f32.mrb[130].mxu0 }
0x59e7   :  { %v13197_v33 = vadd.f32 %v13191_v43, %v18352_v23  ;;  %v13194_v34 = vadd.f32 %v13821_v20, %v13193_v24  ;;  %v15009_v2 = vpop.f32.mrb[131].mxu0 }
0x59e9   :  { %v13198_v45 = vadd.f32 %v13194_v34, %v18349_v26  ;;  %v13201_v50 = vsel %vm705_vm0, %v13197_v33, 0.0 }
0x59ea   :  { %13202 = vadd.xlane.f32.xlu0 %v13201_v50 }
0x59eb   :  { %v13204_v56 = vsel %vm705_vm0, %v13198_v45, 0.0 }
0x59ec   :  { %13205 = vadd.xlane.f32.xlu1 %v13204_v56 }
0x5a77   :  { %v13203_v10 = vpop.xlane.xlu0 %13202 }
0x5a78   :  { %v13207_v19 = vmul.f32 0.03125, %v13203_v10 }
0x5a79   :  { %v13206_v22 = vpop.xlane.xlu1 %13205 }
0x5a7a   :  { %v13209_v60 = vsub.f32 %v13197_v33, %v13207_v19  ;;  %v13208_v39 = vmul.f32 0.03125, %v13206_v22 }
0x5a7c   :  { %v13210_v11 = vsub.f32 %v13198_v45, %v13208_v39  ;;  %v13211_v12 = vmul.f32 %v13209_v60, %v13209_v60  ;;  %v13245_v1 = vmul.f32 %v13827_v48, %v13209_v60 }
0x5a7e   :  { %v13213_v23 = vsel %vm705_vm0, %v13211_v12, 0.0  ;;  %v13212_v14 = vmul.f32 %v13210_v11, %v13210_v11  ;;  %v13246_v30 = vmul.f32 %v13827_v48, %v13210_v11 }
0x5a7f   :  { %13214 = vadd.xlane.f32.xlu0 %v13213_v23 }
0x5a80   :  { %v13216_v26 = vsel %vm705_vm0, %v13212_v14, 0.0 }
0x5a81   :  { %13217 = vadd.xlane.f32.xlu1 %v13216_v26 }
0x5b0c   :  { %v13215_v32 = vpop.xlane.xlu0 %13214 }
0x5b0d   :  { %v13219_v9 = vmul.f32 0.032258064, %v13215_v32 }
0x5b0e   :  { %v13218_v21 = vpop.xlane.xlu1 %13217 }
0x5b0f   :  { %15526 = vrsqrt.f32 %v13219_v9  ;;  %v13220_v28 = vmul.f32 0.032258064, %v13218_v21  ;;  %vm13223_vm1 = vcmp.eq.f32.partialorder %v13219_v9, inf  ;;  %v13226_v62 = vand.u32 2147483648, %v13219_v9 }
0x5b10   :  { %vm13225_vm11 = vcmp.eq.f32.partialorder %v13219_v9, 0.0 }
0x5b11   :  { %15528 = vrsqrt.f32 %v13220_v28  ;;  %vm13230_vm10 = vcmp.eq.f32.partialorder %v13220_v28, inf  ;;  %v13233_v40 = vand.u32 2147483648, %v13220_v28  ;;  %vm13232_vm12 = vcmp.eq.f32.partialorder %v13220_v28, 0.0 }
0x5b19   :  { %v15527_v25 = vpop.eup %15526 }
0x5b1a   :  { %v13222_v18 = vmul.f32 %v15527_v25, %v13219_v9 }
0x5b1b   :  { %v15529_v29 = vpop.eup %15528 }
0x5b1c   :  { %v13224_v27 = vsel %vm13223_vm1, %v13219_v9, %v13222_v18  ;;  %v13229_v36 = vmul.f32 %v15529_v29, %v13220_v28 }
0x5b1d   :  { %v13227_v53 = vsel %vm13225_vm11, %v13226_v62, %v13224_v27 }
0x5b1e   :  { %v13235_v37 = vadd.f32 1e-06, %v13227_v53  ;;  %v13231_v16 = vsel %vm13230_vm10, %v13220_v28, %v13229_v36 }
0x5b1f   :  { %v13234_v54 = vsel %vm13232_vm12, %v13233_v40, %v13231_v16 }
0x5b20   :  { %15530 = vrcp.f32 %v13235_v37  ;;  %v13236_v4 = vadd.f32 1e-06, %v13234_v54 }
0x5b22   :  { %15532 = vrcp.f32 %v13236_v4 }
0x5b2a   :  { %v15531_v57 = vpop.eup %15530 }
0x5b2b   :  { %v13247_v31 = vmul.f32 %v15531_v57, %v13245_v1 }
0x5b2c   :  { %v15533_v55 = vpop.eup %15532 }
0x5b2d   :  { %v13248_v49 = vmul.f32 %v15533_v55, %v13246_v30  ;;  %v13255_v58 = vadd.f32 %v13828_v41, %v13247_v31 }
0x5b2f   :  { %v13256_v35 = vadd.f32 %v13828_v41, %v13248_v49 }
0x5b31   :  { %v13257_v61 = vpack.c.bf16 %v13256_v35, %v13255_v58 }
0x5b33   :  { %15015 = vmatmul.mubr.msk.bf16.vlgmr.msra.gmra.mrb[180].mxu1 %vm705_vm0, %v13257_v61 }
0x5c06   :  { %v13318_v63 = vpop.f32.mrb[180].mxu1 }
0x5c07   :  { %v13319_v13 = vadd.f32 %v13829_v44, %v13318_v63  ;;  %v15016_v8 = vpop.f32.mrb[181].mxu1 }
0x5c08   :  { %v13321_v42 = vpop.f32.mrb[182].mxu1 }
0x5c09   :  { %v13322_v17 = vadd.f32 %v13829_v44, %v13321_v42  ;;  %v15017_v51 = vpop.f32.mrb[183].mxu1  ;;  %v13326_v59 = vsel %vm13325_vm13, %v13319_v13, -inf }
0x5c0a   :  { %13327 = vmax.xlane.f32.xlu0 %v13326_v59 }
0x5c0b   :  { %v13329_v3 = vsel %vm13325_vm13, %v13322_v17, -inf }
0x5c0c   :  { %13330 = vmax.xlane.f32.xlu1 %v13329_v3 }
0x5c97   :  { %v13328_v5 = vpop.xlane.xlu0 %13327 }
0x5c98   :  { %v13332_v52 = vsub.f32 %v13319_v13, %v13328_v5 }
0x5c99   :  { %v13331_v38 = vpop.xlane.xlu1 %13330 }
0x5c9a   :  { %v13334_v47 = vmul.f32 1.442695, %v13332_v52  ;;  %v13333_v6 = vsub.f32 %v13322_v17, %v13331_v38 }
0x5c9c   :  { %15534 = vpow2.f32 %v13334_v47  ;;  %v13336_v20 = vmul.f32 1.442695, %v13333_v6 }
0x5c9e   :  { %15536 = vpow2.f32 %v13336_v20 }
0x5ca6   :  { %v15535_v0 = vpop.eup %15534 }
0x5ca7   :  { %v13338_v43 = vsel %vm13325_vm13, %v15535_v0, 0.0 }
0x5ca8   :  { %v15537_v46 = vpop.eup %15536  ;;  %13339 = vadd.xlane.f32.xlu0 %v13338_v43 }
0x5ca9   :  { %v13341_v24 = vsel %vm13325_vm13, %v15537_v46, 0.0 }
0x5caa   :  { %13342 = vadd.xlane.f32.xlu1 %v13341_v24 }
0x5d35   :  { %v13340_v33 = vpop.xlane.xlu0 %13339 }
0x5d36   :  { %15538 = vlog2.f32 %v13340_v33 }
0x5d37   :  { %v13343_v34 = vpop.xlane.xlu1 %13342 }
0x5d38   :  { %15540 = vlog2.f32 %v13343_v34 }
0x5d40   :  { %v15539_v2 = vpop.eup %15538 }
0x5d41   :  { %v13345_v45 = vmul.f32 0.6931472, %v15539_v2 }
0x5d42   :  { %v15541_v50 = vpop.eup %15540 }
0x5d43   :  { %v13348_v56 = vsub.f32 %v13332_v52, %v13345_v45  ;;  %v13347_v10 = vmul.f32 0.6931472, %v15541_v50 }
0x5d45   :  { %13350 = vst.msk [vmem:[#allocation44] sm:$0xff] %vm13325_vm13, %v13348_v56  ;;  %v13349_v19 = vsub.f32 %v13333_v6, %v13347_v10 }
0x5d47   :  { %13351 = vst.msk [vmem:[#allocation44 + $0x8] sm:$0xff] %vm13325_vm13, %v13349_v19 }
0x5d48   :  { %16154 = shalt.err (!%p16151_p10)
}
0x5d49   :  { %s16155_s27 = scalar_lea.hbm %s16808_s8, 256 }
0x5d4a   :  { %p16156_p11 = scmp.ne.s32.totalorder %s16808_s8, %s16155_s27  ;;  %p16159_p12 = scmp.lt.u32.totalorder %s16155_s27, %s16808_s8 }
0x5d4c   :  { %p16161_p13 = pnand %p16159_p12, %p16156_p11 }
0x5d4e   :  { %16164 = shalt.err (!%p16161_p13)
}
0x5d4f   :  { %s16323_s0 = smov 128   ;;  %s16324_s22 = smov 8  }
0x5d50   :  { %13363 = dma.vmem_to_hbm [thread:$0]  %s13358_s18, 256, %s16808_s8, [#allocation4], %s16323_s0, %s16323_s0, %s16324_s22  }
0x5d51   :  { %16193 = dma.done.wait [#allocation4], 256  }
0x5d52   :  { %16194 = vsyncadd [#allocation4], 4294967040 }
0x5d53   :  { %13367 = vsyncpa [#allocation3], 1 }
0x5d54   :  { %13368 = vsyncpa [#allocation6], 1 }
0x5d55   :  { %13369 = vsyncpa [#allocation9], 1 }
0x5d56   :  { %13370 = vsyncpa [#allocation12], 1 }
0x5d57   :  { %13371 = vsyncpa [#allocation15], 1 }
0x5d58   :  { %13372 = vsyncpa [#allocation18], 1 }
0x5d59   :  { %13373 = vsyncpa [#allocation21], 1 }
0x5d5a   :  { %13374 = vsyncpa [#allocation24], 1 }
0x5d5b   :  { %13375 = vsyncpa [#allocation27], 1 }
0x5d5c   :  { %13376 = vsyncpa [#allocation30], 1 }
0x5d5d   :  { %13377 = vsyncpa [#allocation33], 1 }
0x5d5e   :  { %13378 = vsyncpa [#allocation36], 1 }
0x5d5f   :  { %13379 = vsyncpa [#allocation39], 1 }
0x5d60   :  { %13380 = vsyncpa [#allocation42], 1 }
0x5d61   :  { %13381 = vsyncpa [#allocation4], 1 }

</bundles_post_ra>
